<compile_context>
chip_gen: v7x
topology: tpu7x:2x2x1
jax: 0.10.0
libtpu: 0.0.40
codegen_flags: <defaults>
</compile_context>

<pallas_src>
import functools

import jax
import jax.numpy as jnp
from jax.experimental import pallas as pl
from jax.experimental.pallas import tpu as pltpu


def attention_kernel(is_coverage, t_tile, *refs):
    if is_coverage:
        (s_ref, ctv_ref, encf_ref, enco_ref, mask_ref, cov_ref,
         wdec_ref, bdec_ref, wctv_ref, bctv_ref, wc_ref, vw_ref,
         ct_ref, attn_ref, covout_ref,
         base_ref, m_ref) = refs
    else:
        (s_ref, ctv_ref, encf_ref, enco_ref, mask_ref,
         wdec_ref, bdec_ref, wctv_ref, bctv_ref, vw_ref,
         ct_ref, attn_ref,
         base_ref, m_ref) = refs
        cov_ref = wc_ref = covout_ref = None

    k = pl.program_id(1)
    nk = pl.num_programs(1)
    t0 = pl.multiple_of(k * t_tile, t_tile)

    # ---- per-batch-tile init (runs once per batch tile) -------------------
    @pl.when(k == 0)
    def _init():
        dec_fea = jnp.dot(s_ref[...], wdec_ref[...],
                          preferred_element_type=jnp.float32) + bdec_ref[...]
        ctv_fea = jnp.dot(ctv_ref[...], wctv_ref[...],
                          preferred_element_type=jnp.float32) + bctv_ref[...]
        base_ref[...] = dec_fea + ctv_fea                      # (bB, N)
        m_ref[...] = jnp.full(m_ref.shape, -jnp.inf, dtype=jnp.float32)
        ct_ref[...] = jnp.zeros(ct_ref.shape, ct_ref.dtype)

    # ---- per T-tile scores -------------------------------------------------
    att = encf_ref[...] + base_ref[...][:, None, :]            # (bB, tT, N)
    if is_coverage:
        cov_tile = cov_ref[:, pl.ds(t0, t_tile)]               # (bB, tT)
        att = att + cov_tile[:, :, None] * wc_ref[...][None, :, :]
    e = jnp.tanh(att)                                          # EUP
    scores = jnp.sum(e * vw_ref[...][None, :, :], axis=-1)     # (bB, tT)

    # Stash raw scores in the resident attn output block (normalized at end).
    attn_ref[:, pl.ds(t0, t_tile)] = scores

    # ---- online (flash-style) accumulation of c_t --------------------------
    m_prev = m_ref[...]                                        # (bB, 1)
    m_new = jnp.maximum(m_prev, jnp.max(scores, axis=-1, keepdims=True))
    alpha = jnp.exp(m_prev - m_new)
    p = jnp.exp(scores - m_new) * mask_ref[:, pl.ds(t0, t_tile)]
    # VPU multiply + sublane reduce instead of an M=1 MXU matmul.
    ct_ref[...] = alpha * ct_ref[...] + jnp.sum(
        p[:, :, None] * enco_ref[...], axis=1)
    m_ref[...] = m_new

    # ---- finalize at the last T tile ---------------------------------------
    @pl.when(k == nk - 1)
    def _finalize():
        mask_full = mask_ref[...]                              # (bB, T)
        p_full = jnp.exp(attn_ref[...] - m_ref[...]) * mask_full
        inv_l = pl.reciprocal(jnp.sum(p_full, axis=-1, keepdims=True))
        attn = p_full * inv_l
        attn_ref[...] = attn
        ct_ref[...] = ct_ref[...] * inv_l
        if is_coverage:
            covout_ref[...] = cov_ref[...] + attn


def _choose_t_tile(T, bB, N, budget_bytes=16 * 1024 * 1024):
    """Largest T tile (multiple of 128, else 8) dividing T within a VMEM budget."""
    per_row_bytes = 2 * 2 * bB * N * 4       # 2 streamed tensors x 2 pipeline bufs
    max_rows = max(8, budget_bytes // per_row_bytes)
    if T <= max_rows:
        return T
    for step in (128, 8):
        tt = (max_rows // step) * step
        while tt >= step:
            if T % tt == 0:
                return tt
            tt -= step
    # TODO(synk): pad T when it has no suitable divisor; fall back to full T.
    return T


def attention_forward(params, s_t_hat, encoder_outputs, encoder_feature,
                      enc_padding_mask, coverage, c_t_v, *,
                      is_coverage=True, b_tile=None, t_tile=None):
    B, T, N = encoder_outputs.shape
    enc_feat = encoder_feature.reshape(B, T, N)
    mask = enc_padding_mask.astype(jnp.float32)

    bB = b_tile if b_tile is not None else (8 if B % 8 == 0 else B)
    if B % bB or (bB % 8 and bB != B):
        bB = B
    tT = t_tile if t_tile is not None else _choose_t_tile(T, bB, N)
    assert T % tT == 0 and (tT % 8 == 0 or tT == T)
    nb, nk = B // bB, T // tT

    b_map = lambda i, k: (i, 0)          # (bB, N) blocks, resident over k
    bt_map = lambda i, k: (i, k, 0)      # streamed (bB, tT, N) blocks
    row_map = lambda i, k: (i, 0)        # full (bB, T) rows, resident over k
    w_map = lambda i, k: (0, 0)          # weights, resident everywhere

    in_specs = [
        pl.BlockSpec((bB, N), b_map),          # s_t_hat
        pl.BlockSpec((bB, N), b_map),          # c_t_v
        pl.BlockSpec((bB, tT, N), bt_map),     # encoder_feature
        pl.BlockSpec((bB, tT, N), bt_map),     # encoder_outputs
        pl.BlockSpec((bB, T), row_map),        # enc_padding_mask
    ]
    inputs = [s_t_hat, c_t_v, enc_feat, encoder_outputs, mask]
    if is_coverage:
        in_specs.append(pl.BlockSpec((bB, T), row_map))
        inputs.append(coverage.astype(jnp.float32))

    in_specs += [pl.BlockSpec((N, N), w_map), pl.BlockSpec((1, N), w_map),
                 pl.BlockSpec((N, N), w_map), pl.BlockSpec((1, N), w_map)]
    inputs += [params['W_dec'], params['b_dec'], params['W_ctv'], params['b_ctv']]
    if is_coverage:
        in_specs.append(pl.BlockSpec((1, N), w_map))
        inputs.append(params['w_c'])
    in_specs.append(pl.BlockSpec((1, N), w_map))
    inputs.append(params['v_w'])

    out_shapes = [jax.ShapeDtypeStruct((B, N), jnp.float32),
                  jax.ShapeDtypeStruct((B, T), jnp.float32)]
    out_specs = [pl.BlockSpec((bB, N), b_map),       # c_t (accumulator over k)
                 pl.BlockSpec((bB, T), row_map)]     # attn (resident full row)
    if is_coverage:
        out_shapes.append(jax.ShapeDtypeStruct((B, T), jnp.float32))
        out_specs.append(pl.BlockSpec((bB, T), row_map))

    scratch_shapes = [pltpu.VMEM((bB, N), jnp.float32),   # dec_fea + ctv_fea
                      pltpu.VMEM((bB, 1), jnp.float32)]   # running max

    # VMEM budget: streamed double-buffered blocks + resident rows/weights + margin.
    stream_bytes = 2 * 2 * bB * tT * N * 4
    resident_bytes = 4 * (2 * 2 * bB * N + 4 * bB * T + 2 * N * N + 4 * N
                          + bB * N + bB * (N + 1))
    vmem_limit = int(min(48 * 1024 * 1024,
                         max(16 * 1024 * 1024,
                             stream_bytes + resident_bytes + (4 << 20))))

    grid_spec = pltpu.PrefetchScalarGridSpec(
        num_scalar_prefetch=0,
        grid=(nb, nk),
        in_specs=in_specs,
        out_specs=tuple(out_specs),
        scratch_shapes=scratch_shapes)

    outs = pl.pallas_call(
        functools.partial(attention_kernel, is_coverage, tT),
        out_shape=tuple(out_shapes),
        grid_spec=grid_spec,
        compiler_params=pltpu.CompilerParams(
            dimension_semantics=("parallel", "arbitrary"),
            vmem_limit_bytes=vmem_limit),
    )(*inputs)

    if is_coverage:
        c_t, attn, cov_out = outs
    else:
        c_t, attn = outs
        cov_out = coverage          # pass-through, no kernel round trip
    return c_t, attn, cov_out


def init_params(key, hidden_dim):
    N = hidden_dim * 2
    ks = jax.random.split(key, 6)
    lim = 1.0 / jnp.sqrt(N)
    return {
        # decode_proj: Linear(N, N) with bias (weight stored transposed: (in, out))
        'W_dec': jax.random.uniform(ks[0], (N, N), jnp.float32, -lim, lim),
        'b_dec': jax.random.uniform(ks[1], (1, N), jnp.float32, -lim, lim),
        # c_t_v_proj: Linear(N, N) with bias
        'W_ctv': jax.random.uniform(ks[2], (N, N), jnp.float32, -lim, lim),
        'b_ctv': jax.random.uniform(ks[3], (1, N), jnp.float32, -lim, lim),
        # W_c: Linear(1, N, bias=False) -> stored as row vector (1, N)
        'w_c': jax.random.uniform(ks[4], (1, N), jnp.float32, -1.0, 1.0),
        # v: Linear(N, 1, bias=False) -> stored as row vector (1, N)
        'v_w': jax.random.uniform(ks[5], (1, N), jnp.float32, -lim, lim),
    }


def attention_reference(params, s_t_hat, encoder_outputs, encoder_feature,
                        enc_padding_mask, coverage, c_t_v, *, is_coverage=True):
    """Pure-JAX reference mirroring the PyTorch forward exactly."""
    B, T, N = encoder_outputs.shape
    dec_fea = s_t_hat @ params['W_dec'] + params['b_dec']
    ctv_fea = c_t_v @ params['W_ctv'] + params['b_ctv']
    att = encoder_feature.reshape(B, T, N) + dec_fea[:, None, :] + ctv_fea[:, None, :]
    if is_coverage:
        att = att + coverage[:, :, None] * params['w_c'][None, :, :]
    e = jnp.tanh(att)
    scores = jnp.sum(e * params['v_w'][None, :, :], axis=-1)
    sm = jax.nn.softmax(scores, axis=1) * enc_padding_mask
    attn = sm / jnp.sum(sm, axis=1, keepdims=True)
    c_t = jnp.einsum('bt,btn->bn', attn, encoder_outputs)
    cov_out = coverage + attn if is_coverage else coverage
    return c_t, attn, cov_out


if __name__ == "__main__":
    B, T, hidden_dim = 16, 256, 64
    N = hidden_dim * 2

    key = jax.random.PRNGKey(0)
    kp, k1, k2, k3, k4, k5 = jax.random.split(key, 6)
    params = init_params(kp, hidden_dim)

    s_t_hat = jax.random.normal(k1, (B, N), jnp.float32)
    encoder_outputs = jax.random.normal(k2, (B, T, N), jnp.float32)
    encoder_feature = jax.random.normal(k3, (B * T, N), jnp.float32)
    c_t_v = jax.random.normal(k4, (B, N), jnp.float32)
    coverage = jax.random.uniform(k5, (B, T), jnp.float32, 0.0, 1.0)
    lengths = jnp.maximum(T - 16 * jnp.arange(B), 16)
    enc_padding_mask = (jnp.arange(T)[None, :] < lengths[:, None]).astype(jnp.float32)

    # Coverage path; t_tile=128 forces multiple T steps (exercises online path).
    c_t, attn_dist, cov_out = attention_forward(
        params, s_t_hat, encoder_outputs, encoder_feature,
        enc_padding_mask, coverage, c_t_v, is_coverage=True, t_tile=128)
    jax.block_until_ready((c_t, attn_dist, cov_out))

    c_t_r, attn_r, cov_r = attention_reference(
        params, s_t_hat, encoder_outputs, encoder_feature,
        enc_padding_mask, coverage, c_t_v, is_coverage=True)
    assert jnp.allclose(c_t, c_t_r, atol=1e-4, rtol=1e-4)
    assert jnp.allclose(attn_dist, attn_r, atol=1e-4, rtol=1e-4)
    assert jnp.allclose(cov_out, cov_r, atol=1e-4, rtol=1e-4)

    # No-coverage path.
    c_t2, attn2, cov2 = attention_forward(
        params, s_t_hat, encoder_outputs, encoder_feature,
        enc_padding_mask, coverage, c_t_v, is_coverage=False)
    jax.block_until_ready((c_t2, attn2))
    c_t2_r, attn2_r, _ = attention_reference(
        params, s_t_hat, encoder_outputs, encoder_feature,
        enc_padding_mask, coverage, c_t_v, is_coverage=False)
    assert jnp.allclose(c_t2, c_t2_r, atol=1e-4, rtol=1e-4)
    assert jnp.allclose(attn2, attn2_r, atol=1e-4, rtol=1e-4)

    print("KERNEL_OK")
</pallas_src>

<mosaic_0001>
module attributes {stable_mosaic.version = 11 : i64} {
  func.func @attention_kernel(%arg0: i32, %arg1: i32, %arg2: memref<8x128xf32, #tpu.memory_space<vmem>>, %arg3: memref<8x128xf32, #tpu.memory_space<vmem>>, %arg4: memref<8x128x128xf32, #tpu.memory_space<vmem>>, %arg5: memref<8x128x128xf32, #tpu.memory_space<vmem>>, %arg6: memref<8x256xf32, #tpu.memory_space<vmem>>, %arg7: memref<8x256xf32, #tpu.memory_space<vmem>>, %arg8: memref<128x128xf32, #tpu.memory_space<vmem>>, %arg9: memref<1x128xf32, #tpu.memory_space<vmem>>, %arg10: memref<128x128xf32, #tpu.memory_space<vmem>>, %arg11: memref<1x128xf32, #tpu.memory_space<vmem>>, %arg12: memref<1x128xf32, #tpu.memory_space<vmem>>, %arg13: memref<1x128xf32, #tpu.memory_space<vmem>>, %arg14: memref<8x128xf32, #tpu.memory_space<vmem>>, %arg15: memref<8x256xf32, #tpu.memory_space<vmem>>, %arg16: memref<8x256xf32, #tpu.memory_space<vmem>>, %arg17: memref<8x128xf32, #tpu.memory_space<vmem>>, %arg18: memref<8x1xf32, #tpu.memory_space<vmem>>) attributes {dimension_semantics = [#tpu.dimension_semantics<parallel>, #tpu.dimension_semantics<arbitrary>], iteration_bounds = array<i64: 2, 2>, scalar_prefetch = 0 : i64, scratch_operands = 2 : i64, tpu.core_type = #tpu.core_type<tc>, window_params = [{transform_indices = @transform_0, window_bounds = array<i64: 8, 128>}, {transform_indices = @transform_1, window_bounds = array<i64: 8, 128>}, {transform_indices = @transform_2, window_bounds = array<i64: 8, 128, 128>}, {transform_indices = @transform_3, window_bounds = array<i64: 8, 128, 128>}, {transform_indices = @transform_4, window_bounds = array<i64: 8, 256>}, {transform_indices = @transform_5, window_bounds = array<i64: 8, 256>}, {pipeline_mode = #tpu.pipeline_mode<synchronous>, transform_indices = @transform_6, window_bounds = array<i64: 128, 128>}, {pipeline_mode = #tpu.pipeline_mode<synchronous>, transform_indices = @transform_7, window_bounds = array<i64: 1, 128>}, {pipeline_mode = #tpu.pipeline_mode<synchronous>, transform_indices = @transform_8, window_bounds = array<i64: 128, 128>}, {pipeline_mode = #tpu.pipeline_mode<synchronous>, transform_indices = @transform_9, window_bounds = array<i64: 1, 128>}, {pipeline_mode = #tpu.pipeline_mode<synchronous>, transform_indices = @transform_10, window_bounds = array<i64: 1, 128>}, {pipeline_mode = #tpu.pipeline_mode<synchronous>, transform_indices = @transform_11, window_bounds = array<i64: 1, 128>}, {transform_indices = @transform_12, window_bounds = array<i64: 8, 128>}, {transform_indices = @transform_13, window_bounds = array<i64: 8, 256>}, {transform_indices = @transform_14, window_bounds = array<i64: 8, 256>}]} {
    %c128_i32 = arith.constant 128 : i32
    %0 = arith.muli %arg1, %c128_i32 : i32
    %1 = tpu.assume_multiple %0, 128 : i32
    %c0_i32 = arith.constant 0 : i32
    %2 = arith.cmpi eq, %arg1, %c0_i32 : i32
    %3 = arith.extui %2 : i1 to i32
    %c0_i32_0 = arith.constant 0 : i32
    %4 = arith.cmpi ne, %3, %c0_i32_0 : i32
    scf.if %4 {
      %c0_26 = arith.constant 0 : index
      %c0_27 = arith.constant 0 : index
      %53 = vector.load %arg2[%c0_26, %c0_27] : memref<8x128xf32, #tpu.memory_space<vmem>>, vector<8x128xf32>
      %c0_28 = arith.constant 0 : index
      %c0_29 = arith.constant 0 : index
      %54 = vector.load %arg8[%c0_28, %c0_29] : memref<128x128xf32, #tpu.memory_space<vmem>>, vector<128x128xf32>
      %cst_30 = arith.constant dense<0.000000e+00> : vector<8x128xf32>
      %55 = tpu.matmul %53, %54, %cst_30 {dimension_numbers = #tpu.dot_dimension_numbers<[1], [0], [0], [1], [0, 0, 1, 1], [], []>} : vector<8x128xf32>, vector<128x128xf32>, vector<8x128xf32> -> vector<8x128xf32>
      %c0_31 = arith.constant 0 : index
      %c0_32 = arith.constant 0 : index
      %56 = vector.load %arg9[%c0_31, %c0_32] : memref<1x128xf32, #tpu.memory_space<vmem>>, vector<1x128xf32>
      %57 = vector.broadcast %56 : vector<1x128xf32> to vector<8x128xf32>
      %58 = arith.addf %55, %57 : vector<8x128xf32>
      %c0_33 = arith.constant 0 : index
      %c0_34 = arith.constant 0 : index
      %59 = vector.load %arg3[%c0_33, %c0_34] : memref<8x128xf32, #tpu.memory_space<vmem>>, vector<8x128xf32>
      %c0_35 = arith.constant 0 : index
      %c0_36 = arith.constant 0 : index
      %60 = vector.load %arg10[%c0_35, %c0_36] : memref<128x128xf32, #tpu.memory_space<vmem>>, vector<128x128xf32>
      %cst_37 = arith.constant dense<0.000000e+00> : vector<8x128xf32>
      %61 = tpu.matmul %59, %60, %cst_37 {dimension_numbers = #tpu.dot_dimension_numbers<[1], [0], [0], [1], [0, 0, 1, 1], [], []>} : vector<8x128xf32>, vector<128x128xf32>, vector<8x128xf32> -> vector<8x128xf32>
      %c0_38 = arith.constant 0 : index
      %c0_39 = arith.constant 0 : index
      %62 = vector.load %arg11[%c0_38, %c0_39] : memref<1x128xf32, #tpu.memory_space<vmem>>, vector<1x128xf32>
      %63 = vector.broadcast %62 : vector<1x128xf32> to vector<8x128xf32>
      %64 = arith.addf %61, %63 : vector<8x128xf32>
      %65 = arith.addf %58, %64 : vector<8x128xf32>
      %c0_40 = arith.constant 0 : index
      %c0_41 = arith.constant 0 : index
      %66 = vector.load %arg17[%c0_40, %c0_41] : memref<8x128xf32, #tpu.memory_space<vmem>>, vector<8x128xf32>
      tpu.vector_store %arg17[%c0_40, %c0_41], %65 {strides = array<i32>} : memref<8x128xf32, #tpu.memory_space<vmem>>, vector<8x128xf32>,
      %cst_42 = arith.constant 0xFF800000 : f32
      %67 = vector.broadcast %cst_42 : f32 to vector<8x1xf32>
      %c0_43 = arith.constant 0 : index
      %c0_44 = arith.constant 0 : index
      %68 = vector.load %arg18[%c0_43, %c0_44] : memref<8x1xf32, #tpu.memory_space<vmem>>, vector<8x1xf32>
      tpu.vector_store %arg18[%c0_43, %c0_44], %67 {strides = array<i32>} : memref<8x1xf32, #tpu.memory_space<vmem>>, vector<8x1xf32>,
      %cst_45 = arith.constant 0.000000e+00 : f32
      %69 = vector.broadcast %cst_45 : f32 to vector<8x128xf32>
      %c0_46 = arith.constant 0 : index
      %c0_47 = arith.constant 0 : index
      %70 = vector.load %arg14[%c0_46, %c0_47] : memref<8x128xf32, #tpu.memory_space<vmem>>, vector<8x128xf32>
      tpu.vector_store %arg14[%c0_46, %c0_47], %69 {strides = array<i32>} : memref<8x128xf32, #tpu.memory_space<vmem>>, vector<8x128xf32>,
    } else {
    }
    %c0 = arith.constant 0 : index
    %c0_1 = arith.constant 0 : index
    %c0_2 = arith.constant 0 : index
    %5 = vector.load %arg4[%c0, %c0_1, %c0_2] : memref<8x128x128xf32, #tpu.memory_space<vmem>>, vector<8x128x128xf32>
    %c0_3 = arith.constant 0 : index
    %c0_4 = arith.constant 0 : index
    %6 = vector.load %arg17[%c0_3, %c0_4] : memref<8x128xf32, #tpu.memory_space<vmem>>, vector<8x128xf32>
    %7 = vector.shape_cast %6 : vector<8x128xf32> to vector<8x1x128xf32>
    %8 = vector.broadcast %7 : vector<8x1x128xf32> to vector<8x128x128xf32>
    %9 = arith.addf %5, %8 : vector<8x128x128xf32>
    %c0_5 = arith.constant 0 : index
    %10 = arith.index_cast %1 : i32 to index
    %11 = vector.load %arg7[%c0_5, %10] : memref<8x256xf32, #tpu.memory_space<vmem>>, vector<8x128xf32>
    %12 = vector.shape_cast %11 : vector<8x128xf32> to vector<8x128x1xf32>
    %c0_6 = arith.constant 0 : index
    %c0_7 = arith.constant 0 : index
    %13 = vector.load %arg12[%c0_6, %c0_7] : memref<1x128xf32, #tpu.memory_space<vmem>>, vector<1x128xf32>
    %14 = vector.shape_cast %13 : vector<1x128xf32> to vector<1x1x128xf32>
    %15 = vector.broadcast %12 : vector<8x128x1xf32> to vector<8x128x128xf32>
    %16 = vector.broadcast %14 : vector<1x1x128xf32> to vector<8x128x128xf32>
    %17 = arith.mulf %15, %16 : vector<8x128x128xf32>
    %18 = arith.addf %9, %17 : vector<8x128x128xf32>
    %19 = math.tanh %18 : vector<8x128x128xf32>
    %c0_8 = arith.constant 0 : index
    %c0_9 = arith.constant 0 : index
    %20 = vector.load %arg13[%c0_8, %c0_9] : memref<1x128xf32, #tpu.memory_space<vmem>>, vector<1x128xf32>
    %21 = vector.shape_cast %20 : vector<1x128xf32> to vector<1x1x128xf32>
    %22 = vector.broadcast %21 : vector<1x1x128xf32> to vector<8x128x128xf32>
    %23 = arith.mulf %19, %22 : vector<8x128x128xf32>
    %cst = arith.constant dense<0.000000e+00> : vector<8x128xf32>
    %24 = vector.multi_reduction <add>, %23, %cst [2] : vector<8x128x128xf32> to vector<8x128xf32>
    %c0_10 = arith.constant 0 : index
    %25 = arith.index_cast %1 : i32 to index
    %26 = vector.load %arg15[%c0_10, %25] : memref<8x256xf32, #tpu.memory_space<vmem>>, vector<8x128xf32>
    tpu.vector_store %arg15[%c0_10, %25], %24 {strides = array<i32>} : memref<8x256xf32, #tpu.memory_space<vmem>>, vector<8x128xf32>,
    %c0_11 = arith.constant 0 : index
    %c0_12 = arith.constant 0 : index
    %27 = vector.load %arg18[%c0_11, %c0_12] : memref<8x1xf32, #tpu.memory_space<vmem>>, vector<8x1xf32>
    %cst_13 = arith.constant dense<0xFF800000> : vector<8xf32>
    %28 = vector.multi_reduction <maximumf>, %24, %cst_13 [1] : vector<8x128xf32> to vector<8xf32>
    %29 = vector.shape_cast %28 : vector<8xf32> to vector<8x1xf32>
    %30 = arith.maximumf %27, %29 : vector<8x1xf32>
    %31 = arith.subf %27, %30 : vector<8x1xf32>
    %32 = math.exp %31 : vector<8x1xf32>
    %33 = vector.broadcast %30 : vector<8x1xf32> to vector<8x128xf32>
    %34 = arith.subf %24, %33 : vector<8x128xf32>
    %35 = math.exp %34 : vector<8x128xf32>
    %c0_14 = arith.constant 0 : index
    %36 = arith.index_cast %1 : i32 to index
    %37 = vector.load %arg6[%c0_14, %36] : memref<8x256xf32, #tpu.memory_space<vmem>>, vector<8x128xf32>
    %38 = arith.mulf %35, %37 : vector<8x128xf32>
    %c0_15 = arith.constant 0 : index
    %c0_16 = arith.constant 0 : index
    %39 = vector.load %arg14[%c0_15, %c0_16] : memref<8x128xf32, #tpu.memory_space<vmem>>, vector<8x128xf32>
    %40 = vector.broadcast %32 : vector<8x1xf32> to vector<8x128xf32>
    %41 = arith.mulf %40, %39 : vector<8x128xf32>
    %42 = vector.shape_cast %38 : vector<8x128xf32> to vector<8x128x1xf32>
    %c0_17 = arith.constant 0 : index
    %c0_18 = arith.constant 0 : index
    %c0_19 = arith.constant 0 : index
    %43 = vector.load %arg5[%c0_17, %c0_18, %c0_19] : memref<8x128x128xf32, #tpu.memory_space<vmem>>, vector<8x128x128xf32>
    %44 = vector.broadcast %42 : vector<8x128x1xf32> to vector<8x128x128xf32>
    %45 = arith.mulf %44, %43 : vector<8x128x128xf32>
    %cst_20 = arith.constant dense<0.000000e+00> : vector<8x128xf32>
    %46 = vector.multi_reduction <add>, %45, %cst_20 [1] : vector<8x128x128xf32> to vector<8x128xf32>
    %47 = arith.addf %41, %46 : vector<8x128xf32>
    %c0_21 = arith.constant 0 : index
    %c0_22 = arith.constant 0 : index
    %48 = vector.load %arg14[%c0_21, %c0_22] : memref<8x128xf32, #tpu.memory_space<vmem>>, vector<8x128xf32>
    tpu.vector_store %arg14[%c0_21, %c0_22], %47 {strides = array<i32>} : memref<8x128xf32, #tpu.memory_space<vmem>>, vector<8x128xf32>,
    %c0_23 = arith.constant 0 : index
    %c0_24 = arith.constant 0 : index
    %49 = vector.load %arg18[%c0_23, %c0_24] : memref<8x1xf32, #tpu.memory_space<vmem>>, vector<8x1xf32>
    tpu.vector_store %arg18[%c0_23, %c0_24], %30 {strides = array<i32>} : memref<8x1xf32, #tpu.memory_space<vmem>>, vector<8x1xf32>,
    %c1_i32 = arith.constant 1 : i32
    %50 = arith.cmpi eq, %arg1, %c1_i32 : i32
    %51 = arith.extui %50 : i1 to i32
    %c0_i32_25 = arith.constant 0 : i32
    %52 = arith.cmpi ne, %51, %c0_i32_25 : i32
    scf.if %52 {
      %c0_26 = arith.constant 0 : index
      %c0_27 = arith.constant 0 : index
      %53 = vector.load %arg6[%c0_26, %c0_27] : memref<8x256xf32, #tpu.memory_space<vmem>>, vector<8x256xf32>
      %c0_28 = arith.constant 0 : index
      %c0_29 = arith.constant 0 : index
      %54 = vector.load %arg15[%c0_28, %c0_29] : memref<8x256xf32, #tpu.memory_space<vmem>>, vector<8x256xf32>
      %c0_30 = arith.constant 0 : index
      %c0_31 = arith.constant 0 : index
      %55 = vector.load %arg18[%c0_30, %c0_31] : memref<8x1xf32, #tpu.memory_space<vmem>>, vector<8x1xf32>
      %56 = vector.broadcast %55 : vector<8x1xf32> to vector<8x256xf32>
      %57 = arith.subf %54, %56 : vector<8x256xf32>
      %58 = math.exp %57 : vector<8x256xf32>
      %59 = arith.mulf %58, %53 : vector<8x256xf32>
      %cst_32 = arith.constant dense<0.000000e+00> : vector<8xf32>
      %60 = vector.multi_reduction <add>, %59, %cst_32 [1] : vector<8x256xf32> to vector<8xf32>
      %61 = vector.shape_cast %60 : vector<8xf32> to vector<8x1xf32>
      %62 = tpu.reciprocal %61 : vector<8x1xf32> -> vector<8x1xf32>
      %63 = vector.broadcast %62 : vector<8x1xf32> to vector<8x256xf32>
      %64 = arith.mulf %59, %63 : vector<8x256xf32>
      %c0_33 = arith.constant 0 : index
      %c0_34 = arith.constant 0 : index
      %65 = vector.load %arg15[%c0_33, %c0_34] : memref<8x256xf32, #tpu.memory_space<vmem>>, vector<8x256xf32>
      tpu.vector_store %arg15[%c0_33, %c0_34], %64 {strides = array<i32>} : memref<8x256xf32, #tpu.memory_space<vmem>>, vector<8x256xf32>,
      %c0_35 = arith.constant 0 : index
      %c0_36 = arith.constant 0 : index
      %66 = vector.load %arg14[%c0_35, %c0_36] : memref<8x128xf32, #tpu.memory_space<vmem>>, vector<8x128xf32>
      %67 = vector.broadcast %62 : vector<8x1xf32> to vector<8x128xf32>
      %68 = arith.mulf %66, %67 : vector<8x128xf32>
      %c0_37 = arith.constant 0 : index
      %c0_38 = arith.constant 0 : index
      %69 = vector.load %arg14[%c0_37, %c0_38] : memref<8x128xf32, #tpu.memory_space<vmem>>, vector<8x128xf32>
      tpu.vector_store %arg14[%c0_37, %c0_38], %68 {strides = array<i32>} : memref<8x128xf32, #tpu.memory_space<vmem>>, vector<8x128xf32>,
      %c0_39 = arith.constant 0 : index
      %c0_40 = arith.constant 0 : index
      %70 = vector.load %arg7[%c0_39, %c0_40] : memref<8x256xf32, #tpu.memory_space<vmem>>, vector<8x256xf32>
      %71 = arith.addf %70, %64 : vector<8x256xf32>
      %c0_41 = arith.constant 0 : index
      %c0_42 = arith.constant 0 : index
      %72 = vector.load %arg16[%c0_41, %c0_42] : memref<8x256xf32, #tpu.memory_space<vmem>>, vector<8x256xf32>
      tpu.vector_store %arg16[%c0_41, %c0_42], %71 {strides = array<i32>} : memref<8x256xf32, #tpu.memory_space<vmem>>, vector<8x256xf32>,
    } else {
    }
    return
  }
  func.func @transform_0(%arg0: i32, %arg1: i32) -> (i32, i32) {
    %c0_i32 = arith.constant 0 : i32
    %c0_i32_0 = arith.constant 0 : i32
    return %arg0, %c0_i32 : i32, i32
  }
  func.func @transform_1(%arg0: i32, %arg1: i32) -> (i32, i32) {
    %c0_i32 = arith.constant 0 : i32
    %c0_i32_0 = arith.constant 0 : i32
    return %arg0, %c0_i32 : i32, i32
  }
  func.func @transform_2(%arg0: i32, %arg1: i32) -> (i32, i32, i32) {
    %c0_i32 = arith.constant 0 : i32
    %c0_i32_0 = arith.constant 0 : i32
    return %arg0, %arg1, %c0_i32 : i32, i32, i32
  }
  func.func @transform_3(%arg0: i32, %arg1: i32) -> (i32, i32, i32) {
    %c0_i32 = arith.constant 0 : i32
    %c0_i32_0 = arith.constant 0 : i32
    return %arg0, %arg1, %c0_i32 : i32, i32, i32
  }
  func.func @transform_4(%arg0: i32, %arg1: i32) -> (i32, i32) {
    %c0_i32 = arith.constant 0 : i32
    %c0_i32_0 = arith.constant 0 : i32
    return %arg0, %c0_i32 : i32, i32
  }
  func.func @transform_5(%arg0: i32, %arg1: i32) -> (i32, i32) {
    %c0_i32 = arith.constant 0 : i32
    %c0_i32_0 = arith.constant 0 : i32
    return %arg0, %c0_i32 : i32, i32
  }
  func.func @transform_6(%arg0: i32, %arg1: i32) -> (i32, i32) {
    %c0_i32 = arith.constant 0 : i32
    %c0_i32_0 = arith.constant 0 : i32
    %c0_i32_1 = arith.constant 0 : i32
    return %c0_i32, %c0_i32_0 : i32, i32
  }
  func.func @transform_7(%arg0: i32, %arg1: i32) -> (i32, i32) {
    %c0_i32 = arith.constant 0 : i32
    %c0_i32_0 = arith.constant 0 : i32
    %c0_i32_1 = arith.constant 0 : i32
    return %c0_i32, %c0_i32_0 : i32, i32
  }
  func.func @transform_8(%arg0: i32, %arg1: i32) -> (i32, i32) {
    %c0_i32 = arith.constant 0 : i32
    %c0_i32_0 = arith.constant 0 : i32
    %c0_i32_1 = arith.constant 0 : i32
    return %c0_i32, %c0_i32_0 : i32, i32
  }
  func.func @transform_9(%arg0: i32, %arg1: i32) -> (i32, i32) {
    %c0_i32 = arith.constant 0 : i32
    %c0_i32_0 = arith.constant 0 : i32
    %c0_i32_1 = arith.constant 0 : i32
    return %c0_i32, %c0_i32_0 : i32, i32
  }
  func.func @transform_10(%arg0: i32, %arg1: i32) -> (i32, i32) {
    %c0_i32 = arith.constant 0 : i32
    %c0_i32_0 = arith.constant 0 : i32
    %c0_i32_1 = arith.constant 0 : i32
    return %c0_i32, %c0_i32_0 : i32, i32
  }
  func.func @transform_11(%arg0: i32, %arg1: i32) -> (i32, i32) {
    %c0_i32 = arith.constant 0 : i32
    %c0_i32_0 = arith.constant 0 : i32
    %c0_i32_1 = arith.constant 0 : i32
    return %c0_i32, %c0_i32_0 : i32, i32
  }
  func.func @transform_12(%arg0: i32, %arg1: i32) -> (i32, i32) {
    %c0_i32 = arith.constant 0 : i32
    %c0_i32_0 = arith.constant 0 : i32
    return %arg0, %c0_i32 : i32, i32
  }
  func.func @transform_13(%arg0: i32, %arg1: i32) -> (i32, i32) {
    %c0_i32 = arith.constant 0 : i32
    %c0_i32_0 = arith.constant 0 : i32
    return %arg0, %c0_i32 : i32, i32
  }
  func.func @transform_14(%arg0: i32, %arg1: i32) -> (i32, i32) {
    %c0_i32 = arith.constant 0 : i32
    %c0_i32_0 = arith.constant 0 : i32
    return %arg0, %c0_i32 : i32, i32
  }
}

</mosaic_0001>

<bundles_post_ra>
// kernel: tpu_custom_call.1
= control target key start
LH: loop header
LB: loop body
LE: loop exit
PB: predicated region body
PF: predicated region fallthrough
CT: control target
= control target key end

     0   :  { %s11401_s0 = inlined_call_operand.hbm [shape: f32[16,128], index: 0, kind: input, shape index: {}]   ;;  %s11402_s1 = inlined_call_operand.hbm [shape: f32[16,128], index: 1, kind: input, shape index: {}]   ;;  %s11403_s2 = inlined_call_operand.hbm [shape: f32[16,256,128], index: 2, kind: input, shape index: {}]   ;;  %s11404_s3 = inlined_call_operand.hbm [shape: f32[16,256,128], index: 3, kind: input, shape index: {}]   ;;  %s11405_s4 = inlined_call_operand.hbm [shape: f32[16,256], index: 4, kind: input, shape index: {}]   ;;  %s11406_s5 = inlined_call_operand.hbm [shape: f32[16,256], index: 5, kind: input, shape index: {}]   ;;  %s11407_s6 = inlined_call_operand.hbm [shape: f32[128,128], index: 6, kind: input, shape index: {}]   ;;  %s11408_s7 = inlined_call_operand.hbm [shape: f32[1,128], index: 7, kind: input, shape index: {}]   ;;  %s11409_s8 = inlined_call_operand.hbm [shape: f32[128,128], index: 8, kind: input, shape index: {}]   ;;  %s11410_s9 = inlined_call_operand.hbm [shape: f32[1,128], index: 9, kind: input, shape index: {}]   ;;  %s11411_s10 = inlined_call_operand.hbm [shape: f32[1,128], index: 10, kind: input, shape index: {}]   ;;  %s11412_s11 = inlined_call_operand.hbm [shape: f32[1,128], index: 11, kind: input, shape index: {}]   ;;  %s11413_s12 = inlined_call_operand.hbm [shape: f32[16,128], index: 12, kind: output, shape index: {0}]   ;;  %s11414_s13 = inlined_call_operand.hbm [shape: f32[16,256], index: 13, kind: output, shape index: {1}]   ;;  %s11415_s14 = inlined_call_operand.hbm [shape: f32[16,256], index: 14, kind: output, shape index: {2}]  }
   0x1   :  { %11590 = sst [smem:[#allocation196_spill]] %s11401_s0 }
   0x2   :  { %11591 = sst [smem:[#allocation197_spill]] %s11402_s1 }
   0x3   :  { %11592 = sst [smem:[#allocation198_spill]] %s11403_s2 }
   0x4   :  { %11593 = sst [smem:[#allocation199_spill]] %s11404_s3 }
   0x5   :  { %11594 = sst [smem:[#allocation200_spill]] %s11405_s4 }
   0x6   :  { %11595 = sst [smem:[#allocation201_spill]] %s11406_s5 }
   0x7   :  { %11596 = sst [smem:[#allocation202_spill]] %s11407_s6 }
   0x8   :  { %11597 = sst [smem:[#allocation203_spill]] %s11408_s7 }
   0x9   :  { %11598 = sst [smem:[#allocation204_spill]] %s11409_s8 }
   0xa   :  { %11599 = sst [smem:[#allocation205_spill]] %s11410_s9 }
   0xb   :  { %11600 = sst [smem:[#allocation206_spill]] %s11413_s12 }
   0xc   :  { %11601 = sst [smem:[#allocation207_spill]] %s11414_s13 }
   0xd   :  { %11602 = sst [smem:[#allocation208_spill]] %s11415_s14 }
   0xe   :  { %20 = vsyncpa [#allocation5], 0 }
   0xf   :  { %22 = vsyncpa [#allocation5 + $0x1], 0 }
  0x10   :  { %23 = vsyncpa [#allocation8], 0 }
  0x11   :  { %25 = vsyncpa [#allocation8 + $0x1], 0 }
  0x12   :  { %26 = vsyncpa [#allocation11], 0 }
  0x13   :  { %28 = vsyncpa [#allocation11 + $0x1], 0 }
  0x14   :  { %29 = vsyncpa [#allocation14], 0 }
  0x15   :  { %31 = vsyncpa [#allocation14 + $0x1], 0 }
  0x16   :  { %32 = vsyncpa [#allocation17], 0 }
  0x17   :  { %33 = vsyncpa [#allocation20], 0 }
  0x18   :  { %34 = vsyncpa [#allocation23], 0 }
  0x19   :  { %35 = vsyncpa [#allocation6], 0 }
  0x1a   :  { %37 = vsyncpa [#allocation6 + $0x1], 0 }
  0x1b   :  { %38 = vsyncpa [#allocation26], 0 }
  0x1c   :  { %40 = vsyncpa [#allocation26 + $0x1], 0  ;;  %s7835_s29 = smov 0   ;;  %s7837_s30 = smov 0  }
  0x1d   :  { %s7839_s15 = smov 0   ;;  %s7841_s16 = smov 0  }
  0x1e   :  { %s7843_s17 = smov 0   ;;  %s7845_s18 = smov 0  }
  0x1f   :  { %s7847_s19 = smov 0   ;;  %s7849_s20 = smov 0  }
  0x20   :  { %s7851_s21 = smov 0   ;;  %s7853_s22 = smov 0  }
  0x21   :  { %s7855_s23 = smov 0  }
  0x22 LB: > { %11603 = sst [smem:[#allocation46_spill]] %s7688_s30  ;;  %s7891_s24 = sadd.s32 4294967295, %s7724_s23   ;;  %s7724_s23 = sphi %s7855_s23, %s46_s23   ;;  %s7720_s22 = sphi %s7853_s22, %s12178_s22   ;;  %s7716_s21 = sphi %s7851_s21, %s12177_s21   ;;  %s7712_s20 = sphi %s7849_s20, %s12176_s20   ;;  %s7708_s19 = sphi %s7847_s19, %s12175_s19   ;;  %s7704_s18 = sphi %s7845_s18, %s12174_s18   ;;  %s7700_s17 = sphi %s7843_s17, %s12173_s17   ;;  %s7696_s16 = sphi %s7841_s16, %s12172_s16   ;;  %s7692_s15 = sphi %s7839_s15, %s12171_s15   ;;  %s7688_s30 = sphi %s7837_s30, %s12170_s30   ;;  %s7684_s29 = sphi %s7835_s29, %s12164_s29  }
  0x23   : > { %11604 = sst [smem:[#allocation47_spill]] %s7696_s16  ;;  %s55_s26 = sadd.s32 1, %s7716_s21 }
  0x24   : > { %11605 = sst [smem:[#allocation48_spill]] %s7700_s17  ;;  %s58_s27 = sadd.s32 1, %s7720_s22 }
  0x25   : > { %11606 = sst [smem:[#allocation49_spill]] %s7708_s19  ;;  %p56_p0 = scmp.ge.s32.totalorder %s55_s26, 2 }
  0x26   : > { %11607 = sst [smem:[#allocation50_spill]] %s7712_s20  ;;  %s65_s28 = sadd.s32 1, %s7704_s18 }
  0x27   : > { %11608 = sst [smem:[#allocation51_spill]] %s7891_s24  ;;  %p72_p1 = scmp.ne.s32.totalorder %s7704_s18, %s7700_s17 }
  0x28   : > { %p73_p2 = scmp.eq.s32.totalorder %s7724_s23, 0  ;;  %s12180_s26 = smov (%p56_p0, %s55_s26), 0 }
  0x29   : > { %11609 = sst [smem:[#allocation52_spill]] %s12180_s26  ;;  %s12182_s27 = smov (!%p56_p0, %s58_s27), %s7720_s22 }
  0x2a   : > { %p7908_p3 = por %p73_p2, %p72_p1  ;;  %p11427_p4 = scmp.ne.s32.totalorder %s7700_s17, %s7696_s16 }
  0x2b   : > { %p60_p5 = scmp.ge.s32.totalorder %s12182_s27, 2  ;;  %p11437_p6 = scmp.eq.s32.totalorder %s7891_s24, 0 }
  0x2c   : > { %s11610_s25 = scalar_select %p7908_p3, 1, 0 }
  0x2d   : > { %s115_s14 = ssub.s32 %s7716_s21, %s12180_s26  ;;  %s119_s12 = sadd.s32 1, %s7692_s15 }
  0x2e   : > { %s12184_s27 = smov (%p60_p5, %s12182_s27), 0  ;;  %p7925_p7 = por %p11437_p6, %p11427_p4 }
  0x2f   : > { %11611 = sst [smem:[#allocation53_spill]] %s12184_s27  ;;  %p126_p8 = scmp.ne.s32.totalorder %s7692_s15, %s7688_s30 }
  0x30   : > { %s11612_s13 = scalar_select %p7925_p7, 1, 0 }
  0x31   : > { %s62_s20 = ssub.s32 %s7720_s22, %s12184_s27  ;;  %p132_p9 = scmp.ne.s32.totalorder %s7688_s30, %s7684_s29 }
  0x32   : > { %11613 = sst [smem:[#allocation54_spill]] %s11612_s13  ;;  %p63_p10 = scmp.eq.s32.totalorder %s62_s20, 0 }
  0x33   : > { %s116_s26 = sor.u32 %s115_s14, %s62_s20  ;;  %p7937_p12 = por %p126_p8, %p73_p2 }
  0x34   : > { %p117_p11 = scmp.eq.s32.totalorder %s116_s26, 0  ;;  %p7949_p13 = por %p132_p9, %p11437_p6 }
  0x35   : > { %s11614_s19 = scalar_select %p7937_p12, 1, 0 }
  0x36   : > { %s7942_s5 = scalar_select %p63_p10, %s7704_s18, %s65_s28  }
  0x37   : > { %s7945_s4 = scalar_select %p117_p11, %s7692_s15, %s119_s12  }
  0x38   : > { %11615 = sst [smem:[#allocation55_spill]] %s7942_s5  ;;  %p362_p0 = scmp.eq.s32.totalorder %s7891_s24, 3 }
  0x39   : > { %11616 = sst [smem:[#allocation56_spill]] %s7945_s4  ;;  %s11619_s29 = sadd.s32 4294967294, %s7724_s23  }
  0x3a   : > { %s11617_s13 = scalar_select %p7949_p13, 1, 0 }
  0x3b   : > { %p368_p5 = scmp.eq.s32.totalorder %s11619_s29, 3  ;;  %p6256_p4 = scmp.ge.s32.totalorder %s7724_s23, 1 }
  0x3c   : > { %11618 = sst [smem:[#allocation57_spill]] %s11617_s13  ;;  %p7960_p7 = por %p362_p0, %p72_p1 }
  0x3d   : > { %p427_p2 = scmp.lt.s32.totalorder %s7724_s23, 5  ;;  %p11622_p8 = scmp.ne.s32.totalorder %s7700_s17, %s7696_s16 }
  0x3e   : > { %s11620_s14 = scalar_select %p7960_p7, 1, 0 }
  0x3f   : > { %p7968_p10 = por %p368_p5, %p11622_p8  ;;  %p7972_p11 = pnand %p6256_p4, %p427_p2 }
  0x40   : > { %11621 = sst [smem:[#allocation58_spill]] %s11620_s14  ;;  %s7726_s26 = smov [#allocation16]  }
  0x41   : > { %s11623_s20 = scalar_select %p7968_p10, 1, 0 }
  0x42   : > { %s11625_s12 = scalar_select %p7972_p11, 1, 0 }
  0x43   : > { %11624 = sst [smem:[#allocation59_spill]] %s11623_s20  ;;  %s453_s28 = sshll.u32 %s7726_s26, 4  ;;  %s454_s28 = int_to_ptr.vmem [resolvable:$true] %s453_s28 }
  0x44   : > { %11626 = sst [smem:[#allocation60_spill]] %s11625_s12  ;;  %p6541_p9 = pneg %p7972_p11 }
  0x45   : > { %s7727_s29 = smov [#allocation19]   ;;  %s11628_s7 = sld [smem:[#allocation203_spill]] }
  0x46   : > { %s477_s27 = sshll.u32 %s7727_s29, 4  ;;  %p7980_p1 = pnand %p6541_p9, %p11437_p6  ;;  %s7984_s27 = int_to_ptr.vmem [resolvable:$true] %s477_s27 }
  0x48   : > { %p7994_p0 = pneg %p7980_p1 }
  0x4b   : > { %s7226_s16 = scalar_lea.hbm %s11628_s7, 16 }
  0x4c   : > { %p7227_p4 = scmp.ne.s32.totalorder %s11628_s7, %s7226_s16  ;;  %p7233_p8 = scmp.lt.u32.totalorder %s7226_s16, %s11628_s7 }
  0x4e   : > { %p7229_p5 = pnand %p7994_p0, %p7227_p4 }
  0x50   : > { %p7230_p2 = pneg %p7229_p5 }
  0x52   : > { %p7235_p9 = pnand %p7233_p8, %p7230_p2 }
  0x54   : > { %7238 = shalt.err (!%p7235_p9)
}
  0x55   : > { %s7239_s4 = scalar_lea.vmem %s454_s28, 16  ;;  %s7246_s13 = scalar_lea.vmem %s454_s28, 32 }
  0x56   : > { %p7240_p6 = scmp.ne.s32.totalorder %s454_s28, %s7239_s4  ;;  %p7247_p13 = scmp.lt.s32.totalorder %s454_s28, %s454_s28 }
  0x57   : > { %p7248_p11 = scmp.lt.s32.totalorder %s7246_s13, %s7239_s4 }
  0x58   : > { %p7242_p10 = pnand %p7240_p6, %p7994_p0 }
  0x59   : > { %p7249_p12 = por %p7248_p11, %p7247_p13 }
  0x5a   : > { %p7243_p7 = pneg %p7242_p10 }
  0x5c   : > { %p7250_p3 = pnand %p7249_p12, %p7243_p7 }
  0x5e   : > { %7253 = shalt.err (!%p7250_p3)
}
  0x5f   : > { %6547 = dma.hbm_to_vmem [thread:$0]  (!%p7980_p1), %s11628_s7, 16, %s454_s28, [#allocation17]  }
  0x60   : > { %s11630_s9 = sld [smem:[#allocation205_spill]] }
  0x66   : > { %s7254_s29 = scalar_lea.hbm %s11630_s9, 16 }
  0x67   : > { %p7255_p6 = scmp.ne.s32.totalorder %s11630_s9, %s7254_s29  ;;  %p7261_p3 = scmp.lt.u32.totalorder %s7254_s29, %s11630_s9 }
  0x69   : > { %p7257_p10 = pnand %p7255_p6, %p7994_p0 }
  0x6b   : > { %p7258_p13 = pneg %p7257_p10 }
  0x6d   : > { %p7263_p7 = pnand %p7261_p3, %p7258_p13 }
  0x6f   : > { %7266 = shalt.err (!%p7263_p7)
}
  0x70   : > { %s7267_s28 = scalar_lea.vmem %s7984_s27, 16  ;;  %s7274_s17 = scalar_lea.vmem %s7984_s27, 32 }
  0x71   : > { %p7268_p12 = scmp.ne.s32.totalorder %s7984_s27, %s7267_s28  ;;  %p7275_p5 = scmp.lt.s32.totalorder %s7984_s27, %s7984_s27 }
  0x72   : > { %p7276_p2 = scmp.lt.s32.totalorder %s7274_s17, %s7267_s28 }
  0x73   : > { %p7270_p11 = pnand %p7268_p12, %p7994_p0 }
  0x74   : > { %p7277_p8 = por %p7276_p2, %p7275_p5 }
  0x75   : > { %p7271_p4 = pneg %p7270_p11 }
  0x77   : > { %p7278_p9 = pnand %p7277_p8, %p7271_p4 }
  0x79   : > { %7281 = shalt.err (!%p7278_p9)
}
  0x7a   : > { %6553 = dma.hbm_to_vmem [thread:$0]  (!%p7980_p1), %s11630_s9, 16, %s7984_s27, [#allocation20]  }
  0x7b   : > { %s7728_s20 = smov [#allocation15]   ;;  %s11631_s6 = sld [smem:[#allocation202_spill]] }
  0x7c   : > { %s439_s30 = sshll.u32 %s7728_s20, 4  ;;  %s440_s30 = int_to_ptr.vmem [resolvable:$true] %s439_s30 }
  0x81   : > { %s7282_s4 = scalar_lea.hbm %s11631_s6, 2048 }
  0x82   : > { %p7283_p6 = scmp.ne.s32.totalorder %s11631_s6, %s7282_s4  ;;  %p7289_p3 = scmp.lt.u32.totalorder %s7282_s4, %s11631_s6 }
  0x84   : > { %p7285_p10 = pnand %p7283_p6, %p7994_p0 }
  0x86   : > { %p7286_p13 = pneg %p7285_p10 }
  0x88   : > { %p7291_p7 = pnand %p7289_p3, %p7286_p13 }
  0x8a   : > { %7294 = shalt.err (!%p7291_p7)
}
  0x8b   : > { %s7295_s27 = scalar_lea.vmem %s440_s30, 2048  ;;  %p7303_p5 = scmp.lt.s32.totalorder %s440_s30, %s440_s30 }
  0x8c   : > { %p7296_p12 = scmp.ne.s32.totalorder %s440_s30, %s7295_s27  ;;  %p7304_p2 = scmp.lt.s32.totalorder %s7295_s27, %s7295_s27 }
  0x8e   : > { %p7298_p11 = pnand %p7296_p12, %p7994_p0  ;;  %p7305_p8 = por %p7304_p2, %p7303_p5 }
  0x90   : > { %p7299_p4 = pneg %p7298_p11 }
  0x92   : > { %p7306_p9 = pnand %p7305_p8, %p7299_p4 }
  0x94   : > { %7309 = shalt.err (!%p7306_p9)
}
  0x95   : > { %s7729_s24 = smov 128   ;;  %s7730_s14 = smov 8  }
  0x96   : > { %6544 = dma.hbm_to_vmem [thread:$0]  (!%p7980_p1), %s11631_s6, 2048, %s440_s30, [#allocation14], %s7729_s24, %s7729_s24, %s7730_s14  }
  0x97   : > { %s7731_s16 = smov [#allocation18]   ;;  %s7732_s4 = smov [#allocation21]  }
  0x98   : > { %s463_s29 = sshll.u32 %s7731_s16, 4  ;;  %s488_s13 = sshll.u32 %s7732_s4, 4  ;;  %s464_s29 = int_to_ptr.vmem [resolvable:$true] %s463_s29  ;;  %s489_s13 = int_to_ptr.vmem [resolvable:$true] %s488_s13 }
  0x99   : > { %s11632_s8 = sld [smem:[#allocation204_spill]] }
  0x9f   : > { %s7310_s27 = scalar_lea.hbm %s11632_s8, 2048 }
  0xa0   : > { %p7311_p6 = scmp.ne.s32.totalorder %s11632_s8, %s7310_s27  ;;  %p7317_p3 = scmp.lt.u32.totalorder %s7310_s27, %s11632_s8 }
  0xa2   : > { %p7313_p10 = pnand %p7311_p6, %p7994_p0 }
  0xa4   : > { %p7314_p13 = pneg %p7313_p10 }
  0xa6   : > { %p7319_p7 = pnand %p7317_p3, %p7314_p13 }
  0xa8   : > { %7322 = shalt.err (!%p7319_p7)
}
  0xa9   : > { %s7323_s30 = scalar_lea.vmem %s464_s29, 2048  ;;  %p7331_p5 = scmp.lt.s32.totalorder %s464_s29, %s464_s29 }
  0xaa   : > { %p7324_p12 = scmp.ne.s32.totalorder %s464_s29, %s7323_s30  ;;  %p7332_p2 = scmp.lt.s32.totalorder %s7323_s30, %s7323_s30 }
  0xac   : > { %p7326_p11 = pnand %p7324_p12, %p7994_p0  ;;  %p7333_p8 = por %p7332_p2, %p7331_p5 }
  0xae   : > { %p7327_p4 = pneg %p7326_p11 }
  0xb0   : > { %p7334_p9 = pnand %p7333_p8, %p7327_p4 }
  0xb2   : > { %7337 = shalt.err (!%p7334_p9)
}
  0xb3   : > { %6550 = dma.hbm_to_vmem [thread:$0]  (!%p7980_p1), %s11632_s8, 2048, %s464_s29, [#allocation17], %s7729_s24, %s7729_s24, %s7730_s14  }
  0xb4   : > { %s7338_s7 = scalar_lea.hbm %s11411_s10, 16 }
  0xb5   : > { %p7339_p6 = scmp.ne.s32.totalorder %s11411_s10, %s7338_s7  ;;  %p7345_p3 = scmp.lt.u32.totalorder %s7338_s7, %s11411_s10 }
  0xb7   : > { %p7341_p10 = pnand %p7339_p6, %p7994_p0 }
  0xb9   : > { %p7342_p13 = pneg %p7341_p10 }
  0xbb   : > { %p7347_p7 = pnand %p7345_p3, %p7342_p13 }
  0xbd   : > { %7350 = shalt.err (!%p7347_p7)
}
  0xbe   : > { %s7351_s17 = scalar_lea.vmem %s489_s13, 16  ;;  %s7358_s24 = scalar_lea.vmem %s489_s13, 32 }
  0xbf   : > { %p7352_p12 = scmp.ne.s32.totalorder %s489_s13, %s7351_s17  ;;  %p7359_p5 = scmp.lt.s32.totalorder %s489_s13, %s489_s13 }
  0xc0   : > { %p7360_p2 = scmp.lt.s32.totalorder %s7358_s24, %s7351_s17 }
  0xc1   : > { %p7354_p11 = pnand %p7352_p12, %p7994_p0 }
  0xc2   : > { %p7361_p8 = por %p7360_p2, %p7359_p5 }
  0xc3   : > { %p7355_p4 = pneg %p7354_p11 }
  0xc5   : > { %p7362_p9 = pnand %p7361_p8, %p7355_p4 }
  0xc7   : > { %7365 = shalt.err (!%p7362_p9)
}
  0xc8   : > { %6556 = dma.hbm_to_vmem [thread:$0]  (!%p7980_p1), %s11411_s10, 16, %s489_s13, [#allocation20]  }
  0xc9   : > { %s7733_s27 = smov [#allocation22]   ;;  %s7366_s2 = scalar_lea.hbm %s11412_s11, 16 }
  0xca   : > { %s499_s30 = sshll.u32 %s7733_s27, 4  ;;  %p7367_p6 = scmp.ne.s32.totalorder %s11412_s11, %s7366_s2  ;;  %s500_s30 = int_to_ptr.vmem [resolvable:$true] %s499_s30 }
  0xcb   : > { %p7373_p3 = scmp.lt.u32.totalorder %s7366_s2, %s11412_s11 }
  0xcc   : > { %p7369_p10 = pnand %p7367_p6, %p7994_p0 }
  0xce   : > { %p7370_p13 = pneg %p7369_p10 }
  0xd0   : > { %p7375_p7 = pnand %p7373_p3, %p7370_p13 }
  0xd2   : > { %7378 = shalt.err (!%p7375_p7)
}
  0xd3   : > { %s7379_s13 = scalar_lea.vmem %s500_s30, 16  ;;  %s7386_s4 = scalar_lea.vmem %s500_s30, 32 }
  0xd4   : > { %p7380_p12 = scmp.ne.s32.totalorder %s500_s30, %s7379_s13  ;;  %p7387_p5 = scmp.lt.s32.totalorder %s500_s30, %s500_s30 }
  0xd5   : > { %p7388_p2 = scmp.lt.s32.totalorder %s7386_s4, %s7379_s13 }
  0xd6   : > { %p7382_p11 = pnand %p7380_p12, %p7994_p0 }
  0xd7   : > { %p7389_p8 = por %p7388_p2, %p7387_p5 }
  0xd8   : > { %p7383_p4 = pneg %p7382_p11 }
  0xda   : > { %p7390_p9 = pnand %p7389_p8, %p7383_p4 }
  0xdc   : > { %7393 = shalt.err (!%p7390_p9)
}
  0xdd   : > { %6559 = dma.hbm_to_vmem [thread:$0]  (!%p7980_p1), %s11412_s11, 16, %s500_s30, [#allocation23]  }
  0xde   : > { %p6263_p6 = scmp.ge.s32.totalorder %s7724_s23, 4 }
  0xdf   : > { %s8108_s26 = sand.u32 (!%p6263_p6), 1, %s7704_s18   ;;  %s6265_s24 = sshll.u32 (!%p6263_p6), %s7720_s22, 7 }
  0xe0   : > { %506 = sbr.rel (%p6263_p6) target bundleno = 362 (0x16a), region = 40  ;;  %s6264_s14 = sshll.u32 (!%p6263_p6), %s8108_s26, 3 }
  0xe1   : > { %s11633_s0 = sld [smem:[#allocation196_spill]] (!%p6263_p6)  ;;  %s514_s30 = scalar_lea.vmem (!%p6263_p6), [#allocation4], %s6264_s14 }
  0xe2   : > { %s521_s9 = sshll.u32 (!%p6263_p6), %s514_s30, 4  ;;  %s8122_s12 = sand.u32 (!%p6263_p6), 1, %s7724_s23   ;;  %s522_s9 = int_to_ptr.vmem [resolvable:$true] %s521_s9 }
  0xe3   : > { %s511_s2 = scalar_lea.sflag (!%p6263_p6), [#allocation5], %s8108_s26  ;;  %p11634_p0 = scmp.ne.s32.totalorder (!%p6263_p6), %s11610_s25, 0 }
  0xe7   : > { %s8117_s27 = scalar_lea.hbm %s11633_s0, %s6265_s24  ;;  %s7398_s16 = scalar_lea.hbm %s11633_s0, 256 }
  0xe8   : > { %s7394_s3 = scalar_lea.hbm %s8117_s27, 128  ;;  %p7399_p3 = scmp.lt.u32.totalorder %s8117_s27, %s11633_s0 }
  0xe9   : > { %p7395_p1 = scmp.ne.s32.totalorder %s8117_s27, %s7394_s3  ;;  %p7400_p7 = scmp.lt.u32.totalorder %s7398_s16, %s7394_s3 }
  0xea   : > { %p7402_p11 = scmp.lt.u32.totalorder %s7394_s3, %s8117_s27 }
  0xeb   : > { %p7396_p10 = pnand %p7395_p1, %p11634_p0  ;;  %p7401_p12 = por %p7400_p7, %p7399_p3 }
  0xed   : > { %p7397_p13 = pneg %p7396_p10  ;;  %p7403_p4 = por %p7402_p11, %p7401_p12 }
  0xef   : > { %p7404_p5 = pnand %p7403_p4, %p7397_p13 }
  0xf1   : > { %7407 = shalt.err (!%p7404_p5)
}
  0xf2   : > { %s7408_s28 = scalar_lea.vmem %s522_s9, 128  ;;  %s7734_s17 = smov [#allocation4]  }
  0xf3   : > { %p7409_p2 = scmp.ne.s32.totalorder %s522_s9, %s7408_s28  ;;  %s7412_s5 = sshll.u32 %s7734_s17, 4  ;;  %s7413_s5 = int_to_ptr.vmem [resolvable:$false] %s7412_s5 }
  0xf4   : > { %s7414_s29 = scalar_lea.vmem %s7413_s5, 256  ;;  %p7415_p6 = scmp.lt.s32.totalorder %s522_s9, %s7413_s5 }
  0xf5   : > { %p7410_p8 = pnand %p7409_p2, %p11634_p0  ;;  %p7416_p1 = scmp.lt.s32.totalorder %s7414_s29, %s7408_s28 }
  0xf7   : > { %p7411_p9 = pneg %p7410_p8  ;;  %p7417_p10 = por %p7416_p1, %p7415_p6 }
  0xf9   : > { %p7418_p3 = pnand %p7417_p10, %p7411_p9 }
  0xfb   : > { %7421 = shalt.err (!%p7418_p3)
}
  0xfc   : > { %6497 = dma.hbm_to_vmem [thread:$0]  (%p11634_p0), %s8117_s27, 128, %s522_s9, %s511_s2  }
  0xfd   : > { %s11635_s1 = sld [smem:[#allocation197_spill]]  ;;  %s532_s20 = scalar_lea.vmem [#allocation7], %s6264_s14 }
  0xfe   : > { %s539_s16 = sshll.u32 %s532_s20, 4  ;;  %s529_s13 = scalar_lea.sflag [#allocation8], %s8122_s12  ;;  %s540_s16 = int_to_ptr.vmem [resolvable:$true] %s539_s16 }
 0x103   : > { %s8147_s7 = scalar_lea.hbm %s11635_s1, %s6265_s24  ;;  %s7426_s2 = scalar_lea.hbm %s11635_s1, 256 }
 0x104   : > { %s7422_s4 = scalar_lea.hbm %s8147_s7, 128  ;;  %p7427_p11 = scmp.lt.u32.totalorder %s8147_s7, %s11635_s1 }
 0x105   : > { %p7423_p13 = scmp.ne.s32.totalorder %s8147_s7, %s7422_s4  ;;  %p7428_p4 = scmp.lt.u32.totalorder %s7426_s2, %s7422_s4 }
 0x106   : > { %p7430_p2 = scmp.lt.u32.totalorder %s7422_s4, %s8147_s7 }
 0x107   : > { %p7424_p7 = pnand %p7423_p13, %p11634_p0  ;;  %p7429_p5 = por %p7428_p4, %p7427_p11 }
 0x109   : > { %p7425_p12 = pneg %p7424_p7  ;;  %p7431_p8 = por %p7430_p2, %p7429_p5 }
 0x10b   : > { %p7432_p9 = pnand %p7431_p8, %p7425_p12 }
 0x10d   : > { %7435 = shalt.err (!%p7432_p9)
}
 0x10e   : > { %s7436_s14 = scalar_lea.vmem %s540_s16, 128  ;;  %s7735_s17 = smov [#allocation7]  }
 0x10f   : > { %p7437_p6 = scmp.ne.s32.totalorder %s540_s16, %s7436_s14  ;;  %s7440_s5 = sshll.u32 %s7735_s17, 4  ;;  %s7441_s5 = int_to_ptr.vmem [resolvable:$false] %s7440_s5 }
 0x110   : > { %s7442_s29 = scalar_lea.vmem %s7441_s5, 256  ;;  %p7443_p3 = scmp.lt.s32.totalorder %s540_s16, %s7441_s5 }
 0x111   : > { %p7438_p1 = pnand %p7437_p6, %p11634_p0  ;;  %p7444_p13 = scmp.lt.s32.totalorder %s7442_s29, %s7436_s14 }
 0x113   : > { %p7439_p10 = pneg %p7438_p1  ;;  %p7445_p7 = por %p7444_p13, %p7443_p3 }
 0x115   : > { %p7446_p4 = pnand %p7445_p7, %p7439_p10 }
 0x117   : > { %7449 = shalt.err (!%p7446_p4)
}
 0x118   : > { %6498 = dma.hbm_to_vmem [thread:$0]  (%p11634_p0), %s8147_s7, 128, %s540_s16, %s529_s13  }
 0x119   : > { %s548_s30 = sand.u32 1, %s7692_s15   ;;  %s6270_s3 = sshll.u32 %s7716_s21, 4 }
 0x11a   : > { %s6268_s20 = sshll.u32 %s548_s30, 10  ;;  %s8174_s4 = sshll.u32 %s7720_s22, 8 }
 0x11b   : > { %s557_s27 = sadd.s32 %s8174_s4, %s6270_s3  ;;  %s11636_s7 = sld [smem:[#allocation198_spill]] }
 0x11c   : > { %s6272_s9 = sshll.u32 %s557_s27, 7  ;;  %s550_s28 = scalar_lea.vmem [#allocation9], %s6268_s20 }
 0x11d   : > { %s572_s14 = sshll.u32 %s550_s28, 4  ;;  %p11637_p12 = scmp.ne.s32.totalorder %s11614_s19, 0  ;;  %s573_s14 = int_to_ptr.vmem [resolvable:$true] %s572_s14 }
 0x11e   : > { %s7736_s29 = smov 4096   ;;  %s7737_s30 = smov 2048  }
 0x11f   : > { %s6499_s17 = scalar_select %p11637_p12, [#allocation0], [#allocation32] }
 0x120   : > { %6500 = sst [smem:[#allocation29]] (%p11637_p12), %s7736_s29  ;;  %s7738_s3 = smov 16  }
 0x121   : > { %s559_s16 = scalar_lea.hbm %s11636_s7, %s6272_s9  ;;  %s564_s5 = sld [smem:[%s6499_s17]]  }
 0x122   : > { %6501 = sst [smem:[#allocation29 + $0x1]] (%p11637_p12), %s7737_s30  ;;  %s7739_s27 = smov 128  }
 0x123   : > { %6502 = sst [smem:[#allocation29 + $0x2]] (%p11637_p12), %s7738_s3  ;;  %s7740_s2 = smov 8  }
 0x124   : > { %6503 = sst [smem:[#allocation29 + $0x3]] (%p11637_p12), %s7739_s27  ;;  %s7741_s28 = smov [#allocation28]  }
 0x125   : > { %6504 = sst [smem:[#allocation29 + $0x4]] (%p11637_p12), %s7739_s27 }
 0x126   : > { %6505 = sst [smem:[#allocation29 + $0x5]] (%p11637_p12), %s7740_s2 }
 0x127   : > { %s6273_s24 = sshll.u32 %s564_s5, 26 }
 0x128   : > { %s6274_s7 = sadd.s32 134217728, %s6273_s24 }
 0x129   : > { %6506 = dma.general (%p11637_p12), %s559_s16, 16384, %s573_s14, %s529_s13, %s7741_s28, [#allocation29], %s6274_s7, 0  }
 0x12a   : > { %s11638_s30 = sld [smem:[#allocation199_spill]]  ;;  %s599_s2 = scalar_lea.vmem [#allocation10], %s6268_s20 }
 0x12b   : > { %s6507_s27 = scalar_select %p11637_p12, [#allocation0], [#allocation33] }
 0x12c   : > { %s621_s5 = sshll.u32 %s599_s2, 4  ;;  %s7742_s0 = smov 4096   ;;  %s622_s5 = int_to_ptr.vmem [resolvable:$true] %s621_s5 }
 0x12d   : > { %s613_s24 = sld [smem:[%s6507_s27]]   ;;  %s7743_s13 = smov 2048  }
 0x12e   : > { %6508 = sst [smem:[#allocation31]] (%p11637_p12), %s7742_s0  ;;  %s7744_s16 = smov 16  }
 0x12f   : > { %6509 = sst [smem:[#allocation31 + $0x1]] (%p11637_p12), %s7743_s13  ;;  %s7746_s14 = smov 8  }
 0x130   : > { %s608_s3 = scalar_lea.hbm %s11638_s30, %s6272_s9  ;;  %6510 = sst [smem:[#allocation31 + $0x2]] (%p11637_p12), %s7744_s16 }
 0x131   : > { %s7745_s9 = smov 128   ;;  %6513 = sst [smem:[#allocation31 + $0x5]] (%p11637_p12), %s7746_s14 }
 0x132   : > { %6511 = sst [smem:[#allocation31 + $0x3]] (%p11637_p12), %s7745_s9  ;;  %s596_s28 = scalar_lea.sflag [#allocation11], %s8122_s12 }
 0x133   : > { %6512 = sst [smem:[#allocation31 + $0x4]] (%p11637_p12), %s7745_s9  ;;  %s6280_s20 = sshll.u32 %s613_s24, 26 }
 0x134   : > { %s6281_s7 = sadd.s32 134217728, %s6280_s20  ;;  %s7747_s17 = smov [#allocation30]  }
 0x135   : > { %6514 = dma.general (%p11637_p12), %s608_s3, 16384, %s622_s5, %s596_s28, %s7747_s17, [#allocation31], %s6281_s7, 0  }
 0x136   : > { %s6282_s0 = sshll.u32 %s8108_s26, 4  ;;  %s11639_s27 = sld [smem:[#allocation200_spill]] }
 0x137   : > { %s648_s24 = scalar_lea.vmem [#allocation12], %s6282_s0  ;;  %s11640_s13 = sld [smem:[#allocation201_spill]] }
 0x138   : > { %s656_s19 = sshll.u32 %s648_s24, 4  ;;  %s657_s19 = int_to_ptr.vmem [resolvable:$true] %s656_s19 }
 0x13c   : > { %s8225_s2 = scalar_lea.hbm %s11639_s27, %s8174_s4  ;;  %s7454_s7 = scalar_lea.hbm %s11639_s27, 512 }
 0x13d   : > { %s8233_s16 = scalar_lea.hbm %s11640_s13, %s8174_s4  ;;  %s7450_s9 = scalar_lea.hbm %s8225_s2, 256 }
 0x13e   : > { %p7451_p11 = scmp.ne.s32.totalorder %s8225_s2, %s7450_s9  ;;  %p7455_p8 = scmp.lt.u32.totalorder %s8225_s2, %s11639_s27 }
 0x13f   : > { %p7456_p9 = scmp.lt.u32.totalorder %s7454_s7, %s7450_s9  ;;  %p7458_p1 = scmp.lt.u32.totalorder %s7450_s9, %s8225_s2 }
 0x140   : > { %p7452_p5 = pnand %p7451_p11, %p11634_p0 }
 0x141   : > { %p7457_p6 = por %p7456_p9, %p7455_p8 }
 0x142   : > { %p7453_p2 = pneg %p7452_p5 }
 0x143   : > { %p7459_p10 = por %p7458_p1, %p7457_p6 }
 0x145   : > { %p7460_p3 = pnand %p7459_p10, %p7453_p2 }
 0x147   : > { %7463 = shalt.err (!%p7460_p3)
}
 0x148   : > { %s7464_s4 = scalar_lea.vmem %s657_s19, 256  ;;  %s7748_s30 = smov [#allocation12]  }
 0x149   : > { %p7465_p13 = scmp.ne.s32.totalorder %s657_s19, %s7464_s4  ;;  %s7468_s24 = sshll.u32 %s7748_s30, 4  ;;  %s7469_s24 = int_to_ptr.vmem [resolvable:$false] %s7468_s24 }
 0x14a   : > { %s7470_s3 = scalar_lea.vmem %s7469_s24, 512  ;;  %p7471_p12 = scmp.lt.s32.totalorder %s657_s19, %s7469_s24 }
 0x14b   : > { %p7466_p7 = pnand %p7465_p13, %p11634_p0  ;;  %p7472_p11 = scmp.lt.s32.totalorder %s7470_s3, %s7464_s4 }
 0x14d   : > { %p7467_p4 = pneg %p7466_p7  ;;  %p7473_p5 = por %p7472_p11, %p7471_p12 }
 0x14f   : > { %p7474_p8 = pnand %p7473_p5, %p7467_p4 }
 0x151   : > { %7477 = shalt.err (!%p7474_p8)
}
 0x152   : > { %6515 = dma.hbm_to_vmem [thread:$0]  (%p11634_p0), %s8225_s2, 256, %s657_s19, %s596_s28  }
 0x153   : > { %s667_s5 = scalar_lea.vmem [#allocation13], %s6282_s0  ;;  %s664_s20 = scalar_lea.sflag [#allocation14], %s8122_s12 }
 0x154   : > { %s675_s9 = sshll.u32 %s667_s5, 4  ;;  %s7478_s14 = scalar_lea.hbm %s8233_s16, 256  ;;  %s676_s9 = int_to_ptr.vmem [resolvable:$true] %s675_s9 }
 0x155   : > { %p7479_p2 = scmp.ne.s32.totalorder %s8233_s16, %s7478_s14  ;;  %s7482_s29 = scalar_lea.hbm %s11640_s13, 512 }
 0x156   : > { %p7483_p1 = scmp.lt.u32.totalorder %s8233_s16, %s11640_s13  ;;  %p7484_p10 = scmp.lt.u32.totalorder %s7482_s29, %s7478_s14 }
 0x157   : > { %p7480_p9 = pnand %p7479_p2, %p11634_p0  ;;  %p7486_p13 = scmp.lt.u32.totalorder %s7478_s14, %s8233_s16 }
 0x158   : > { %p7485_p3 = por %p7484_p10, %p7483_p1 }
 0x159   : > { %p7481_p6 = pneg %p7480_p9 }
 0x15a   : > { %p7487_p7 = por %p7486_p13, %p7485_p3 }
 0x15c   : > { %p7488_p4 = pnand %p7487_p7, %p7481_p6 }
 0x15e   : > { %7491 = shalt.err (!%p7488_p4)
}
 0x15f   : > { %s7492_s26 = scalar_lea.vmem %s676_s9, 256  ;;  %s7749_s12 = smov [#allocation13]  }
 0x160   : > { %p7493_p12 = scmp.ne.s32.totalorder %s676_s9, %s7492_s26  ;;  %s7496_s28 = sshll.u32 %s7749_s12, 4  ;;  %s7497_s28 = int_to_ptr.vmem [resolvable:$false] %s7496_s28 }
 0x161   : > { %s7498_s0 = scalar_lea.vmem %s7497_s28, 512  ;;  %p7499_p8 = scmp.lt.s32.totalorder %s676_s9, %s7497_s28 }
 0x162   : > { %p7494_p11 = pnand %p7493_p12, %p11634_p0  ;;  %p7500_p2 = scmp.lt.s32.totalorder %s7498_s0, %s7492_s26 }
 0x164   : > { %p7495_p5 = pneg %p7494_p11  ;;  %p7501_p9 = por %p7500_p2, %p7499_p8 }
 0x166   : > { %p7502_p1 = pnand %p7501_p9, %p7495_p5 }
 0x168   : > { %7505 = shalt.err (!%p7502_p1)
}
 0x169   : > { %6516 = dma.hbm_to_vmem [thread:$0]  (%p11634_p0), %s8233_s16, 256, %s676_s9, %s664_s20  }
 0x16a PF: > { %s11641_s2 = sld [smem:[#allocation60_spill]] }
 0x170   : > { %p11642_p6 = scmp.ne.s32.totalorder %s11641_s2, 0 }
 0x172   : > { %684 = sbr.rel (%p11642_p6) target bundleno = 2498 (0x9c2), region = 68 }
 0x179   : > { %s11643_s19 = sld [smem:[#allocation48_spill]]  ;;  %s11644_s24 = sld [smem:[#allocation54_spill]] }
 0x17f   : > { %s8277_s3 = sand.u32 1, %s11643_s19   ;;  %p11645_p10 = scmp.ne.s32.totalorder %s11644_s24, 0 }
 0x180   : > { %s8280_s5 = sshll.u32 %s8277_s3, 3  ;;  %s687_s14 = scalar_lea.sflag [#allocation5], %s8277_s3 }
 0x181   : > { %s690_s7 = scalar_lea.vmem [#allocation4], %s8280_s5 }
 0x182   : > { %7635 = dma.done.wait (%p11645_p10), %s687_s14, 128  }
 0x183   : > { %7637 = vsyncadd (%p11645_p10), %s687_s14, 4294967168  ;;  %s11646_s25 = sld [smem:[#allocation51_spill]]  ;;  %s699_s20 = scalar_lea.vmem [#allocation7], %s8280_s5 }
 0x189   : > { %s8289_s16 = sand.u32 1, %s11646_s25  }
 0x18a   : > { %s696_s9 = scalar_lea.sflag [#allocation8], %s8289_s16 }
 0x18b   : > { %7639 = dma.done.wait (%p11645_p10), %s696_s9, 128  }
 0x18c   : > { %7641 = vsyncadd (%p11645_p10), %s696_s9, 4294967168  ;;  %s11647_s17 = sld [smem:[#allocation46_spill]]  ;;  %s11648_s29 = sld [smem:[#allocation57_spill]] }
 0x192   : > { %s706_s4 = sand.u32 1, %s11647_s17   ;;  %p11649_p0 = scmp.ne.s32.totalorder %s11648_s29, 0 }
 0x193   : > { %s6291_s30 = sshll.u32 %s706_s4, 10 }
 0x194   : > { %s8298_s26 = scalar_lea.vmem [#allocation9], %s6291_s30 }
 0x195   : > { %7643 = dma.done.wait (%p11649_p0), %s696_s9, 16384  }
 0x196   : > { %7645 = vsyncadd (%p11649_p0), %s696_s9, 4294950912  ;;  %s714_s12 = scalar_lea.sflag [#allocation11], %s8289_s16  ;;  %s8305_s28 = scalar_lea.vmem [#allocation10], %s6291_s30 }
 0x197   : > { %7647 = dma.done.wait (%p11649_p0), %s714_s12, 16384  }
 0x198   : > { %7649 = vsyncadd (%p11649_p0), %s714_s12, 4294950912  ;;  %s6293_s0 = sshll.u32 %s8277_s3, 4 }
 0x199   : > { %s8312_s2 = scalar_lea.vmem [#allocation12], %s6293_s0 }
 0x19a   : > { %7651 = dma.done.wait (%p11645_p10), %s714_s12, 256  }
 0x19b   : > { %7653 = vsyncadd (%p11645_p10), %s714_s12, 4294967040  ;;  %s732_s19 = scalar_lea.sflag [#allocation14], %s8289_s16  ;;  %s8319_s14 = scalar_lea.vmem [#allocation13], %s6293_s0 }
 0x19c   : > { %7655 = dma.done.wait (%p11645_p10), %s732_s19, 256  }
 0x19d   : > { %7657 = vsyncadd (%p11645_p10), %s732_s19, 4294967040  ;;  %p11650_p3 = scmp.eq.s32.totalorder %s11646_s25, 0 }
 0x19f   : > { %7659 = dma.done.wait (%p11650_p3), [#allocation14], 2048   ;;  %p11651_p13 = pmov %p11650_p3 }
 0x1a0   : > { %p11652_p7 = pmov %p11650_p3 }
 0x1a1   : > { %7661 = vsyncadd (%p11651_p13), [#allocation14], 4294965248 }
 0x1a2   : > { %7663 = dma.done.wait (%p11652_p7), [#allocation17], 2064   ;;  %p11653_p4 = pmov %p11650_p3 }
 0x1a3   : > { %p11654_p12 = pmov %p11650_p3 }
 0x1a4   : > { %7665 = vsyncadd (%p11653_p4), [#allocation17], 4294965232 }
 0x1a5   : > { %7667 = dma.done.wait (%p11654_p12), [#allocation20], 32   ;;  %p11655_p11 = pmov %p11650_p3 }
 0x1a6   : > { %p11656_p5 = pmov %p11650_p3 }
 0x1a7   : > { %7669 = vsyncadd (%p11655_p11), [#allocation20], 4294967264 }
 0x1a8   : > { %7671 = dma.done.wait (%p11656_p5), [#allocation23], 16   ;;  %p11657_p8 = pmov %p11650_p3 }
 0x1a9   : > { %s11658_s24 = sld [smem:[#allocation49_spill]]  ;;  %s8343_s17 = scalar_lea.vmem [#allocation24], %s8280_s5 }
 0x1aa   : > { %7673 = vsyncadd (%p11657_p8), [#allocation23], 4294967280  ;;  %s8345_s29 = scalar_lea.vmem [#allocation25], %s6293_s0  ;;  %s8347_s4 = scalar_lea.vmem [#allocation27], %s6293_s0 }
 0x1af   : > { %s6304_s9 = sshll.u32 %s11658_s24, 7  ;;  %p6305_p2 = scmp.ne.s32.totalorder %s11658_s24, 0 }
 0x1b0   : > { %v849_v0 = vld [vmem:[#allocation15] sm:$0xff] (!%p6305_p2)  ;;  %v850_v1 = vld [vmem:[#allocation15 + $0x8] sm:$0xff] (!%p6305_p2)  ;;  %v7750_v3 = vmov (!%p6305_p2), 0.0|0.0   ;;  %v851_v6 = vld [vmem:[#allocation15 + $0x10] sm:$0xff] (!%p6305_p2)  ;;  %v7751_v8 = vmov (!%p6305_p2), 0.0   ;;  %vm7752_vm0 = vmmov (!%p6305_p2), 0  }
 0x1b1   : > { %847 = sbr.rel (%p6305_p2) target bundleno = 685 (0x2ad), region = 120  ;;  %v943_v2 = vld [vmem:[#allocation18] sm:$0xff] (!%p6305_p2)  ;;  %6434 = vmatprep.subr.bf16.mxu1 (!%p6305_p2), %v7750_v3  ;;  %v6435_v4 = vpack.c.bf16 (!%p6305_p2), %v850_v1, %v849_v0  ;;  %6458 = vmatprep.subr.bf16.mxu0 (!%p6305_p2), %v7750_v3  ;;  %v944_v5 = vld [vmem:[#allocation18 + $0x8] sm:$0xff] (!%p6305_p2)  ;;  %v852_v7 = vld [vmem:[#allocation15 + $0x18] sm:$0xff] (!%p6305_p2)  ;;  %1040 = vst [vmem:[%s8343_s17] sm:$0xff] (!%p6305_p2), %v7751_v8  ;;  %vm1038_vm1 = vcmask (!%p6305_p2), 7168   ;;  %v7753_v52 = vmov (!%p6305_p2), -inf  }
 0x1b2   : > { %v6459_v9 = vpack.c.bf16 (!%p6305_p2), %v944_v5, %v943_v2  ;;  %v945_v10 = vld [vmem:[#allocation18 + $0x10] sm:$0xff] (!%p6305_p2)  ;;  %v946_v11 = vld [vmem:[#allocation18 + $0x18] sm:$0xff] (!%p6305_p2)  ;;  %6396 = vmatprep.mubr.msk.f32.mxu1 (!%p6305_p2), %vm7752_vm0, %v7751_v8  ;;  %6431 = vmatprep.mubr.msk.f32.mxu0 (!%p6305_p2), %vm7752_vm0, %v7751_v8  ;;  %v6438_v12 = vpack.c.bf16 (!%p6305_p2), %v852_v7, %v851_v6  ;;  %v854_v15 = vld [vmem:[#allocation15 + $0x28] sm:$0xff] (!%p6305_p2)  ;;  %1039 = vst.msk [vmem:[#allocation3] sm:$0xff] (!%p6305_p2), %vm1038_vm1, %v7753_v52 }
 0x1b3   : > { %6436 = vmatpush3.bf16.msra.mxu1 (!%p6305_p2), %v6435_v4  ;;  %v6462_v13 = vpack.c.bf16 (!%p6305_p2), %v946_v11, %v945_v10  ;;  %v853_v14 = vld [vmem:[#allocation15 + $0x20] sm:$0xff] (!%p6305_p2)  ;;  %v948_v17 = vld [vmem:[#allocation18 + $0x28] sm:$0xff] (!%p6305_p2)  ;;  %v856_v21 = vld [vmem:[#allocation15 + $0x38] sm:$0xff] (!%p6305_p2) }
 0x1b4   : > { %6437 = vmatprep.subr.bf16.mxu1 (!%p6305_p2), %v7750_v3  ;;  %6460 = vmatpush3.bf16.msra.mxu0 (!%p6305_p2), %v6459_v9  ;;  %v947_v16 = vld [vmem:[#allocation18 + $0x20] sm:$0xff] (!%p6305_p2)  ;;  %v6441_v18 = vpack.c.bf16 (!%p6305_p2), %v854_v15, %v853_v14  ;;  %v855_v20 = vld [vmem:[#allocation15 + $0x30] sm:$0xff] (!%p6305_p2)  ;;  %v950_v23 = vld [vmem:[#allocation18 + $0x38] sm:$0xff] (!%p6305_p2) }
 0x1b5   : > { %6461 = vmatprep.subr.bf16.mxu0 (!%p6305_p2), %v7750_v3  ;;  %v6465_v19 = vpack.c.bf16 (!%p6305_p2), %v948_v17, %v947_v16  ;;  %v949_v22 = vld [vmem:[#allocation18 + $0x30] sm:$0xff] (!%p6305_p2)  ;;  %v6444_v24 = vpack.c.bf16 (!%p6305_p2), %v856_v21, %v855_v20  ;;  %v857_v26 = vld [vmem:[#allocation15 + $0x40] sm:$0xff] (!%p6305_p2)  ;;  %v858_v27 = vld [vmem:[#allocation15 + $0x48] sm:$0xff] (!%p6305_p2) }
 0x1b6   : > { %v6468_v25 = vpack.c.bf16 (!%p6305_p2), %v950_v23, %v949_v22  ;;  %v951_v28 = vld [vmem:[#allocation18 + $0x40] sm:$0xff] (!%p6305_p2)  ;;  %v952_v29 = vld [vmem:[#allocation18 + $0x48] sm:$0xff] (!%p6305_p2)  ;;  %v6447_v30 = vpack.c.bf16 (!%p6305_p2), %v858_v27, %v857_v26  ;;  %v860_v33 = vld [vmem:[#allocation15 + $0x58] sm:$0xff] (!%p6305_p2) }
 0x1b7   : > { %6439 = vmatpush3.bf16.msra.mxu1 (!%p6305_p2), %v6438_v12  ;;  %v6471_v31 = vpack.c.bf16 (!%p6305_p2), %v952_v29, %v951_v28  ;;  %v859_v32 = vld [vmem:[#allocation15 + $0x50] sm:$0xff] (!%p6305_p2)  ;;  %v954_v35 = vld [vmem:[#allocation18 + $0x58] sm:$0xff] (!%p6305_p2)  ;;  %v862_v39 = vld [vmem:[#allocation15 + $0x68] sm:$0xff] (!%p6305_p2) }
 0x1b8   : > { %6440 = vmatprep.subr.bf16.mxu1 %v7750_v3  ;;  %6463 = vmatpush3.bf16.msra.mxu0 %v6462_v13  ;;  %v953_v34 = vld [vmem:[#allocation18 + $0x50] sm:$0xff]  ;;  %v6450_v36 = vpack.c.bf16 %v860_v33, %v859_v32  ;;  %v861_v38 = vld [vmem:[#allocation15 + $0x60] sm:$0xff]  ;;  %v956_v41 = vld [vmem:[#allocation18 + $0x68] sm:$0xff] }
 0x1b9   : > { %6464 = vmatprep.subr.bf16.mxu0 %v7750_v3  ;;  %v6474_v37 = vpack.c.bf16 %v954_v35, %v953_v34  ;;  %v955_v40 = vld [vmem:[#allocation18 + $0x60] sm:$0xff]  ;;  %v6453_v42 = vpack.c.bf16 %v862_v39, %v861_v38  ;;  %v863_v44 = vld [vmem:[#allocation15 + $0x70] sm:$0xff]  ;;  %v864_v45 = vld [vmem:[#allocation15 + $0x78] sm:$0xff] }
 0x1ba   : > { %v6477_v43 = vpack.c.bf16 %v956_v41, %v955_v40  ;;  %v957_v46 = vld [vmem:[#allocation18 + $0x70] sm:$0xff]  ;;  %v958_v47 = vld [vmem:[#allocation18 + $0x78] sm:$0xff]  ;;  %v6456_v48 = vpack.c.bf16 %v864_v45, %v863_v44  ;;  %v6307_v55 = vld [vmem:[#allocation19] ss:$0 sm:$0xff] }
 0x1bb   : > { %6442 = vmatpush3.bf16.msra.mxu1 %v6441_v18  ;;  %v6480_v49 = vpack.c.bf16 %v958_v47, %v957_v46  ;;  %v848_v50 = vld [vmem:[%s690_s7] sm:$0xff]  ;;  %v942_v51 = vld [vmem:[%s699_s20] sm:$0xff] }
 0x1bc   : > { %6443 = vmatprep.subr.bf16.mxu1 %v7750_v3  ;;  %6466 = vmatpush3.bf16.msra.mxu0 %v6465_v19  ;;  %v6306_v53 = vld [vmem:[#allocation16] ss:$0 sm:$0xff] }
 0x1bd   : > { %6467 = vmatprep.subr.bf16.mxu0 %v7750_v3 }
 0x1bf   : > { %6445 = vmatpush3.bf16.msra.mxu1 %v6444_v24 }
 0x1c0   : > { %6446 = vmatprep.subr.bf16.mxu1 %v7750_v3  ;;  %6469 = vmatpush3.bf16.msra.mxu0 %v6468_v25 }
 0x1c1   : > { %6470 = vmatprep.subr.bf16.mxu0 %v7750_v3 }
 0x1c3   : > { %6448 = vmatpush3.bf16.msra.mxu1 %v6447_v30 }
 0x1c4   : > { %6449 = vmatprep.subr.bf16.mxu1 %v7750_v3  ;;  %6472 = vmatpush3.bf16.msra.mxu0 %v6471_v31 }
 0x1c5   : > { %6473 = vmatprep.subr.bf16.mxu0 %v7750_v3 }
 0x1c7   : > { %6451 = vmatpush3.bf16.msra.mxu1 %v6450_v36 }
 0x1c8   : > { %6452 = vmatprep.subr.bf16.mxu1 %v7750_v3  ;;  %6475 = vmatpush3.bf16.msra.mxu0 %v6474_v37 }
 0x1c9   : > { %6476 = vmatprep.subr.bf16.mxu0 %v7750_v3 }
 0x1cb   : > { %6454 = vmatpush3.bf16.msra.mxu1 %v6453_v42 }
 0x1cc   : > { %6455 = vmatprep.subr.bf16.mxu1 %v7750_v3  ;;  %6478 = vmatpush3.bf16.msra.mxu0 %v6477_v43 }
 0x1cd   : > { %6479 = vmatprep.subr.bf16.mxu0 %v7750_v3 }
 0x1cf   : > { %6457 = vmatpush3.bf16.msra.mxu1 %v6456_v48 }
 0x1d0   : > { %6481 = vmatpush3.bf16.msra.mxu0 %v6480_v49 }
 0x1d2   : > { %6397 = vmatmul.mubr.f32.vlgmr.msra.gmra.mrb[0].mxu1 %v848_v50 }
 0x1d3   : > { %6432 = vmatmul.mubr.f32.vlgmr.msra.gmra.mrb[0].mxu0 %v942_v51 }
 0x2a5   : > { %v938_v54 = vpop.f32.mrb[0].mxu1 }
 0x2a6   : > { %v939_v56 = vadd.f32 %v6306_v53, %v938_v54  ;;  %v6398_v57 = vpop.f32.mrb[1].mxu1  ;;  %v1032_v58 = vpop.f32.mrb[0].mxu0 }
 0x2a7   : > { %v6433_v59 = vpop.f32.mrb[1].mxu0 }
 0x2a8   : > { %v6483_v60 = vadd.f32 %v6307_v55, %v939_v56 }
 0x2aa   : > { %v6484_v61 = vadd.f32 %v6483_v60, %v1032_v58 }
 0x2ac   : > { %1037 = vst [vmem:[#allocation2] sm:$0xff] %v6484_v61 }
 0x2ad PF: > { %v11447_v62 = vlaneseq  ;;  %s11659_s7 = sld [smem:[#allocation49_spill]]  ;;  %s1388_s5 = sshra.s32 %s6304_s9, 7  ;;  %vm2850_vm2 = vcmask 130112   ;;  %vm2857_vm3 = vcmask 195712   ;;  %vm2864_vm4 = vcmask 261312  }
 0x2ae   : > { %s8373_s25 = sshll.u32 %s1388_s5, 3  ;;  %vm2871_vm5 = vcmask 326912   ;;  %vm2878_vm6 = vcmask 392512   ;;  %vm2885_vm7 = vcmask 458112   ;;  %vm2892_vm8 = vcmask 523712  }
 0x2af   : > { %v8376_v63 = vshrl.u32 %v11447_v62, 7  ;;  %s1391_s20 = scalar_lea.vmem %s8319_s14, %s8373_s25 [#allocation13]  ;;  %vm2899_vm9 = vcmask 589312   ;;  %vm2906_vm10 = vcmask 654912   ;;  %vm2913_vm11 = vcmask 720512   ;;  %s3519_s30 = scalar_lea.vmem %s8345_s29, %s8373_s25 [#allocation25] }
 0x2b0   : > { %v8380_v0 = vld [vmem:[%s1391_s20] sm:$0xff]  ;;  %vm2920_vm12 = vcmask 786112   ;;  %vm2927_vm13 = vcmask 851712   ;;  %vm2934_vm14 = vcmask 917312   ;;  %vm2941_vm15 = vcmask 982912  }
 0x2b1   : > { %11660 = vst [vmem:[#allocation61_spill] sm:$0xff] %v8376_v63  ;;  %v8383_v1 = vsub.s32 0, %v8376_v63  ;;  %v8388_v3 = vsub.s32 1, %v8376_v63  ;;  %v8393_v5 = vsub.s32 2, %v8376_v63  ;;  %v8398_v7 = vsub.s32 3, %v8376_v63 }
 0x2b2   : > { %v8411_v13 = vsub.s32 4, %v8376_v63  ;;  %v8448_v31 = vsub.s32 5, %v8376_v63  ;;  %v8485_v49 = vsub.s32 6, %v8376_v63  ;;  %vm2948_vm0 = vcmask 1048512  }
 0x2b3   : > { %11661 = vst [vmem:[#allocation62_spill] sm:$0xff] %v8383_v1  ;;  %v1396_v2 = vrot.slane %v8380_v0, %v8383_v1  ;;  %11662 = vst [vmem:[#allocation63_spill] sm:$0xff] %v8388_v3  ;;  %v1463_v4 = vrot.slane %v8380_v0, %v8388_v3  ;;  %v1530_v6 = vrot.slane %v8380_v0, %v8393_v5  ;;  %vm3503_vm1 = vcmask 1041409   ;;  %p6313_p9 = scmp.ne.s32.totalorder %s11659_s7, 1 }
 0x2b4   : > { %11663 = vst [vmem:[#allocation64_spill] sm:$0xff] %v8393_v5  ;;  %11664 = vst [vmem:[#allocation65_spill] sm:$0xff] %v8398_v7  ;;  %v1597_v8 = vrot.slane %v8380_v0, %v8398_v7  ;;  %v1664_v16 = vrot.slane %v8380_v0, %v8411_v13  ;;  %v1731_v34 = vrot.slane %v8380_v0, %v8448_v31 }
 0x2b5   : > { %1406 = vbcast.lane.b32.xlu1 %v1396_v2, 272  ;;  %1398 = vbcast.lane.b32.xlu0 %v1396_v2, 256  ;;  %11665 = vst [vmem:[#allocation66_spill] sm:$0xff] %v8411_v13  ;;  %11666 = vst [vmem:[#allocation67_spill] sm:$0xff] %v8448_v31  ;;  %v1798_v52 = vrot.slane %v8380_v0, %v8485_v49 }
 0x2b6   : > { %11667 = vst [vmem:[#allocation68_spill] sm:$0xff] %v8485_v49 }
 0x2b9   : > { %1410 = vbcast.lane.b32.xlu1 %v1396_v2, 280  ;;  %1402 = vbcast.lane.b32.xlu0 %v1396_v2, 264 }
 0x2bd   : > { %1418 = vbcast.lane.b32.xlu1 %v1396_v2, 296  ;;  %1414 = vbcast.lane.b32.xlu0 %v1396_v2, 288 }
 0x2c1   : > { %1426 = vbcast.lane.b32.xlu1 %v1396_v2, 312  ;;  %1422 = vbcast.lane.b32.xlu0 %v1396_v2, 304 }
 0x2c5   : > { %1434 = vbcast.lane.b32.xlu1 %v1396_v2, 328  ;;  %1430 = vbcast.lane.b32.xlu0 %v1396_v2, 320 }
 0x2c9   : > { %1442 = vbcast.lane.b32.xlu1 %v1396_v2, 344  ;;  %1438 = vbcast.lane.b32.xlu0 %v1396_v2, 336 }
 0x2cd   : > { %1450 = vbcast.lane.b32.xlu1 %v1396_v2, 360  ;;  %1446 = vbcast.lane.b32.xlu0 %v1396_v2, 352 }
 0x2d1   : > { %1458 = vbcast.lane.b32.xlu1 %v1396_v2, 376  ;;  %1454 = vbcast.lane.b32.xlu0 %v1396_v2, 368 }
 0x2d5   : > { %1469 = vbcast.lane.b32.xlu1 %v1463_v4, 264  ;;  %1465 = vbcast.lane.b32.xlu0 %v1463_v4, 256 }
 0x2d9   : > { %1477 = vbcast.lane.b32.xlu1 %v1463_v4, 280  ;;  %1473 = vbcast.lane.b32.xlu0 %v1463_v4, 272 }
 0x2dd   : > { %1485 = vbcast.lane.b32.xlu1 %v1463_v4, 296  ;;  %1481 = vbcast.lane.b32.xlu0 %v1463_v4, 288 }
 0x2e1   : > { %1493 = vbcast.lane.b32.xlu1 %v1463_v4, 312  ;;  %1489 = vbcast.lane.b32.xlu0 %v1463_v4, 304 }
 0x2e5   : > { %1501 = vbcast.lane.b32.xlu1 %v1463_v4, 328  ;;  %1497 = vbcast.lane.b32.xlu0 %v1463_v4, 320 }
 0x2e9   : > { %1509 = vbcast.lane.b32.xlu1 %v1463_v4, 344  ;;  %1505 = vbcast.lane.b32.xlu0 %v1463_v4, 336 }
 0x2ed   : > { %1517 = vbcast.lane.b32.xlu1 %v1463_v4, 360  ;;  %1513 = vbcast.lane.b32.xlu0 %v1463_v4, 352 }
 0x2f1   : > { %1525 = vbcast.lane.b32.xlu1 %v1463_v4, 376  ;;  %1521 = vbcast.lane.b32.xlu0 %v1463_v4, 368 }
 0x2f5   : > { %1536 = vbcast.lane.b32.xlu1 %v1530_v6, 264  ;;  %1532 = vbcast.lane.b32.xlu0 %v1530_v6, 256 }
 0x2f9   : > { %1544 = vbcast.lane.b32.xlu1 %v1530_v6, 280  ;;  %1540 = vbcast.lane.b32.xlu0 %v1530_v6, 272 }
 0x2fd   : > { %1552 = vbcast.lane.b32.xlu1 %v1530_v6, 296  ;;  %1548 = vbcast.lane.b32.xlu0 %v1530_v6, 288 }
 0x301   : > { %1560 = vbcast.lane.b32.xlu1 %v1530_v6, 312  ;;  %1556 = vbcast.lane.b32.xlu0 %v1530_v6, 304 }
 0x305   : > { %1568 = vbcast.lane.b32.xlu1 %v1530_v6, 328  ;;  %1564 = vbcast.lane.b32.xlu0 %v1530_v6, 320 }
 0x309   : > { %1576 = vbcast.lane.b32.xlu1 %v1530_v6, 344  ;;  %1572 = vbcast.lane.b32.xlu0 %v1530_v6, 336 }
 0x30d   : > { %1584 = vbcast.lane.b32.xlu1 %v1530_v6, 360  ;;  %1580 = vbcast.lane.b32.xlu0 %v1530_v6, 352 }
 0x311   : > { %1592 = vbcast.lane.b32.xlu1 %v1530_v6, 376  ;;  %1588 = vbcast.lane.b32.xlu0 %v1530_v6, 368 }
 0x315   : > { %1603 = vbcast.lane.b32.xlu1 %v1597_v8, 264  ;;  %1599 = vbcast.lane.b32.xlu0 %v1597_v8, 256 }
 0x319   : > { %1611 = vbcast.lane.b32.xlu1 %v1597_v8, 280  ;;  %1607 = vbcast.lane.b32.xlu0 %v1597_v8, 272 }
 0x31d   : > { %1619 = vbcast.lane.b32.xlu1 %v1597_v8, 296  ;;  %1615 = vbcast.lane.b32.xlu0 %v1597_v8, 288 }
 0x321   : > { %1627 = vbcast.lane.b32.xlu1 %v1597_v8, 312  ;;  %1623 = vbcast.lane.b32.xlu0 %v1597_v8, 304 }
 0x325   : > { %1635 = vbcast.lane.b32.xlu1 %v1597_v8, 328  ;;  %1631 = vbcast.lane.b32.xlu0 %v1597_v8, 320 }
 0x327   : > { %v8402_v9 = vpop.permute.xlu0 %1398  ;;  %v8404_v10 = vpop.permute.xlu1 %1406 }
 0x329   : > { %1643 = vbcast.lane.b32.xlu1 %v1597_v8, 344  ;;  %1639 = vbcast.lane.b32.xlu0 %v1597_v8, 336 }
 0x32b   : > { %v8406_v11 = vpop.permute.xlu0 %1402  ;;  %v8408_v12 = vpop.permute.xlu1 %1410 }
 0x32d   : > { %1651 = vbcast.lane.b32.xlu1 %v1597_v8, 360  ;;  %1647 = vbcast.lane.b32.xlu0 %v1597_v8, 352 }
 0x32f   : > { %v8413_v14 = vpop.permute.xlu0 %1414  ;;  %v8415_v15 = vpop.permute.xlu1 %1418 }
 0x331   : > { %1659 = vbcast.lane.b32.xlu1 %v1597_v8, 376  ;;  %1655 = vbcast.lane.b32.xlu0 %v1597_v8, 368 }
 0x333   : > { %v8419_v17 = vpop.permute.xlu0 %1422  ;;  %v8421_v18 = vpop.permute.xlu1 %1426 }
 0x335   : > { %1670 = vbcast.lane.b32.xlu1 %v1664_v16, 264  ;;  %1666 = vbcast.lane.b32.xlu0 %v1664_v16, 256 }
 0x337   : > { %v8423_v19 = vpop.permute.xlu0 %1430  ;;  %v8425_v20 = vpop.permute.xlu1 %1434 }
 0x339   : > { %1678 = vbcast.lane.b32.xlu1 %v1664_v16, 280  ;;  %1674 = vbcast.lane.b32.xlu0 %v1664_v16, 272 }
 0x33b   : > { %v8427_v21 = vpop.permute.xlu0 %1438  ;;  %v8429_v22 = vpop.permute.xlu1 %1442 }
 0x33d   : > { %1686 = vbcast.lane.b32.xlu1 %v1664_v16, 296  ;;  %1682 = vbcast.lane.b32.xlu0 %v1664_v16, 288 }
 0x33f   : > { %v8431_v23 = vpop.permute.xlu0 %1446  ;;  %v8433_v24 = vpop.permute.xlu1 %1450 }
 0x341   : > { %1694 = vbcast.lane.b32.xlu1 %v1664_v16, 312  ;;  %1690 = vbcast.lane.b32.xlu0 %v1664_v16, 304 }
 0x343   : > { %v8435_v25 = vpop.permute.xlu0 %1454  ;;  %v8437_v26 = vpop.permute.xlu1 %1458 }
 0x345   : > { %1702 = vbcast.lane.b32.xlu1 %v1664_v16, 328  ;;  %1698 = vbcast.lane.b32.xlu0 %v1664_v16, 320 }
 0x347   : > { %v8439_v27 = vpop.permute.xlu0 %1465  ;;  %v8441_v28 = vpop.permute.xlu1 %1469 }
 0x349   : > { %1710 = vbcast.lane.b32.xlu1 %v1664_v16, 344  ;;  %1706 = vbcast.lane.b32.xlu0 %v1664_v16, 336 }
 0x34b   : > { %v8443_v29 = vpop.permute.xlu0 %1473  ;;  %v8445_v30 = vpop.permute.xlu1 %1477 }
 0x34d   : > { %1718 = vbcast.lane.b32.xlu1 %v1664_v16, 360  ;;  %1714 = vbcast.lane.b32.xlu0 %v1664_v16, 352 }
 0x34f   : > { %v8450_v32 = vpop.permute.xlu0 %1481  ;;  %v8452_v33 = vpop.permute.xlu1 %1485 }
 0x351   : > { %1726 = vbcast.lane.b32.xlu1 %v1664_v16, 376  ;;  %1722 = vbcast.lane.b32.xlu0 %v1664_v16, 368 }
 0x353   : > { %v8456_v35 = vpop.permute.xlu0 %1489  ;;  %v8458_v36 = vpop.permute.xlu1 %1493 }
 0x355   : > { %1737 = vbcast.lane.b32.xlu1 %v1731_v34, 264  ;;  %1733 = vbcast.lane.b32.xlu0 %v1731_v34, 256 }
 0x357   : > { %v8460_v37 = vpop.permute.xlu0 %1497  ;;  %v8462_v38 = vpop.permute.xlu1 %1501 }
 0x359   : > { %1745 = vbcast.lane.b32.xlu1 %v1731_v34, 280  ;;  %1741 = vbcast.lane.b32.xlu0 %v1731_v34, 272 }
 0x35b   : > { %v8464_v39 = vpop.permute.xlu0 %1505  ;;  %v8466_v40 = vpop.permute.xlu1 %1509 }
 0x35d   : > { %1753 = vbcast.lane.b32.xlu1 %v1731_v34, 296  ;;  %1749 = vbcast.lane.b32.xlu0 %v1731_v34, 288 }
 0x35f   : > { %v8468_v41 = vpop.permute.xlu0 %1513  ;;  %v8470_v42 = vpop.permute.xlu1 %1517 }
 0x361   : > { %1761 = vbcast.lane.b32.xlu1 %v1731_v34, 312  ;;  %1757 = vbcast.lane.b32.xlu0 %v1731_v34, 304 }
 0x363   : > { %v8472_v43 = vpop.permute.xlu0 %1521  ;;  %v8474_v44 = vpop.permute.xlu1 %1525 }
 0x365   : > { %1769 = vbcast.lane.b32.xlu1 %v1731_v34, 328  ;;  %1765 = vbcast.lane.b32.xlu0 %v1731_v34, 320 }
 0x367   : > { %v8476_v45 = vpop.permute.xlu0 %1532  ;;  %v8478_v46 = vpop.permute.xlu1 %1536 }
 0x369   : > { %1777 = vbcast.lane.b32.xlu1 %v1731_v34, 344  ;;  %1773 = vbcast.lane.b32.xlu0 %v1731_v34, 336 }
 0x36b   : > { %v8480_v47 = vpop.permute.xlu0 %1540  ;;  %v8482_v48 = vpop.permute.xlu1 %1544 }
 0x36d   : > { %1785 = vbcast.lane.b32.xlu1 %v1731_v34, 360  ;;  %1781 = vbcast.lane.b32.xlu0 %v1731_v34, 352 }
 0x36f   : > { %v8487_v50 = vpop.permute.xlu0 %1548  ;;  %v8489_v51 = vpop.permute.xlu1 %1552 }
 0x371   : > { %1793 = vbcast.lane.b32.xlu1 %v1731_v34, 376  ;;  %1789 = vbcast.lane.b32.xlu0 %v1731_v34, 368  ;;  %v8522_v34 = vsub.s32 7, %v8376_v63 }
 0x373   : > { %v8493_v53 = vpop.permute.xlu0 %1556  ;;  %v8495_v54 = vpop.permute.xlu1 %1560  ;;  %11676 = vst [vmem:[#allocation77_spill] sm:$0xff] %v8522_v34  ;;  %v1865_v31 = vrot.slane %v8380_v0, %v8522_v34  ;;  %v7754_v34 = vmov 1966171168  }
 0x375   : > { %1804 = vbcast.lane.b32.xlu1 %v1798_v52, 264  ;;  %1800 = vbcast.lane.b32.xlu0 %v1798_v52, 256 }
 0x377   : > { %v8497_v55 = vpop.permute.xlu0 %1564  ;;  %v8499_v56 = vpop.permute.xlu1 %1568 }
 0x379   : > { %1812 = vbcast.lane.b32.xlu1 %v1798_v52, 280  ;;  %1808 = vbcast.lane.b32.xlu0 %v1798_v52, 272 }
 0x37b   : > { %v8501_v57 = vpop.permute.xlu0 %1572  ;;  %v8503_v58 = vpop.permute.xlu1 %1576 }
 0x37d   : > { %1820 = vbcast.lane.b32.xlu1 %v1798_v52, 296  ;;  %1816 = vbcast.lane.b32.xlu0 %v1798_v52, 288 }
 0x37f   : > { %v8505_v59 = vpop.permute.xlu0 %1580  ;;  %v8507_v60 = vpop.permute.xlu1 %1584 }
 0x380   : > { %11668 = vst [vmem:[#allocation69_spill] sm:$0xff] %v8505_v59  ;;  %11669 = vst [vmem:[#allocation70_spill] sm:$0xff] %v8507_v60 }
 0x381   : > { %1828 = vbcast.lane.b32.xlu1 %v1798_v52, 312  ;;  %1824 = vbcast.lane.b32.xlu0 %v1798_v52, 304 }
 0x383   : > { %v8509_v61 = vpop.permute.xlu0 %1588  ;;  %v8511_v2 = vpop.permute.xlu1 %1592 }
 0x384   : > { %11670 = vst [vmem:[#allocation71_spill] sm:$0xff] %v8509_v61  ;;  %11671 = vst [vmem:[#allocation72_spill] sm:$0xff] %v8511_v2  ;;  %v1045_v61 = vld [vmem:[%s8298_s26 + $0x20] sm:$0xff] }
 0x385   : > { %1836 = vbcast.lane.b32.xlu1 %v1798_v52, 328  ;;  %1832 = vbcast.lane.b32.xlu0 %v1798_v52, 320 }
 0x387   : > { %v8513_v4 = vpop.permute.xlu0 %1599  ;;  %v8515_v6 = vpop.permute.xlu1 %1603 }
 0x388   : > { %11672 = vst [vmem:[#allocation73_spill] sm:$0xff] %v8513_v4  ;;  %11673 = vst [vmem:[#allocation74_spill] sm:$0xff] %v8515_v6 }
 0x389   : > { %1844 = vbcast.lane.b32.xlu1 %v1798_v52, 344  ;;  %1840 = vbcast.lane.b32.xlu0 %v1798_v52, 336 }
 0x38b   : > { %v8517_v8 = vpop.permute.xlu0 %1607  ;;  %v8519_v16 = vpop.permute.xlu1 %1611 }
 0x38c   : > { %11674 = vst [vmem:[#allocation75_spill] sm:$0xff] %v8517_v8  ;;  %11675 = vst [vmem:[#allocation76_spill] sm:$0xff] %v8519_v16 }
 0x38d   : > { %1852 = vbcast.lane.b32.xlu1 %v1798_v52, 360  ;;  %1848 = vbcast.lane.b32.xlu0 %v1798_v52, 352 }
 0x38f   : > { %v8524_v62 = vpop.permute.xlu0 %1615  ;;  %v8526_v49 = vpop.permute.xlu1 %1619 }
 0x390   : > { %11677 = vst [vmem:[#allocation78_spill] sm:$0xff] %v8524_v62  ;;  %11678 = vst [vmem:[#allocation79_spill] sm:$0xff] %v8526_v49 }
 0x391   : > { %1860 = vbcast.lane.b32.xlu1 %v1798_v52, 376  ;;  %1856 = vbcast.lane.b32.xlu0 %v1798_v52, 368 }
 0x393   : > { %v8530_v13 = vpop.permute.xlu0 %1623  ;;  %v8532_v7 = vpop.permute.xlu1 %1627 }
 0x394   : > { %11679 = vst [vmem:[#allocation80_spill] sm:$0xff] %v8530_v13  ;;  %11680 = vst [vmem:[#allocation81_spill] sm:$0xff] %v8532_v7  ;;  %v1173_v7 = vunpack.c.l.s4 %v7754_v34  ;;  %v8557_v34 = vld [vmem:[#allocation2] sm:$0xff] }
 0x395   : > { %1871 = vbcast.lane.b32.xlu1 %v1865_v31, 264  ;;  %1867 = vbcast.lane.b32.xlu0 %v1865_v31, 256  ;;  %11691 = vst [vmem:[#allocation92_spill] sm:$0xff] %v8557_v34 }
 0x397   : > { %v8534_v5 = vpop.permute.xlu0 %1631  ;;  %v8536_v3 = vpop.permute.xlu1 %1635 }
 0x398   : > { %11681 = vst [vmem:[#allocation82_spill] sm:$0xff] %v8534_v5  ;;  %11682 = vst [vmem:[#allocation83_spill] sm:$0xff] %v8536_v3  ;;  %v1174_v3 = vunpack.c.0.s8 %v1173_v7 }
 0x399   : > { %1879 = vbcast.lane.b32.xlu1 %v1865_v31, 280  ;;  %1875 = vbcast.lane.b32.xlu0 %v1865_v31, 272 }
 0x39a   : > { %v8555_v16 = vsub.s32 %v1174_v3, %v8376_v63 }
 0x39b   : > { %v8538_v62 = vpop.permute.xlu0 %1639  ;;  %v8540_v49 = vpop.permute.xlu1 %1643 }
 0x39c   : > { %11683 = vst [vmem:[#allocation84_spill] sm:$0xff] %v8538_v62  ;;  %11684 = vst [vmem:[#allocation85_spill] sm:$0xff] %v8540_v49  ;;  %v8565_v7 = vrot.slane %v8557_v34, %v8555_v16  ;;  %v1043_v34 = vld [vmem:[%s8298_s26 + $0x10] sm:$0xff] }
 0x39d   : > { %1887 = vbcast.lane.b32.xlu1 %v1865_v31, 296  ;;  %1883 = vbcast.lane.b32.xlu0 %v1865_v31, 288 }
 0x39e   : > { %v8573_v63 = vrot.slane %v8565_v7, %v8555_v16 }
 0x39f   : > { %v8542_v52 = vpop.permute.xlu0 %1647  ;;  %v8544_v0 = vpop.permute.xlu1 %1651 }
 0x3a0   : > { %11685 = vst [vmem:[#allocation86_spill] sm:$0xff] %v8542_v52  ;;  %11686 = vst [vmem:[#allocation87_spill] sm:$0xff] %v8544_v0 }
 0x3a1   : > { %1895 = vbcast.lane.b32.xlu1 %v1865_v31, 312  ;;  %1891 = vbcast.lane.b32.xlu0 %v1865_v31, 304 }
 0x3a3   : > { %v8546_v13 = vpop.permute.xlu0 %1655  ;;  %v8548_v5 = vpop.permute.xlu1 %1659 }
 0x3a4   : > { %11687 = vst [vmem:[#allocation88_spill] sm:$0xff] %v8546_v13  ;;  %11688 = vst [vmem:[#allocation89_spill] sm:$0xff] %v8548_v5  ;;  %v1041_v5 = vld [vmem:[%s8298_s26] sm:$0xff] }
 0x3a5   : > { %1903 = vbcast.lane.b32.xlu1 %v1865_v31, 328  ;;  %1899 = vbcast.lane.b32.xlu0 %v1865_v31, 320 }
 0x3a7   : > { %v8550_v62 = vpop.permute.xlu0 %1666  ;;  %v8552_v49 = vpop.permute.xlu1 %1670 }
 0x3a8   : > { %11689 = vst [vmem:[#allocation90_spill] sm:$0xff] %v8550_v62  ;;  %11690 = vst [vmem:[#allocation91_spill] sm:$0xff] %v8552_v49  ;;  %v8581_v62 = vld [vmem:[#allocation21] ss:$0 sm:$0xff] }
 0x3a9   : > { %1911 = vbcast.lane.b32.xlu1 %v1865_v31, 344  ;;  %1907 = vbcast.lane.b32.xlu0 %v1865_v31, 336  ;;  %v1938_v2 = vmul.f32 %v8581_v62, %v8404_v10 }
 0x3ab   : > { %v8559_v0 = vpop.permute.xlu0 %1674  ;;  %v8561_v13 = vpop.permute.xlu1 %1678 }
 0x3ac   : > { %11692 = vst [vmem:[#allocation93_spill] sm:$0xff] %v8559_v0  ;;  %11693 = vst [vmem:[#allocation94_spill] sm:$0xff] %v8561_v13  ;;  %v8579_v13 = vrot.slane %v8573_v63, %v8383_v1 }
 0x3ad   : > { %1919 = vbcast.lane.b32.xlu1 %v1865_v31, 360  ;;  %1915 = vbcast.lane.b32.xlu0 %v1865_v31, 352 }
 0x3ae   : > { %v1260_v52 = vadd.f32 %v8579_v13, %v1041_v5  ;;  %v1262_v4 = vadd.f32 %v8579_v13, %v1043_v34  ;;  %v1937_v5 = vmul.f32 %v8581_v62, %v8406_v11  ;;  %v1264_v10 = vadd.f32 %v8579_v13, %v1045_v61  ;;  %v1047_v11 = vld [vmem:[%s8298_s26 + $0x30] sm:$0xff] }
 0x3af   : > { %v8567_v49 = vpop.permute.xlu0 %1682  ;;  %v8569_v3 = vpop.permute.xlu1 %1686 }
 0x3b0   : > { %11694 = vst [vmem:[#allocation95_spill] sm:$0xff] %v8567_v49  ;;  %11695 = vst [vmem:[#allocation96_spill] sm:$0xff] %v8569_v3  ;;  %v2066_v60 = vadd.f32 %v1938_v2, %v1262_v4  ;;  %v1941_v4 = vmul.f32 %v8581_v62, %v8415_v15  ;;  %v1050_v15 = vld [vmem:[%s8298_s26 + $0x48] sm:$0xff] }
 0x3b1   : > { %1927 = vbcast.lane.b32.xlu1 %v1865_v31, 376  ;;  %1923 = vbcast.lane.b32.xlu0 %v1865_v31, 368  ;;  %v1936_v31 = vmul.f32 %v8581_v62, %v8402_v9  ;;  %v1044_v9 = vld [vmem:[%s8298_s26 + $0x18] sm:$0xff] }
 0x3b3   : > { %v8575_v0 = vpop.permute.xlu0 %1690  ;;  %v8584_v49 = vpop.permute.xlu1 %1694  ;;  %v2064_v6 = vadd.f32 %v1936_v31, %v1260_v52  ;;  %v1939_v52 = vmul.f32 %v8581_v62, %v8408_v12  ;;  %v1046_v31 = vld [vmem:[%s8298_s26 + $0x28] sm:$0xff] }
 0x3b4   : > { %11696 = vst [vmem:[#allocation97_spill] sm:$0xff] %v8575_v0  ;;  %11697 = vst [vmem:[#allocation98_spill] sm:$0xff] %v8584_v49  ;;  %v1042_v0 = vld [vmem:[%s8298_s26 + $0x8] sm:$0xff]  ;;  %v1265_v12 = vadd.f32 %v8579_v13, %v1046_v31  ;;  %v1944_v31 = vmul.f32 %v8581_v62, %v8423_v19 }
 0x3b5   : > { %6701 = vtanh.f32 %v2064_v6  ;;  %v1266_v6 = vadd.f32 %v8579_v13, %v1047_v11 }
 0x3b6   : > { %6703 = vtanh.f32 %v2066_v60  ;;  %v2069_v60 = vadd.f32 %v1941_v4, %v1265_v12  ;;  %v1269_v12 = vadd.f32 %v8579_v13, %v1050_v15 }
 0x3b7   : > { %v8586_v3 = vpop.permute.xlu0 %1698  ;;  %v8593_v8 = vpop.permute.xlu1 %1702 }
 0x3b8   : > { %11698 = vst [vmem:[#allocation99_spill] sm:$0xff] %v8586_v3  ;;  %11699 = vst [vmem:[#allocation100_spill] sm:$0xff] %v8593_v8  ;;  %v1261_v3 = vadd.f32 %v8579_v13, %v1042_v0  ;;  %v1263_v8 = vadd.f32 %v8579_v13, %v1044_v9  ;;  %v1940_v0 = vmul.f32 %v8581_v62, %v8413_v14 }
 0x3b9   : > { %v1942_v14 = vmul.f32 %v8581_v62, %v8419_v17 }
 0x3ba   : > { %v2065_v34 = vadd.f32 %v1937_v5, %v1261_v3  ;;  %v2067_v2 = vadd.f32 %v1939_v52, %v1263_v8  ;;  %v2068_v61 = vadd.f32 %v1940_v0, %v1264_v10  ;;  %v1048_v3 = vld [vmem:[%s8298_s26 + $0x38] sm:$0xff]  ;;  %v1049_v5 = vld [vmem:[%s8298_s26 + $0x40] sm:$0xff]  ;;  %v1943_v52 = vmul.f32 %v8581_v62, %v8421_v18 }
 0x3bb   : > { %v8598_v49 = vpop.permute.xlu0 %1706  ;;  %v1267_v8 = vadd.f32 %v8579_v13, %v1048_v3  ;;  %v2070_v0 = vadd.f32 %v1942_v14, %v1266_v6  ;;  %v1268_v17 = vadd.f32 %v8579_v13, %v1049_v5  ;;  %v1945_v3 = vmul.f32 %v8581_v62, %v8425_v20 }
 0x3bc   : > { %11700 = vst [vmem:[#allocation101_spill] sm:$0xff] %v8598_v49  ;;  %v8612_v49 = vpop.permute.xlu1 %1710  ;;  %6705 = vtanh.f32 %v2065_v34  ;;  %v1051_v34 = vld [vmem:[%s8298_s26 + $0x50] sm:$0xff]  ;;  %v1186_v6 = vcombine.high %v8565_v7, %v8565_v7  ;;  %v1946_v14 = vmul.f32 %v8581_v62, %v8427_v21 }
 0x3bd   : > { %6707 = vtanh.f32 %v2067_v2  ;;  %v8637_v2 = vld [vmem:[#allocation22] ss:$0 sm:$0xff]  ;;  %v1270_v4 = vadd.f32 %v8579_v13, %v1051_v34  ;;  %v2071_v18 = vadd.f32 %v1943_v52, %v1267_v8  ;;  %v2072_v19 = vadd.f32 %v1944_v31, %v1268_v17  ;;  %v1054_v17 = vld [vmem:[%s8298_s26 + $0x68] sm:$0xff]  ;;  %v1055_v21 = vld [vmem:[%s8298_s26 + $0x70] sm:$0xff] }
 0x3be   : > { %6709 = vtanh.f32 %v2068_v61  ;;  %v1053_v61 = vld [vmem:[%s8298_s26 + $0x60] sm:$0xff]  ;;  %v2073_v7 = vadd.f32 %v1945_v3, %v1269_v12  ;;  %v8661_v31 = vrot.slane %v1186_v6, %v8555_v16  ;;  %v1274_v3 = vadd.f32 %v8579_v13, %v1055_v21 }
 0x3bf   : > { %v8615_v59 = vpop.permute.xlu0 %1714  ;;  %v6702_v11 = vpop.eup %6701  ;;  %6711 = vtanh.f32 %v2069_v60  ;;  %v1272_v34 = vadd.f32 %v8579_v13, %v1053_v61 }
 0x3c0   : > { %v8625_v9 = vpop.permute.xlu1 %1718  ;;  %6713 = vtanh.f32 %v2070_v0  ;;  %v2327_v60 = vmul.f32 %v6702_v11, %v8637_v2  ;;  %v6704_v8 = vpop.eup %6703  ;;  %v1947_v0 = vmul.f32 %v8581_v62, %v8429_v22  ;;  %v2074_v11 = vadd.f32 %v1946_v14, %v1270_v4 }
 0x3c1   : > { %6715 = vtanh.f32 %v2071_v18  ;;  %v1273_v22 = vadd.f32 %v8579_v13, %v1054_v17  ;;  %v1949_v4 = vmul.f32 %v8581_v62, %v8433_v24  ;;  %v1057_v17 = vld [vmem:[%s8298_s26 + $0x80] sm:$0xff] }
 0x3c2   : > { %6717 = vtanh.f32 %v2072_v19  ;;  %v8676_v19 = vrot.slane %v8661_v31, %v8383_v1 }
 0x3c3   : > { %v8632_v10 = vpop.permute.xlu0 %1722  ;;  %6719 = vtanh.f32 %v2073_v7 }
 0x3c4   : > { %11701 = vst [vmem:[#allocation102_spill] sm:$0xff] %v8632_v10  ;;  %v1052_v10 = vld [vmem:[%s8298_s26 + $0x58] sm:$0xff]  ;;  %v8649_v5 = vpop.permute.xlu1 %1726  ;;  %6721 = vtanh.f32 %v2074_v11  ;;  %v1951_v11 = vmul.f32 %v8581_v62, %v8437_v26 }
 0x3c5   : > { %v1271_v15 = vadd.f32 %v8579_v13, %v1052_v10  ;;  %v2329_v10 = vmul.f32 %v6704_v8, %v8637_v2 }
 0x3c6   : > { %v6706_v20 = vpop.eup %6705 }
 0x3c7   : > { %v8652_v52 = vpop.permute.xlu0 %1733  ;;  %v6708_v61 = vpop.eup %6707  ;;  %v2328_v18 = vmul.f32 %v6706_v20, %v8637_v2  ;;  %v2075_v6 = vadd.f32 %v1947_v0, %v1271_v15  ;;  %v1950_v20 = vmul.f32 %v8581_v62, %v8435_v25 }
 0x3c8   : > { %11702 = vst [vmem:[#allocation103_spill] sm:$0xff] %v8652_v52  ;;  %v1948_v52 = vmul.f32 %v8581_v62, %v8431_v23  ;;  %v6710_v12 = vpop.eup %6709  ;;  %v1056_v23 = vld [vmem:[%s8298_s26 + $0x78] sm:$0xff]  ;;  %v2330_v15 = vmul.f32 %v6708_v61, %v8637_v2  ;;  %v1952_v61 = vmul.f32 %v8581_v62, %v8439_v27  ;;  %v1953_v27 = vmul.f32 %v8581_v62, %v8441_v28 }
 0x3c9   : > { %v6712_v7 = vpop.eup %6711  ;;  %v2331_v24 = vmul.f32 %v6710_v12, %v8637_v2  ;;  %v1275_v21 = vadd.f32 %v8579_v13, %v1056_v23  ;;  %6723 = vtanh.f32 %v2075_v6  ;;  %v2078_v25 = vadd.f32 %v1950_v20, %v1274_v3  ;;  %v1060_v20 = vld [vmem:[%s8298_s26 + $0x98] sm:$0xff] }
 0x3ca   : > { %v2076_v8 = vadd.f32 %v1948_v52, %v1272_v34  ;;  %v6714_v0 = vpop.eup %6713  ;;  %v1276_v52 = vadd.f32 %v8676_v19, %v1057_v17  ;;  %v1058_v34 = vld [vmem:[%s8298_s26 + $0x88] sm:$0xff]  ;;  %v2332_v13 = vmul.f32 %v6712_v7, %v8637_v2  ;;  %v1061_v7 = vld [vmem:[%s8298_s26 + $0xa0] sm:$0xff]  ;;  %v1279_v28 = vadd.f32 %v8676_v19, %v1060_v20 }
 0x3cb   : > { %v8678_v14 = vpop.permute.xlu0 %1741  ;;  %v2333_v26 = vmul.f32 %v6714_v0, %v8637_v2  ;;  %v1277_v23 = vadd.f32 %v8676_v19, %v1058_v34  ;;  %v2079_v3 = vadd.f32 %v1951_v11, %v1275_v21  ;;  %v1957_v20 = vmul.f32 %v8581_v62, %v8452_v33 }
 0x3cc   : > { %6725 = vtanh.f32 %v2076_v8  ;;  %v2080_v17 = vadd.f32 %v1952_v61, %v1276_v52  ;;  %v1955_v52 = vmul.f32 %v8581_v62, %v8445_v30 }
 0x3cd   : > { %v2081_v34 = vadd.f32 %v1953_v27, %v1277_v23 }
 0x3ce   : > { %v2083_v27 = vadd.f32 %v1955_v52, %v1279_v28 }
 0x3cf   : > { %v8696_v6 = vpop.permute.xlu0 %1749 }
 0x3d0   : > { %2455 = vadd.xlane.f32.xlu0 %v2327_v60  ;;  %v8669_v60 = vpop.permute.xlu1 %1737 }
 0x3d3   : > { %v8716_v61 = vpop.permute.xlu0 %1757 }
 0x3d4   : > { %2459 = vadd.xlane.f32.xlu0 %v2329_v10  ;;  %v2077_v10 = vadd.f32 %v1949_v4, %v1273_v22  ;;  %v8693_v12 = vpop.permute.xlu1 %1745  ;;  %v6716_v22 = vpop.eup %6715 }
 0x3d5   : > { %2457 = vadd.xlane.f32.xlu1 %v2328_v18  ;;  %v1059_v18 = vld [vmem:[%s8298_s26 + $0x90] sm:$0xff]  ;;  %v6718_v4 = vpop.eup %6717 }
 0x3d6   : > { %6727 = vtanh.f32 %v2077_v10  ;;  %v1278_v8 = vadd.f32 %v8676_v19, %v1059_v18  ;;  %v6720_v0 = vpop.eup %6719  ;;  %v2335_v21 = vmul.f32 %v6718_v4, %v8637_v2 }
 0x3d7   : > { %6729 = vtanh.f32 %v2078_v25  ;;  %v6722_v10 = vpop.eup %6721  ;;  %v1062_v25 = vld [vmem:[%s8298_s26 + $0xa8] sm:$0xff] }
 0x3d8   : > { %2461 = vadd.xlane.f32.xlu0 %v2330_v15  ;;  %v1954_v15 = vmul.f32 %v8581_v62, %v8443_v29  ;;  %v8710_v11 = vpop.permute.xlu1 %1753  ;;  %6731 = vtanh.f32 %v2079_v3  ;;  %v1280_v29 = vadd.f32 %v8676_v19, %v1061_v7  ;;  %v6724_v4 = vpop.eup %6723  ;;  %v2337_v23 = vmul.f32 %v6722_v10, %v8637_v2  ;;  %v1065_v7 = vld [vmem:[%s8298_s26 + $0xc0] sm:$0xff] }
 0x3d9   : > { %2463 = vadd.xlane.f32.xlu1 %v2331_v24  ;;  %v2334_v24 = vmul.f32 %v6716_v22, %v8637_v2  ;;  %6733 = vtanh.f32 %v2080_v17  ;;  %v1063_v22 = vld [vmem:[%s8298_s26 + $0xb0] sm:$0xff]  ;;  %v6726_v30 = vpop.eup %6725  ;;  %v1281_v3 = vadd.f32 %v8676_v19, %v1062_v25  ;;  %v1064_v17 = vld [vmem:[%s8298_s26 + $0xb8] sm:$0xff]  ;;  %v8734_v10 = vpop.permute.xlu0 %1765  ;;  %v1066_v25 = vld [vmem:[%s8298_s26 + $0xc8] sm:$0xff] }
 0x3da   : > { %v2082_v18 = vadd.f32 %v1954_v15, %v1278_v8  ;;  %6735 = vtanh.f32 %v2081_v34  ;;  %v1282_v8 = vadd.f32 %v8676_v19, %v1063_v22  ;;  %v1958_v15 = vmul.f32 %v8581_v62, %v8456_v35  ;;  %v1067_v22 = vld [vmem:[%s8298_s26 + $0xd0] sm:$0xff] }
 0x3db   : > { %v2339_v33 = vmul.f32 %v6726_v30, %v8637_v2  ;;  %v1283_v34 = vadd.f32 %v8676_v19, %v1064_v17  ;;  %v2085_v52 = vadd.f32 %v1957_v20, %v1281_v3  ;;  %v1959_v35 = vmul.f32 %v8581_v62, %v8458_v36  ;;  %v1069_v17 = vld [vmem:[%s8298_s26 + $0xe0] sm:$0xff] }
 0x3dc   : > { %2465 = vadd.xlane.f32.xlu0 %v2332_v13  ;;  %v1956_v13 = vmul.f32 %v8581_v62, %v8450_v32  ;;  %6737 = vtanh.f32 %v2082_v18  ;;  %v2086_v18 = vadd.f32 %v1958_v15, %v1282_v8  ;;  %v1285_v36 = vadd.f32 %v8676_v19, %v1066_v25  ;;  %v1071_v25 = vld [vmem:[%s8298_s26 + $0xf0] sm:$0xff] }
 0x3dd   : > { %2467 = vadd.xlane.f32.xlu1 %v2333_v26  ;;  %v2336_v26 = vmul.f32 %v6720_v0, %v8637_v2  ;;  %v2338_v0 = vmul.f32 %v6724_v4, %v8637_v2  ;;  %6739 = vtanh.f32 %v2083_v27  ;;  %v2087_v27 = vadd.f32 %v1959_v35, %v1283_v34 }
 0x3de   : > { %v2084_v32 = vadd.f32 %v1956_v13, %v1280_v29  ;;  %v1284_v29 = vadd.f32 %v8676_v19, %v1065_v7  ;;  %v1960_v13 = vmul.f32 %v8581_v62, %v8460_v37  ;;  %v1961_v20 = vmul.f32 %v8581_v62, %v8462_v38  ;;  %v1068_v37 = vld [vmem:[%s8298_s26 + $0xd8] sm:$0xff] }
 0x3df   : > { %v1286_v8 = vadd.f32 %v8676_v19, %v1067_v22  ;;  %v1962_v7 = vmul.f32 %v8581_v62, %v8464_v39  ;;  %v1288_v34 = vadd.f32 %v8676_v19, %v1069_v17  ;;  %v1963_v35 = vmul.f32 %v8581_v62, %v8466_v40 }
 0x3e0   : > { %2469 = vadd.xlane.f32.xlu0 %v2334_v24  ;;  %v8731_v24 = vpop.permute.xlu1 %1761  ;;  %6741 = vtanh.f32 %v2084_v32  ;;  %v8755_v32 = vpop.permute.xlu0 %1773  ;;  %v2088_v15 = vadd.f32 %v1960_v13, %v1284_v29  ;;  %v1070_v29 = vld [vmem:[%s8298_s26 + $0xe8] sm:$0xff]  ;;  %v1216_v39 = vcombine.high %v8573_v63, %v8573_v63  ;;  %v1964_v13 = vmul.f32 %v8581_v62, %v8468_v41 }
 0x3e1   : > { %2471 = vadd.xlane.f32.xlu1 %v2335_v21  ;;  %v6728_v21 = vpop.eup %6727  ;;  %6743 = vtanh.f32 %v2085_v52  ;;  %v2089_v52 = vadd.f32 %v1961_v20, %v1285_v36  ;;  %v1289_v63 = vadd.f32 %v8676_v19, %v1070_v29  ;;  %v1290_v36 = vadd.f32 %v8676_v19, %v1071_v25  ;;  %v1072_v20 = vld [vmem:[%s8298_s26 + $0xf8] sm:$0xff]  ;;  %v1075_v25 = vld [vmem:[%s8298_s26 + $0x110] sm:$0xff] }
 0x3e2   : > { %v6730_v28 = vpop.eup %6729  ;;  %6745 = vtanh.f32 %v2086_v18  ;;  %v2090_v18 = vadd.f32 %v1962_v7, %v1286_v8  ;;  %v1965_v41 = vmul.f32 %v8581_v62, %v8470_v42  ;;  %v8783_v8 = vrot.slane %v1216_v39, %v8383_v1 }
 0x3e3   : > { %v6732_v4 = vpop.eup %6731  ;;  %6747 = vtanh.f32 %v2087_v27  ;;  %v1966_v17 = vmul.f32 %v8581_v62, %v8472_v43  ;;  %v1291_v42 = vadd.f32 %v8676_v19, %v1072_v20 }
 0x3e4   : > { %2473 = vadd.xlane.f32.xlu0 %v2336_v26  ;;  %v2340_v26 = vmul.f32 %v6728_v21, %v8637_v2  ;;  %v6734_v30 = vpop.eup %6733  ;;  %v8748_v3 = vpop.permute.xlu1 %1769  ;;  %6749 = vtanh.f32 %v2088_v15  ;;  %v1073_v15 = vld [vmem:[%s8298_s26 + $0x100] sm:$0xff] }
 0x3e5   : > { %2475 = vadd.xlane.f32.xlu1 %v2337_v23  ;;  %v2341_v23 = vmul.f32 %v6730_v28, %v8637_v2  ;;  %v6736_v21 = vpop.eup %6735  ;;  %v1287_v28 = vadd.f32 %v8676_v19, %v1068_v37  ;;  %6751 = vtanh.f32 %v2089_v52  ;;  %v2092_v37 = vadd.f32 %v1964_v13, %v1288_v34  ;;  %v1074_v52 = vld [vmem:[%s8298_s26 + $0x108] sm:$0xff] }
 0x3e6   : > { %v6738_v38 = vpop.eup %6737  ;;  %6753 = vtanh.f32 %v2090_v18  ;;  %v1967_v34 = vmul.f32 %v8581_v62, %v8474_v44  ;;  %v1292_v43 = vadd.f32 %v8783_v8, %v1073_v15  ;;  %v2094_v29 = vadd.f32 %v1966_v17, %v1290_v36 }
 0x3e7   : > { %v2345_v40 = vmul.f32 %v6738_v38, %v8637_v2  ;;  %v2091_v27 = vadd.f32 %v1963_v35, %v1287_v28  ;;  %v2093_v28 = vadd.f32 %v1965_v41, %v1289_v63  ;;  %v1968_v19 = vmul.f32 %v8581_v62, %v8476_v45  ;;  %v1076_v63 = vld [vmem:[%s8298_s26 + $0x118] sm:$0xff] }
 0x3e8   : > { %2477 = vadd.xlane.f32.xlu0 %v2338_v0  ;;  %v2342_v0 = vmul.f32 %v6732_v4, %v8637_v2  ;;  %v8771_v22 = vpop.permute.xlu1 %1777  ;;  %v6740_v4 = vpop.eup %6739  ;;  %v1970_v36 = vmul.f32 %v8581_v62, %v8480_v47  ;;  %v1971_v47 = vmul.f32 %v8581_v62, %v8482_v48 }
 0x3e9   : > { %2479 = vadd.xlane.f32.xlu1 %v2339_v33  ;;  %v2343_v33 = vmul.f32 %v6734_v30, %v8637_v2  ;;  %v2346_v7 = vmul.f32 %v6740_v4, %v8637_v2  ;;  %6755 = vtanh.f32 %v2091_v27  ;;  %v2095_v4 = vadd.f32 %v1967_v34, %v1291_v42  ;;  %v1077_v27 = vld [vmem:[%s8298_s26 + $0x120] sm:$0xff]  ;;  %v1079_v34 = vld [vmem:[%s8298_s26 + $0x130] sm:$0xff] }
 0x3ea   : > { %v6742_v30 = vpop.eup %6741  ;;  %6757 = vtanh.f32 %v2092_v37  ;;  %v2096_v45 = vadd.f32 %v1968_v19, %v1292_v43 }
 0x3eb   : > { %6759 = vtanh.f32 %v2093_v28  ;;  %v1972_v28 = vmul.f32 %v8581_v62, %v8487_v50  ;;  %v1298_v50 = vadd.f32 %v8783_v8, %v1079_v34 }
 0x3ec   : > { %2481 = vadd.xlane.f32.xlu0 %v2340_v26  ;;  %v2344_v26 = vmul.f32 %v6736_v21, %v8637_v2  ;;  %v2347_v21 = vmul.f32 %v6742_v30, %v8637_v2  ;;  %v8791_v38 = vpop.permute.xlu1 %1785  ;;  %v1294_v30 = vadd.f32 %v8783_v8, %v1075_v25  ;;  %6761 = vtanh.f32 %v2094_v29 }
 0x3ed   : > { %2483 = vadd.xlane.f32.xlu1 %v2341_v23  ;;  %v8774_v23 = vpop.permute.xlu0 %1781  ;;  %6763 = vtanh.f32 %v2095_v4  ;;  %v1974_v4 = vmul.f32 %v8581_v62, %v8493_v53 }
 0x3ee   : > { %6765 = vtanh.f32 %v2096_v45  ;;  %v2098_v42 = vadd.f32 %v1970_v36, %v1294_v30 }
 0x3ef   : > { %v2102_v53 = vadd.f32 %v1974_v4, %v1298_v50 }
 0x3f0   : > { %2485 = vadd.xlane.f32.xlu0 %v2342_v0  ;;  %v6744_v0 = vpop.eup %6743  ;;  %v8812_v41 = vpop.permute.xlu1 %1793 }
 0x3f1   : > { %2487 = vadd.xlane.f32.xlu1 %v2343_v33  ;;  %v6746_v33 = vpop.eup %6745  ;;  %v8797_v35 = vpop.permute.xlu0 %1789  ;;  %v2348_v39 = vmul.f32 %v6744_v0, %v8637_v2 }
 0x3f2   : > { %v6748_v18 = vpop.eup %6747  ;;  %v2349_v13 = vmul.f32 %v6746_v33, %v8637_v2  ;;  %v1078_v33 = vld [vmem:[%s8298_s26 + $0x128] sm:$0xff] }
 0x3f3   : > { %v6750_v44 = vpop.eup %6749  ;;  %v2350_v20 = vmul.f32 %v6748_v18, %v8637_v2  ;;  %v1297_v48 = vadd.f32 %v8783_v8, %v1078_v33  ;;  %v1973_v18 = vmul.f32 %v8581_v62, %v8489_v51 }
 0x3f4   : > { %2489 = vadd.xlane.f32.xlu0 %v2344_v26  ;;  %v1293_v26 = vadd.f32 %v8783_v8, %v1074_v52  ;;  %v6752_v37 = vpop.eup %6751  ;;  %v8829_v25 = vpop.permute.xlu1 %1804 }
 0x3f5   : > { %2491 = vadd.xlane.f32.xlu1 %v2345_v40  ;;  %v1969_v40 = vmul.f32 %v8581_v62, %v8478_v46  ;;  %v8815_v17 = vpop.permute.xlu0 %1800  ;;  %v2351_v46 = vmul.f32 %v6750_v44, %v8637_v2  ;;  %v6754_v15 = vpop.eup %6753  ;;  %v2352_v43 = vmul.f32 %v6752_v37, %v8637_v2 }
 0x3f6   : > { %v6756_v52 = vpop.eup %6755  ;;  %v2353_v29 = vmul.f32 %v6754_v15, %v8637_v2  ;;  %v1976_v15 = vmul.f32 %v8581_v62, %v8497_v55 }
 0x3f7   : > { %v2097_v0 = vadd.f32 %v1969_v40, %v1293_v26  ;;  %v6758_v19 = vpop.eup %6757  ;;  %v1081_v40 = vld [vmem:[%s8298_s26 + $0x140] sm:$0xff]  ;;  %v2354_v30 = vmul.f32 %v6756_v52, %v8637_v2  ;;  %v1084_v52 = vld [vmem:[%s8298_s26 + $0x158] sm:$0xff] }
 0x3f8   : > { %2493 = vadd.xlane.f32.xlu0 %v2346_v7  ;;  %v1295_v7 = vadd.f32 %v8783_v8, %v1076_v63  ;;  %v6760_v63 = vpop.eup %6759  ;;  %v2355_v45 = vmul.f32 %v6758_v19, %v8637_v2  ;;  %v1300_v37 = vadd.f32 %v8783_v8, %v1081_v40 }
 0x3f9   : > { %2495 = vadd.xlane.f32.xlu1 %v2347_v21  ;;  %v1296_v21 = vadd.f32 %v8783_v8, %v1077_v27  ;;  %6767 = vtanh.f32 %v2097_v0  ;;  %v8835_v44 = vpop.permute.xlu0 %1808  ;;  %v6762_v51 = vpop.eup %6761  ;;  %v2101_v27 = vadd.f32 %v1973_v18, %v1297_v48  ;;  %v1978_v48 = vmul.f32 %v8581_v62, %v8501_v57  ;;  %v1087_v57 = vld [vmem:[%s8298_s26 + $0x170] sm:$0xff] }
 0x3fa   : > { %6769 = vtanh.f32 %v2098_v42  ;;  %v8850_v0 = vpop.permute.xlu1 %1812  ;;  %v2104_v19 = vadd.f32 %v1976_v15, %v1300_v37 }
 0x3fb   : > { %v2100_v26 = vadd.f32 %v1972_v28, %v1296_v21  ;;  %v6764_v21 = vpop.eup %6763 }
 0x3fc   : > { %2497 = vadd.xlane.f32.xlu0 %v2348_v39  ;;  %v2099_v39 = vadd.f32 %v1971_v47, %v1295_v7  ;;  %v1083_v7 = vld [vmem:[%s8298_s26 + $0x150] sm:$0xff]  ;;  %v2356_v47 = vmul.f32 %v6760_v63, %v8637_v2  ;;  %v6766_v42 = vpop.eup %6765  ;;  %v1086_v63 = vld [vmem:[%s8298_s26 + $0x168] sm:$0xff] }
 0x3fd   : > { %2499 = vadd.xlane.f32.xlu1 %v2349_v13  ;;  %v1080_v13 = vld [vmem:[%s8298_s26 + $0x138] sm:$0xff]  ;;  %v8853_v33 = vpop.permute.xlu0 %1816  ;;  %v1302_v55 = vadd.f32 %v8783_v8, %v1083_v7  ;;  %v2359_v50 = vmul.f32 %v6766_v42, %v8637_v2  ;;  %v1305_v15 = vadd.f32 %v8783_v8, %v1086_v63 }
 0x3fe   : > { %v1299_v36 = vadd.f32 %v8783_v8, %v1080_v13  ;;  %6771 = vtanh.f32 %v2099_v39  ;;  %v2358_v39 = vmul.f32 %v6764_v21, %v8637_v2  ;;  %v8868_v4 = vpop.permute.xlu1 %1820 }
 0x3ff   : > { %6773 = vtanh.f32 %v2100_v26 }
 0x400   : > { %2501 = vadd.xlane.f32.xlu0 %v2350_v20  ;;  %v1975_v20 = vmul.f32 %v8581_v62, %v8495_v54  ;;  %v2357_v54 = vmul.f32 %v6762_v51, %v8637_v2  ;;  %6775 = vtanh.f32 %v2101_v27  ;;  %v11703_v27 = vld [vmem:[#allocation69_spill] sm:$0xff] }
 0x401   : > { %2503 = vadd.xlane.f32.xlu1 %v2351_v46  ;;  %v1082_v46 = vld [vmem:[%s8298_s26 + $0x148] sm:$0xff]  ;;  %6777 = vtanh.f32 %v2102_v53  ;;  %v8876_v51 = vpop.permute.xlu0 %1824 }
 0x402   : > { %v1301_v28 = vadd.f32 %v8783_v8, %v1082_v46  ;;  %v2103_v34 = vadd.f32 %v1975_v20, %v1299_v36  ;;  %v2106_v36 = vadd.f32 %v1978_v48, %v1302_v55  ;;  %v1980_v20 = vmul.f32 %v8581_v62, %v11703_v27  ;;  %v1089_v55 = vld [vmem:[%s8298_s26 + $0x180] sm:$0xff] }
 0x403   : > { %v6768_v18 = vpop.eup %6767 }
 0x404   : > { %2505 = vadd.xlane.f32.xlu0 %v2352_v43  ;;  %v1977_v43 = vmul.f32 %v8581_v62, %v8499_v56  ;;  %v6770_v13 = vpop.eup %6769  ;;  %v1303_v56 = vadd.f32 %v8783_v8, %v1084_v52  ;;  %6779 = vtanh.f32 %v2103_v34  ;;  %v2360_v37 = vmul.f32 %v6768_v18, %v8637_v2  ;;  %v11705_v34 = vld [vmem:[#allocation71_spill] sm:$0xff]  ;;  %v8893_v52 = vpop.permute.xlu1 %1828 }
 0x405   : > { %2507 = vadd.xlane.f32.xlu1 %v2353_v29  ;;  %v1085_v29 = vld [vmem:[%s8298_s26 + $0x160] sm:$0xff]  ;;  %6781 = vtanh.f32 %v2104_v19  ;;  %v8896_v48 = vpop.permute.xlu0 %1832 }
 0x406   : > { %v1304_v26 = vadd.f32 %v8783_v8, %v1085_v29  ;;  %v2105_v40 = vadd.f32 %v1977_v43, %v1301_v28  ;;  %v1982_v43 = vmul.f32 %v8581_v62, %v11705_v34 }
 0x408   : > { %2509 = vadd.xlane.f32.xlu0 %v2354_v30  ;;  %v1979_v30 = vmul.f32 %v8581_v62, %v8503_v58  ;;  %v6772_v46 = vpop.eup %6771  ;;  %v2361_v58 = vmul.f32 %v6770_v13, %v8637_v2  ;;  %6783 = vtanh.f32 %v2105_v40  ;;  %v2108_v28 = vadd.f32 %v1980_v20, %v1304_v26 }
 0x409   : > { %2511 = vadd.xlane.f32.xlu1 %v2355_v45  ;;  %v1218_v45 = vcombine.high %v8661_v31, %v8661_v31  ;;  %v6774_v53 = vpop.eup %6773  ;;  %v1306_v31 = vadd.f32 %v8783_v8, %v1087_v57  ;;  %6785 = vtanh.f32 %v2106_v36  ;;  %v2362_v29 = vmul.f32 %v6772_v46, %v8637_v2  ;;  %v11707_v57 = vld [vmem:[#allocation73_spill] sm:$0xff]  ;;  %v1091_v36 = vld [vmem:[%s8298_s26 + $0x190] sm:$0xff] }
 0x40a   : > { %v2107_v7 = vadd.f32 %v1979_v30, %v1303_v56  ;;  %v6776_v19 = vpop.eup %6775  ;;  %v11706_v56 = vld [vmem:[#allocation72_spill] sm:$0xff]  ;;  %v1090_v30 = vld [vmem:[%s8298_s26 + $0x188] sm:$0xff] }
 0x40b   : > { %v8888_v42 = vrot.slane %v1218_v45, %v8383_v1  ;;  %v6778_v18 = vpop.eup %6777  ;;  %v1983_v26 = vmul.f32 %v8581_v62, %v11706_v56  ;;  %v2110_v63 = vadd.f32 %v1982_v43, %v1306_v31  ;;  %v1984_v45 = vmul.f32 %v8581_v62, %v11707_v57  ;;  %v1093_v43 = vld [vmem:[%s8298_s26 + $0x1a0] sm:$0xff] }
 0x40c   : > { %2513 = vadd.xlane.f32.xlu0 %v2356_v47  ;;  %v11704_v47 = vld [vmem:[#allocation70_spill] sm:$0xff]  ;;  %6787 = vtanh.f32 %v2107_v7  ;;  %v2364_v27 = vmul.f32 %v6776_v19, %v8637_v2  ;;  %v2365_v20 = vmul.f32 %v6778_v18, %v8637_v2 }
 0x40d   : > { %2515 = vadd.xlane.f32.xlu1 %v2357_v54  ;;  %v1981_v21 = vmul.f32 %v8581_v62, %v11704_v47  ;;  %v1088_v54 = vld [vmem:[%s8298_s26 + $0x178] sm:$0xff]  ;;  %v1308_v40 = vadd.f32 %v8888_v42, %v1089_v55  ;;  %6789 = vtanh.f32 %v2108_v28  ;;  %v1309_v46 = vadd.f32 %v8888_v42, %v1090_v30  ;;  %v11709_v28 = vld [vmem:[#allocation75_spill] sm:$0xff] }
 0x40e   : > { %v1310_v7 = vadd.f32 %v8888_v42, %v1091_v36  ;;  %v1092_v47 = vld [vmem:[%s8298_s26 + $0x198] sm:$0xff]  ;;  %v1986_v34 = vmul.f32 %v8581_v62, %v11709_v28  ;;  %v1097_v28 = vld [vmem:[%s8298_s26 + $0x1c0] sm:$0xff] }
 0x40f   : > { %v2109_v13 = vadd.f32 %v1981_v21, %v1305_v15  ;;  %v11708_v15 = vld [vmem:[#allocation74_spill] sm:$0xff]  ;;  %v8916_v21 = vpop.permute.xlu0 %1840  ;;  %v1311_v18 = vadd.f32 %v8888_v42, %v1092_v47 }
 0x410   : > { %2517 = vadd.xlane.f32.xlu0 %v2358_v39  ;;  %v2363_v39 = vmul.f32 %v6774_v53, %v8637_v2  ;;  %v1985_v31 = vmul.f32 %v8581_v62, %v11708_v15  ;;  %v2114_v30 = vadd.f32 %v1986_v34, %v1310_v7 }
 0x411   : > { %2519 = vadd.xlane.f32.xlu1 %v2359_v50  ;;  %v1307_v50 = vadd.f32 %v8783_v8, %v1088_v54  ;;  %v6780_v8 = vpop.eup %6779  ;;  %6791 = vtanh.f32 %v2109_v13  ;;  %v2112_v54 = vadd.f32 %v1984_v45, %v1308_v40  ;;  %v11710_v13 = vld [vmem:[#allocation76_spill] sm:$0xff]  ;;  %v1094_v40 = vld [vmem:[%s8298_s26 + $0x1a8] sm:$0xff] }
 0x412   : > { %6793 = vtanh.f32 %v2110_v63  ;;  %v2366_v55 = vmul.f32 %v6780_v8, %v8637_v2  ;;  %v1987_v56 = vmul.f32 %v8581_v62, %v11710_v13  ;;  %v11711_v63 = vld [vmem:[#allocation78_spill] sm:$0xff]  ;;  %v1095_v45 = vld [vmem:[%s8298_s26 + $0x1b0] sm:$0xff]  ;;  %v1316_v13 = vadd.f32 %v8888_v42, %v1097_v28 }
 0x413   : > { %v2111_v53 = vadd.f32 %v1983_v26, %v1307_v50  ;;  %v2113_v50 = vadd.f32 %v1985_v31, %v1309_v46  ;;  %v1312_v26 = vadd.f32 %v8888_v42, %v1093_v43  ;;  %v1988_v57 = vmul.f32 %v8581_v62, %v11711_v63  ;;  %v11712_v31 = vld [vmem:[#allocation79_spill] sm:$0xff]  ;;  %v11713_v43 = vld [vmem:[#allocation80_spill] sm:$0xff] }
 0x414   : > { %2521 = vadd.xlane.f32.xlu0 %v2360_v37  ;;  %v6782_v37 = vpop.eup %6781  ;;  %v2115_v15 = vadd.f32 %v1987_v56, %v1311_v18  ;;  %v1989_v7 = vmul.f32 %v8581_v62, %v11712_v31  ;;  %v1314_v47 = vadd.f32 %v8888_v42, %v1095_v45  ;;  %v1098_v63 = vld [vmem:[%s8298_s26 + $0x1c8] sm:$0xff]  ;;  %v11715_v45 = vld [vmem:[#allocation92_spill] sm:$0xff] }
 0x415   : > { %2523 = vadd.xlane.f32.xlu1 %v2361_v58  ;;  %v8910_v58 = vpop.permute.xlu1 %1836  ;;  %v2367_v19 = vmul.f32 %v6782_v37, %v8637_v2  ;;  %6795 = vtanh.f32 %v2111_v53  ;;  %v1313_v53 = vadd.f32 %v8888_v42, %v1094_v40  ;;  %v2116_v34 = vadd.f32 %v1988_v57, %v1312_v26  ;;  %v1099_v57 = vld [vmem:[%s8298_s26 + $0x1d0] sm:$0xff] }
 0x416   : > { %6797 = vtanh.f32 %v2112_v54  ;;  %v1096_v54 = vld [vmem:[%s8298_s26 + $0x1b8] sm:$0xff]  ;;  %v1317_v28 = vadd.f32 %v8888_v42, %v1098_v63 }
 0x417   : > { %6799 = vtanh.f32 %v2113_v50  ;;  %v1315_v50 = vadd.f32 %v8888_v42, %v1096_v54  ;;  %v2117_v40 = vadd.f32 %v1989_v7, %v1313_v53 }
 0x418   : > { %2525 = vadd.xlane.f32.xlu0 %v2362_v29  ;;  %v6784_v29 = vpop.eup %6783  ;;  %6801 = vtanh.f32 %v2114_v30  ;;  %v11714_v30 = vld [vmem:[#allocation81_spill] sm:$0xff] }
 0x419   : > { %2527 = vadd.xlane.f32.xlu1 %v2363_v39  ;;  %v6786_v39 = vpop.eup %6785  ;;  %v8931_v36 = vpop.permute.xlu1 %1844  ;;  %6803 = vtanh.f32 %v2115_v15  ;;  %v1991_v26 = vmul.f32 %v8581_v62, %v11714_v30  ;;  %v11718_v30 = vld [vmem:[#allocation83_spill] sm:$0xff] }
 0x41a   : > { %v6788_v8 = vpop.eup %6787  ;;  %v2369_v37 = vmul.f32 %v6786_v39, %v8637_v2  ;;  %6805 = vtanh.f32 %v2116_v34  ;;  %v1993_v34 = vmul.f32 %v8581_v62, %v11718_v30  ;;  %v1103_v30 = vld [vmem:[%s8298_s26 + $0x1f0] sm:$0xff] }
 0x41b   : > { %v6790_v46 = vpop.eup %6789  ;;  %6807 = vtanh.f32 %v2117_v40 }
 0x41c   : > { %2529 = vadd.xlane.f32.xlu0 %v2364_v27  ;;  %v2368_v27 = vmul.f32 %v6784_v29, %v8637_v2  ;;  %v2370_v29 = vmul.f32 %v6788_v8, %v8637_v2  ;;  %v2371_v39 = vmul.f32 %v6790_v46, %v8637_v2  ;;  %v11717_v46 = vld [vmem:[#allocation82_spill] sm:$0xff] }
 0x41d   : > { %2531 = vadd.xlane.f32.xlu1 %v2365_v20  ;;  %v8934_v20 = vpop.permute.xlu0 %1848  ;;  %v8949_v56 = vpop.permute.xlu1 %1852  ;;  %v1992_v31 = vmul.f32 %v8581_v62, %v11717_v46 }
 0x420   : > { %2533 = vadd.xlane.f32.xlu0 %v2366_v55  ;;  %v1990_v55 = vmul.f32 %v8581_v62, %v11713_v43  ;;  %v1318_v43 = vadd.f32 %v8888_v42, %v1099_v57 }
 0x421   : > { %2535 = vadd.xlane.f32.xlu1 %v2367_v19  ;;  %v6792_v19 = vpop.eup %6791  ;;  %v8957_v8 = vpop.permute.xlu0 %1856 }
 0x422   : > { %v6794_v18 = vpop.eup %6793  ;;  %11716 = vst [vmem:[#allocation69_spill] sm:$0xff] %v8957_v8  ;;  %v2372_v53 = vmul.f32 %v6792_v19, %v8637_v2  ;;  %v2120_v19 = vadd.f32 %v1992_v31, %v1316_v13  ;;  %v8974_v57 = vpop.permute.xlu1 %1860  ;;  %v2121_v13 = vadd.f32 %v1993_v34, %v1317_v28 }
 0x423   : > { %v6796_v15 = vpop.eup %6795  ;;  %v2373_v7 = vmul.f32 %v6794_v18, %v8637_v2  ;;  %v11719_v18 = vld [vmem:[#allocation84_spill] sm:$0xff]  ;;  %11720 = vst [vmem:[#allocation70_spill] sm:$0xff] %v8974_v57  ;;  %v11728_v57 = vld [vmem:[#allocation89_spill] sm:$0xff] }
 0x424   : > { %2537 = vadd.xlane.f32.xlu0 %v2368_v27  ;;  %v1171_v27 = vcombine.high %v11715_v45, %v11715_v45  ;;  %v6798_v54 = vpop.eup %6797  ;;  %v1994_v63 = vmul.f32 %v8581_v62, %v11719_v18  ;;  %v11723_v18 = vld [vmem:[#allocation86_spill] sm:$0xff] }
 0x425   : > { %2539 = vadd.xlane.f32.xlu1 %v2369_v37  ;;  %v2118_v37 = vadd.f32 %v1990_v55, %v1314_v47  ;;  %v1100_v47 = vld [vmem:[%s8298_s26 + $0x1d8] sm:$0xff]  ;;  %v1101_v55 = vld [vmem:[%s8298_s26 + $0x1e0] sm:$0xff]  ;;  %v6800_v40 = vpop.eup %6799  ;;  %v2375_v45 = vmul.f32 %v6798_v54, %v8637_v2 }
 0x426   : > { %v6802_v46 = vpop.eup %6801  ;;  %v2122_v54 = vadd.f32 %v1994_v63, %v1318_v43  ;;  %v8998_v43 = vld [vmem:[#allocation21] ss:$0 sm:$0xff]  ;;  %v11725_v63 = vld [vmem:[#allocation87_spill] sm:$0xff] }
 0x427   : > { %6809 = vtanh.f32 %v2118_v37  ;;  %v11722_v37 = vld [vmem:[#allocation85_spill] sm:$0xff]  ;;  %v2377_v28 = vmul.f32 %v6802_v46, %v8637_v2 }
 0x428   : > { %2541 = vadd.xlane.f32.xlu0 %v2370_v29  ;;  %v2119_v29 = vadd.f32 %v1991_v26, %v1315_v50  ;;  %v2374_v50 = vmul.f32 %v6796_v15, %v8637_v2  ;;  %v8977_v26 = vpop.permute.xlu0 %1867  ;;  %v1995_v31 = vmul.f32 %v8581_v62, %v11722_v37  ;;  %v1322_v37 = vadd.f32 %v8888_v42, %v1103_v30  ;;  %v11727_v30 = vld [vmem:[#allocation88_spill] sm:$0xff] }
 0x429   : > { %2543 = vadd.xlane.f32.xlu1 %v2371_v39  ;;  %v8970_v39 = vrot.slane %v1171_v27, %v8555_v16  ;;  %11721 = vst [vmem:[#allocation71_spill] sm:$0xff] %v8977_v26  ;;  %v1319_v27 = vadd.f32 %v8888_v42, %v1100_v47  ;;  %v1996_v47 = vmul.f32 %v8581_v62, %v11723_v18  ;;  %v8996_v26 = vpop.permute.xlu1 %1871 }
 0x42a   : > { %6811 = vtanh.f32 %v2119_v29  ;;  %v6804_v29 = vpop.eup %6803  ;;  %11724 = vst [vmem:[#allocation72_spill] sm:$0xff] %v8996_v26  ;;  %v1997_v62 = vmul.f32 %v8998_v43, %v11725_v63 }
 0x42b   : > { %v8988_v15 = vrot.slane %v8970_v39, %v8555_v16  ;;  %6813 = vtanh.f32 %v2120_v19  ;;  %v6806_v34 = vpop.eup %6805  ;;  %v2123_v19 = vadd.f32 %v1995_v31, %v1319_v27  ;;  %v1105_v27 = vld [vmem:[%s8298_s26 + $0x200] sm:$0xff]  ;;  %v2378_v31 = vmul.f32 %v6804_v29, %v8637_v2 }
 0x42c   : > { %2545 = vadd.xlane.f32.xlu0 %v2372_v53  ;;  %v1320_v53 = vadd.f32 %v8888_v42, %v1101_v55  ;;  %v2376_v55 = vmul.f32 %v6800_v40, %v8637_v2  ;;  %6815 = vtanh.f32 %v2121_v13  ;;  %v1104_v40 = vld [vmem:[%s8298_s26 + $0x1f8] sm:$0xff]  ;;  %v9007_v46 = vpop.permute.xlu0 %1875  ;;  %v1998_v13 = vmul.f32 %v8998_v43, %v11727_v30  ;;  %v6808_v18 = vpop.eup %6807  ;;  %v11729_v29 = vld [vmem:[#allocation90_spill] sm:$0xff] }
 0x42d   : > { %2547 = vadd.xlane.f32.xlu1 %v2373_v7  ;;  %v1102_v7 = vld [vmem:[%s8298_s26 + $0x1e8] sm:$0xff]  ;;  %11726 = vst [vmem:[#allocation73_spill] sm:$0xff] %v9007_v46  ;;  %6817 = vtanh.f32 %v2122_v54  ;;  %v1323_v26 = vadd.f32 %v8888_v42, %v1104_v40  ;;  %v1999_v54 = vmul.f32 %v8998_v43, %v11728_v57  ;;  %v2000_v30 = vmul.f32 %v8998_v43, %v11729_v29  ;;  %v9022_v8 = vpop.permute.xlu1 %1879 }
 0x42e   : > { %6819 = vtanh.f32 %v2123_v19 }
 0x430   : > { %2549 = vadd.xlane.f32.xlu0 %v2374_v50  ;;  %v1321_v50 = vadd.f32 %v8888_v42, %v1102_v7  ;;  %v2124_v7 = vadd.f32 %v1996_v47, %v1320_v53  ;;  %v1106_v47 = vld [vmem:[%s8298_s26 + $0x208] sm:$0xff]  ;;  %v2380_v42 = vmul.f32 %v6808_v18, %v8637_v2  ;;  %v9025_v19 = vpop.permute.xlu0 %1883 }
 0x431   : > { %2551 = vadd.xlane.f32.xlu1 %v2375_v45  ;;  %v9005_v45 = vrot.slane %v8988_v15, %v8383_v1  ;;  %v6810_v63 = vpop.eup %6809  ;;  %11730 = vst [vmem:[#allocation74_spill] sm:$0xff] %v9025_v19 }
 0x432   : > { %v2125_v46 = vadd.f32 %v1997_v62, %v1321_v50  ;;  %6821 = vtanh.f32 %v2124_v7  ;;  %v2381_v57 = vmul.f32 %v6810_v63, %v8637_v2  ;;  %v11731_v7 = vld [vmem:[#allocation91_spill] sm:$0xff]  ;;  %v1109_v63 = vld [vmem:[%s8298_s26 + $0x220] sm:$0xff] }
 0x433   : > { %v1324_v53 = vadd.f32 %v9005_v45, %v1105_v27  ;;  %v1325_v40 = vadd.f32 %v9005_v45, %v1106_v47 }
 0x434   : > { %2553 = vadd.xlane.f32.xlu0 %v2376_v55  ;;  %v2379_v55 = vmul.f32 %v6806_v34, %v8637_v2  ;;  %v1107_v34 = vld [vmem:[%s8298_s26 + $0x210] sm:$0xff]  ;;  %v6812_v50 = vpop.eup %6811  ;;  %6823 = vtanh.f32 %v2125_v46 }
 0x435   : > { %2555 = vadd.xlane.f32.xlu1 %v2377_v28  ;;  %v2126_v28 = vadd.f32 %v1998_v13, %v1322_v37  ;;  %v6814_v62 = vpop.eup %6813  ;;  %v2127_v37 = vadd.f32 %v1999_v54, %v1323_v26  ;;  %v2001_v13 = vmul.f32 %v8998_v43, %v11731_v7  ;;  %v1326_v27 = vadd.f32 %v9005_v45, %v1107_v34  ;;  %v9045_v7 = vpop.permute.xlu0 %1891 }
 0x436   : > { %v2128_v18 = vadd.f32 %v2000_v30, %v1324_v53  ;;  %v2382_v19 = vmul.f32 %v6812_v50, %v8637_v2  ;;  %v6816_v47 = vpop.eup %6815  ;;  %v2383_v26 = vmul.f32 %v6814_v62, %v8637_v2  ;;  %v1328_v30 = vadd.f32 %v9005_v45, %v1109_v63  ;;  %11735 = vst [vmem:[#allocation76_spill] sm:$0xff] %v9045_v7  ;;  %v11736_v50 = vld [vmem:[#allocation95_spill] sm:$0xff]  ;;  %v1113_v7 = vld [vmem:[%s8298_s26 + $0x240] sm:$0xff] }
 0x437   : > { %6825 = vtanh.f32 %v2126_v28  ;;  %v6818_v46 = vpop.eup %6817  ;;  %v2129_v34 = vadd.f32 %v2001_v13, %v1325_v40  ;;  %v11734_v28 = vld [vmem:[#allocation94_spill] sm:$0xff]  ;;  %v2004_v62 = vmul.f32 %v8998_v43, %v11736_v50 }
 0x438   : > { %2557 = vadd.xlane.f32.xlu0 %v2378_v31  ;;  %v1108_v31 = vld [vmem:[%s8298_s26 + $0x218] sm:$0xff]  ;;  %6827 = vtanh.f32 %v2127_v37  ;;  %v2003_v53 = vmul.f32 %v8998_v43, %v11734_v28  ;;  %v6820_v40 = vpop.eup %6819 }
 0x439   : > { %2559 = vadd.xlane.f32.xlu1 %v2379_v55  ;;  %v11732_v55 = vld [vmem:[#allocation93_spill] sm:$0xff]  ;;  %v1327_v54 = vadd.f32 %v9005_v45, %v1108_v31  ;;  %6829 = vtanh.f32 %v2128_v18  ;;  %v1111_v31 = vld [vmem:[%s8298_s26 + $0x230] sm:$0xff]  ;;  %v2132_v50 = vadd.f32 %v2004_v62, %v1328_v30 }
 0x43a   : > { %v2002_v29 = vmul.f32 %v8998_v43, %v11732_v55  ;;  %v9050_v55 = vld [vmem:[#allocation22] ss:$0 sm:$0xff]  ;;  %6831 = vtanh.f32 %v2129_v34  ;;  %v11737_v18 = vld [vmem:[#allocation96_spill] sm:$0xff]  ;;  %v1112_v28 = vld [vmem:[%s8298_s26 + $0x238] sm:$0xff] }
 0x43b   : > { %v2385_v37 = vmul.f32 %v9050_v55, %v6818_v46  ;;  %v2386_v34 = vmul.f32 %v9050_v55, %v6820_v40 }
 0x43c   : > { %2561 = vadd.xlane.f32.xlu0 %v2380_v42  ;;  %v9039_v42 = vpop.permute.xlu1 %1887  ;;  %v2130_v2 = vadd.f32 %v2002_v29, %v1326_v27  ;;  %v6822_v13 = vpop.eup %6821  ;;  %v2005_v27 = vmul.f32 %v8998_v43, %v11737_v18  ;;  %v1330_v29 = vadd.f32 %v9005_v45, %v1111_v31  ;;  %v1114_v18 = vld [vmem:[%s8298_s26 + $0x248] sm:$0xff] }
 0x43d   : > { %2563 = vadd.xlane.f32.xlu1 %v2381_v57  ;;  %11733 = vst [vmem:[#allocation75_spill] sm:$0xff] %v9039_v42  ;;  %v1110_v57 = vld [vmem:[%s8298_s26 + $0x228] sm:$0xff] }
 0x43e   : > { %v1329_v63 = vadd.f32 %v9005_v45, %v1110_v57  ;;  %6833 = vtanh.f32 %v2130_v2  ;;  %v2387_v57 = vmul.f32 %v9050_v55, %v6822_v13  ;;  %v11740_v2 = vld [vmem:[#allocation98_spill] sm:$0xff] }
 0x43f   : > { %v2007_v62 = vmul.f32 %v8998_v43, %v11740_v2 }
 0x440   : > { %2565 = vadd.xlane.f32.xlu0 %v2382_v19  ;;  %v2384_v19 = vmul.f32 %v9050_v55, %v6816_v47  ;;  %v11738_v47 = vld [vmem:[#allocation97_spill] sm:$0xff]  ;;  %v9062_v42 = vpop.permute.xlu1 %1895  ;;  %v2133_v30 = vadd.f32 %v2005_v27, %v1329_v63  ;;  %v1333_v27 = vadd.f32 %v9005_v45, %v1114_v18 }
 0x441   : > { %2567 = vadd.xlane.f32.xlu1 %v2383_v26  ;;  %v2131_v26 = vadd.f32 %v2003_v53, %v1327_v54  ;;  %v2006_v46 = vmul.f32 %v8998_v43, %v11738_v47  ;;  %v6824_v54 = vpop.eup %6823  ;;  %v9065_v53 = vpop.permute.xlu0 %1899  ;;  %v1115_v47 = vld [vmem:[%s8298_s26 + $0x250] sm:$0xff] }
 0x442   : > { %11739 = vst [vmem:[#allocation78_spill] sm:$0xff] %v9065_v53  ;;  %v6826_v31 = vpop.eup %6825  ;;  %v11741_v53 = vld [vmem:[#allocation99_spill] sm:$0xff] }
 0x443   : > { %6835 = vtanh.f32 %v2131_v26  ;;  %v2134_v40 = vadd.f32 %v2006_v46, %v1330_v29  ;;  %v2008_v13 = vmul.f32 %v8998_v43, %v11741_v53  ;;  %v2389_v63 = vmul.f32 %v9050_v55, %v6826_v31  ;;  %v1116_v46 = vld [vmem:[%s8298_s26 + $0x258] sm:$0xff]  ;;  %v1117_v53 = vld [vmem:[%s8298_s26 + $0x260] sm:$0xff] }
 0x444   : > { %2569 = vadd.xlane.f32.xlu0 %v2384_v19  ;;  %v1331_v19 = vadd.f32 %v9005_v45, %v1112_v28  ;;  %6837 = vtanh.f32 %v2132_v50  ;;  %v2388_v28 = vmul.f32 %v9050_v55, %v6824_v54  ;;  %v9080_v2 = vpop.permute.xlu1 %1903  ;;  %v11743_v50 = vld [vmem:[#allocation100_spill] sm:$0xff]  ;;  %v1187_v54 = vcombine.high %v8970_v39, %v8970_v39 }
 0x445   : > { %2571 = vadd.xlane.f32.xlu1 %v2385_v37  ;;  %v1332_v37 = vadd.f32 %v9005_v45, %v1113_v7  ;;  %v1334_v7 = vadd.f32 %v9005_v45, %v1115_v47  ;;  %11742 = vst [vmem:[#allocation79_spill] sm:$0xff] %v9080_v2  ;;  %6839 = vtanh.f32 %v2133_v30  ;;  %v2009_v29 = vmul.f32 %v8998_v43, %v11743_v50  ;;  %v9088_v31 = vpop.permute.xlu0 %1907  ;;  %v11745_v47 = vld [vmem:[#allocation101_spill] sm:$0xff] }
 0x446   : > { %11744 = vst [vmem:[#allocation80_spill] sm:$0xff] %v9088_v31  ;;  %6841 = vtanh.f32 %v2134_v40  ;;  %v1335_v2 = vadd.f32 %v9005_v45, %v1116_v46  ;;  %v1336_v39 = vadd.f32 %v9005_v45, %v1117_v53  ;;  %v2011_v40 = vmul.f32 %v8998_v43, %v8612_v49 }
 0x447   : > { %v2136_v18 = vadd.f32 %v2008_v13, %v1332_v37  ;;  %v2137_v31 = vadd.f32 %v2009_v29, %v1333_v27  ;;  %v1118_v37 = vld [vmem:[%s8298_s26 + $0x268] sm:$0xff]  ;;  %v1119_v13 = vld [vmem:[%s8298_s26 + $0x270] sm:$0xff] }
 0x448   : > { %2573 = vadd.xlane.f32.xlu0 %v2386_v34  ;;  %v6828_v34 = vpop.eup %6827  ;;  %v9105_v46 = vpop.permute.xlu1 %1911 }
 0x449   : > { %2575 = vadd.xlane.f32.xlu1 %v2387_v57  ;;  %v6830_v26 = vpop.eup %6829  ;;  %v2135_v57 = vadd.f32 %v2007_v62, %v1331_v19  ;;  %v2390_v19 = vmul.f32 %v9050_v55, %v6828_v34  ;;  %v9108_v29 = vpop.permute.xlu0 %1915 }
 0x44a   : > { %v6832_v30 = vpop.eup %6831  ;;  %v2391_v62 = vmul.f32 %v9050_v55, %v6830_v26  ;;  %v2012_v26 = vmul.f32 %v8998_v43, %v8615_v59  ;;  %v2013_v59 = vmul.f32 %v8998_v43, %v8625_v9 }
 0x44b   : > { %v6834_v50 = vpop.eup %6833  ;;  %6843 = vtanh.f32 %v2135_v57  ;;  %v2392_v57 = vmul.f32 %v9050_v55, %v6832_v30 }
 0x44c   : > { %2577 = vadd.xlane.f32.xlu0 %v2388_v28  ;;  %v2010_v28 = vmul.f32 %v8998_v43, %v11745_v47  ;;  %6845 = vtanh.f32 %v2136_v18  ;;  %v2393_v49 = vmul.f32 %v9050_v55, %v6834_v50  ;;  %v1120_v18 = vld [vmem:[%s8298_s26 + $0x278] sm:$0xff] }
 0x44d   : > { %2579 = vadd.xlane.f32.xlu1 %v2389_v63  ;;  %v9101_v63 = vrot.slane %v1187_v54, %v8555_v16  ;;  %v6836_v27 = vpop.eup %6835  ;;  %v1337_v16 = vadd.f32 %v9005_v45, %v1118_v37  ;;  %v1338_v54 = vadd.f32 %v9005_v45, %v1119_v13  ;;  %6847 = vtanh.f32 %v2137_v31  ;;  %v9126_v37 = vpop.permute.xlu1 %1919 }
 0x44e   : > { %v2138_v34 = vadd.f32 %v2010_v28, %v1334_v7  ;;  %v6838_v53 = vpop.eup %6837  ;;  %v2139_v7 = vadd.f32 %v2011_v40, %v1335_v2  ;;  %v2140_v28 = vadd.f32 %v2012_v26, %v1336_v39  ;;  %v2394_v50 = vmul.f32 %v9050_v55, %v6836_v27  ;;  %v1122_v26 = vld [vmem:[%s8298_s26 + $0x288] sm:$0xff] }
 0x44f   : > { %v9118_v47 = vrot.slane %v9101_v63, %v8383_v1  ;;  %v6840_v31 = vpop.eup %6839  ;;  %v2395_v2 = vmul.f32 %v9050_v55, %v6838_v53  ;;  %v1339_v40 = vadd.f32 %v9005_v45, %v1120_v18  ;;  %v2141_v13 = vadd.f32 %v2013_v59, %v1337_v16  ;;  %v1123_v53 = vld [vmem:[%s8298_s26 + $0x290] sm:$0xff] }
 0x450   : > { %2581 = vadd.xlane.f32.xlu0 %v2390_v19  ;;  %6849 = vtanh.f32 %v2138_v34  ;;  %v11746_v19 = vld [vmem:[#allocation102_spill] sm:$0xff]  ;;  %v6842_v9 = vpop.eup %6841  ;;  %v2015_v39 = vmul.f32 %v8998_v43, %v8649_v5  ;;  %v2396_v18 = vmul.f32 %v9050_v55, %v6840_v31  ;;  %v2018_v31 = vmul.f32 %v8998_v43, %v8678_v14 }
 0x451   : > { %2583 = vadd.xlane.f32.xlu1 %v2391_v62  ;;  %v2014_v30 = vmul.f32 %v8998_v43, %v11746_v19  ;;  %v1121_v62 = vld [vmem:[%s8298_s26 + $0x280] sm:$0xff]  ;;  %6851 = vtanh.f32 %v2139_v7  ;;  %v2397_v7 = vmul.f32 %v9050_v55, %v6842_v9  ;;  %v1341_v59 = vadd.f32 %v9118_v47, %v1122_v26  ;;  %v9149_v9 = vpop.permute.xlu1 %1927 }
 0x452   : > { %v1340_v34 = vadd.f32 %v9118_v47, %v1121_v62  ;;  %6853 = vtanh.f32 %v2140_v28  ;;  %v2143_v19 = vadd.f32 %v2015_v39, %v1339_v40  ;;  %v2017_v28 = vmul.f32 %v8998_v43, %v8669_v60 }
 0x453   : > { %v2142_v27 = vadd.f32 %v2014_v30, %v1338_v54  ;;  %6855 = vtanh.f32 %v2141_v13  ;;  %v1342_v54 = vadd.f32 %v9118_v47, %v1123_v53  ;;  %v1124_v30 = vld [vmem:[%s8298_s26 + $0x298] sm:$0xff] }
 0x454   : > { %2585 = vadd.xlane.f32.xlu0 %v2392_v57  ;;  %v9132_v57 = vpop.permute.xlu0 %1923  ;;  %v1343_v26 = vadd.f32 %v9118_v47, %v1124_v30 }
 0x455   : > { %2587 = vadd.xlane.f32.xlu1 %v2393_v49  ;;  %v11747_v49 = vld [vmem:[#allocation103_spill] sm:$0xff]  ;;  %v6844_v16 = vpop.eup %6843  ;;  %6857 = vtanh.f32 %v2142_v27  ;;  %v2146_v53 = vadd.f32 %v2018_v31, %v1342_v54  ;;  %v2021_v54 = vmul.f32 %v8998_v43, %v8710_v11 }
 0x456   : > { %v2016_v45 = vmul.f32 %v8998_v43, %v11747_v49  ;;  %v6846_v5 = vpop.eup %6845  ;;  %v2398_v40 = vmul.f32 %v9050_v55, %v6844_v16  ;;  %6859 = vtanh.f32 %v2143_v19  ;;  %v2145_v49 = vadd.f32 %v2017_v28, %v1341_v59  ;;  %v1126_v27 = vld [vmem:[%s8298_s26 + $0x2a8] sm:$0xff]  ;;  %v1127_v16 = vld [vmem:[%s8298_s26 + $0x2b0] sm:$0xff] }
 0x457   : > { %v6848_v13 = vpop.eup %6847  ;;  %v2399_v60 = vmul.f32 %v9050_v55, %v6846_v5  ;;  %v1345_v28 = vadd.f32 %v9118_v47, %v1126_v27 }
 0x458   : > { %2589 = vadd.xlane.f32.xlu0 %v2394_v50  ;;  %v2144_v50 = vadd.f32 %v2016_v45, %v1340_v34  ;;  %v2019_v34 = vmul.f32 %v8998_v43, %v8693_v12  ;;  %v2400_v5 = vmul.f32 %v9050_v55, %v6848_v13  ;;  %v1129_v13 = vld [vmem:[%s8298_s26 + $0x2c0] sm:$0xff] }
 0x459   : > { %2591 = vadd.xlane.f32.xlu1 %v2395_v2  ;;  %v1125_v2 = vld [vmem:[%s8298_s26 + $0x2a0] sm:$0xff]  ;;  %v2149_v27 = vadd.f32 %v2021_v54, %v1345_v28 }
 0x45a   : > { %v6850_v39 = vpop.eup %6849  ;;  %v1344_v14 = vadd.f32 %v9118_v47, %v1125_v2  ;;  %6861 = vtanh.f32 %v2144_v50  ;;  %v2147_v30 = vadd.f32 %v2019_v34, %v1343_v26  ;;  %v1128_v50 = vld [vmem:[%s8298_s26 + $0x2b8] sm:$0xff] }
 0x45b   : > { %v6852_v59 = vpop.eup %6851  ;;  %v2401_v12 = vmul.f32 %v9050_v55, %v6850_v39  ;;  %6863 = vtanh.f32 %v2145_v49  ;;  %v1347_v34 = vadd.f32 %v9118_v47, %v1128_v50 }
 0x45c   : > { %2593 = vadd.xlane.f32.xlu0 %v2396_v18  ;;  %v2020_v18 = vmul.f32 %v8998_v43, %v8696_v6  ;;  %v6854_v19 = vpop.eup %6853  ;;  %v1346_v6 = vadd.f32 %v9118_v47, %v1127_v16  ;;  %6865 = vtanh.f32 %v2146_v53  ;;  %v2402_v39 = vmul.f32 %v9050_v55, %v6852_v59  ;;  %v1130_v53 = vld [vmem:[%s8298_s26 + $0x2c8] sm:$0xff]  ;;  %v1131_v59 = vld [vmem:[%s8298_s26 + $0x2d0] sm:$0xff] }
 0x45d   : > { %2595 = vadd.xlane.f32.xlu1 %v2397_v7  ;;  %v9144_v62 = vpop.xlane.xlu0 %2455  ;;  %v6856_v26 = vpop.eup %6855  ;;  %v2403_v11 = vmul.f32 %v9050_v55, %v6854_v19  ;;  %6867 = vtanh.f32 %v2147_v30  ;;  %v1349_v54 = vadd.f32 %v9118_v47, %v1130_v53 }
 0x45e   : > { %11748 = vst [vmem:[#allocation81_spill] sm:$0xff] %v9144_v62  ;;  %v2148_v2 = vadd.f32 %v2020_v18, %v1344_v14  ;;  %v2023_v14 = vmul.f32 %v8998_v43, %v8731_v24  ;;  %v2404_v19 = vmul.f32 %v9050_v55, %v6856_v26  ;;  %v2026_v26 = vmul.f32 %v8998_v43, %v8755_v32  ;;  %v1135_v32 = vld [vmem:[%s8298_s26 + $0x2f0] sm:$0xff] }
 0x45f   : > { %v6858_v49 = vpop.eup %6857 }
 0x460   : > { %2597 = vadd.xlane.f32.xlu0 %v2398_v40  ;;  %v2022_v40 = vmul.f32 %v8998_v43, %v8716_v61  ;;  %v1348_v61 = vadd.f32 %v9118_v47, %v1129_v13  ;;  %6869 = vtanh.f32 %v2148_v2  ;;  %v6860_v28 = vpop.eup %6859  ;;  %v2405_v24 = vmul.f32 %v9050_v55, %v6858_v49 }
 0x461   : > { %2599 = vadd.xlane.f32.xlu1 %v2399_v60  ;;  %v9158_v45 = vpop.xlane.xlu0 %2459  ;;  %6871 = vtanh.f32 %v2149_v27  ;;  %v2151_v50 = vadd.f32 %v2023_v14, %v1347_v34  ;;  %v1350_v2 = vadd.f32 %v9118_v47, %v1131_v59  ;;  %v2406_v49 = vmul.f32 %v9050_v55, %v6860_v28 }
 0x462   : > { %11749 = vst [vmem:[#allocation92_spill] sm:$0xff] %v9158_v45  ;;  %v9163_v7 = vpop.xlane.xlu1 %2457  ;;  %v2150_v16 = vadd.f32 %v2022_v40, %v1346_v6  ;;  %v2025_v6 = vmul.f32 %v8998_v43, %v8748_v3  ;;  %v1133_v40 = vld [vmem:[%s8298_s26 + $0x2e0] sm:$0xff] }
 0x463   : > { %11750 = vst [vmem:[#allocation82_spill] sm:$0xff] %v9163_v7  ;;  %v1352_v53 = vadd.f32 %v9118_v47, %v1133_v40  ;;  %v2154_v28 = vadd.f32 %v2026_v26, %v1350_v2  ;;  %v2029_v2 = vmul.f32 %v8998_v43, %v8791_v38 }
 0x464   : > { %2601 = vadd.xlane.f32.xlu0 %v2400_v5  ;;  %v2024_v5 = vmul.f32 %v8998_v43, %v8734_v10  ;;  %v6862_v30 = vpop.eup %6861  ;;  %v1132_v10 = vld [vmem:[%s8298_s26 + $0x2d8] sm:$0xff]  ;;  %6873 = vtanh.f32 %v2150_v16  ;;  %v2153_v59 = vadd.f32 %v2025_v6, %v1349_v54  ;;  %v1134_v16 = vld [vmem:[%s8298_s26 + $0x2e8] sm:$0xff] }
 0x465   : > { %2603 = vadd.xlane.f32.xlu1 %v2401_v12  ;;  %v9172_v31 = vpop.xlane.xlu0 %2461  ;;  %v6864_v34 = vpop.eup %6863  ;;  %v2407_v3 = vmul.f32 %v9050_v55, %v6862_v30  ;;  %v1351_v14 = vadd.f32 %v9118_v47, %v1132_v10  ;;  %6875 = vtanh.f32 %v2151_v50  ;;  %v1354_v10 = vadd.f32 %v9118_v47, %v1135_v32 }
 0x466   : > { %11751 = vst [vmem:[#allocation83_spill] sm:$0xff] %v9172_v31  ;;  %v9177_v60 = vpop.xlane.xlu1 %2463  ;;  %v6866_v27 = vpop.eup %6865  ;;  %v2408_v54 = vmul.f32 %v9050_v55, %v6864_v34  ;;  %v2030_v34 = vmul.f32 %v8998_v43, %v8797_v35 }
 0x467   : > { %11752 = vst [vmem:[#allocation84_spill] sm:$0xff] %v9177_v60  ;;  %v6868_v50 = vpop.eup %6867 }
 0x468   : > { %2605 = vadd.xlane.f32.xlu0 %v2402_v39  ;;  %v2152_v39 = vadd.f32 %v2024_v5, %v1348_v61  ;;  %v2027_v61 = vmul.f32 %v8998_v43, %v8771_v22  ;;  %v1217_v5 = vcombine.high %v8988_v15, %v8988_v15  ;;  %v2409_v22 = vmul.f32 %v9050_v55, %v6866_v27 }
 0x469   : > { %2607 = vadd.xlane.f32.xlu1 %v2403_v11  ;;  %v9186_v18 = vpop.xlane.xlu0 %2465  ;;  %v1353_v15 = vadd.f32 %v9118_v47, %v1134_v16 }
 0x46a   : > { %11753 = vst [vmem:[#allocation85_spill] sm:$0xff] %v9186_v18  ;;  %v9191_v12 = vpop.xlane.xlu1 %2467  ;;  %6877 = vtanh.f32 %v2152_v39  ;;  %v6870_v6 = vpop.eup %6869  ;;  %v2155_v40 = vadd.f32 %v2027_v61, %v1351_v14  ;;  %v9231_v39 = vrot.slane %v1217_v5, %v8383_v1  ;;  %v2410_v14 = vmul.f32 %v9050_v55, %v6868_v50  ;;  %v1138_v5 = vld [vmem:[%s8298_s26 + $0x308] sm:$0xff]  ;;  %v1139_v50 = vld [vmem:[%s8298_s26 + $0x310] sm:$0xff] }
 0x46b   : > { %6879 = vtanh.f32 %v2153_v59  ;;  %v6872_v38 = vpop.eup %6871  ;;  %v2411_v59 = vmul.f32 %v9050_v55, %v6870_v6  ;;  %v2157_v32 = vadd.f32 %v2029_v2, %v1353_v15 }
 0x46c   : > { %2609 = vadd.xlane.f32.xlu0 %v2404_v19  ;;  %6881 = vtanh.f32 %v2154_v28 }
 0x46d   : > { %2611 = vadd.xlane.f32.xlu1 %v2405_v24  ;;  %v9201_v13 = vpop.xlane.xlu0 %2469  ;;  %v2028_v24 = vmul.f32 %v8998_v43, %v8774_v23  ;;  %v1136_v23 = vld [vmem:[%s8298_s26 + $0x2f8] sm:$0xff]  ;;  %6883 = vtanh.f32 %v2155_v40  ;;  %v1357_v40 = vadd.f32 %v9231_v39, %v1138_v5  ;;  %v1142_v5 = vld [vmem:[%s8298_s26 + $0x328] sm:$0xff] }
 0x46e   : > { %11754 = vst [vmem:[#allocation86_spill] sm:$0xff] %v9201_v13  ;;  %v9205_v11 = vpop.xlane.xlu1 %2471  ;;  %v6874_v61 = vpop.eup %6873  ;;  %v1355_v16 = vadd.f32 %v9118_v47, %v1136_v23  ;;  %v1140_v23 = vld [vmem:[%s8298_s26 + $0x318] sm:$0xff] }
 0x46f   : > { %v6876_v6 = vpop.eup %6875 }
 0x470   : > { %2613 = vadd.xlane.f32.xlu0 %v2406_v49  ;;  %v2156_v49 = vadd.f32 %v2028_v24, %v1352_v53  ;;  %v2031_v53 = vmul.f32 %v8998_v43, %v8812_v41  ;;  %v2158_v24 = vadd.f32 %v2030_v34, %v1354_v10  ;;  %v2413_v41 = vmul.f32 %v9050_v55, %v6874_v61 }
 0x471   : > { %2615 = vadd.xlane.f32.xlu1 %v2407_v3  ;;  %v9217_v19 = vpop.xlane.xlu0 %2473  ;;  %v1137_v3 = vld [vmem:[%s8298_s26 + $0x300] sm:$0xff]  ;;  %v2033_v10 = vmul.f32 %v8998_v43, %v8829_v25 }
 0x472   : > { %11755 = vst [vmem:[#allocation87_spill] sm:$0xff] %v9217_v19  ;;  %v9221_v30 = vpop.xlane.xlu1 %2475  ;;  %v1356_v35 = vadd.f32 %v9231_v39, %v1137_v3  ;;  %6885 = vtanh.f32 %v2156_v49  ;;  %v2159_v2 = vadd.f32 %v2031_v53, %v1355_v16  ;;  %v2034_v3 = vmul.f32 %v8998_v43, %v8835_v44 }
 0x473   : > { %6887 = vtanh.f32 %v2157_v32  ;;  %v1359_v32 = vadd.f32 %v9231_v39, %v1140_v23  ;;  %v2161_v53 = vadd.f32 %v2033_v10, %v1357_v40  ;;  %v1144_v23 = vld [vmem:[%s8298_s26 + $0x338] sm:$0xff] }
 0x474   : > { %2617 = vadd.xlane.f32.xlu0 %v2408_v54  ;;  %v2032_v54 = vmul.f32 %v8998_v43, %v8815_v17  ;;  %v6878_v15 = vpop.eup %6877  ;;  %v1358_v17 = vadd.f32 %v9231_v39, %v1139_v50  ;;  %6889 = vtanh.f32 %v2158_v24  ;;  %v2036_v50 = vmul.f32 %v8998_v43, %v8853_v33 }
 0x475   : > { %2619 = vadd.xlane.f32.xlu1 %v2409_v22  ;;  %v9233_v26 = vpop.xlane.xlu0 %2477  ;;  %v2412_v22 = vmul.f32 %v9050_v55, %v6872_v38  ;;  %v6880_v61 = vpop.eup %6879  ;;  %v2415_v25 = vmul.f32 %v9050_v55, %v6878_v15  ;;  %6891 = vtanh.f32 %v2159_v2  ;;  %v1361_v2 = vadd.f32 %v9231_v39, %v1142_v5  ;;  %v1146_v5 = vld [vmem:[%s8298_s26 + $0x348] sm:$0xff] }
 0x476   : > { %11756 = vst [vmem:[#allocation88_spill] sm:$0xff] %v9233_v26  ;;  %v9238_v27 = vpop.xlane.xlu1 %2479  ;;  %v2160_v34 = vadd.f32 %v2032_v54, %v1356_v35  ;;  %v6882_v16 = vpop.eup %6881  ;;  %v2035_v35 = vmul.f32 %v8998_v43, %v8850_v0  ;;  %v2162_v54 = vadd.f32 %v2034_v3, %v1358_v17  ;;  %v2037_v17 = vmul.f32 %v8998_v43, %v8868_v4 }
 0x477   : > { %v6884_v15 = vpop.eup %6883  ;;  %v2417_v0 = vmul.f32 %v9050_v55, %v6882_v16 }
 0x478   : > { %2621 = vadd.xlane.f32.xlu0 %v2410_v14  ;;  %v1141_v14 = vld [vmem:[%s8298_s26 + $0x320] sm:$0xff]  ;;  %6893 = vtanh.f32 %v2160_v34  ;;  %v2163_v10 = vadd.f32 %v2035_v35, %v1359_v32  ;;  %v2165_v35 = vadd.f32 %v2037_v17, %v1361_v2 }
 0x479   : > { %2623 = vadd.xlane.f32.xlu1 %v2411_v59  ;;  %v9247_v28 = vpop.xlane.xlu0 %2481  ;;  %v2414_v59 = vmul.f32 %v9050_v55, %v6876_v6  ;;  %v1360_v44 = vadd.f32 %v9231_v39, %v1141_v14  ;;  %6895 = vtanh.f32 %v2161_v53  ;;  %v2038_v14 = vmul.f32 %v8998_v43, %v8876_v51 }
 0x47a   : > { %11757 = vst [vmem:[#allocation89_spill] sm:$0xff] %v9247_v28  ;;  %v9252_v47 = vpop.xlane.xlu1 %2483  ;;  %6897 = vtanh.f32 %v2162_v54  ;;  %v1363_v53 = vadd.f32 %v9231_v39, %v1144_v23 }
 0x47b   : > { %11758 = vst [vmem:[#allocation90_spill] sm:$0xff] %v9252_v47  ;;  %v2164_v3 = vadd.f32 %v2036_v50, %v1360_v44  ;;  %6899 = vtanh.f32 %v2163_v10  ;;  %v2039_v44 = vmul.f32 %v8998_v43, %v8893_v52  ;;  %v1365_v10 = vadd.f32 %v9231_v39, %v1146_v5 }
 0x47c   : > { %2625 = vadd.xlane.f32.xlu0 %v2412_v22  ;;  %v1143_v22 = vld [vmem:[%s8298_s26 + $0x330] sm:$0xff]  ;;  %v6886_v40 = vpop.eup %6885 }
 0x47d   : > { %2627 = vadd.xlane.f32.xlu1 %v2413_v41  ;;  %v9261_v49 = vpop.xlane.xlu0 %2485  ;;  %v2416_v41 = vmul.f32 %v9050_v55, %v6880_v61  ;;  %v1362_v33 = vadd.f32 %v9231_v39, %v1143_v22  ;;  %v6888_v16 = vpop.eup %6887  ;;  %v2419_v4 = vmul.f32 %v9050_v55, %v6886_v40  ;;  %6901 = vtanh.f32 %v2164_v3  ;;  %v1149_v3 = vld [vmem:[%s8298_s26 + $0x360] sm:$0xff] }
 0x47e   : > { %11759 = vst [vmem:[#allocation91_spill] sm:$0xff] %v9261_v49  ;;  %v9266_v38 = vpop.xlane.xlu1 %2487  ;;  %v6890_v32 = vpop.eup %6889  ;;  %v2040_v22 = vmul.f32 %v8998_v43, %v8896_v48  ;;  %6903 = vtanh.f32 %v2165_v35  ;;  %v2167_v17 = vadd.f32 %v2039_v44, %v1363_v53  ;;  %v1148_v48 = vld [vmem:[%s8298_s26 + $0x358] sm:$0xff]  ;;  %v1368_v44 = vadd.f32 %v9231_v39, %v1149_v3  ;;  %v1159_v49 = vld [vmem:[%s8298_s26 + $0x3b0] sm:$0xff] }
 0x47f   : > { %11760 = vst [vmem:[#allocation93_spill] sm:$0xff] %v9266_v38  ;;  %v2166_v50 = vadd.f32 %v2038_v14, %v1362_v33  ;;  %v6892_v40 = vpop.eup %6891  ;;  %v2421_v52 = vmul.f32 %v9050_v55, %v6890_v32  ;;  %v2041_v33 = vmul.f32 %v8998_v43, %v8910_v58  ;;  %v1367_v35 = vadd.f32 %v9231_v39, %v1148_v48 }
 0x480   : > { %2629 = vadd.xlane.f32.xlu0 %v2414_v59  ;;  %v1145_v59 = vld [vmem:[%s8298_s26 + $0x340] sm:$0xff] }
 0x481   : > { %2631 = vadd.xlane.f32.xlu1 %v2415_v25  ;;  %v9275_v24 = vpop.xlane.xlu0 %2489  ;;  %v2418_v25 = vmul.f32 %v9050_v55, %v6884_v15  ;;  %v1364_v51 = vadd.f32 %v9231_v39, %v1145_v59  ;;  %6905 = vtanh.f32 %v2166_v50  ;;  %v2169_v5 = vadd.f32 %v2041_v33, %v1365_v10  ;;  %v1150_v50 = vld [vmem:[%s8298_s26 + $0x368] sm:$0xff] }
 0x482   : > { %11761 = vst [vmem:[#allocation94_spill] sm:$0xff] %v9275_v24  ;;  %v9280_v6 = vpop.xlane.xlu1 %2491  ;;  %v6894_v2 = vpop.eup %6893  ;;  %6907 = vtanh.f32 %v2167_v17 }
 0x483   : > { %11762 = vst [vmem:[#allocation95_spill] sm:$0xff] %v9280_v6  ;;  %v2168_v59 = vadd.f32 %v2040_v22, %v1364_v51  ;;  %v6896_v32 = vpop.eup %6895  ;;  %v2423_v58 = vmul.f32 %v9050_v55, %v6894_v2  ;;  %v2043_v51 = vmul.f32 %v8998_v43, %v8931_v36  ;;  %v1219_v22 = vcombine.high %v9101_v63, %v9101_v63 }
 0x484   : > { %2633 = vadd.xlane.f32.xlu0 %v2416_v41  ;;  %v1147_v41 = vld [vmem:[%s8298_s26 + $0x350] sm:$0xff]  ;;  %v6898_v53 = vpop.eup %6897  ;;  %v2424_v2 = vmul.f32 %v9050_v55, %v6896_v32  ;;  %v1369_v63 = vadd.f32 %v9231_v39, %v1150_v50 }
 0x485   : > { %2635 = vadd.xlane.f32.xlu1 %v2417_v0  ;;  %v9289_v34 = vpop.xlane.xlu0 %2493  ;;  %v2420_v0 = vmul.f32 %v9050_v55, %v6888_v16  ;;  %v1366_v23 = vadd.f32 %v9231_v39, %v1147_v41  ;;  %6909 = vtanh.f32 %v2168_v59  ;;  %v6900_v10 = vpop.eup %6899  ;;  %v2425_v36 = vmul.f32 %v9050_v55, %v6898_v53 }
 0x486   : > { %11763 = vst [vmem:[#allocation96_spill] sm:$0xff] %v9289_v34  ;;  %v9294_v61 = vpop.xlane.xlu1 %2495  ;;  %6911 = vtanh.f32 %v2169_v5  ;;  %v2171_v48 = vadd.f32 %v2043_v51, %v1367_v35  ;;  %v9348_v3 = vrot.slane %v1219_v22, %v8383_v1  ;;  %v2426_v35 = vmul.f32 %v9050_v55, %v6900_v10  ;;  %v11771_v22 = vld [vmem:[#allocation70_spill] sm:$0xff] }
 0x487   : > { %11764 = vst [vmem:[#allocation97_spill] sm:$0xff] %v9294_v61  ;;  %v6902_v17 = vpop.eup %6901  ;;  %v1157_v1 = vld [vmem:[%s8298_s26 + $0x3a0] sm:$0xff] }
 0x488   : > { %2637 = vadd.xlane.f32.xlu0 %v2418_v25  ;;  %v2042_v25 = vmul.f32 %v8998_v43, %v8916_v21  ;;  %v1151_v21 = vld [vmem:[%s8298_s26 + $0x370] sm:$0xff]  ;;  %v2427_v5 = vmul.f32 %v9050_v55, %v6902_v17 }
 0x489   : > { %2639 = vadd.xlane.f32.xlu1 %v2419_v4  ;;  %v9303_v54 = vpop.xlane.xlu0 %2497  ;;  %v2422_v4 = vmul.f32 %v9050_v55, %v6892_v40  ;;  %v2044_v40 = vmul.f32 %v8998_v43, %v8934_v20  ;;  %v1370_v33 = vadd.f32 %v9231_v39, %v1151_v21  ;;  %v1152_v20 = vld [vmem:[%s8298_s26 + $0x378] sm:$0xff] }
 0x48a   : > { %11765 = vst [vmem:[#allocation98_spill] sm:$0xff] %v9303_v54  ;;  %v9308_v15 = vpop.xlane.xlu1 %2499  ;;  %v1371_v50 = vadd.f32 %v9231_v39, %v1152_v20 }
 0x48c   : > { %2641 = vadd.xlane.f32.xlu0 %v2420_v0  ;;  %v2170_v0 = vadd.f32 %v2042_v25, %v1366_v23  ;;  %v2045_v23 = vmul.f32 %v8998_v43, %v8949_v56  ;;  %v2172_v25 = vadd.f32 %v2044_v40, %v1368_v44  ;;  %v6904_v56 = vpop.eup %6903  ;;  %v2047_v44 = vmul.f32 %v8998_v43, %v11771_v22  ;;  %v1154_v40 = vld [vmem:[%s8298_s26 + $0x388] sm:$0xff] }
 0x48d   : > { %2643 = vadd.xlane.f32.xlu1 %v2421_v52  ;;  %v9318_v14 = vpop.xlane.xlu0 %2501  ;;  %v6906_v51 = vpop.eup %6905 }
 0x48e   : > { %11766 = vst [vmem:[#allocation99_spill] sm:$0xff] %v9318_v14  ;;  %v9322_v16 = vpop.xlane.xlu1 %2503  ;;  %6913 = vtanh.f32 %v2170_v0  ;;  %v2173_v21 = vadd.f32 %v2045_v23, %v1369_v63  ;;  %v2428_v63 = vmul.f32 %v9050_v55, %v6904_v56  ;;  %v2429_v23 = vmul.f32 %v9050_v55, %v6906_v51 }
 0x48f   : > { %6915 = vtanh.f32 %v2171_v48  ;;  %v6908_v48 = vpop.eup %6907 }
 0x490   : > { %2645 = vadd.xlane.f32.xlu0 %v2422_v4  ;;  %v11769_v4 = vld [vmem:[#allocation69_spill] sm:$0xff]  ;;  %6917 = vtanh.f32 %v2172_v25  ;;  %v6910_v20 = vpop.eup %6909  ;;  %v11775_v25 = vld [vmem:[#allocation72_spill] sm:$0xff] }
 0x491   : > { %2647 = vadd.xlane.f32.xlu1 %v2423_v58  ;;  %v9334_v41 = vpop.xlane.xlu0 %2505  ;;  %v2046_v32 = vmul.f32 %v8998_v43, %v11769_v4  ;;  %v1153_v58 = vld [vmem:[%s8298_s26 + $0x380] sm:$0xff]  ;;  %v1155_v4 = vld [vmem:[%s8298_s26 + $0x390] sm:$0xff]  ;;  %6919 = vtanh.f32 %v2173_v21  ;;  %v6912_v21 = vpop.eup %6911 }
 0x492   : > { %11767 = vst [vmem:[#allocation100_spill] sm:$0xff] %v9334_v41  ;;  %v9338_v52 = vpop.xlane.xlu1 %2507  ;;  %v1372_v0 = vadd.f32 %v9348_v3, %v1153_v58  ;;  %v1373_v58 = vadd.f32 %v9348_v3, %v1154_v40 }
 0x493   : > { %v2174_v10 = vadd.f32 %v2046_v32, %v1370_v33  ;;  %v2049_v33 = vmul.f32 %v8998_v43, %v11775_v25  ;;  %v1374_v32 = vadd.f32 %v9348_v3, %v1155_v4 }
 0x494   : > { %2649 = vadd.xlane.f32.xlu0 %v2424_v2 }
 0x495   : > { %2651 = vadd.xlane.f32.xlu1 %v2425_v36  ;;  %v9350_v59 = vpop.xlane.xlu0 %2509  ;;  %v11773_v36 = vld [vmem:[#allocation71_spill] sm:$0xff]  ;;  %6921 = vtanh.f32 %v2174_v10  ;;  %v1376_v10 = vadd.f32 %v9348_v3, %v1157_v1 }
 0x496   : > { %11768 = vst [vmem:[#allocation101_spill] sm:$0xff] %v9350_v59  ;;  %v9355_v53 = vpop.xlane.xlu1 %2511  ;;  %v2048_v17 = vmul.f32 %v8998_v43, %v11773_v36  ;;  %v11777_v36 = vld [vmem:[#allocation73_spill] sm:$0xff] }
 0x497   : > { %11770 = vst [vmem:[#allocation102_spill] sm:$0xff] %v9355_v53  ;;  %v2050_v51 = vmul.f32 %v8998_v43, %v11777_v36  ;;  %v11780_v36 = vld [vmem:[#allocation74_spill] sm:$0xff] }
 0x498   : > { %2653 = vadd.xlane.f32.xlu0 %v2426_v35  ;;  %v2175_v35 = vadd.f32 %v2047_v44, %v1371_v50  ;;  %v2176_v56 = vadd.f32 %v2048_v17, %v1372_v0  ;;  %v2430_v50 = vmul.f32 %v9050_v55, %v6908_v48  ;;  %v2431_v44 = vmul.f32 %v9050_v55, %v6910_v20  ;;  %v6914_v4 = vpop.eup %6913  ;;  %v1158_v17 = vld [vmem:[%s8298_s26 + $0x3a8] sm:$0xff]  ;;  %v1165_v53 = vld [vmem:[%s8298_s26 + $0x3e0] sm:$0xff] }
 0x499   : > { %2655 = vadd.xlane.f32.xlu1 %v2427_v5  ;;  %v9364_v2 = vpop.xlane.xlu0 %2513  ;;  %v1156_v5 = vld [vmem:[%s8298_s26 + $0x398] sm:$0xff]  ;;  %v2051_v0 = vmul.f32 %v8998_v43, %v9022_v8  ;;  %v2178_v48 = vadd.f32 %v2050_v51, %v1374_v32  ;;  %v2052_v20 = vmul.f32 %v8998_v43, %v11780_v36  ;;  %v2433_v8 = vmul.f32 %v9050_v55, %v6914_v4 }
 0x49a   : > { %11772 = vst [vmem:[#allocation103_spill] sm:$0xff] %v9364_v2  ;;  %v9369_v39 = vpop.xlane.xlu1 %2515  ;;  %6923 = vtanh.f32 %v2175_v35  ;;  %v6916_v35 = vpop.eup %6915  ;;  %v1378_v51 = vadd.f32 %v9348_v3, %v1159_v49  ;;  %v11791_v2 = vld [vmem:[#allocation80_spill] sm:$0xff] }
 0x49b   : > { %11774 = vst [vmem:[#allocation69_spill] sm:$0xff] %v9369_v39  ;;  %6925 = vtanh.f32 %v2176_v56  ;;  %v6918_v1 = vpop.eup %6917  ;;  %v11782_v56 = vld [vmem:[#allocation75_spill] sm:$0xff]  ;;  %v1161_v39 = vld [vmem:[%s8298_s26 + $0x3c0] sm:$0xff] }
 0x49c   : > { %2657 = vadd.xlane.f32.xlu0 %v2428_v63  ;;  %v1375_v63 = vadd.f32 %v9348_v3, %v1156_v5  ;;  %v2053_v32 = vmul.f32 %v8998_v43, %v11782_v56 }
 0x49d   : > { %2659 = vadd.xlane.f32.xlu1 %v2429_v23  ;;  %v9378_v22 = vpop.xlane.xlu0 %2517  ;;  %v2177_v23 = vadd.f32 %v2049_v33, %v1373_v58  ;;  %v2432_v58 = vmul.f32 %v9050_v55, %v6912_v21  ;;  %v1377_v33 = vadd.f32 %v9348_v3, %v1158_v17  ;;  %v2180_v21 = vadd.f32 %v2052_v20, %v1376_v10  ;;  %v1162_v10 = vld [vmem:[%s8298_s26 + $0x3c8] sm:$0xff] }
 0x49e   : > { %11776 = vst [vmem:[#allocation70_spill] sm:$0xff] %v9378_v22  ;;  %v9383_v40 = vpop.xlane.xlu1 %2519  ;;  %v11784_v22 = vld [vmem:[#allocation76_spill] sm:$0xff] }
 0x49f   : > { %11778 = vst [vmem:[#allocation71_spill] sm:$0xff] %v9383_v40  ;;  %6927 = vtanh.f32 %v2177_v23  ;;  %v2054_v4 = vmul.f32 %v8998_v43, %v11784_v22  ;;  %v6920_v23 = vpop.eup %6919  ;;  %v1380_v22 = vadd.f32 %v9348_v3, %v1161_v39 }
 0x4a0   : > { %2661 = vadd.xlane.f32.xlu0 %v2430_v50  ;;  %v2179_v50 = vadd.f32 %v2051_v0, %v1375_v63  ;;  %6929 = vtanh.f32 %v2178_v48  ;;  %v2434_v63 = vmul.f32 %v9050_v55, %v6916_v35  ;;  %v2435_v0 = vmul.f32 %v9050_v55, %v6918_v1  ;;  %v6922_v49 = vpop.eup %6921  ;;  %v11787_v1 = vld [vmem:[#allocation78_spill] sm:$0xff] }
 0x4a1   : > { %2663 = vadd.xlane.f32.xlu1 %v2431_v44  ;;  %v9392_v25 = vpop.xlane.xlu0 %2521  ;;  %v1160_v44 = vld [vmem:[%s8298_s26 + $0x3b8] sm:$0xff]  ;;  %v2181_v48 = vadd.f32 %v2053_v32, %v1377_v33  ;;  %v2182_v35 = vadd.f32 %v2054_v4, %v1378_v51  ;;  %v2436_v33 = vmul.f32 %v9050_v55, %v6920_v23 }
 0x4a2   : > { %11779 = vst [vmem:[#allocation72_spill] sm:$0xff] %v9392_v25  ;;  %v9397_v5 = vpop.xlane.xlu1 %2523  ;;  %6931 = vtanh.f32 %v2179_v50 }
 0x4a3   : > { %11781 = vst [vmem:[#allocation73_spill] sm:$0xff] %v9397_v5  ;;  %6933 = vtanh.f32 %v2180_v21  ;;  %v11789_v21 = vld [vmem:[#allocation79_spill] sm:$0xff] }
 0x4a4   : > { %2665 = vadd.xlane.f32.xlu0 %v2432_v58  ;;  %v1379_v58 = vadd.f32 %v9348_v3, %v1160_v44  ;;  %v1163_v44 = vld [vmem:[%s8298_s26 + $0x3d0] sm:$0xff]  ;;  %v6924_v32 = vpop.eup %6923  ;;  %6935 = vtanh.f32 %v2181_v48 }
 0x4a5   : > { %2667 = vadd.xlane.f32.xlu1 %v2433_v8  ;;  %v9406_v36 = vpop.xlane.xlu0 %2525  ;;  %v9416_v8 = vld [vmem:[#allocation21] ss:$0 sm:$0xff]  ;;  %v6926_v39 = vpop.eup %6925  ;;  %v1382_v4 = vadd.f32 %v9348_v3, %v1163_v44  ;;  %6937 = vtanh.f32 %v2182_v35  ;;  %v1166_v35 = vld [vmem:[%s8298_s26 + $0x3e8] sm:$0xff] }
 0x4a6   : > { %11783 = vst [vmem:[#allocation74_spill] sm:$0xff] %v9406_v36  ;;  %v9411_v17 = vpop.xlane.xlu1 %2527  ;;  %v2055_v43 = vmul.f32 %v9416_v8, %v9062_v42  ;;  %v2056_v56 = vmul.f32 %v9416_v8, %v11787_v1  ;;  %v2437_v42 = vmul.f32 %v9050_v55, %v6922_v49  ;;  %v2057_v51 = vmul.f32 %v9416_v8, %v11789_v21  ;;  %v1164_v1 = vld [vmem:[%s8298_s26 + $0x3d8] sm:$0xff]  ;;  %v1167_v21 = vld [vmem:[%s8298_s26 + $0x3f0] sm:$0xff] }
 0x4a7   : > { %11785 = vst [vmem:[#allocation75_spill] sm:$0xff] %v9411_v17  ;;  %v2058_v49 = vmul.f32 %v9416_v8, %v11791_v2  ;;  %v1384_v2 = vadd.f32 %v9348_v3, %v1165_v53  ;;  %v1385_v53 = vadd.f32 %v9348_v3, %v1166_v35 }
 0x4a8   : > { %2669 = vadd.xlane.f32.xlu0 %v2434_v63  ;;  %v1381_v63 = vadd.f32 %v9348_v3, %v1162_v10  ;;  %v2184_v23 = vadd.f32 %v2056_v56, %v1380_v22  ;;  %v2059_v22 = vmul.f32 %v9416_v8, %v9105_v46 }
 0x4a9   : > { %2671 = vadd.xlane.f32.xlu1 %v2435_v0  ;;  %v9422_v20 = vpop.xlane.xlu0 %2529  ;;  %v2183_v0 = vadd.f32 %v2055_v43, %v1379_v58  ;;  %v2438_v58 = vmul.f32 %v9050_v55, %v6924_v32  ;;  %v6928_v48 = vpop.eup %6927  ;;  %v2439_v43 = vmul.f32 %v9050_v55, %v6926_v39  ;;  %v2186_v32 = vadd.f32 %v2058_v49, %v1382_v4 }
 0x4aa   : > { %11786 = vst [vmem:[#allocation76_spill] sm:$0xff] %v9422_v20  ;;  %v9427_v50 = vpop.xlane.xlu1 %2531  ;;  %v6930_v44 = vpop.eup %6929  ;;  %v2060_v39 = vmul.f32 %v9416_v8, %v9108_v29  ;;  %v2061_v4 = vmul.f32 %v9416_v8, %v9126_v37  ;;  %v1386_v29 = vadd.f32 %v9348_v3, %v1167_v21 }
 0x4ab   : > { %11788 = vst [vmem:[#allocation78_spill] sm:$0xff] %v9427_v50  ;;  %6939 = vtanh.f32 %v2183_v0  ;;  %v2441_v46 = vmul.f32 %v9050_v55, %v6930_v44 }
 0x4ac   : > { %2673 = vadd.xlane.f32.xlu0 %v2436_v33  ;;  %v1383_v33 = vadd.f32 %v9348_v3, %v1164_v1  ;;  %6941 = vtanh.f32 %v2184_v23  ;;  %v6932_v0 = vpop.eup %6931  ;;  %v2188_v49 = vadd.f32 %v2060_v39, %v1384_v2  ;;  %v2189_v37 = vadd.f32 %v2061_v4, %v1385_v53 }
 0x4ad   : > { %2675 = vadd.xlane.f32.xlu1 %v2437_v42  ;;  %v9436_v47 = vpop.xlane.xlu0 %2533  ;;  %v2185_v42 = vadd.f32 %v2057_v51, %v1381_v63  ;;  %v2440_v63 = vmul.f32 %v9050_v55, %v6928_v48  ;;  %v6934_v51 = vpop.eup %6933  ;;  %v1168_v55 = vld [vmem:[%s8298_s26 + $0x3f8] sm:$0xff]  ;;  %s3957_s26 = scalar_lea.vmem %s8312_s2, %s8373_s25 [#allocation12] }
 0x4ae   : > { %11790 = vst [vmem:[#allocation79_spill] sm:$0xff] %v9436_v47  ;;  %v9441_v10 = vpop.xlane.xlu1 %2535  ;;  %v2187_v1 = vadd.f32 %v2059_v22, %v1383_v33  ;;  %v1387_v35 = vadd.f32 %v9348_v3, %v1168_v55 }
 0x4af   : > { %11792 = vst [vmem:[#allocation80_spill] sm:$0xff] %v9441_v10  ;;  %6943 = vtanh.f32 %v2185_v42  ;;  %v6936_v42 = vpop.eup %6935 }
 0x4b0   : > { %2677 = vadd.xlane.f32.xlu0 %v2438_v58  ;;  %6945 = vtanh.f32 %v2186_v32  ;;  %v2062_v58 = vmul.f32 %v9416_v8, %v9132_v57  ;;  %v6938_v22 = vpop.eup %6937  ;;  %v2063_v32 = vmul.f32 %v9416_v8, %v9149_v9 }
 0x4b1   : > { %2679 = vadd.xlane.f32.xlu1 %v2439_v43  ;;  %v9450_v56 = vpop.xlane.xlu0 %2537  ;;  %v7218_v43 = vld [vmem:[#allocation22] ss:$0 sm:$0xff]  ;;  %6947 = vtanh.f32 %v2187_v1 }
 0x4b2   : > { %11793 = vst [vmem:[#allocation104_spill] sm:$0xff] %v9450_v56  ;;  %v9455_v28 = vpop.xlane.xlu1 %2539  ;;  %v2442_v44 = vmul.f32 %v7218_v43, %v6932_v0  ;;  %v2443_v33 = vmul.f32 %v7218_v43, %v6934_v51  ;;  %6949 = vtanh.f32 %v2188_v49  ;;  %v2190_v57 = vadd.f32 %v2062_v58, %v1386_v29 }
 0x4b3   : > { %11794 = vst [vmem:[#allocation105_spill] sm:$0xff] %v9455_v28  ;;  %v2444_v21 = vmul.f32 %v7218_v43, %v6936_v42  ;;  %v2445_v0 = vmul.f32 %v7218_v43, %v6938_v22  ;;  %6951 = vtanh.f32 %v2189_v37  ;;  %v2191_v51 = vadd.f32 %v2063_v32, %v1387_v35 }
 0x4b4   : > { %2681 = vadd.xlane.f32.xlu0 %v2440_v63  ;;  %6953 = vtanh.f32 %v2190_v57 }
 0x4b5   : > { %2683 = vadd.xlane.f32.xlu1 %v2441_v46  ;;  %v9463_v23 = vpop.xlane.xlu0 %2541  ;;  %v6940_v63 = vpop.eup %6939  ;;  %6955 = vtanh.f32 %v2191_v51 }
 0x4b6   : > { %11795 = vst [vmem:[#allocation106_spill] sm:$0xff] %v9463_v23  ;;  %v9468_v48 = vpop.xlane.xlu1 %2543  ;;  %v6942_v46 = vpop.eup %6941  ;;  %v2446_v9 = vmul.f32 %v7218_v43, %v6940_v63 }
 0x4b7   : > { %11796 = vst [vmem:[#allocation107_spill] sm:$0xff] %v9468_v48  ;;  %v2447_v1 = vmul.f32 %v7218_v43, %v6942_v46 }
 0x4b8   : > { %2685 = vadd.xlane.f32.xlu0 %v2442_v44 }
 0x4b9   : > { %2687 = vadd.xlane.f32.xlu1 %v2443_v33  ;;  %v9473_v2 = vpop.xlane.xlu0 %2545  ;;  %v6944_v8 = vpop.eup %6943 }
 0x4ba   : > { %11797 = vst [vmem:[#allocation108_spill] sm:$0xff] %v9473_v2  ;;  %v9475_v39 = vpop.xlane.xlu1 %2547  ;;  %v6946_v4 = vpop.eup %6945  ;;  %v2448_v58 = vmul.f32 %v7218_v43, %v6944_v8 }
 0x4bb   : > { %11798 = vst [vmem:[#allocation109_spill] sm:$0xff] %v9475_v39  ;;  %v6948_v55 = vpop.eup %6947  ;;  %v2449_v44 = vmul.f32 %v7218_v43, %v6946_v4 }
 0x4bc   : > { %2689 = vadd.xlane.f32.xlu0 %v2444_v21  ;;  %v6950_v42 = vpop.eup %6949  ;;  %v2450_v37 = vmul.f32 %v7218_v43, %v6948_v55 }
 0x4bd   : > { %2691 = vadd.xlane.f32.xlu1 %v2445_v0  ;;  %v9477_v53 = vpop.xlane.xlu0 %2549  ;;  %v6952_v35 = vpop.eup %6951  ;;  %v2451_v32 = vmul.f32 %v7218_v43, %v6950_v42 }
 0x4be   : > { %11799 = vst [vmem:[#allocation110_spill] sm:$0xff] %v9477_v53  ;;  %v9479_v3 = vpop.xlane.xlu1 %2551  ;;  %v6954_v57 = vpop.eup %6953  ;;  %v2452_v0 = vmul.f32 %v7218_v43, %v6952_v35 }
 0x4bf   : > { %11800 = vst [vmem:[#allocation111_spill] sm:$0xff] %v9479_v3  ;;  %v6956_v46 = vpop.eup %6955  ;;  %v2453_v51 = vmul.f32 %v7218_v43, %v6954_v57 }
 0x4c0   : > { %2693 = vadd.xlane.f32.xlu0 %v2446_v9 }
 0x4c1   : > { %2695 = vadd.xlane.f32.xlu1 %v2447_v1  ;;  %v9481_v29 = vpop.xlane.xlu0 %2553  ;;  %v2454_v1 = vmul.f32 %v7218_v43, %v6956_v46 }
 0x4c2   : > { %11801 = vst [vmem:[#allocation112_spill] sm:$0xff] %v9481_v29  ;;  %v9483_v49 = vpop.xlane.xlu1 %2555 }
 0x4c3   : > { %11802 = vst [vmem:[#allocation113_spill] sm:$0xff] %v9483_v49 }
 0x4c4   : > { %2697 = vadd.xlane.f32.xlu0 %v2448_v58 }
 0x4c5   : > { %2699 = vadd.xlane.f32.xlu1 %v2449_v44  ;;  %v9485_v33 = vpop.xlane.xlu0 %2557 }
 0x4c6   : > { %11803 = vst [vmem:[#allocation114_spill] sm:$0xff] %v9485_v33  ;;  %v9487_v22 = vpop.xlane.xlu1 %2559 }
 0x4c7   : > { %11804 = vst [vmem:[#allocation115_spill] sm:$0xff] %v9487_v22 }
 0x4c8   : > { %2701 = vadd.xlane.f32.xlu0 %v2450_v37 }
 0x4c9   : > { %2703 = vadd.xlane.f32.xlu1 %v2451_v32  ;;  %v9489_v21 = vpop.xlane.xlu0 %2561 }
 0x4ca   : > { %11805 = vst [vmem:[#allocation116_spill] sm:$0xff] %v9489_v21  ;;  %v9491_v63 = vpop.xlane.xlu1 %2563 }
 0x4cb   : > { %11806 = vst [vmem:[#allocation117_spill] sm:$0xff] %v9491_v63 }
 0x4cc   : > { %2705 = vadd.xlane.f32.xlu0 %v2452_v0 }
 0x4cd   : > { %2707 = vadd.xlane.f32.xlu1 %v2453_v51  ;;  %v9493_v9 = vpop.xlane.xlu0 %2565 }
 0x4ce   : > { %11807 = vst [vmem:[#allocation118_spill] sm:$0xff] %v9493_v9  ;;  %v9495_v8 = vpop.xlane.xlu1 %2567 }
 0x4cf   : > { %11808 = vst [vmem:[#allocation119_spill] sm:$0xff] %v9495_v8 }
 0x4d0   : > { %2709 = vadd.xlane.f32.xlu0 %v2454_v1 }
 0x4d1   : > { %v9497_v4 = vpop.xlane.xlu0 %2569 }
 0x4d2   : > { %11809 = vst [vmem:[#allocation120_spill] sm:$0xff] %v9497_v4  ;;  %v9499_v58 = vpop.xlane.xlu1 %2571 }
 0x4d3   : > { %11810 = vst [vmem:[#allocation121_spill] sm:$0xff] %v9499_v58 }
 0x4d5   : > { %v9501_v55 = vpop.xlane.xlu0 %2573 }
 0x4d6   : > { %11811 = vst [vmem:[#allocation122_spill] sm:$0xff] %v9501_v55  ;;  %v9503_v44 = vpop.xlane.xlu1 %2575 }
 0x4d7   : > { %11812 = vst [vmem:[#allocation123_spill] sm:$0xff] %v9503_v44 }
 0x4d9   : > { %v9505_v42 = vpop.xlane.xlu0 %2577 }
 0x4da   : > { %11813 = vst [vmem:[#allocation124_spill] sm:$0xff] %v9505_v42  ;;  %v9507_v37 = vpop.xlane.xlu1 %2579 }
 0x4db   : > { %11814 = vst [vmem:[#allocation125_spill] sm:$0xff] %v9507_v37 }
 0x4dd   : > { %v9509_v35 = vpop.xlane.xlu0 %2581 }
 0x4de   : > { %11815 = vst [vmem:[#allocation126_spill] sm:$0xff] %v9509_v35  ;;  %v9511_v32 = vpop.xlane.xlu1 %2583 }
 0x4df   : > { %11816 = vst [vmem:[#allocation127_spill] sm:$0xff] %v9511_v32 }
 0x4e1   : > { %v9513_v57 = vpop.xlane.xlu0 %2585 }
 0x4e2   : > { %11817 = vst [vmem:[#allocation128_spill] sm:$0xff] %v9513_v57  ;;  %v9515_v43 = vpop.xlane.xlu1 %2587 }
 0x4e3   : > { %11818 = vst [vmem:[#allocation129_spill] sm:$0xff] %v9515_v43 }
 0x4e5   : > { %v9517_v0 = vpop.xlane.xlu0 %2589 }
 0x4e6   : > { %11819 = vst [vmem:[#allocation130_spill] sm:$0xff] %v9517_v0  ;;  %v9519_v46 = vpop.xlane.xlu1 %2591 }
 0x4e7   : > { %11820 = vst [vmem:[#allocation131_spill] sm:$0xff] %v9519_v46 }
 0x4e9   : > { %v9521_v51 = vpop.xlane.xlu0 %2593 }
 0x4ea   : > { %11821 = vst [vmem:[#allocation132_spill] sm:$0xff] %v9521_v51  ;;  %v9523_v1 = vpop.xlane.xlu1 %2595 }
 0x4eb   : > { %11822 = vst [vmem:[#allocation133_spill] sm:$0xff] %v9523_v1 }
 0x4ed   : > { %v9525_v53 = vpop.xlane.xlu0 %2597 }
 0x4ee   : > { %11823 = vst [vmem:[#allocation134_spill] sm:$0xff] %v9525_v53  ;;  %v9527_v42 = vpop.xlane.xlu1 %2599 }
 0x4ef   : > { %11824 = vst [vmem:[#allocation135_spill] sm:$0xff] %v9527_v42 }
 0x4f1   : > { %v9529_v37 = vpop.xlane.xlu0 %2601 }
 0x4f2   : > { %11825 = vst [vmem:[#allocation136_spill] sm:$0xff] %v9529_v37  ;;  %v9531_v35 = vpop.xlane.xlu1 %2603 }
 0x4f3   : > { %11826 = vst [vmem:[#allocation137_spill] sm:$0xff] %v9531_v35 }
 0x4f5   : > { %v9533_v44 = vpop.xlane.xlu0 %2605 }
 0x4f6   : > { %11827 = vst [vmem:[#allocation138_spill] sm:$0xff] %v9533_v44  ;;  %v9535_v55 = vpop.xlane.xlu1 %2607 }
 0x4f7   : > { %11828 = vst [vmem:[#allocation139_spill] sm:$0xff] %v9535_v55  ;;  %v11839_v55 = vlaneseq }
 0x4f9   : > { %v9537_v58 = vpop.xlane.xlu0 %2609 }
 0x4fa   : > { %11829 = vst [vmem:[#allocation140_spill] sm:$0xff] %v9537_v58  ;;  %v9539_v39 = vpop.xlane.xlu1 %2611  ;;  %v9558_v58 = vand.u32 127, %v11839_v55 }
 0x4fb   : > { %11830 = vst [vmem:[#allocation141_spill] sm:$0xff] %v9539_v39 }
 0x4fc   : > { %v2845_v39 = vadd.s32 4294967288, %v9558_v58  ;;  %v2859_v55 = vadd.s32 4294967272, %v9558_v58  ;;  %v2873_v32 = vadd.s32 4294967256, %v9558_v58  ;;  %v2894_v2 = vadd.s32 4294967232, %v9558_v58 }
 0x4fd   : > { %v9541_v46 = vpop.xlane.xlu0 %2613 }
 0x4fe   : > { %11831 = vst [vmem:[#allocation142_spill] sm:$0xff] %v9541_v46  ;;  %v9543_v51 = vpop.xlane.xlu1 %2615 }
 0x4ff   : > { %11832 = vst [vmem:[#allocation143_spill] sm:$0xff] %v9543_v51 }
 0x501   : > { %v9545_v1 = vpop.xlane.xlu0 %2617 }
 0x502   : > { %11833 = vst [vmem:[#allocation144_spill] sm:$0xff] %v9545_v1  ;;  %v9547_v53 = vpop.xlane.xlu1 %2619  ;;  %v11842_v1 = vld [vmem:[#allocation61_spill] sm:$0xff] }
 0x503   : > { %11834 = vst [vmem:[#allocation145_spill] sm:$0xff] %v9547_v53  ;;  %v9566_v0 = vsub.s32 %v2845_v39, %v11842_v1  ;;  %v9591_v43 = vsub.s32 %v2859_v55, %v11842_v1 }
 0x505   : > { %v9549_v42 = vpop.xlane.xlu0 %2621 }
 0x506   : > { %11835 = vst [vmem:[#allocation146_spill] sm:$0xff] %v9549_v42  ;;  %v9551_v37 = vpop.xlane.xlu1 %2623 }
 0x507   : > { %11836 = vst [vmem:[#allocation147_spill] sm:$0xff] %v9551_v37  ;;  %v2852_v37 = vadd.s32 4294967280, %v9558_v58 }
 0x509   : > { %v9553_v35 = vpop.xlane.xlu0 %2625  ;;  %v9584_v39 = vsub.s32 %v2852_v37, %v11842_v1  ;;  %v2957_v37 = vrot.slane %v9275_v24, %v9566_v0 }
 0x50a   : > { %11837 = vst [vmem:[#allocation148_spill] sm:$0xff] %v9553_v35  ;;  %v9555_v44 = vpop.xlane.xlu1 %2627  ;;  %v2866_v35 = vadd.s32 4294967264, %v9558_v58 }
 0x50b   : > { %11838 = vst [vmem:[#allocation149_spill] sm:$0xff] %v9555_v44  ;;  %v9575_v44 = vsub.s32 %v9558_v58, %v11842_v1  ;;  %v2856_v55 = vrot.slane %v9158_v45, %v9584_v39  ;;  %v2962_v24 = vrot.slane %v9280_v6, %v9584_v39 }
 0x50c   : > { %v9595_v4 = vsub.s32 %v2866_v35, %v11842_v1  ;;  %v2901_v35 = vadd.s32 4294967224, %v9558_v58 }
 0x50d   : > { %v9561_v46 = vpop.xlane.xlu0 %2629  ;;  %v2953_v8 = vrot.slane %v9266_v38, %v9575_v44  ;;  %v2967_v38 = vrot.slane %v9289_v34, %v9591_v43 }
 0x50e   : > { %11840 = vst [vmem:[#allocation150_spill] sm:$0xff] %v9561_v46  ;;  %v9563_v51 = vpop.xlane.xlu1 %2631  ;;  %v2972_v6 = vrot.slane %v9294_v61, %v9595_v4 }
 0x50f   : > { %11841 = vst [vmem:[#allocation151_spill] sm:$0xff] %v9563_v51  ;;  %v2849_v51 = vrot.slane %v9163_v7, %v9566_v0  ;;  %v2880_v7 = vadd.s32 4294967248, %v9558_v58  ;;  %v2958_v57 = vsel %vm2850_vm2, %v2957_v37, %v2953_v8  ;;  %v3036_v8 = vrot.slane %v9392_v25, %v9566_v0 }
 0x510   : > { %v2963_v34 = vsel %vm2857_vm3, %v2962_v24, %v2958_v57  ;;  %v2922_v57 = vadd.s32 4294967200, %v9558_v58 }
 0x511   : > { %v9568_v53 = vpop.xlane.xlu0 %2633 }
 0x512   : > { %11843 = vst [vmem:[#allocation61_spill] sm:$0xff] %v9568_v53  ;;  %v9571_v42 = vpop.xlane.xlu1 %2635 }
 0x513   : > { %11844 = vst [vmem:[#allocation152_spill] sm:$0xff] %v9571_v42  ;;  %v2844_v42 = vrot.slane %v9144_v62, %v9575_v44  ;;  %v2887_v62 = vadd.s32 4294967240, %v9558_v58 }
 0x515   : > { %v9581_v46 = vpop.xlane.xlu0 %2637 }
 0x516   : > { %11845 = vst [vmem:[#allocation153_spill] sm:$0xff] %v9581_v46  ;;  %v9586_v53 = vpop.xlane.xlu1 %2639  ;;  %v2851_v46 = vsel %vm2850_vm2, %v2849_v51, %v2844_v42  ;;  %v2863_v42 = vrot.slane %v9172_v31, %v9591_v43  ;;  %v9615_v51 = vsub.s32 %v2873_v32, %v11842_v1  ;;  %v9627_v31 = vsub.s32 %v2887_v62, %v11842_v1 }
 0x517   : > { %11846 = vst [vmem:[#allocation154_spill] sm:$0xff] %v9586_v53  ;;  %v2858_v45 = vsel %vm2857_vm3, %v2856_v55, %v2851_v46  ;;  %v2908_v32 = vadd.s32 4294967216, %v9558_v58  ;;  %v9634_v46 = vsub.s32 %v2894_v2, %v11842_v1  ;;  %v2870_v55 = vrot.slane %v9177_v60, %v9595_v4 }
 0x518   : > { %v2865_v62 = vsel %vm2864_vm4, %v2863_v42, %v2858_v45  ;;  %v2877_v2 = vrot.slane %v9186_v18, %v9615_v51  ;;  %v2977_v25 = vrot.slane %v9303_v54, %v9615_v51  ;;  %v3032_v45 = vrot.slane %v9383_v40, %v9575_v44 }
 0x519   : > { %v9602_v53 = vpop.xlane.xlu0 %2641  ;;  %v9657_v42 = vsub.s32 %v2908_v32, %v11842_v1  ;;  %v3041_v18 = vrot.slane %v9397_v5, %v9584_v39  ;;  %v3046_v32 = vrot.slane %v9406_v36, %v9591_v43  ;;  %v2987_v36 = vrot.slane %v9318_v14, %v9627_v31 }
 0x51a   : > { %11847 = vst [vmem:[#allocation155_spill] sm:$0xff] %v9602_v53  ;;  %v9610_v48 = vpop.xlane.xlu1 %2643  ;;  %v9621_v53 = vsub.s32 %v2880_v7, %v11842_v1  ;;  %v9637_v7 = vsub.s32 %v2901_v35, %v11842_v1  ;;  %v2968_v35 = vsel %vm2864_vm4, %v2967_v38, %v2963_v34  ;;  %v2929_v38 = vadd.s32 4294967192, %v9558_v58 }
 0x51b   : > { %11848 = vst [vmem:[#allocation156_spill] sm:$0xff] %v9610_v48  ;;  %v2915_v48 = vadd.s32 4294967208, %v9558_v58  ;;  %v2936_v34 = vadd.s32 4294967184, %v9558_v58  ;;  %v3037_v54 = vsel %vm2850_vm2, %v3036_v8, %v3032_v45  ;;  %v2973_v5 = vsel %vm2871_vm5, %v2972_v6, %v2968_v35 }
 0x51c   : > { %v2884_v60 = vrot.slane %v9191_v12, %v9621_v53  ;;  %v2891_v8 = vrot.slane %v9201_v13, %v9627_v31  ;;  %v2978_v45 = vsel %vm2878_vm6, %v2977_v25, %v2973_v5  ;;  %v3042_v6 = vsel %vm2857_vm3, %v3041_v18, %v3037_v54 }
 0x51d   : > { %v9631_v9 = vpop.xlane.xlu0 %2645  ;;  %v9660_v24 = vsub.s32 %v2915_v48, %v11842_v1  ;;  %v2872_v48 = vsel %vm2871_vm5, %v2870_v55, %v2865_v62  ;;  %v9687_v62 = vsub.s32 %v2922_v57, %v11842_v1  ;;  %v3051_v55 = vrot.slane %v9411_v17, %v9595_v4 }
 0x51e   : > { %11849 = vst [vmem:[#allocation157_spill] sm:$0xff] %v9631_v9  ;;  %v9641_v37 = vpop.xlane.xlu1 %2647  ;;  %v2982_v9 = vrot.slane %v9308_v15, %v9621_v53  ;;  %v3047_v25 = vsel %vm2864_vm4, %v3046_v32, %v3042_v6  ;;  %v3056_v5 = vrot.slane %v9422_v20, %v9615_v51  ;;  %v2898_v54 = vrot.slane %v9205_v11, %v9634_v46 }
 0x51f   : > { %11850 = vst [vmem:[#allocation158_spill] sm:$0xff] %v9641_v37  ;;  %v2879_v37 = vsel %vm2878_vm6, %v2877_v2, %v2872_v48  ;;  %v9695_v2 = vsub.s32 %v2929_v38, %v11842_v1  ;;  %v9698_v48 = vsub.s32 %v2936_v34, %v11842_v1  ;;  %v3115_v38 = vrot.slane %v9481_v29, %v9566_v0 }
 0x520   : > { %v2886_v18 = vsel %vm2885_vm7, %v2884_v60, %v2879_v37  ;;  %v2983_v14 = vsel %vm2885_vm7, %v2982_v9, %v2978_v45  ;;  %v2905_v32 = vrot.slane %v9217_v19, %v9637_v7  ;;  %v2992_v20 = vrot.slane %v9322_v16, %v9634_v46 }
 0x521   : > { %v9665_v61 = vpop.xlane.xlu0 %2649  ;;  %v2893_v34 = vsel %vm2892_vm8, %v2891_v8, %v2886_v18  ;;  %v2988_v6 = vsel %vm2892_vm8, %v2987_v36, %v2983_v14  ;;  %v2997_v60 = vrot.slane %v9334_v41, %v9637_v7  ;;  %v3052_v9 = vsel %vm2871_vm5, %v3051_v55, %v3047_v25 }
 0x522   : > { %11851 = vst [vmem:[#allocation159_spill] sm:$0xff] %v9665_v61  ;;  %v9672_v40 = vpop.xlane.xlu1 %2651  ;;  %v3061_v37 = vrot.slane %v9427_v50, %v9621_v53  ;;  %v3111_v8 = vrot.slane %v9479_v3, %v9575_v44  ;;  %v2943_v18 = vadd.s32 4294967176, %v9558_v58  ;;  %v3057_v14 = vsel %vm2878_vm6, %v3056_v5, %v3052_v9  ;;  %v11880_v50 = vld [vmem:[#allocation109_spill] sm:$0xff] }
 0x523   : > { %11852 = vst [vmem:[#allocation160_spill] sm:$0xff] %v9672_v40  ;;  %v3066_v36 = vrot.slane %v9436_v47, %v9627_v31  ;;  %v3120_v29 = vrot.slane %v9483_v49, %v9584_v39  ;;  %v2900_v55 = vsel %vm2899_vm9, %v2898_v54, %v2893_v34  ;;  %v2912_v25 = vrot.slane %v9221_v30, %v9657_v42  ;;  %v11871_v49 = vld [vmem:[#allocation119_spill] sm:$0xff] }
 0x524   : > { %v3116_v19 = vsel %vm2850_vm2, %v3115_v38, %v3111_v8  ;;  %v3125_v58 = vrot.slane %v9485_v33, %v9591_v43  ;;  %v2907_v5 = vsel %vm2906_vm10, %v2905_v32, %v2900_v55  ;;  %v2919_v9 = vrot.slane %v9233_v26, %v9660_v24 }
 0x525   : > { %v9692_v35 = vpop.xlane.xlu0 %2653  ;;  %v2993_v47 = vsel %vm2899_vm9, %v2992_v20, %v2988_v6  ;;  %v3002_v13 = vrot.slane %v9338_v52, %v9657_v42  ;;  %v3007_v34 = vrot.slane %v9350_v59, %v9660_v24  ;;  %v3062_v38 = vsel %vm2885_vm7, %v3061_v37, %v3057_v14  ;;  %v11860_v59 = vld [vmem:[#allocation102_spill] sm:$0xff] }
 0x526   : > { %11853 = vst [vmem:[#allocation161_spill] sm:$0xff] %v9692_v35  ;;  %v9703_v57 = vpop.xlane.xlu1 %2655  ;;  %v2998_v54 = vsel %vm2906_vm10, %v2997_v60, %v2993_v47  ;;  %v3071_v8 = vrot.slane %v9441_v10, %v9634_v46  ;;  %v3067_v32 = vsel %vm2892_vm8, %v3066_v36, %v3062_v38  ;;  %v3076_v20 = vrot.slane %v9450_v56, %v9637_v7  ;;  %v11859_v56 = vld [vmem:[#allocation89_spill] sm:$0xff] }
 0x527   : > { %11854 = vst [vmem:[#allocation162_spill] sm:$0xff] %v9703_v57  ;;  %v3121_v6 = vsel %vm2857_vm3, %v3120_v29, %v3116_v19  ;;  %v3130_v47 = vrot.slane %v9487_v22, %v9595_v4  ;;  %v2914_v37 = vsel %vm2913_vm11, %v2912_v25, %v2907_v5  ;;  %v2926_v14 = vrot.slane %v9238_v27, %v9687_v62  ;;  %v11861_v5 = vld [vmem:[#allocation103_spill] sm:$0xff] }
 0x528   : > { %v3126_v55 = vsel %vm2864_vm4, %v3125_v58, %v3121_v6  ;;  %v3135_v36 = vrot.slane %v9489_v21, %v9615_v51  ;;  %v2921_v38 = vsel %vm2920_vm12, %v2919_v9, %v2914_v37  ;;  %v2933_v19 = vrot.slane %v11859_v56, %v9695_v2  ;;  %v11866_v56 = vld [vmem:[#allocation69_spill] sm:$0xff] }
 0x529   : > { %v9724_v45 = vpop.xlane.xlu0 %2657  ;;  %v3003_v29 = vsel %vm2913_vm11, %v3002_v13, %v2998_v54  ;;  %v3012_v26 = vrot.slane %v11860_v59, %v9687_v62  ;;  %v3017_v22 = vrot.slane %v11861_v5, %v9695_v2  ;;  %v3072_v58 = vsel %vm2899_vm9, %v3071_v8, %v3067_v32  ;;  %v11864_v5 = vld [vmem:[#allocation118_spill] sm:$0xff] }
 0x52a   : > { %11855 = vst [vmem:[#allocation163_spill] sm:$0xff] %v9724_v45  ;;  %v9732_v41 = vpop.xlane.xlu1 %2659  ;;  %v3008_v25 = vsel %vm2920_vm12, %v3007_v34, %v3003_v29  ;;  %v3081_v6 = vrot.slane %v9455_v28, %v9657_v42  ;;  %v3077_v9 = vsel %vm2906_vm10, %v3076_v20, %v3072_v58  ;;  %v3086_v13 = vrot.slane %v9463_v23, %v9660_v24  ;;  %v11865_v23 = vld [vmem:[#allocation90_spill] sm:$0xff] }
 0x52b   : > { %11856 = vst [vmem:[#allocation164_spill] sm:$0xff] %v9732_v41  ;;  %v3131_v54 = vsel %vm2871_vm5, %v3130_v47, %v3126_v55  ;;  %v3140_v34 = vrot.slane %v9491_v63, %v9621_v53  ;;  %v2928_v29 = vsel %vm2927_vm13, %v2926_v14, %v2921_v38  ;;  %v9792_v8 = vsub.s32 %v2943_v18, %v11842_v1  ;;  %v11867_v1 = vld [vmem:[#allocation70_spill] sm:$0xff]  ;;  %v11868_v38 = vld [vmem:[#allocation128_spill] sm:$0xff] }
 0x52c   : > { %v3136_v32 = vsel %vm2878_vm6, %v3135_v36, %v3131_v54  ;;  %v3145_v20 = vrot.slane %v11864_v5, %v9627_v31  ;;  %v2935_v58 = vsel %vm2934_vm14, %v2933_v19, %v2928_v29  ;;  %v2940_v47 = vrot.slane %v11865_v23, %v9698_v48  ;;  %v11870_v29 = vld [vmem:[#allocation107_spill] sm:$0xff] }
 0x52d   : > { %v9752_v33 = vpop.xlane.xlu0 %2661  ;;  %v3013_v55 = vsel %vm2927_vm13, %v3012_v26, %v3008_v25  ;;  %v3022_v63 = vrot.slane %v11866_v56, %v9698_v48  ;;  %v3027_v18 = vrot.slane %v11867_v1, %v9792_v8  ;;  %v3082_v36 = vsel %vm2913_vm11, %v3081_v6, %v3077_v9  ;;  %v11873_v1 = vld [vmem:[#allocation108_spill] sm:$0xff] }
 0x52e   : > { %11857 = vst [vmem:[#allocation165_spill] sm:$0xff] %v9752_v33  ;;  %v9760_v60 = vpop.xlane.xlu1 %2663  ;;  %v3018_v14 = vsel %vm2934_vm14, %v3017_v22, %v3013_v55  ;;  %v3194_v54 = vrot.slane %v11868_v38, %v9566_v0  ;;  %v3087_v19 = vsel %vm2920_vm12, %v3086_v13, %v3082_v36  ;;  %v3091_v26 = vrot.slane %v11870_v29, %v9687_v62  ;;  %v11874_v38 = vld [vmem:[#allocation120_spill] sm:$0xff]  ;;  %v11875_v13 = vld [vmem:[#allocation127_spill] sm:$0xff] }
 0x52f   : > { %11858 = vst [vmem:[#allocation166_spill] sm:$0xff] %v9760_v60  ;;  %v3141_v25 = vsel %vm2885_vm7, %v3140_v34, %v3136_v32  ;;  %v3150_v22 = vrot.slane %v11871_v49, %v9634_v46  ;;  %v3096_v6 = vrot.slane %v11873_v1, %v9695_v2  ;;  %v3155_v3 = vrot.slane %v11874_v38, %v9637_v7  ;;  %v11876_v29 = vld [vmem:[#allocation91_spill] sm:$0xff]  ;;  %v11877_v32 = vld [vmem:[#allocation129_spill] sm:$0xff] }
 0x530   : > { %v3146_v9 = vsel %vm2892_vm8, %v3145_v20, %v3141_v25  ;;  %v3190_v36 = vrot.slane %v11875_v13, %v9575_v44  ;;  %v2947_v34 = vrot.slane %v11876_v29, %v9792_v8  ;;  %v3199_v49 = vrot.slane %v11877_v32, %v9584_v39  ;;  %v11878_v25 = vld [vmem:[#allocation130_spill] sm:$0xff]  ;;  %v11881_v32 = vld [vmem:[#allocation121_spill] sm:$0xff] }
 0x531   : > { %v9780_v21 = vpop.xlane.xlu0 %2665  ;;  %v2942_v28 = vsel %vm2941_vm15, %v2940_v47, %v2935_v58  ;;  %v3023_v1 = vsel %vm2941_vm15, %v3022_v63, %v3018_v14  ;;  %v3204_v38 = vrot.slane %v11878_v25, %v9591_v43  ;;  %v3092_v13 = vsel %vm2927_vm13, %v3091_v26, %v3087_v19  ;;  %v11884_v26 = vld [vmem:[#allocation122_spill] sm:$0xff] }
 0x532   : > { %11862 = vst [vmem:[#allocation102_spill] sm:$0xff] %v9780_v21  ;;  %v9788_v37 = vpop.xlane.xlu1 %2667  ;;  %v3195_v20 = vsel %vm2850_vm2, %v3194_v54, %v3190_v36  ;;  %v3101_v29 = vrot.slane %v11880_v50, %v9698_v48  ;;  %v3151_v17 = vsel %vm2899_vm9, %v3150_v22, %v3146_v9  ;;  %v3160_v56 = vrot.slane %v11881_v32, %v9657_v42  ;;  %v11883_v54 = vld [vmem:[#allocation144_spill] sm:$0xff]  ;;  %v11885_v9 = vld [vmem:[#allocation131_spill] sm:$0xff] }
 0x533   : > { %11863 = vst [vmem:[#allocation167_spill] sm:$0xff] %v9788_v37  ;;  %v3028_v63 = vsel %vm2948_vm0, %v3027_v18, %v3023_v1  ;;  %v3097_v47 = vsel %vm2934_vm14, %v3096_v6, %v3092_v13  ;;  %v3156_v14 = vsel %vm2906_vm10, %v3155_v3, %v3151_v17  ;;  %v3273_v36 = vrot.slane %v11883_v54, %v9566_v0  ;;  %v11886_v1 = vld [vmem:[#allocation132_spill] sm:$0xff]  ;;  %v11887_v17 = vld [vmem:[#allocation143_spill] sm:$0xff] }
 0x534   : > { %v2949_v19 = vsel %vm2948_vm0, %v2947_v34, %v2942_v28  ;;  %v3165_v25 = vrot.slane %v11884_v26, %v9660_v24  ;;  %v3200_v22 = vsel %vm2857_vm3, %v3199_v49, %v3195_v20  ;;  %v3209_v32 = vrot.slane %v11885_v9, %v9595_v4  ;;  %v11891_v54 = vld [vmem:[#allocation123_spill] sm:$0xff]  ;;  %v11892_v26 = vld [vmem:[#allocation146_spill] sm:$0xff] }
 0x535   : > { %v9809_v5 = vpop.xlane.xlu0 %2669  ;;  %v3205_v50 = vsel %vm2864_vm4, %v3204_v38, %v3200_v22  ;;  %v3214_v18 = vrot.slane %v11886_v1, %v9615_v51  ;;  %v3269_v3 = vrot.slane %v11887_v17, %v9575_v44  ;;  %v3352_v6 = vrot.slane %v9665_v61, %v9566_v0  ;;  %v11889_v38 = vld [vmem:[#allocation145_spill] sm:$0xff] }
 0x536   : > { %11869 = vst [vmem:[#allocation90_spill] sm:$0xff] %v9809_v5  ;;  %v9817_v55 = vpop.xlane.xlu1 %2671  ;;  %v9866_v13 = vsel %vm3503_vm1, %v3028_v63, %v2949_v19  ;;  %v9869_v49 = vsel %vm2941_vm15, %v3101_v29, %v3097_v47  ;;  %v3161_v34 = vsel %vm2913_vm11, %v3160_v56, %v3156_v14  ;;  %v3278_v20 = vrot.slane %v11889_v38, %v9584_v39  ;;  %v11893_v63 = vld [vmem:[#allocation158_spill] sm:$0xff]  ;;  %v11894_v47 = vld [vmem:[#allocation133_spill] sm:$0xff] }
 0x537   : > { %11872 = vst [vmem:[#allocation168_spill] sm:$0xff] %v9817_v55  ;;  %v3170_v1 = vrot.slane %v11891_v54, %v9687_v62  ;;  %v3274_v61 = vsel %vm2850_vm2, %v3273_v36, %v3269_v3  ;;  %v3283_v17 = vrot.slane %v11892_v26, %v9591_v43  ;;  %v3348_v19 = vrot.slane %v11893_v63, %v9575_v44  ;;  %v11895_v36 = vld [vmem:[#allocation134_spill] sm:$0xff] }
 0x538   : > { %v3166_v29 = vsel %vm2920_vm12, %v3165_v25, %v3161_v34  ;;  %v3210_v56 = vsel %vm2871_vm5, %v3209_v32, %v3205_v50  ;;  %v3219_v14 = vrot.slane %v11894_v47, %v9621_v53  ;;  %v3357_v38 = vrot.slane %v9672_v40, %v9584_v39  ;;  %v11897_v32 = vld [vmem:[#allocation147_spill] sm:$0xff] }
 0x539   : > { %v9835_v10 = vpop.xlane.xlu0 %2673  ;;  %v3215_v9 = vsel %vm2878_vm6, %v3214_v18, %v3210_v56  ;;  %v3224_v3 = vrot.slane %v11895_v36, %v9627_v31  ;;  %v3353_v26 = vsel %vm2850_vm2, %v3352_v6, %v3348_v19  ;;  %v3362_v63 = vrot.slane %v9692_v35, %v9591_v43  ;;  %v11899_v6 = vld [vmem:[#allocation110_spill] sm:$0xff]  ;;  %v11900_v36 = vld [vmem:[#allocation148_spill] sm:$0xff]  ;;  %v11901_v19 = vld [vmem:[#allocation135_spill] sm:$0xff] }
 0x53a   : > { %11879 = vst [vmem:[#allocation169_spill] sm:$0xff] %v9835_v10  ;;  %v9843_v58 = vpop.xlane.xlu1 %2675  ;;  %v3279_v50 = vsel %vm2857_vm3, %v3278_v20, %v3274_v61  ;;  %v3288_v25 = vrot.slane %v11897_v32, %v9595_v4  ;;  %v3293_v40 = vrot.slane %v11900_v36, %v9615_v51  ;;  %v3171_v20 = vsel %vm2927_vm13, %v3170_v1, %v3166_v29 }
 0x53b   : > { %11882 = vst [vmem:[#allocation170_spill] sm:$0xff] %v9843_v58  ;;  %v3284_v35 = vsel %vm2864_vm4, %v3283_v17, %v3279_v50  ;;  %v3229_v17 = vrot.slane %v11901_v19, %v9634_v46  ;;  %v3372_v36 = vrot.slane %v9724_v45, %v9615_v51 }
 0x53d   : > { %v9863_v28 = vpop.xlane.xlu0 %2677 }
 0x53e   : > { %11888 = vst [vmem:[#allocation171_spill] sm:$0xff] %v9863_v28  ;;  %v9874_v22 = vpop.xlane.xlu1 %2679 }
 0x53f   : > { %11890 = vst [vmem:[#allocation172_spill] sm:$0xff] %v9874_v22  ;;  %v3427_v34 = vrot.slane %v9874_v22, %v9575_v44  ;;  %v3358_v44 = vsel %vm2857_vm3, %v3357_v38, %v3353_v26  ;;  %v3220_v22 = vsel %vm2885_vm7, %v3219_v14, %v3215_v9  ;;  %v3289_v26 = vsel %vm2871_vm5, %v3288_v25, %v3284_v35  ;;  %v11903_v38 = vld [vmem:[#allocation149_spill] sm:$0xff]  ;;  %v11906_v35 = vld [vmem:[#allocation124_spill] sm:$0xff] }
 0x540   : > { %v3363_v50 = vsel %vm2864_vm4, %v3362_v63, %v3358_v44  ;;  %v3225_v1 = vsel %vm2892_vm8, %v3224_v3, %v3220_v22  ;;  %v3298_v29 = vrot.slane %v11903_v38, %v9621_v53  ;;  %v11905_v63 = vld [vmem:[#allocation150_spill] sm:$0xff]  ;;  %v3175_v3 = vrot.slane %v11906_v35, %v9695_v2 }
 0x541   : > { %v9895_v54 = vpop.xlane.xlu0 %2681 }
 0x542   : > { %11896 = vst [vmem:[#allocation133_spill] sm:$0xff] %v9895_v54  ;;  %v3431_v18 = vrot.slane %v9895_v54, %v9566_v0  ;;  %v9904_v56 = vpop.xlane.xlu1 %2683  ;;  %v3367_v0 = vrot.slane %v9703_v57, %v9595_v4 }
 0x543   : > { %11898 = vst [vmem:[#allocation147_spill] sm:$0xff] %v9904_v56  ;;  %v3436_v61 = vrot.slane %v9904_v56, %v9584_v39 }
 0x544   : > { %v3432_v54 = vsel %vm2850_vm2, %v3431_v18, %v3427_v34  ;;  %v3294_v34 = vsel %vm2878_vm6, %v3293_v40, %v3289_v26  ;;  %v3303_v18 = vrot.slane %v11905_v63, %v9627_v31  ;;  %v3368_v25 = vsel %vm2871_vm5, %v3367_v0, %v3363_v50  ;;  %v11907_v40 = vld [vmem:[#allocation125_spill] sm:$0xff]  ;;  %v11908_v63 = vld [vmem:[#allocation136_spill] sm:$0xff] }
 0x545   : > { %v9924_v39 = vpop.xlane.xlu0 %2685  ;;  %v3437_v44 = vsel %vm2857_vm3, %v3436_v61, %v3432_v54  ;;  %v3234_v45 = vrot.slane %v11908_v63, %v9637_v7  ;;  %v3373_v54 = vsel %vm2878_vm6, %v3372_v36, %v3368_v25  ;;  %v3230_v0 = vsel %vm2899_vm9, %v3229_v17, %v3225_v1  ;;  %v11912_v36 = vld [vmem:[#allocation61_spill] sm:$0xff] }
 0x546   : > { %11902 = vst [vmem:[#allocation135_spill] sm:$0xff] %v9924_v39  ;;  %v3441_v9 = vrot.slane %v9924_v39, %v9591_v43  ;;  %v9932_v14 = vpop.xlane.xlu1 %2687  ;;  %v3377_v43 = vrot.slane %v9732_v41, %v9621_v53  ;;  %v3299_v50 = vsel %vm2885_vm7, %v3298_v29, %v3294_v34  ;;  %v3313_v25 = vrot.slane %v11912_v36, %v9637_v7  ;;  %v11913_v1 = vld [vmem:[#allocation137_spill] sm:$0xff] }
 0x547   : > { %11904 = vst [vmem:[#allocation173_spill] sm:$0xff] %v9932_v14  ;;  %v3446_v22 = vrot.slane %v9932_v14, %v9595_v4  ;;  %v3382_v4 = vrot.slane %v9752_v33, %v9627_v31  ;;  %v11910_v14 = vld [vmem:[#allocation151_spill] sm:$0xff]  ;;  %v3304_v63 = vsel %vm2892_vm8, %v3303_v18, %v3299_v50  ;;  %v3239_v29 = vrot.slane %v11913_v1, %v9657_v42  ;;  %v11914_v50 = vld [vmem:[#allocation138_spill] sm:$0xff] }
 0x548   : > { %v3442_v39 = vsel %vm2864_vm4, %v3441_v9, %v3437_v44  ;;  %v3308_v9 = vrot.slane %v11910_v14, %v9634_v46  ;;  %v3378_v34 = vsel %vm2885_vm7, %v3377_v43, %v3373_v54  ;;  %v3235_v18 = vsel %vm2906_vm10, %v3234_v45, %v3230_v0  ;;  %v11916_v54 = vld [vmem:[#allocation152_spill] sm:$0xff] }
 0x549   : > { %v9953_v61 = vpop.xlane.xlu0 %2689  ;;  %v3447_v33 = vsel %vm2871_vm5, %v3446_v22, %v3442_v39  ;;  %v3244_v36 = vrot.slane %v11914_v50, %v9660_v24  ;;  %v3383_v39 = vsel %vm2892_vm8, %v3382_v4, %v3378_v34  ;;  %v11918_v4 = vld [vmem:[#allocation153_spill] sm:$0xff]  ;;  %vm3505_vm2 = vcmask 1042434   ;;  %v11943_v50 = vld [vmem:[#allocation68_spill] sm:$0xff] }
 0x54a   : > { %11909 = vst [vmem:[#allocation125_spill] sm:$0xff] %v9953_v61  ;;  %v3451_v44 = vrot.slane %v9953_v61, %v9615_v51  ;;  %v9961_v26 = vpop.xlane.xlu1 %2691  ;;  %v3387_v51 = vrot.slane %v9760_v60, %v9634_v46  ;;  %v3309_v43 = vsel %vm2899_vm9, %v3308_v9, %v3304_v63  ;;  %v3318_v60 = vrot.slane %v11916_v54, %v9657_v42  ;;  %v11963_v54 = vld [vmem:[#allocation84_spill] sm:$0xff] }
 0x54b   : > { %11911 = vst [vmem:[#allocation174_spill] sm:$0xff] %v9961_v26  ;;  %v3456_v17 = vrot.slane %v9961_v26, %v9621_v53  ;;  %v3392_v53 = vrot.slane %v9780_v21, %v9637_v7  ;;  %v3176_v26 = vsel %vm2934_vm14, %v3175_v3, %v3171_v20  ;;  %v3314_v0 = vsel %vm2906_vm10, %v3313_v25, %v3309_v43  ;;  %v11919_v43 = vld [vmem:[#allocation139_spill] sm:$0xff] }
 0x54c   : > { %v3452_v61 = vsel %vm2878_vm6, %v3451_v44, %v3447_v33  ;;  %v3323_v44 = vrot.slane %v11918_v4, %v9660_v24  ;;  %v3240_v63 = vsel %vm2913_vm11, %v3239_v29, %v3235_v18  ;;  %v3388_v3 = vsel %vm2899_vm9, %v3387_v51, %v3383_v39  ;;  %v11921_v29 = vld [vmem:[#allocation140_spill] sm:$0xff]  ;;  %v11922_v39 = vld [vmem:[#allocation154_spill] sm:$0xff] }
 0x54d   : > { %v9981_v22 = vpop.xlane.xlu0 %2693  ;;  %v3457_v34 = vsel %vm2885_vm7, %v3456_v17, %v3452_v61  ;;  %v3397_v9 = vrot.slane %v9788_v37, %v9657_v42  ;;  %v3245_v25 = vsel %vm2920_vm12, %v3244_v36, %v3240_v63  ;;  %v3393_v61 = vsel %vm2906_vm10, %v3392_v53, %v3388_v3  ;;  %v11924_v63 = vld [vmem:[#allocation155_spill] sm:$0xff] }
 0x54e   : > { %11915 = vst [vmem:[#allocation137_spill] sm:$0xff] %v9981_v22  ;;  %v3461_v33 = vrot.slane %v9981_v22, %v9627_v31  ;;  %v9989_v45 = vpop.xlane.xlu1 %2695  ;;  %v3249_v22 = vrot.slane %v11919_v43, %v9687_v62  ;;  %vm3507_vm3 = vcmask 1043459   ;;  %v3254_v51 = vrot.slane %v11921_v29, %v9695_v2 }
 0x54f   : > { %11917 = vst [vmem:[#allocation175_spill] sm:$0xff] %v9989_v45  ;;  %v3466_v20 = vrot.slane %v9989_v45, %v9634_v46  ;;  %v3402_v46 = vrot.slane %v9809_v5, %v9660_v24  ;;  %v3319_v18 = vsel %vm2913_vm11, %v3318_v60, %v3314_v0  ;;  %v3333_v3 = vrot.slane %v11924_v63, %v9695_v2  ;;  %v11925_v60 = vld [vmem:[#allocation126_spill] sm:$0xff] }
 0x550   : > { %v3462_v31 = vsel %vm2892_vm8, %v3461_v33, %v3457_v34  ;;  %v3328_v33 = vrot.slane %v11922_v39, %v9687_v62  ;;  %v3324_v53 = vsel %vm2920_vm12, %v3323_v44, %v3319_v18  ;;  %vm3509_vm4 = vcmask 1044484   ;;  %v11926_v18 = vld [vmem:[#allocation141_spill] sm:$0xff] }
 0x551   : > { %v10008_v17 = vpop.xlane.xlu0 %2697  ;;  %v3467_v45 = vsel %vm2899_vm9, %v3466_v20, %v3462_v31  ;;  %v3185_v0 = vrot.slane %v11925_v60, %v9792_v8  ;;  %v3398_v29 = vsel %vm2913_vm11, %v3397_v9, %v3393_v61  ;;  %v3250_v44 = vsel %vm2927_vm13, %v3249_v22, %v3245_v25  ;;  %v11928_v9 = vld [vmem:[#allocation142_spill] sm:$0xff] }
 0x552   : > { %11920 = vst [vmem:[#allocation139_spill] sm:$0xff] %v10008_v17  ;;  %v3471_v36 = vrot.slane %v10008_v17, %v9637_v7  ;;  %v10017_v34 = vpop.xlane.xlu1 %2699  ;;  %v3407_v7 = vrot.slane %v9817_v55, %v9687_v62  ;;  %v3259_v63 = vrot.slane %v11926_v18, %v9698_v48  ;;  %v3403_v20 = vsel %vm2920_vm12, %v3402_v46, %v3398_v29  ;;  %v11930_v46 = vld [vmem:[#allocation156_spill] sm:$0xff] }
 0x553   : > { %11923 = vst [vmem:[#allocation176_spill] sm:$0xff] %v10017_v34  ;;  %v3476_v4 = vrot.slane %v10017_v34, %v9657_v42  ;;  %v3412_v42 = vrot.slane %v9835_v10, %v9695_v2  ;;  %v3255_v34 = vsel %vm2934_vm14, %v3254_v51, %v3250_v44  ;;  %v3264_v61 = vrot.slane %v11928_v9, %v9792_v8  ;;  %v11931_v44 = vld [vmem:[#allocation157_spill] sm:$0xff] }
 0x554   : > { %v3472_v17 = vsel %vm2906_vm10, %v3471_v36, %v3467_v45  ;;  %v3329_v55 = vsel %vm2927_vm13, %v3328_v33, %v3324_v53  ;;  %v3338_v29 = vrot.slane %v11930_v46, %v9698_v48  ;;  %v3343_v9 = vrot.slane %v11931_v44, %v9792_v8 }
 0x555   : > { %v10037_v31 = vpop.xlane.xlu0 %2701  ;;  %v3334_v25 = vsel %vm2934_vm14, %v3333_v3, %v3329_v55  ;;  %v3477_v36 = vsel %vm2913_vm11, %v3476_v4, %v3472_v17  ;;  %v3408_v33 = vsel %vm2927_vm13, %v3407_v7, %v3403_v20  ;;  %v11932_v55 = vrot.slane %v11899_v6, %v9792_v8 }
 0x556   : > { %11927 = vst [vmem:[#allocation141_spill] sm:$0xff] %v10037_v31  ;;  %v3481_v22 = vrot.slane %v10037_v31, %v9660_v24  ;;  %v10045_v45 = vpop.xlane.xlu1 %2703  ;;  %v3417_v24 = vrot.slane %v9843_v58, %v9698_v48  ;;  %v11933_v4 = vrot.slane %v11907_v40, %v9698_v48  ;;  %v3413_v17 = vsel %vm2934_vm14, %v3412_v42, %v3408_v33 }
 0x557   : > { %11929 = vst [vmem:[#allocation177_spill] sm:$0xff] %v10045_v45  ;;  %v3486_v51 = vrot.slane %v10045_v45, %v9687_v62  ;;  %v3107_v3 = vsel %vm2948_vm0, %v11932_v55, %v9869_v49  ;;  %v3422_v7 = vrot.slane %v9863_v28, %v9792_v8  ;;  %vm3511_vm5 = vcmask 1045509  }
 0x558   : > { %v3482_v53 = vsel %vm2920_vm12, %v3481_v22, %v3477_v36  ;;  %v3181_v62 = vsel %vm2941_vm15, %v11933_v4, %v3176_v26  ;;  %v3260_v36 = vsel %vm2941_vm15, %v3259_v63, %v3255_v34  ;;  %v3339_v26 = vsel %vm2941_vm15, %v3338_v29, %v3334_v25 }
 0x559   : > { %v10071_v20 = vpop.xlane.xlu0 %2705  ;;  %v3186_v22 = vsel %vm2948_vm0, %v3185_v0, %v3181_v62  ;;  %v3265_v55 = vsel %vm2948_vm0, %v3264_v61, %v3260_v36  ;;  %v3487_v42 = vsel %vm2927_vm13, %v3486_v51, %v3482_v53  ;;  %v3506_v34 = vsel %vm3505_vm2, %v3107_v3, %v9866_v13  ;;  %v10105_v3 = vld [vmem:[%s3957_s26] sm:$0xff] }
 0x55a   : > { %11934 = vst [vmem:[#allocation178_spill] sm:$0xff] %v10071_v20  ;;  %v3491_v45 = vrot.slane %v10071_v20, %v9695_v2  ;;  %v10077_v49 = vpop.xlane.xlu1 %2707  ;;  %v3344_v63 = vsel %vm2948_vm0, %v3343_v9, %v3339_v26  ;;  %v3418_v2 = vsel %vm2941_vm15, %v3417_v24, %v3413_v17  ;;  %v3508_v61 = vsel %vm3507_vm3, %v3186_v22, %v3506_v34  ;;  %v11938_v17 = vld [vmem:[#allocation63_spill] sm:$0xff]  ;;  %v11939_v22 = vld [vmem:[#allocation64_spill] sm:$0xff] }
 0x55b   : > { %11935 = vst [vmem:[#allocation179_spill] sm:$0xff] %v10077_v49  ;;  %v3496_v33 = vrot.slane %v10077_v49, %v9698_v48  ;;  %v3423_v29 = vsel %vm2948_vm0, %v3422_v7, %v3418_v2  ;;  %vm3513_vm6 = vcmask 1046534   ;;  %v3510_v13 = vsel %vm3509_vm4, %v3265_v55, %v3508_v61  ;;  %v11940_v55 = vld [vmem:[#allocation65_spill] sm:$0xff] }
 0x55c   : > { %v3492_v0 = vsel %vm2934_vm14, %v3491_v45, %v3487_v42  ;;  %vm3515_vm7 = vcmask 1047559   ;;  %v3512_v51 = vsel %vm3511_vm5, %v3344_v63, %v3510_v13  ;;  %v7755_v62 = vmov 0   ;;  %v10140_v42 = vld [vmem:[#allocation3] sm:$0xff]  ;;  %v11942_v63 = vld [vmem:[#allocation67_spill] sm:$0xff] }
 0x55d   : > { %v10090_v25 = vpop.xlane.xlu0 %2709  ;;  %v3497_v9 = vsel %vm2941_vm15, %v3496_v33, %v3492_v0  ;;  %v3514_v24 = vsel %vm3513_vm6, %v3423_v29, %v3512_v51  ;;  %6698 = vset.pattern.permute.xlu0 %v7755_v62  ;;  %6699 = vset.pattern.permute.xlu1 %v7755_v62  ;;  %v10111_v7 = vrot.slane %v10105_v3, %v11938_v17  ;;  %vm5841_vm8 = vcmask 7168  }
 0x55e   : > { %11936 = vst [vmem:[#allocation180_spill] sm:$0xff] %v10090_v25  ;;  %v3501_v48 = vrot.slane %v10090_v25, %v9792_v8  ;;  %v11937_v8 = vld [vmem:[#allocation62_spill] sm:$0xff]  ;;  %v10123_v36 = vrot.slane %v10105_v3, %v11939_v22  ;;  %v10135_v26 = vrot.slane %v10105_v3, %v11940_v55  ;;  %v10199_v25 = vrot.slane %v10105_v3, %v11942_v63 }
 0x55f   : > { %v3963_v4 = vrot.slane %v10105_v3, %v11937_v8  ;;  %v10235_v5 = vrot.slane %v10105_v3, %v11943_v50 }
 0x560   : > { %v3502_v45 = vsel %vm2948_vm0, %v3501_v48, %v3497_v9  ;;  %v11941_v48 = vld [vmem:[#allocation66_spill] sm:$0xff] }
 0x561   : > { %v3516_v53 = vsel %vm3515_vm7, %v3502_v45, %v3514_v24  ;;  %v10164_v13 = vrot.slane %v10105_v3, %v11941_v48 }
 0x562   : > { %3522 = vmax.xlane.f32.xlu1 %v3516_v53  ;;  %3520 = vst [vmem:[%s3519_s30] sm:$0xff] %v3516_v53 }
 0x573   : > { %3965 = vbcast.lane.b32.xlu1 %v3963_v4, 256 }
 0x577   : > { %3969 = vbcast.lane.b32.xlu1 %v3963_v4, 264 }
 0x57b   : > { %3973 = vbcast.lane.b32.xlu1 %v3963_v4, 272 }
 0x57f   : > { %3977 = vbcast.lane.b32.xlu1 %v3963_v4, 280 }
 0x583   : > { %3981 = vbcast.lane.b32.xlu1 %v3963_v4, 288 }
 0x587   : > { %3985 = vbcast.lane.b32.xlu1 %v3963_v4, 296 }
 0x58b   : > { %3989 = vbcast.lane.b32.xlu1 %v3963_v4, 304 }
 0x58f   : > { %3993 = vbcast.lane.b32.xlu1 %v3963_v4, 312 }
 0x593   : > { %4001 = vbcast.lane.b32.xlu1 %v3963_v4, 328 }
 0x597   : > { %4009 = vbcast.lane.b32.xlu1 %v3963_v4, 344 }
 0x59b   : > { %4017 = vbcast.lane.b32.xlu1 %v3963_v4, 360 }
 0x59f   : > { %4025 = vbcast.lane.b32.xlu1 %v3963_v4, 376 }
 0x5a3   : > { %4036 = vbcast.lane.b32.xlu1 %v10111_v7, 264 }
 0x5a7   : > { %4044 = vbcast.lane.b32.xlu1 %v10111_v7, 280 }
 0x5ab   : > { %4052 = vbcast.lane.b32.xlu1 %v10111_v7, 296 }
 0x5af   : > { %4060 = vbcast.lane.b32.xlu1 %v10111_v7, 312 }
 0x5b3   : > { %4068 = vbcast.lane.b32.xlu1 %v10111_v7, 328 }
 0x5b7   : > { %4076 = vbcast.lane.b32.xlu1 %v10111_v7, 344 }
 0x5bb   : > { %4084 = vbcast.lane.b32.xlu1 %v10111_v7, 360 }
 0x5bf   : > { %4092 = vbcast.lane.b32.xlu1 %v10111_v7, 376 }
 0x5c3   : > { %4103 = vbcast.lane.b32.xlu1 %v10123_v36, 264 }
 0x5c7   : > { %4111 = vbcast.lane.b32.xlu1 %v10123_v36, 280 }
 0x5cb   : > { %4119 = vbcast.lane.b32.xlu1 %v10123_v36, 296 }
 0x5cf   : > { %4127 = vbcast.lane.b32.xlu1 %v10123_v36, 312 }
 0x5d3   : > { %4135 = vbcast.lane.b32.xlu1 %v10123_v36, 328 }
 0x5d7   : > { %4143 = vbcast.lane.b32.xlu1 %v10123_v36, 344 }
 0x5db   : > { %4151 = vbcast.lane.b32.xlu1 %v10123_v36, 360 }
 0x5df   : > { %4159 = vbcast.lane.b32.xlu1 %v10123_v36, 376 }
 0x5e3   : > { %4170 = vbcast.lane.b32.xlu1 %v10135_v26, 264 }
 0x5e7   : > { %4178 = vbcast.lane.b32.xlu1 %v10135_v26, 280 }
 0x5eb   : > { %4186 = vbcast.lane.b32.xlu1 %v10135_v26, 296 }
 0x5ef   : > { %v3523_v33 = vpop.xlane.xlu1 %3522  ;;  %4194 = vbcast.lane.b32.xlu1 %v10135_v26, 312 }
 0x5f0   : > { %v10144_v34 = vmax.f32 %v10140_v42, %v3523_v33 }
 0x5f2   : > { %5842 = vst.msk [vmem:[#allocation3] sm:$0xff] %vm5841_vm8, %v10144_v34  ;;  %3530 = vperm.xlu0 %6698, %v10144_v34  }
 0x5f3   : > { %v10150_v2 = vpop.permute.xlu1 %3965  ;;  %4202 = vbcast.lane.b32.xlu1 %v10135_v26, 328 }
 0x5f6   : > { %3997 = vbcast.lane.b32.xlu0 %v3963_v4, 320 }
 0x5f7   : > { %v10153_v0 = vpop.permute.xlu1 %3969  ;;  %4210 = vbcast.lane.b32.xlu1 %v10135_v26, 344 }
 0x5fa   : > { %4005 = vbcast.lane.b32.xlu0 %v3963_v4, 336 }
 0x5fb   : > { %v10156_v61 = vpop.permute.xlu1 %3973  ;;  %4218 = vbcast.lane.b32.xlu1 %v10135_v26, 360 }
 0x5fe   : > { %4013 = vbcast.lane.b32.xlu0 %v3963_v4, 352 }
 0x5ff   : > { %v10159_v29 = vpop.permute.xlu1 %3977  ;;  %4226 = vbcast.lane.b32.xlu1 %v10135_v26, 376 }
 0x602   : > { %4021 = vbcast.lane.b32.xlu0 %v3963_v4, 368 }
 0x603   : > { %v10166_v9 = vpop.permute.xlu1 %3981  ;;  %4237 = vbcast.lane.b32.xlu1 %v10164_v13, 264 }
 0x606   : > { %4032 = vbcast.lane.b32.xlu0 %v10111_v7, 256 }
 0x607   : > { %v10170_v51 = vpop.permute.xlu1 %3985  ;;  %4245 = vbcast.lane.b32.xlu1 %v10164_v13, 280 }
 0x60a   : > { %4040 = vbcast.lane.b32.xlu0 %v10111_v7, 272 }
 0x60b   : > { %v10174_v45 = vpop.permute.xlu1 %3989  ;;  %4253 = vbcast.lane.b32.xlu1 %v10164_v13, 296 }
 0x60e   : > { %4048 = vbcast.lane.b32.xlu0 %v10111_v7, 288 }
 0x60f   : > { %v10178_v24 = vpop.permute.xlu1 %3993  ;;  %4261 = vbcast.lane.b32.xlu1 %v10164_v13, 312 }
 0x612   : > { %4056 = vbcast.lane.b32.xlu0 %v10111_v7, 304 }
 0x613   : > { %v10182_v53 = vpop.permute.xlu1 %4001  ;;  %4269 = vbcast.lane.b32.xlu1 %v10164_v13, 328 }
 0x616   : > { %4064 = vbcast.lane.b32.xlu0 %v10111_v7, 320 }
 0x617   : > { %v10186_v4 = vpop.permute.xlu1 %4009  ;;  %4277 = vbcast.lane.b32.xlu1 %v10164_v13, 344 }
 0x61a   : > { %4072 = vbcast.lane.b32.xlu0 %v10111_v7, 336 }
 0x61b   : > { %v10190_v62 = vpop.permute.xlu1 %4017  ;;  %4285 = vbcast.lane.b32.xlu1 %v10164_v13, 360 }
 0x61e   : > { %4080 = vbcast.lane.b32.xlu0 %v10111_v7, 352 }
 0x61f   : > { %v10194_v33 = vpop.permute.xlu1 %4025  ;;  %4293 = vbcast.lane.b32.xlu1 %v10164_v13, 376 }
 0x622   : > { %4088 = vbcast.lane.b32.xlu0 %v10111_v7, 368 }
 0x623   : > { %v10202_v49 = vpop.permute.xlu1 %4036  ;;  %4304 = vbcast.lane.b32.xlu1 %v10199_v25, 264 }
 0x626   : > { %4099 = vbcast.lane.b32.xlu0 %v10123_v36, 256 }
 0x627   : > { %v10206_v20 = vpop.permute.xlu1 %4044  ;;  %4312 = vbcast.lane.b32.xlu1 %v10199_v25, 280 }
 0x62a   : > { %4107 = vbcast.lane.b32.xlu0 %v10123_v36, 272 }
 0x62b   : > { %v10210_v31 = vpop.permute.xlu1 %4052  ;;  %4320 = vbcast.lane.b32.xlu1 %v10199_v25, 296 }
 0x62e   : > { %4115 = vbcast.lane.b32.xlu0 %v10123_v36, 288 }
 0x62f   : > { %v10214_v44 = vpop.permute.xlu1 %4060  ;;  %4328 = vbcast.lane.b32.xlu1 %v10199_v25, 312 }
 0x632   : > { %4123 = vbcast.lane.b32.xlu0 %v10123_v36, 304 }
 0x633   : > { %v10218_v7 = vpop.permute.xlu1 %4068  ;;  %4336 = vbcast.lane.b32.xlu1 %v10199_v25, 328 }
 0x636   : > { %4131 = vbcast.lane.b32.xlu0 %v10123_v36, 320 }
 0x637   : > { %v10222_v28 = vpop.permute.xlu1 %4076  ;;  %4344 = vbcast.lane.b32.xlu1 %v10199_v25, 344 }
 0x63a   : > { %4139 = vbcast.lane.b32.xlu0 %v10123_v36, 336 }
 0x63b   : > { %v10226_v58 = vpop.permute.xlu1 %4084  ;;  %4352 = vbcast.lane.b32.xlu1 %v10199_v25, 360 }
 0x63e   : > { %4147 = vbcast.lane.b32.xlu0 %v10123_v36, 352 }
 0x63f   : > { %v10230_v10 = vpop.permute.xlu1 %4092  ;;  %4360 = vbcast.lane.b32.xlu1 %v10199_v25, 376 }
 0x642   : > { %4155 = vbcast.lane.b32.xlu0 %v10123_v36, 368 }
 0x643   : > { %v10238_v37 = vpop.permute.xlu1 %4103  ;;  %4371 = vbcast.lane.b32.xlu1 %v10235_v5, 264 }
 0x644   : > { %11944 = vst [vmem:[#allocation62_spill] sm:$0xff] %v10238_v37 }
 0x646   : > { %4166 = vbcast.lane.b32.xlu0 %v10135_v26, 256 }
 0x647   : > { %v10242_v21 = vpop.permute.xlu1 %4111  ;;  %4379 = vbcast.lane.b32.xlu1 %v10235_v5, 280 }
 0x648   : > { %11945 = vst [vmem:[#allocation63_spill] sm:$0xff] %v10242_v21 }
 0x64a   : > { %4174 = vbcast.lane.b32.xlu0 %v10135_v26, 272 }
 0x64b   : > { %v10246_v41 = vpop.permute.xlu1 %4119  ;;  %4387 = vbcast.lane.b32.xlu1 %v10235_v5, 296 }
 0x64c   : > { %11946 = vst [vmem:[#allocation64_spill] sm:$0xff] %v10246_v41 }
 0x64e   : > { %4182 = vbcast.lane.b32.xlu0 %v10135_v26, 288 }
 0x64f   : > { %v10250_v60 = vpop.permute.xlu1 %4127  ;;  %4395 = vbcast.lane.b32.xlu1 %v10235_v5, 312 }
 0x650   : > { %11947 = vst [vmem:[#allocation65_spill] sm:$0xff] %v10250_v60 }
 0x652   : > { %4190 = vbcast.lane.b32.xlu0 %v10135_v26, 304 }
 0x653   : > { %v10254_v36 = vpop.permute.xlu1 %4135  ;;  %4403 = vbcast.lane.b32.xlu1 %v10235_v5, 328 }
 0x654   : > { %11948 = vst [vmem:[#allocation66_spill] sm:$0xff] %v10254_v36  ;;  %v11952_v36 = vld [vmem:[#allocation77_spill] sm:$0xff] }
 0x655   : > { %v10271_v46 = vrot.slane %v10105_v3, %v11952_v36 }
 0x656   : > { %4198 = vbcast.lane.b32.xlu0 %v10135_v26, 320 }
 0x657   : > { %v10258_v35 = vpop.permute.xlu1 %4143  ;;  %4411 = vbcast.lane.b32.xlu1 %v10235_v5, 344 }
 0x658   : > { %11949 = vst [vmem:[#allocation67_spill] sm:$0xff] %v10258_v35 }
 0x65a   : > { %4206 = vbcast.lane.b32.xlu0 %v10135_v26, 336 }
 0x65b   : > { %v10262_v57 = vpop.permute.xlu1 %4151  ;;  %4419 = vbcast.lane.b32.xlu1 %v10235_v5, 360 }
 0x65c   : > { %11950 = vst [vmem:[#allocation181_spill] sm:$0xff] %v10262_v57 }
 0x65e   : > { %4214 = vbcast.lane.b32.xlu0 %v10135_v26, 352 }
 0x65f   : > { %v10266_v56 = vpop.permute.xlu1 %4159  ;;  %4427 = vbcast.lane.b32.xlu1 %v10235_v5, 376 }
 0x660   : > { %11951 = vst [vmem:[#allocation182_spill] sm:$0xff] %v10266_v56 }
 0x662   : > { %4222 = vbcast.lane.b32.xlu0 %v10135_v26, 368 }
 0x663   : > { %v10274_v35 = vpop.permute.xlu1 %4170  ;;  %4438 = vbcast.lane.b32.xlu1 %v10271_v46, 264 }
 0x664   : > { %11953 = vst [vmem:[#allocation183_spill] sm:$0xff] %v10274_v35 }
 0x666   : > { %4233 = vbcast.lane.b32.xlu0 %v10164_v13, 256 }
 0x667   : > { %v10278_v57 = vpop.permute.xlu1 %4178  ;;  %4446 = vbcast.lane.b32.xlu1 %v10271_v46, 280 }
 0x668   : > { %11954 = vst [vmem:[#allocation184_spill] sm:$0xff] %v10278_v57 }
 0x66a   : > { %4241 = vbcast.lane.b32.xlu0 %v10164_v13, 272 }
 0x66b   : > { %v10282_v56 = vpop.permute.xlu1 %4186  ;;  %4454 = vbcast.lane.b32.xlu1 %v10271_v46, 296 }
 0x66c   : > { %11955 = vst [vmem:[#allocation185_spill] sm:$0xff] %v10282_v56 }
 0x66e   : > { %4249 = vbcast.lane.b32.xlu0 %v10164_v13, 288 }
 0x66f   : > { %v10286_v3 = vpop.permute.xlu1 %4194  ;;  %4462 = vbcast.lane.b32.xlu1 %v10271_v46, 312 }
 0x670   : > { %11956 = vst [vmem:[#allocation186_spill] sm:$0xff] %v10286_v3 }
 0x671   : > { %v10289_v26 = vpop.permute.xlu0 %3530 }
 0x672   : > { %4257 = vbcast.lane.b32.xlu0 %v10164_v13, 304  ;;  %v10299_v56 = vrot.slane %v10289_v26, %v11937_v8  ;;  %v11961_v8 = vld [vmem:[#allocation92_spill] sm:$0xff] }
 0x673   : > { %v10292_v35 = vpop.permute.xlu1 %4202  ;;  %4470 = vbcast.lane.b32.xlu1 %v10271_v46, 328 }
 0x674   : > { %11957 = vst [vmem:[#allocation187_spill] sm:$0xff] %v10292_v35  ;;  %v11959_v35 = vld [vmem:[#allocation81_spill] sm:$0xff]  ;;  %v3574_v41 = vsub.f32 %v11961_v8, %v10299_v56  ;;  %v3576_v21 = vsub.f32 %v11963_v54, %v10299_v56  ;;  %v3578_v8 = vsub.f32 %v9191_v12, %v10299_v56  ;;  %v3580_v54 = vsub.f32 %v9205_v11, %v10299_v56 }
 0x675   : > { %v10295_v57 = vpop.permute.xlu0 %3997  ;;  %v3572_v50 = vsub.f32 %v11959_v35, %v10299_v56 }
 0x676   : > { %4265 = vbcast.lane.b32.xlu0 %v10164_v13, 320  ;;  %v3708_v37 = vmul.f32 1.442695, %v3576_v21  ;;  %v3716_v12 = vmul.f32 1.442695, %v3580_v54 }
 0x677   : > { %v10302_v36 = vpop.permute.xlu1 %4210  ;;  %4478 = vbcast.lane.b32.xlu1 %v10271_v46, 344 }
 0x678   : > { %11958 = vst [vmem:[#allocation188_spill] sm:$0xff] %v10302_v36  ;;  %v3700_v36 = vmul.f32 1.442695, %v3572_v50 }
 0x679   : > { %v10305_v3 = vpop.permute.xlu0 %4005 }
 0x67a   : > { %4273 = vbcast.lane.b32.xlu0 %v10164_v13, 336  ;;  %6957 = vpow2.f32 %v3700_v36 }
 0x67b   : > { %v10310_v60 = vpop.permute.xlu1 %4218  ;;  %4486 = vbcast.lane.b32.xlu1 %v10271_v46, 360 }
 0x67c   : > { %11960 = vst [vmem:[#allocation81_spill] sm:$0xff] %v10310_v60  ;;  %v3704_v60 = vmul.f32 1.442695, %v3574_v41  ;;  %v3712_v41 = vmul.f32 1.442695, %v3578_v8 }
 0x67d   : > { %v10313_v39 = vpop.permute.xlu0 %4013 }
 0x67e   : > { %4281 = vbcast.lane.b32.xlu0 %v10164_v13, 352  ;;  %6959 = vpow2.f32 %v3704_v60  ;;  %v3582_v60 = vsub.f32 %v9221_v30, %v10299_v56 }
 0x67f   : > { %v10318_v6 = vpop.permute.xlu1 %4226  ;;  %4494 = vbcast.lane.b32.xlu1 %v10271_v46, 376  ;;  %6961 = vpow2.f32 %v3708_v37 }
 0x680   : > { %11962 = vst [vmem:[#allocation92_spill] sm:$0xff] %v10318_v6  ;;  %6963 = vpow2.f32 %v3712_v41  ;;  %v3720_v8 = vmul.f32 1.442695, %v3582_v60 }
 0x681   : > { %v10323_v35 = vpop.permute.xlu0 %4021  ;;  %6965 = vpow2.f32 %v3716_v12 }
 0x682   : > { %4289 = vbcast.lane.b32.xlu0 %v10164_v13, 368  ;;  %6967 = vpow2.f32 %v3720_v8 }
 0x683   : > { %v10326_v14 = vpop.permute.xlu1 %4237 }
 0x684   : > { %11964 = vst [vmem:[#allocation84_spill] sm:$0xff] %v10326_v14  ;;  %v6958_v36 = vpop.eup %6957 }
 0x685   : > { %v10330_v50 = vpop.permute.xlu0 %4032  ;;  %v4624_v14 = vmul.f32 %v6958_v36, %v10150_v2 }
 0x686   : > { %4300 = vbcast.lane.b32.xlu0 %v10199_v25, 256 }
 0x687   : > { %v10333_v6 = vpop.permute.xlu1 %4245  ;;  %4889 = vperm.xlu1 %6699, %v4624_v14   ;;  %v3586_v14 = vsub.f32 %v11865_v23, %v10299_v56 }
 0x688   : > { %11965 = vst [vmem:[#allocation189_spill] sm:$0xff] %v10333_v6  ;;  %v6960_v11 = vpop.eup %6959 }
 0x689   : > { %v10337_v13 = vpop.permute.xlu0 %4040  ;;  %v4626_v54 = vmul.f32 %v6960_v11, %v10156_v61  ;;  %v6962_v30 = vpop.eup %6961  ;;  %v10365_v61 = vrot.slane %v10289_v26, %v11938_v17  ;;  %v3728_v11 = vmul.f32 1.442695, %v3586_v14 }
 0x68a   : > { %4308 = vbcast.lane.b32.xlu0 %v10199_v25, 272  ;;  %v4628_v36 = vmul.f32 %v6962_v30, %v10166_v9  ;;  %v11968_v9 = vld [vmem:[#allocation93_spill] sm:$0xff] }
 0x68b   : > { %v10340_v21 = vpop.permute.xlu1 %4253  ;;  %4899 = vperm.xlu1 %6699, %v4626_v54   ;;  %v3588_v54 = vsub.f32 %v11968_v9, %v10365_v61 }
 0x68c   : > { %11966 = vst [vmem:[#allocation190_spill] sm:$0xff] %v10340_v21  ;;  %v3584_v21 = vsub.f32 %v9238_v27, %v10299_v56  ;;  %v6964_v27 = vpop.eup %6963 }
 0x68d   : > { %v10345_v6 = vpop.permute.xlu0 %4048  ;;  %v6966_v23 = vpop.eup %6965  ;;  %v3732_v14 = vmul.f32 1.442695, %v3588_v54 }
 0x68e   : > { %4316 = vbcast.lane.b32.xlu0 %v10199_v25, 288  ;;  %v3724_v41 = vmul.f32 1.442695, %v3584_v21  ;;  %v4630_v21 = vmul.f32 %v6964_v27, %v10174_v45  ;;  %v4632_v30 = vmul.f32 %v6966_v23, %v10295_v57  ;;  %v11970_v45 = vld [vmem:[#allocation95_spill] sm:$0xff]  ;;  %v11972_v57 = vld [vmem:[#allocation97_spill] sm:$0xff] }
 0x68f   : > { %v10348_v37 = vpop.permute.xlu1 %4261  ;;  %4909 = vperm.xlu1 %6699, %v4628_v36   ;;  %v3590_v27 = vsub.f32 %v11970_v45, %v10365_v61  ;;  %v3592_v23 = vsub.f32 %v11972_v57, %v10365_v61 }
 0x690   : > { %6969 = vpow2.f32 %v3724_v41  ;;  %v6968_v41 = vpop.eup %6967 }
 0x691   : > { %v10353_v38 = vpop.permute.xlu0 %4056  ;;  %6971 = vpow2.f32 %v3728_v11  ;;  %v4634_v9 = vmul.f32 %v6968_v41, %v10305_v3  ;;  %v3736_v11 = vmul.f32 1.442695, %v3590_v27  ;;  %v3740_v3 = vmul.f32 1.442695, %v3592_v23 }
 0x692   : > { %4324 = vbcast.lane.b32.xlu0 %v10199_v25, 304  ;;  %6973 = vpow2.f32 %v3732_v14  ;;  %v3594_v41 = vsub.f32 %v9308_v15, %v10365_v61 }
 0x693   : > { %v10356_v2 = vpop.permute.xlu1 %4269  ;;  %4919 = vperm.xlu1 %6699, %v4630_v21   ;;  %6975 = vpow2.f32 %v3736_v11 }
 0x694   : > { %6977 = vpow2.f32 %v3740_v3 }
 0x695   : > { %v10361_v12 = vpop.permute.xlu0 %4064 }
 0x696   : > { %4332 = vbcast.lane.b32.xlu0 %v10199_v25, 320 }
 0x697   : > { %v10368_v60 = vpop.permute.xlu1 %4277  ;;  %4929 = vperm.xlu1 %6699, %v4632_v30  }
 0x698   : > { %11967 = vst [vmem:[#allocation191_spill] sm:$0xff] %v10368_v60 }
 0x699   : > { %v10371_v8 = vpop.permute.xlu0 %4072 }
 0x69a   : > { %4340 = vbcast.lane.b32.xlu0 %v10199_v25, 336 }
 0x69b   : > { %v10376_v17 = vpop.permute.xlu1 %4285  ;;  %4939 = vperm.xlu1 %6699, %v4634_v9   ;;  %v3744_v9 = vmul.f32 1.442695, %v3594_v41 }
 0x69c   : > { %11969 = vst [vmem:[#allocation93_spill] sm:$0xff] %v10376_v17  ;;  %v6970_v17 = vpop.eup %6969 }
 0x69d   : > { %v10379_v36 = vpop.permute.xlu0 %4080  ;;  %v4636_v45 = vmul.f32 %v6970_v17, %v10313_v39  ;;  %v3596_v39 = vsub.f32 %v9322_v16, %v10365_v61  ;;  %6979 = vpow2.f32 %v3744_v9 }
 0x69e   : > { %4348 = vbcast.lane.b32.xlu0 %v10199_v25, 352 }
 0x69f   : > { %v10384_v60 = vpop.permute.xlu1 %4293  ;;  %4949 = vperm.xlu1 %6699, %v4636_v45   ;;  %v3748_v23 = vmul.f32 1.442695, %v3596_v39 }
 0x6a0   : > { %11971 = vst [vmem:[#allocation95_spill] sm:$0xff] %v10384_v60  ;;  %v6972_v60 = vpop.eup %6971 }
 0x6a1   : > { %v10387_v21 = vpop.permute.xlu0 %4088  ;;  %v6974_v15 = vpop.eup %6973  ;;  %6981 = vpow2.f32 %v3748_v23 }
 0x6a2   : > { %4356 = vbcast.lane.b32.xlu0 %v10199_v25, 368  ;;  %v4638_v25 = vmul.f32 %v6972_v60, %v10323_v35  ;;  %v4640_v11 = vmul.f32 %v6974_v15, %v10330_v50  ;;  %v3598_v35 = vsub.f32 %v9338_v52, %v10365_v61  ;;  %v6976_v16 = vpop.eup %6975  ;;  %v3600_v50 = vsub.f32 %v11860_v59, %v10365_v61 }
 0x6a3   : > { %v10392_v54 = vpop.permute.xlu1 %4304  ;;  %v4642_v45 = vmul.f32 %v6976_v16, %v10337_v13  ;;  %v6978_v52 = vpop.eup %6977  ;;  %v10431_v13 = vrot.slane %v10289_v26, %v11939_v22  ;;  %v11980_v22 = vld [vmem:[#allocation71_spill] sm:$0xff] }
 0x6a4   : > { %11973 = vst [vmem:[#allocation97_spill] sm:$0xff] %v10392_v54  ;;  %4959 = vperm.xlu1 %6699, %v4638_v25   ;;  %v3752_v41 = vmul.f32 1.442695, %v3598_v35  ;;  %v4644_v9 = vmul.f32 %v6978_v52, %v10345_v6  ;;  %v3756_v15 = vmul.f32 1.442695, %v3600_v50 }
 0x6a5   : > { %v10395_v30 = vpop.permute.xlu0 %4099  ;;  %v3604_v52 = vsub.f32 %v11980_v22, %v10431_v13 }
 0x6a6   : > { %4367 = vbcast.lane.b32.xlu0 %v10235_v5, 256  ;;  %6983 = vpow2.f32 %v3752_v41 }
 0x6a7   : > { %v10400_v14 = vpop.permute.xlu1 %4312  ;;  %v6980_v35 = vpop.eup %6979  ;;  %6985 = vpow2.f32 %v3756_v15 }
 0x6a8   : > { %11974 = vst [vmem:[#allocation192_spill] sm:$0xff] %v10400_v14  ;;  %4969 = vperm.xlu1 %6699, %v4640_v11   ;;  %v11978_v11 = vld [vmem:[#allocation69_spill] sm:$0xff]  ;;  %v4646_v16 = vmul.f32 %v6980_v35, %v10353_v38 }
 0x6a9   : > { %v10403_v27 = vpop.permute.xlu0 %4107  ;;  %v3602_v23 = vsub.f32 %v11978_v11, %v10365_v61  ;;  %v11982_v38 = vld [vmem:[#allocation73_spill] sm:$0xff] }
 0x6aa   : > { %4375 = vbcast.lane.b32.xlu0 %v10235_v5, 272  ;;  %v3606_v35 = vsub.f32 %v11982_v38, %v10431_v13 }
 0x6ab   : > { %v10408_v17 = vpop.permute.xlu1 %4320  ;;  %v6982_v50 = vpop.eup %6981 }
 0x6ac   : > { %11975 = vst [vmem:[#allocation193_spill] sm:$0xff] %v10408_v17  ;;  %4979 = vperm.xlu1 %6699, %v4642_v45   ;;  %v3760_v45 = vmul.f32 1.442695, %v3602_v23 }
 0x6ad   : > { %v10411_v57 = vpop.permute.xlu0 %4115 }
 0x6ae   : > { %4383 = vbcast.lane.b32.xlu0 %v10235_v5, 288  ;;  %6987 = vpow2.f32 %v3760_v45 }
 0x6af   : > { %v10416_v60 = vpop.permute.xlu1 %4328 }
 0x6b0   : > { %11976 = vst [vmem:[#allocation194_spill] sm:$0xff] %v10416_v60  ;;  %4989 = vperm.xlu1 %6699, %v4644_v9   ;;  %v4648_v9 = vmul.f32 %v6982_v50, %v10361_v12  ;;  %v6984_v23 = vpop.eup %6983  ;;  %v11984_v12 = vld [vmem:[#allocation75_spill] sm:$0xff] }
 0x6b1   : > { %v10419_v3 = vpop.permute.xlu0 %4123  ;;  %v3608_v50 = vsub.f32 %v11984_v12, %v10431_v13 }
 0x6b2   : > { %4391 = vbcast.lane.b32.xlu0 %v10235_v5, 304 }
 0x6b3   : > { %v10424_v25 = vpop.permute.xlu1 %4336 }
 0x6b4   : > { %11977 = vst [vmem:[#allocation195_spill] sm:$0xff] %v10424_v25  ;;  %4999 = vperm.xlu1 %6699, %v4646_v16   ;;  %v4650_v16 = vmul.f32 %v6984_v23, %v10371_v8  ;;  %v11986_v8 = vld [vmem:[#allocation78_spill] sm:$0xff]  ;;  %v11992_v25 = vsub.f32 %v10140_v42, %v10144_v34  ;;  %v11994_v34 = vld [vmem:[#allocation83_spill] sm:$0xff] }
 0x6b5   : > { %v10427_v39 = vpop.permute.xlu0 %4131  ;;  %v3610_v23 = vsub.f32 %v11986_v8, %v10431_v13 }
 0x6b6   : > { %4399 = vbcast.lane.b32.xlu0 %v10235_v5, 320 }
 0x6b7   : > { %v10436_v59 = vpop.permute.xlu1 %4344  ;;  %v3776_v12 = vmul.f32 1.442695, %v3610_v23 }
 0x6b8   : > { %11979 = vst [vmem:[#allocation69_spill] sm:$0xff] %v10436_v59  ;;  %v3764_v59 = vmul.f32 1.442695, %v3604_v52  ;;  %5009 = vperm.xlu1 %6699, %v4648_v9   ;;  %v6986_v52 = vpop.eup %6985 }
 0x6b9   : > { %v10439_v6 = vpop.permute.xlu0 %4139  ;;  %v4652_v9 = vmul.f32 %v6986_v52, %v10379_v36  ;;  %v11988_v36 = vld [vmem:[#allocation80_spill] sm:$0xff] }
 0x6ba   : > { %4407 = vbcast.lane.b32.xlu0 %v10235_v5, 336  ;;  %6989 = vpow2.f32 %v3764_v59  ;;  %v3612_v52 = vsub.f32 %v11988_v36, %v10431_v13 }
 0x6bb   : > { %v10444_v41 = vpop.permute.xlu1 %4352 }
 0x6bc   : > { %11981 = vst [vmem:[#allocation71_spill] sm:$0xff] %v10444_v41  ;;  %v3768_v41 = vmul.f32 1.442695, %v3606_v35  ;;  %5019 = vperm.xlu1 %6699, %v4650_v16   ;;  %v6988_v35 = vpop.eup %6987 }
 0x6bd   : > { %v10447_v11 = vpop.permute.xlu0 %4147 }
 0x6be   : > { %4415 = vbcast.lane.b32.xlu0 %v10235_v5, 352  ;;  %6991 = vpow2.f32 %v3768_v41 }
 0x6bf   : > { %v10452_v15 = vpop.permute.xlu1 %4360 }
 0x6c0   : > { %11983 = vst [vmem:[#allocation73_spill] sm:$0xff] %v10452_v15  ;;  %v3772_v15 = vmul.f32 1.442695, %v3608_v50  ;;  %5029 = vperm.xlu1 %6699, %v4652_v9  }
 0x6c1   : > { %v10455_v22 = vpop.permute.xlu0 %4155 }
 0x6c2   : > { %4423 = vbcast.lane.b32.xlu0 %v10235_v5, 368  ;;  %v4654_v5 = vmul.f32 %v6988_v35, %v10387_v21  ;;  %6993 = vpow2.f32 %v3772_v15  ;;  %v11989_v21 = vld [vmem:[#allocation105_spill] sm:$0xff] }
 0x6c3   : > { %v10460_v45 = vpop.permute.xlu1 %4371  ;;  %6995 = vpow2.f32 %v3776_v12  ;;  %v3614_v35 = vsub.f32 %v11989_v21, %v10431_v13 }
 0x6c4   : > { %11985 = vst [vmem:[#allocation75_spill] sm:$0xff] %v10460_v45  ;;  %5039 = vperm.xlu1 %6699, %v4654_v5   ;;  %v6990_v50 = vpop.eup %6989 }
 0x6c5   : > { %v10463_v38 = vpop.permute.xlu0 %4166  ;;  %v4656_v9 = vmul.f32 %v6990_v50, %v10395_v30  ;;  %v3784_v45 = vmul.f32 1.442695, %v3614_v35  ;;  %v11990_v30 = vld [vmem:[#allocation107_spill] sm:$0xff]  ;;  %v10504_v35 = vrot.slane %v10289_v26, %v11940_v55 }
 0x6c6   : > { %4434 = vbcast.lane.b32.xlu0 %v10271_v46, 256  ;;  %v3616_v50 = vsub.f32 %v11990_v30, %v10431_v13  ;;  %v11993_v30 = vld [vmem:[#allocation109_spill] sm:$0xff] }
 0x6c7   : > { %v10468_v59 = vpop.permute.xlu1 %4379  ;;  %v3618_v60 = vsub.f32 %v11993_v30, %v10431_v13 }
 0x6c8   : > { %11987 = vst [vmem:[#allocation78_spill] sm:$0xff] %v10468_v59  ;;  %v3780_v59 = vmul.f32 1.442695, %v3612_v52  ;;  %5049 = vperm.xlu1 %6699, %v4656_v9   ;;  %v6992_v23 = vpop.eup %6991  ;;  %v11991_v52 = vld [vmem:[#allocation82_spill] sm:$0xff] }
 0x6c9   : > { %v10471_v16 = vpop.permute.xlu0 %4174  ;;  %v4658_v5 = vmul.f32 %v6992_v23, %v10403_v27  ;;  %v3573_v9 = vsub.f32 %v11991_v52, %v10299_v56  ;;  %v3526_v27 = vmul.f32 1.442695, %v11992_v25 }
 0x6ca   : > { %4442 = vbcast.lane.b32.xlu0 %v10271_v46, 272  ;;  %6997 = vpow2.f32 %v3780_v59 }
 0x6cb   : > { %v10476_v41 = vpop.permute.xlu1 %4387  ;;  %6999 = vpow2.f32 %v3784_v45  ;;  %v3702_v42 = vmul.f32 1.442695, %v3573_v9  ;;  %v3792_v45 = vmul.f32 1.442695, %v3618_v60 }
 0x6cc   : > { %5059 = vperm.xlu1 %6699, %v4658_v5   ;;  %v6994_v21 = vpop.eup %6993  ;;  %v3788_v5 = vmul.f32 1.442695, %v3616_v50  ;;  %7001 = vpow2.f32 %v3526_v27  ;;  %v11995_v50 = vld [vmem:[#allocation111_spill] sm:$0xff] }
 0x6cd   : > { %v10479_v8 = vpop.permute.xlu0 %4182  ;;  %v4660_v23 = vmul.f32 %v6994_v21, %v10411_v57  ;;  %v3575_v57 = vsub.f32 %v11994_v34, %v10299_v56  ;;  %v6996_v25 = vpop.eup %6995  ;;  %v3620_v30 = vsub.f32 %v11995_v50, %v10504_v35  ;;  %v11997_v34 = vld [vmem:[#allocation85_spill] sm:$0xff] }
 0x6ce   : > { %4450 = vbcast.lane.b32.xlu0 %v10271_v46, 288  ;;  %v4662_v21 = vmul.f32 %v6996_v25, %v10419_v3  ;;  %7003 = vpow2.f32 %v3788_v5  ;;  %v3577_v17 = vsub.f32 %v11997_v34, %v10299_v56  ;;  %v11998_v5 = vld [vmem:[#allocation113_spill] sm:$0xff] }
 0x6cf   : > { %v10484_v15 = vpop.permute.xlu1 %4395  ;;  %7005 = vpow2.f32 %v3702_v42  ;;  %v3706_v9 = vmul.f32 1.442695, %v3575_v57  ;;  %v3796_v60 = vmul.f32 1.442695, %v3620_v30  ;;  %v3622_v50 = vsub.f32 %v11998_v5, %v10504_v35  ;;  %v12000_v57 = vld [vmem:[#allocation86_spill] sm:$0xff]  ;;  %v12001_v30 = vld [vmem:[#allocation115_spill] sm:$0xff] }
 0x6d0   : > { %5069 = vperm.xlu1 %6699, %v4660_v23   ;;  %7007 = vpow2.f32 %v3792_v45  ;;  %v3710_v42 = vmul.f32 1.442695, %v3577_v17  ;;  %v3579_v34 = vsub.f32 %v12000_v57, %v10299_v56  ;;  %v3624_v5 = vsub.f32 %v12001_v30, %v10504_v35  ;;  %v12004_v30 = vld [vmem:[#allocation117_spill] sm:$0xff] }
 0x6d1   : > { %v10487_v36 = vpop.permute.xlu0 %4190  ;;  %7009 = vpow2.f32 %v3706_v9  ;;  %v3800_v45 = vmul.f32 1.442695, %v3622_v50  ;;  %v12003_v9 = vld [vmem:[#allocation87_spill] sm:$0xff] }
 0x6d2   : > { %4458 = vbcast.lane.b32.xlu0 %v10271_v46, 304  ;;  %7011 = vpow2.f32 %v3796_v60  ;;  %v3714_v17 = vmul.f32 1.442695, %v3579_v34  ;;  %v3581_v57 = vsub.f32 %v12003_v9, %v10299_v56  ;;  %v3804_v50 = vmul.f32 1.442695, %v3624_v5  ;;  %v12005_v34 = vld [vmem:[#allocation88_spill] sm:$0xff] }
 0x6d3   : > { %v10492_v12 = vpop.permute.xlu1 %4403  ;;  %7013 = vpow2.f32 %v3710_v42  ;;  %v3583_v9 = vsub.f32 %v12005_v34, %v10299_v56 }
 0x6d4   : > { %5079 = vperm.xlu1 %6699, %v4662_v21   ;;  %v6998_v27 = vpop.eup %6997  ;;  %7015 = vpow2.f32 %v3800_v45  ;;  %v3718_v42 = vmul.f32 1.442695, %v3581_v57 }
 0x6d5   : > { %v10500_v59 = vpop.permute.xlu0 %4198  ;;  %v4664_v3 = vmul.f32 %v6998_v27, %v10427_v39  ;;  %v7000_v14 = vpop.eup %6999  ;;  %7017 = vpow2.f32 %v3714_v17  ;;  %v3722_v57 = vmul.f32 1.442695, %v3583_v9  ;;  %v12010_v9 = vld [vmem:[#allocation91_spill] sm:$0xff] }
 0x6d6   : > { %4466 = vbcast.lane.b32.xlu0 %v10271_v46, 320  ;;  %v4666_v39 = vmul.f32 %v7000_v14, %v10439_v6  ;;  %7019 = vpow2.f32 %v3804_v50 }
 0x6d7   : > { %v10509_v52 = vpop.permute.xlu1 %4411  ;;  %7021 = vpow2.f32 %v3718_v42 }
 0x6d8   : > { %5089 = vperm.xlu1 %6699, %v4664_v3   ;;  %v7002_v3 = vpop.eup %7001 }
 0x6d9   : > { %v10514_v55 = vpop.permute.xlu0 %4206  ;;  %v7004_v54 = vpop.eup %7003 }
 0x6da   : > { %4474 = vbcast.lane.b32.xlu0 %v10271_v46, 336  ;;  %v7006_v14 = vpop.eup %7005  ;;  %v4668_v6 = vmul.f32 %v7004_v54, %v10447_v11 }
 0x6db   : > { %v10519_v23 = vpop.permute.xlu1 %4419 }
 0x6dc   : > { %11996 = vst [vmem:[#allocation80_spill] sm:$0xff] %v10519_v23  ;;  %5099 = vperm.xlu1 %6699, %v4666_v39   ;;  %v4625_v23 = vmul.f32 %v7006_v14, %v10153_v0 }
 0x6dd   : > { %v10524_v25 = vpop.permute.xlu0 %4214 }
 0x6de   : > { %4482 = vbcast.lane.b32.xlu0 %v10271_v46, 352 }
 0x6df   : > { %v10529_v21 = vpop.permute.xlu1 %4427 }
 0x6e0   : > { %11999 = vst [vmem:[#allocation105_spill] sm:$0xff] %v10529_v21  ;;  %5109 = vperm.xlu1 %6699, %v4668_v6  }
 0x6e1   : > { %v10534_v27 = vpop.permute.xlu0 %4222 }
 0x6e2   : > { %4490 = vbcast.lane.b32.xlu0 %v10271_v46, 368  ;;  %v3626_v46 = vsub.f32 %v12004_v30, %v10504_v35  ;;  %v12008_v30 = vld [vmem:[#allocation89_spill] sm:$0xff] }
 0x6e3   : > { %v10539_v21 = vpop.permute.xlu1 %4438  ;;  %v3585_v34 = vsub.f32 %v12008_v30, %v10299_v56 }
 0x6e4   : > { %12002 = vst [vmem:[#allocation107_spill] sm:$0xff] %v10539_v21  ;;  %v7008_v21 = vpop.eup %7007  ;;  %v3808_v5 = vmul.f32 1.442695, %v3626_v46 }
 0x6e5   : > { %v10544_v60 = vpop.permute.xlu0 %4233  ;;  %v7010_v54 = vpop.eup %7009  ;;  %v4670_v11 = vmul.f32 %v7008_v21, %v10455_v22  ;;  %v3726_v42 = vmul.f32 1.442695, %v3585_v34 }
 0x6e6   : > { %4755 = vperm.xlu0 %6698, %v7002_v3   ;;  %v12006_v3 = vld [vmem:[#allocation119_spill] sm:$0xff]  ;;  %v7012_v0 = vpop.eup %7011  ;;  %v4627_v14 = vmul.f32 %v7010_v54, %v10159_v29  ;;  %7023 = vpow2.f32 %v3808_v5 }
 0x6e7   : > { %v10548_v39 = vpop.permute.xlu1 %4446  ;;  %v3628_v6 = vsub.f32 %v12006_v3, %v10504_v35  ;;  %5119 = vperm.xlu1 %6699, %v4670_v11   ;;  %v7014_v22 = vpop.eup %7013  ;;  %v4672_v21 = vmul.f32 %v7012_v0, %v10463_v38  ;;  %7025 = vpow2.f32 %v3722_v57  ;;  %v3587_v3 = vsub.f32 %v12010_v9, %v10299_v56  ;;  %v12011_v0 = vld [vmem:[#allocation123_spill] sm:$0xff]  ;;  %v12012_v56 = vld [vmem:[#allocation94_spill] sm:$0xff] }
 0x6e8   : > { %v7016_v30 = vpop.eup %7015  ;;  %v4629_v29 = vmul.f32 %v7014_v22, %v10170_v51  ;;  %v3589_v34 = vsub.f32 %v12012_v56, %v10365_v61 }
 0x6e9   : > { %v10554_v45 = vpop.permute.xlu0 %4241  ;;  %v3812_v46 = vmul.f32 1.442695, %v3628_v6  ;;  %v7018_v38 = vpop.eup %7017  ;;  %v4674_v54 = vmul.f32 %v7016_v30, %v10471_v16  ;;  %v3730_v57 = vmul.f32 1.442695, %v3587_v3  ;;  %v12013_v3 = vld [vmem:[#allocation96_spill] sm:$0xff] }
 0x6ea   : > { %4894 = vperm.xlu0 %6698, %v4625_v23   ;;  %v12009_v23 = vld [vmem:[#allocation121_spill] sm:$0xff]  ;;  %v4631_v51 = vmul.f32 %v7018_v38, %v10178_v24  ;;  %v3734_v24 = vmul.f32 1.442695, %v3589_v34 }
 0x6eb   : > { %v10558_v17 = vpop.permute.xlu1 %4454  ;;  %v3630_v11 = vsub.f32 %v12009_v23, %v10504_v35  ;;  %5129 = vperm.xlu1 %6699, %v4672_v21   ;;  %7027 = vpow2.f32 %v3812_v46  ;;  %v7020_v21 = vpop.eup %7019  ;;  %v10586_v46 = vrot.slane %v10289_v26, %v11941_v48 }
 0x6ec   : > { %12007 = vst [vmem:[#allocation82_spill] sm:$0xff] %v10558_v17  ;;  %7029 = vpow2.f32 %v3726_v42  ;;  %v7022_v22 = vpop.eup %7021  ;;  %v4676_v16 = vmul.f32 %v7020_v21, %v10479_v8  ;;  %v3634_v42 = vsub.f32 %v11907_v40, %v10504_v35  ;;  %v3591_v8 = vsub.f32 %v12013_v3, %v10365_v61  ;;  %v12014_v40 = vld [vmem:[#allocation127_spill] sm:$0xff] }
 0x6ed   : > { %v10564_v50 = vpop.permute.xlu0 %4249  ;;  %v3816_v6 = vmul.f32 1.442695, %v3630_v11  ;;  %v12018_v3 = vld [vmem:[#allocation99_spill] sm:$0xff] }
 0x6ee   : > { %4904 = vperm.xlu0 %6698, %v4627_v14   ;;  %v3632_v14 = vsub.f32 %v12011_v0, %v10504_v35  ;;  %v3636_v0 = vsub.f32 %v12014_v40, %v10586_v46 }
 0x6ef   : > { %v10570_v17 = vpop.permute.xlu1 %4462  ;;  %5139 = vperm.xlu1 %6699, %v4674_v54   ;;  %7031 = vpow2.f32 %v3816_v6  ;;  %v3824_v6 = vmul.f32 1.442695, %v3634_v42 }
 0x6f0   : > { %v3820_v11 = vmul.f32 1.442695, %v3632_v14  ;;  %7033 = vpow2.f32 %v3730_v57  ;;  %v7024_v30 = vpop.eup %7023  ;;  %v3738_v14 = vmul.f32 1.442695, %v3591_v8  ;;  %v12015_v57 = vld [vmem:[#allocation98_spill] sm:$0xff]  ;;  %v3595_v8 = vsub.f32 %v12018_v3, %v10365_v61 }
 0x6f1   : > { %v10574_v5 = vpop.permute.xlu0 %4257  ;;  %v7026_v38 = vpop.eup %7025  ;;  %v4678_v48 = vmul.f32 %v7024_v30, %v10487_v36  ;;  %v3593_v56 = vsub.f32 %v12015_v57, %v10365_v61  ;;  %v12021_v57 = vld [vmem:[#allocation100_spill] sm:$0xff] }
 0x6f2   : > { %4914 = vperm.xlu0 %6698, %v4629_v29   ;;  %v4633_v29 = vmul.f32 %v7022_v22, %v10182_v53  ;;  %7035 = vpow2.f32 %v3820_v11  ;;  %v4635_v53 = vmul.f32 %v7026_v38, %v10186_v4  ;;  %v12017_v11 = vld [vmem:[#allocation129_spill] sm:$0xff] }
 0x6f3   : > { %v10590_v9 = vpop.permute.xlu1 %4470  ;;  %5149 = vperm.xlu1 %6699, %v4676_v16   ;;  %7037 = vpow2.f32 %v3734_v24  ;;  %v3828_v16 = vmul.f32 1.442695, %v3636_v0  ;;  %v3638_v42 = vsub.f32 %v12017_v11, %v10586_v46  ;;  %v3742_v24 = vmul.f32 1.442695, %v3593_v56 }
 0x6f4   : > { %7039 = vpow2.f32 %v3824_v6  ;;  %v12019_v6 = vld [vmem:[#allocation131_spill] sm:$0xff]  ;;  %v3597_v56 = vsub.f32 %v12021_v57, %v10365_v61 }
 0x6f5   : > { %v10582_v23 = vpop.permute.xlu0 %4265  ;;  %v7028_v34 = vpop.eup %7027  ;;  %7041 = vpow2.f32 %v3738_v14  ;;  %v3640_v40 = vsub.f32 %v12019_v6, %v10586_v46  ;;  %v3746_v14 = vmul.f32 1.442695, %v3595_v8 }
 0x6f6   : > { %4924 = vperm.xlu0 %6698, %v4631_v51   ;;  %v7030_v36 = vpop.eup %7029  ;;  %v4680_v51 = vmul.f32 %v7028_v34, %v10500_v59  ;;  %7043 = vpow2.f32 %v3828_v16  ;;  %v3642_v16 = vsub.f32 %v11894_v47, %v10586_v46  ;;  %v3750_v11 = vmul.f32 1.442695, %v3597_v56 }
 0x6f7   : > { %5159 = vperm.xlu1 %6699, %v4678_v48   ;;  %v10602_v21 = vpop.permute.xlu1 %4478  ;;  %v4637_v4 = vmul.f32 %v7030_v36, %v10190_v62  ;;  %v3832_v48 = vmul.f32 1.442695, %v3638_v42  ;;  %7045 = vpow2.f32 %v3742_v24  ;;  %v12022_v42 = vld [vmem:[#allocation101_spill] sm:$0xff]  ;;  %v3644_v47 = vsub.f32 %v11901_v19, %v10586_v46 }
 0x6f8   : > { %12016 = vst [vmem:[#allocation109_spill] sm:$0xff] %v10602_v21  ;;  %v3599_v24 = vsub.f32 %v12022_v42, %v10365_v61  ;;  %v3646_v19 = vsub.f32 %v11913_v1, %v10586_v46  ;;  %v3648_v1 = vsub.f32 %v11919_v43, %v10586_v46  ;;  %v10666_v43 = vrot.slane %v10289_v26, %v11942_v63 }
 0x6f9   : > { %v10596_v54 = vpop.permute.xlu0 %4273  ;;  %v7032_v30 = vpop.eup %7031  ;;  %7047 = vpow2.f32 %v3832_v48  ;;  %v12024_v48 = vld [vmem:[#allocation103_spill] sm:$0xff]  ;;  %v3844_v56 = vmul.f32 1.442695, %v3644_v47 }
 0x6fa   : > { %4934 = vperm.xlu0 %6698, %v4633_v29   ;;  %v7034_v29 = vpop.eup %7033  ;;  %v4682_v59 = vmul.f32 %v7032_v30, %v10514_v55  ;;  %7049 = vpow2.f32 %v3746_v14  ;;  %v3601_v6 = vsub.f32 %v12024_v48, %v10365_v61  ;;  %v3848_v42 = vmul.f32 1.442695, %v3646_v19 }
 0x6fb   : > { %5169 = vperm.xlu1 %6699, %v4680_v51   ;;  %v10618_v0 = vpop.permute.xlu1 %4486  ;;  %v4639_v34 = vmul.f32 %v7034_v29, %v10194_v33  ;;  %v3836_v51 = vmul.f32 1.442695, %v3640_v40  ;;  %v3840_v29 = vmul.f32 1.442695, %v3642_v16  ;;  %v3852_v47 = vmul.f32 1.442695, %v3648_v1 }
 0x6fc   : > { %12020 = vst [vmem:[#allocation83_spill] sm:$0xff] %v10618_v0  ;;  %v7036_v62 = vpop.eup %7035  ;;  %v12030_v1 = vld [vmem:[#allocation145_spill] sm:$0xff] }
 0x6fd   : > { %v10606_v22 = vpop.permute.xlu0 %4281  ;;  %v7038_v55 = vpop.eup %7037  ;;  %7051 = vpow2.f32 %v3836_v51 }
 0x6fe   : > { %4944 = vperm.xlu0 %6698, %v4635_v53   ;;  %v4684_v53 = vmul.f32 %v7036_v62, %v10524_v25  ;;  %v7040_v3 = vpop.eup %7039  ;;  %v4641_v33 = vmul.f32 %v7038_v55, %v10202_v49  ;;  %7053 = vpow2.f32 %v3750_v11  ;;  %v12025_v55 = vld [vmem:[#allocation70_spill] sm:$0xff] }
 0x6ff   : > { %5179 = vperm.xlu1 %6699, %v4682_v59   ;;  %v10630_v8 = vpop.permute.xlu1 %4494  ;;  %v7042_v25 = vpop.eup %7041  ;;  %v4686_v30 = vmul.f32 %v7040_v3, %v10534_v27  ;;  %v3754_v59 = vmul.f32 1.442695, %v3599_v24  ;;  %7055 = vpow2.f32 %v3840_v29 }
 0x700   : > { %12023 = vst [vmem:[#allocation111_spill] sm:$0xff] %v10630_v8  ;;  %v7044_v40 = vpop.eup %7043  ;;  %v4643_v49 = vmul.f32 %v7042_v25, %v10206_v20 }
 0x701   : > { %v10614_v38 = vpop.permute.xlu0 %4289  ;;  %v7046_v14 = vpop.eup %7045  ;;  %v4688_v27 = vmul.f32 %v7044_v40, %v10544_v60  ;;  %7057 = vpow2.f32 %v3754_v59  ;;  %v3650_v59 = vsub.f32 %v11926_v18, %v10586_v46  ;;  %v12028_v18 = vld [vmem:[#allocation143_spill] sm:$0xff] }
 0x702   : > { %4954 = vperm.xlu0 %6698, %v4637_v4   ;;  %v4645_v51 = vmul.f32 %v7046_v14, %v10210_v31  ;;  %7059 = vpow2.f32 %v3844_v56  ;;  %v3652_v19 = vsub.f32 %v12028_v18, %v10666_v43 }
 0x703   : > { %5189 = vperm.xlu1 %6699, %v4684_v53   ;;  %v3603_v53 = vsub.f32 %v12025_v55, %v10365_v61  ;;  %v7048_v20 = vpop.eup %7047  ;;  %v12026_v61 = vld [vmem:[#allocation72_spill] sm:$0xff]  ;;  %v3856_v56 = vmul.f32 1.442695, %v3650_v59 }
 0x704   : > { %v7050_v60 = vpop.eup %7049  ;;  %v4690_v16 = vmul.f32 %v7048_v20, %v10554_v45 }
 0x705   : > { %v10624_v36 = vpop.permute.xlu0 %4300  ;;  %v3762_v3 = vmul.f32 1.442695, %v3603_v53  ;;  %v4647_v25 = vmul.f32 %v7050_v60, %v10214_v44  ;;  %v12029_v53 = vld [vmem:[#allocation76_spill] sm:$0xff] }
 0x706   : > { %4964 = vperm.xlu0 %6698, %v4639_v34   ;;  %v10646_v62 = vpop.permute.xlu1 %4889  ;;  %v3758_v34 = vmul.f32 1.442695, %v3601_v6  ;;  %v12027_v6 = vld [vmem:[#allocation74_spill] sm:$0xff]  ;;  %v3609_v20 = vsub.f32 %v12029_v53, %v10431_v13 }
 0x707   : > { %5199 = vperm.xlu1 %6699, %v4686_v30   ;;  %v7052_v31 = vpop.eup %7051 }
 0x708   : > { %7061 = vpow2.f32 %v3758_v34  ;;  %v7054_v45 = vpop.eup %7053  ;;  %v4692_v30 = vmul.f32 %v7052_v31, %v10564_v50  ;;  %v3607_v50 = vsub.f32 %v12027_v6, %v10431_v13  ;;  %v12031_v31 = vld [vmem:[#allocation79_spill] sm:$0xff] }
 0x709   : > { %v10634_v4 = vpop.permute.xlu0 %4308  ;;  %7063 = vpow2.f32 %v3848_v42  ;;  %v7056_v40 = vpop.eup %7055  ;;  %v3860_v42 = vmul.f32 1.442695, %v3652_v19 }
 0x70a   : > { %4974 = vperm.xlu0 %6698, %v4641_v33   ;;  %v10656_v24 = vpop.permute.xlu1 %4899  ;;  %v3605_v33 = vsub.f32 %v12026_v61, %v10431_v13  ;;  %7065 = vpow2.f32 %v3762_v3  ;;  %v4694_v63 = vmul.f32 %v7056_v40, %v10574_v5  ;;  %v3770_v55 = vmul.f32 1.442695, %v3607_v50  ;;  %v12032_v40 = vld [vmem:[#allocation104_spill] sm:$0xff] }
 0x70b   : > { %5209 = vperm.xlu1 %6699, %v4688_v27   ;;  %v7058_v14 = vpop.eup %7057  ;;  %7067 = vpow2.f32 %v3852_v47  ;;  %v3654_v3 = vsub.f32 %v12030_v1, %v10666_v43 }
 0x70c   : > { %v3766_v44 = vmul.f32 1.442695, %v3605_v33  ;;  %v3774_v33 = vmul.f32 1.442695, %v3609_v20  ;;  %v12034_v20 = vld [vmem:[#allocation106_spill] sm:$0xff] }
 0x70d   : > { %v10642_v57 = vpop.permute.xlu0 %4316  ;;  %v3864_v59 = vmul.f32 1.442695, %v3654_v3  ;;  %v12036_v3 = vld [vmem:[#allocation151_spill] sm:$0xff] }
 0x70e   : > { %4984 = vperm.xlu0 %6698, %v4643_v49   ;;  %v10670_v48 = vpop.permute.xlu1 %4909  ;;  %v4649_v49 = vmul.f32 %v7054_v45, %v10218_v7  ;;  %7069 = vpow2.f32 %v3766_v44  ;;  %v7060_v7 = vpop.eup %7059  ;;  %v3656_v44 = vsub.f32 %v11897_v32, %v10666_v43  ;;  %v12033_v32 = vld [vmem:[#allocation149_spill] sm:$0xff] }
 0x70f   : > { %5219 = vperm.xlu1 %6699, %v4690_v16   ;;  %v4696_v60 = vmul.f32 %v7060_v7, %v10582_v23  ;;  %7071 = vpow2.f32 %v3856_v56  ;;  %v3658_v19 = vsub.f32 %v12033_v32, %v10666_v43  ;;  %v3615_v7 = vsub.f32 %v12034_v20, %v10431_v13 }
 0x710   : > { %7073 = vpow2.f32 %v3770_v55  ;;  %v3868_v18 = vmul.f32 1.442695, %v3656_v44 }
 0x711   : > { %v10652_v11 = vpop.permute.xlu0 %4324  ;;  %7075 = vpow2.f32 %v3860_v42  ;;  %v3872_v1 = vmul.f32 1.442695, %v3658_v19  ;;  %v12041_v19 = vld [vmem:[#allocation64_spill] sm:$0xff] }
 0x712   : > { %4994 = vperm.xlu0 %6698, %v4645_v51   ;;  %v10680_v34 = vpop.permute.xlu1 %4919  ;;  %v4651_v51 = vmul.f32 %v7058_v14, %v10222_v28  ;;  %v7062_v5 = vpop.eup %7061  ;;  %7077 = vpow2.f32 %v3774_v33  ;;  %v3660_v33 = vsub.f32 %v12036_v3, %v10666_v43 }
 0x713   : > { %5229 = vperm.xlu1 %6699, %v4692_v30   ;;  %v7064_v28 = vpop.eup %7063  ;;  %v4653_v45 = vmul.f32 %v7062_v5, %v10226_v58  ;;  %7079 = vpow2.f32 %v3864_v59 }
 0x714   : > { %v7066_v23 = vpop.eup %7065  ;;  %v4698_v30 = vmul.f32 %v7064_v28, %v10596_v54  ;;  %v12037_v28 = vld [vmem:[#allocation108_spill] sm:$0xff] }
 0x715   : > { %v10662_v29 = vpop.permute.xlu0 %4332  ;;  %v7068_v58 = vpop.eup %7067  ;;  %v4655_v14 = vmul.f32 %v7066_v23, %v10230_v10 }
 0x716   : > { %5004 = vperm.xlu0 %6698, %v4647_v25   ;;  %v10690_v61 = vpop.permute.xlu1 %4929  ;;  %v3611_v25 = vsub.f32 %v12031_v31, %v10431_v13 }
 0x717   : > { %5239 = vperm.xlu1 %6699, %v4694_v63   ;;  %v4700_v63 = vmul.f32 %v7068_v58, %v10606_v22 }
 0x718   : > { %v3778_v50 = vmul.f32 1.442695, %v3611_v25  ;;  %v7070_v54 = vpop.eup %7069  ;;  %v3786_v25 = vmul.f32 1.442695, %v3615_v7 }
 0x719   : > { %v10676_v27 = vpop.permute.xlu0 %4340  ;;  %v7072_v10 = vpop.eup %7071 }
 0x71a   : > { %5014 = vperm.xlu0 %6698, %v4649_v49   ;;  %v10700_v6 = vpop.permute.xlu1 %4939  ;;  %v3613_v49 = vsub.f32 %v12032_v40, %v10431_v13  ;;  %7081 = vpow2.f32 %v3778_v50  ;;  %v7074_v22 = vpop.eup %7073  ;;  %v3876_v40 = vmul.f32 1.442695, %v3660_v33  ;;  %v12044_v33 = vld [vmem:[#allocation65_spill] sm:$0xff] }
 0x71b   : > { %5249 = vperm.xlu1 %6699, %v4696_v60   ;;  %v4702_v60 = vmul.f32 %v7072_v10, %v10614_v38  ;;  %7083 = vpow2.f32 %v3868_v18  ;;  %v7076_v23 = vpop.eup %7075 }
 0x71c   : > { %v3782_v53 = vmul.f32 1.442695, %v3613_v49  ;;  %v7078_v38 = vpop.eup %7077  ;;  %v4704_v44 = vmul.f32 %v7076_v23, %v10624_v36  ;;  %v12039_v49 = vld [vmem:[#allocation152_spill] sm:$0xff] }
 0x71d   : > { %v10686_v16 = vpop.permute.xlu0 %4348  ;;  %v3662_v58 = vsub.f32 %v12039_v49, %v10666_v43  ;;  %v7080_v32 = vpop.eup %7079  ;;  %v12045_v23 = vld [vmem:[#allocation68_spill] sm:$0xff] }
 0x71e   : > { %5024 = vperm.xlu0 %6698, %v4651_v51   ;;  %v10710_v55 = vpop.permute.xlu1 %4949  ;;  %v12035_v51 = vld [vmem:[#allocation62_spill] sm:$0xff]  ;;  %7085 = vpow2.f32 %v3782_v53  ;;  %v4661_v53 = vmul.f32 %v7078_v38, %v12041_v19  ;;  %v4706_v20 = vmul.f32 %v7080_v32, %v10634_v4  ;;  %v12046_v38 = vld [vmem:[#allocation156_spill] sm:$0xff] }
 0x71f   : > { %5259 = vperm.xlu1 %6699, %v4698_v30   ;;  %v4657_v5 = vmul.f32 %v7070_v54, %v12035_v51  ;;  %v12038_v30 = vld [vmem:[#allocation63_spill] sm:$0xff]  ;;  %7087 = vpow2.f32 %v3872_v1  ;;  %v3880_v10 = vmul.f32 1.442695, %v3662_v58  ;;  %v12042_v51 = vld [vmem:[#allocation154_spill] sm:$0xff] }
 0x720   : > { %v4659_v59 = vmul.f32 %v7074_v22, %v12038_v30  ;;  %7089 = vpow2.f32 %v3786_v25  ;;  %v10750_v30 = vrot.slane %v10289_v26, %v12045_v23  ;;  %v12047_v58 = vld [vmem:[#allocation114_spill] sm:$0xff] }
 0x721   : > { %v10696_v47 = vpop.permute.xlu0 %4356  ;;  %7091 = vpow2.f32 %v3876_v40 }
 0x722   : > { %5034 = vperm.xlu0 %6698, %v4653_v45   ;;  %v3617_v45 = vsub.f32 %v12037_v28, %v10431_v13 }
 0x723   : > { %5269 = vperm.xlu1 %6699, %v4700_v63   ;;  %v10720_v31 = vpop.permute.xlu1 %4959  ;;  %v12040_v63 = vld [vmem:[#allocation110_spill] sm:$0xff] }
 0x724   : > { %v3790_v54 = vmul.f32 1.442695, %v3617_v45  ;;  %v3619_v18 = vsub.f32 %v12040_v63, %v10431_v13  ;;  %v7082_v36 = vpop.eup %7081  ;;  %v12043_v13 = vld [vmem:[#allocation112_spill] sm:$0xff]  ;;  %v12048_v63 = vld [vmem:[#allocation66_spill] sm:$0xff] }
 0x725   : > { %v10706_v56 = vpop.permute.xlu0 %4367  ;;  %v3621_v1 = vsub.f32 %v12043_v13, %v10504_v35  ;;  %v7084_v3 = vpop.eup %7083  ;;  %v4663_v25 = vmul.f32 %v7082_v36, %v12044_v33 }
 0x726   : > { %5044 = vperm.xlu0 %6698, %v4655_v14   ;;  %7093 = vpow2.f32 %v3790_v54  ;;  %v4708_v28 = vmul.f32 %v7084_v3, %v10642_v57  ;;  %v3623_v57 = vsub.f32 %v12047_v58, %v10504_v35  ;;  %v12051_v3 = vld [vmem:[#allocation67_spill] sm:$0xff] }
 0x727   : > { %5279 = vperm.xlu1 %6699, %v4702_v60   ;;  %v10730_v14 = vpop.permute.xlu1 %4969  ;;  %v3794_v60 = vmul.f32 1.442695, %v3619_v18  ;;  %7095 = vpow2.f32 %v3880_v10  ;;  %v3798_v49 = vmul.f32 1.442695, %v3621_v1 }
 0x728   : > { %v7086_v4 = vpop.eup %7085 }
 0x729   : > { %v10716_v42 = vpop.permute.xlu0 %4375  ;;  %7097 = vpow2.f32 %v3794_v60  ;;  %v7088_v54 = vpop.eup %7087  ;;  %v4665_v18 = vmul.f32 %v7086_v4, %v12048_v63  ;;  %v12050_v60 = vld [vmem:[#allocation116_spill] sm:$0xff]  ;;  %v12055_v63 = vld [vmem:[#allocation181_spill] sm:$0xff] }
 0x72a   : > { %5054 = vperm.xlu0 %6698, %v4657_v5   ;;  %v3664_v5 = vsub.f32 %v12042_v51, %v10666_v43  ;;  %v7090_v32 = vpop.eup %7089  ;;  %v4710_v19 = vmul.f32 %v7088_v54, %v10652_v11  ;;  %v3625_v13 = vsub.f32 %v12050_v60, %v10504_v35  ;;  %v12057_v60 = vld [vmem:[#allocation120_spill] sm:$0xff] }
 0x72b   : > { %5289 = vperm.xlu1 %6699, %v4704_v44   ;;  %v10740_v22 = vpop.permute.xlu1 %4979  ;;  %v3666_v44 = vsub.f32 %v12046_v38, %v10666_v43  ;;  %v7092_v1 = vpop.eup %7091  ;;  %v4667_v33 = vmul.f32 %v7090_v32, %v12051_v3  ;;  %v12053_v38 = vld [vmem:[#allocation160_spill] sm:$0xff] }
 0x72c   : > { %v3806_v58 = vmul.f32 1.442695, %v3625_v13  ;;  %v3629_v13 = vsub.f32 %v12057_v60, %v10504_v35 }
 0x72d   : > { %v10726_v50 = vpop.permute.xlu0 %4383  ;;  %v3888_v36 = vmul.f32 1.442695, %v3666_v44  ;;  %v3670_v44 = vsub.f32 %v12053_v38, %v10750_v30 }
 0x72e   : > { %5064 = vperm.xlu0 %6698, %v4659_v59   ;;  %v3884_v59 = vmul.f32 1.442695, %v3664_v5  ;;  %v3802_v5 = vmul.f32 1.442695, %v3623_v57  ;;  %v12054_v57 = vld [vmem:[#allocation118_spill] sm:$0xff] }
 0x72f   : > { %5299 = vperm.xlu1 %6699, %v4706_v20   ;;  %v10754_v40 = vpop.permute.xlu1 %4989  ;;  %v12049_v20 = vld [vmem:[#allocation158_spill] sm:$0xff] }
 0x730   : > { %7099 = vpow2.f32 %v3884_v59  ;;  %v3668_v10 = vsub.f32 %v12049_v20, %v10750_v30  ;;  %v7094_v11 = vpop.eup %7093 }
 0x731   : > { %v10736_v7 = vpop.permute.xlu0 %4391  ;;  %7101 = vpow2.f32 %v3798_v49  ;;  %v7096_v54 = vpop.eup %7095 }
 0x732   : > { %5074 = vperm.xlu0 %6698, %v4661_v53   ;;  %7103 = vpow2.f32 %v3888_v36  ;;  %v3892_v59 = vmul.f32 1.442695, %v3668_v10  ;;  %v3896_v36 = vmul.f32 1.442695, %v3670_v44  ;;  %v12056_v10 = vld [vmem:[#allocation172_spill] sm:$0xff]  ;;  %v12059_v44 = vld [vmem:[#allocation147_spill] sm:$0xff] }
 0x733   : > { %5309 = vperm.xlu1 %6699, %v4708_v28   ;;  %v10764_v51 = vpop.permute.xlu1 %4999  ;;  %v12052_v28 = vld [vmem:[#allocation77_spill] sm:$0xff]  ;;  %7105 = vpow2.f32 %v3802_v5  ;;  %v7098_v32 = vpop.eup %7097 }
 0x734   : > { %v10774_v23 = vrot.slane %v10289_v26, %v12052_v28  ;;  %v4714_v26 = vmul.f32 %v7096_v54, %v10676_v27  ;;  %7107 = vpow2.f32 %v3892_v59  ;;  %v3814_v54 = vmul.f32 1.442695, %v3629_v13 }
 0x735   : > { %v10746_v45 = vpop.permute.xlu0 %4399  ;;  %7109 = vpow2.f32 %v3806_v58 }
 0x736   : > { %5084 = vperm.xlu0 %6698, %v4663_v25   ;;  %v4712_v25 = vmul.f32 %v7092_v1, %v10662_v29  ;;  %v3627_v29 = vsub.f32 %v12054_v57, %v10504_v35  ;;  %v3684_v5 = vsub.f32 %v12056_v10, %v10774_v23  ;;  %7111 = vpow2.f32 %v3896_v36  ;;  %v12062_v10 = vld [vmem:[#allocation162_spill] sm:$0xff] }
 0x737   : > { %5319 = vperm.xlu1 %6699, %v4710_v19   ;;  %v10778_v49 = vpop.permute.xlu1 %5009  ;;  %v3686_v57 = vsub.f32 %v12059_v44, %v10774_v23 }
 0x738   : > { %v3810_v1 = vmul.f32 1.442695, %v3627_v29  ;;  %v3924_v38 = vmul.f32 1.442695, %v3684_v5  ;;  %v3672_v5 = vsub.f32 %v12062_v10, %v10750_v30 }
 0x739   : > { %v10760_v53 = vpop.permute.xlu0 %4407 }
 0x73a   : > { %5094 = vperm.xlu0 %6698, %v4665_v18   ;;  %v4669_v18 = vmul.f32 %v7094_v11, %v12055_v63  ;;  %v7100_v3 = vpop.eup %7099  ;;  %v12060_v63 = vld [vmem:[#allocation122_spill] sm:$0xff]  ;;  %7113 = vpow2.f32 %v3810_v1 }
 0x73b   : > { %5329 = vperm.xlu1 %6699, %v4712_v25   ;;  %v10786_v20 = vpop.permute.xlu1 %5019  ;;  %v7102_v27 = vpop.eup %7101  ;;  %v4716_v25 = vmul.f32 %v7100_v3, %v10686_v16  ;;  %v3631_v58 = vsub.f32 %v12060_v63, %v10504_v35  ;;  %7115 = vpow2.f32 %v3924_v38  ;;  %v3928_v3 = vmul.f32 1.442695, %v3686_v57 }
 0x73c   : > { %v7104_v29 = vpop.eup %7103  ;;  %7117 = vpow2.f32 %v3814_v54  ;;  %v3900_v38 = vmul.f32 1.442695, %v3672_v5  ;;  %v12068_v5 = vld [vmem:[#allocation164_spill] sm:$0xff] }
 0x73d   : > { %v10770_v4 = vpop.permute.xlu0 %4415  ;;  %v4718_v16 = vmul.f32 %v7104_v29, %v10696_v47  ;;  %v3818_v13 = vmul.f32 1.442695, %v3631_v58  ;;  %v12065_v29 = vld [vmem:[#allocation163_spill] sm:$0xff]  ;;  %7119 = vpow2.f32 %v3928_v3  ;;  %v12066_v58 = vld [vmem:[#allocation126_spill] sm:$0xff]  ;;  %v3674_v3 = vsub.f32 %v12068_v5, %v10750_v30 }
 0x73e   : > { %5104 = vperm.xlu0 %6698, %v4667_v33   ;;  %v12058_v33 = vld [vmem:[#allocation182_spill] sm:$0xff] }
 0x73f   : > { %5339 = vperm.xlu1 %6699, %v4714_v26   ;;  %v4671_v11 = vmul.f32 %v7098_v32, %v12058_v33  ;;  %v10794_v59 = vpop.permute.xlu1 %5029  ;;  %v7106_v26 = vpop.eup %7105  ;;  %v12063_v33 = vld [vmem:[#allocation124_spill] sm:$0xff]  ;;  %7121 = vpow2.f32 %v3818_v13 }
 0x740   : > { %v3633_v1 = vsub.f32 %v12063_v33, %v10504_v35  ;;  %7123 = vpow2.f32 %v3900_v38 }
 0x741   : > { %v10784_v19 = vpop.permute.xlu0 %4423 }
 0x742   : > { %5114 = vperm.xlu0 %6698, %v4669_v18   ;;  %v12061_v18 = vld [vmem:[#allocation183_spill] sm:$0xff]  ;;  %v3822_v54 = vmul.f32 1.442695, %v3633_v1 }
 0x743   : > { %5349 = vperm.xlu1 %6699, %v4716_v25   ;;  %v4673_v32 = vmul.f32 %v7102_v27, %v12061_v18  ;;  %v10804_v60 = vpop.permute.xlu1 %5039  ;;  %v12064_v27 = vld [vmem:[#allocation184_spill] sm:$0xff]  ;;  %v3673_v18 = vsub.f32 %v12065_v29, %v10750_v30 }
 0x744   : > { %v4675_v25 = vmul.f32 %v7106_v26, %v12064_v27  ;;  %7125 = vpow2.f32 %v3822_v54 }
 0x745   : > { %v4435_v28 = vpop.permute.xlu0 %4434  ;;  %v3902_v27 = vmul.f32 1.442695, %v3673_v18  ;;  %v12071_v18 = vld [vmem:[#allocation165_spill] sm:$0xff] }
 0x746   : > { %5124 = vperm.xlu0 %6698, %v4671_v11   ;;  %v7108_v11 = vpop.eup %7107  ;;  %v3675_v38 = vsub.f32 %v12071_v18, %v10750_v30 }
 0x747   : > { %5359 = vperm.xlu1 %6699, %v4718_v16   ;;  %v7110_v44 = vpop.eup %7109  ;;  %v4720_v47 = vmul.f32 %v7108_v11, %v10706_v56  ;;  %v10814_v57 = vpop.permute.xlu1 %5049  ;;  %v12067_v16 = vld [vmem:[#allocation185_spill] sm:$0xff]  ;;  %7127 = vpow2.f32 %v3902_v27 }
 0x748   : > { %v7112_v26 = vpop.eup %7111  ;;  %v4677_v10 = vmul.f32 %v7110_v44, %v12067_v16  ;;  %v3904_v16 = vmul.f32 1.442695, %v3674_v3  ;;  %v3906_v27 = vmul.f32 1.442695, %v3675_v38  ;;  %v12074_v3 = vld [vmem:[#allocation166_spill] sm:$0xff] }
 0x749   : > { %v4443_v36 = vpop.permute.xlu0 %4442  ;;  %v7114_v56 = vpop.eup %7113  ;;  %v4722_v33 = vmul.f32 %v7112_v26, %v10716_v42  ;;  %v3676_v18 = vsub.f32 %v12074_v3, %v10750_v30 }
 0x74a   : > { %5134 = vperm.xlu0 %6698, %v4673_v32   ;;  %v3635_v32 = vsub.f32 %v12066_v58, %v10504_v35  ;;  %v12069_v35 = vld [vmem:[#allocation128_spill] sm:$0xff]  ;;  %v7116_v44 = vpop.eup %7115 }
 0x74b   : > { %5369 = vperm.xlu1 %6699, %v4720_v47   ;;  %v3637_v1 = vsub.f32 %v12069_v35, %v10586_v46  ;;  %v12070_v47 = vld [vmem:[#allocation186_spill] sm:$0xff]  ;;  %v7118_v42 = vpop.eup %7117  ;;  %v4736_v58 = vmul.f32 %v7116_v44, %v4435_v28  ;;  %v3908_v3 = vmul.f32 1.442695, %v3676_v18  ;;  %v12082_v18 = vld [vmem:[#allocation167_spill] sm:$0xff] }
 0x74c   : > { %v3826_v13 = vmul.f32 1.442695, %v3635_v32  ;;  %v4679_v29 = vmul.f32 %v7114_v56, %v12070_v47  ;;  %v7120_v32 = vpop.eup %7119  ;;  %v12073_v56 = vld [vmem:[#allocation130_spill] sm:$0xff] }
 0x74d   : > { %v10810_v63 = vpop.permute.xlu0 %4450  ;;  %v3830_v54 = vmul.f32 1.442695, %v3637_v1  ;;  %v7122_v35 = vpop.eup %7121  ;;  %v3639_v28 = vsub.f32 %v12073_v56, %v10586_v46  ;;  %v4738_v44 = vmul.f32 %v7120_v32, %v4443_v36  ;;  %v12075_v1 = vld [vmem:[#allocation188_spill] sm:$0xff] }
 0x74e   : > { %5144 = vperm.xlu0 %6698, %v4675_v25   ;;  %v10824_v25 = vpop.permute.xlu1 %5059  ;;  %7129 = vpow2.f32 %v3826_v13  ;;  %v7124_v13 = vpop.eup %7123 }
 0x74f   : > { %5379 = vperm.xlu1 %6699, %v4722_v33   ;;  %7131 = vpow2.f32 %v3904_v16  ;;  %v4724_v32 = vmul.f32 %v7124_v13, %v10726_v50  ;;  %v12078_v16 = vld [vmem:[#allocation102_spill] sm:$0xff] }
 0x750   : > { %7133 = vpow2.f32 %v3830_v54  ;;  %v3677_v56 = vsub.f32 %v12078_v16, %v10750_v30  ;;  %v3678_v16 = vsub.f32 %v12082_v18, %v10750_v30 }
 0x751   : > { %v10820_v11 = vpop.permute.xlu0 %4458  ;;  %7135 = vpow2.f32 %v3906_v27 }
 0x752   : > { %5154 = vperm.xlu0 %6698, %v4677_v10   ;;  %v10833_v5 = vpop.permute.xlu1 %5069  ;;  %v12072_v10 = vld [vmem:[#allocation187_spill] sm:$0xff]  ;;  %v3910_v0 = vmul.f32 1.442695, %v3677_v56 }
 0x753   : > { %5449 = vperm.xlu1 %6699, %v4736_v58   ;;  %v4681_v33 = vmul.f32 %v7118_v42, %v12072_v10  ;;  %v7126_v42 = vpop.eup %7125  ;;  %v3834_v58 = vmul.f32 1.442695, %v3639_v28  ;;  %v12076_v10 = vld [vmem:[#allocation132_spill] sm:$0xff] }
 0x754   : > { %v3641_v36 = vsub.f32 %v12076_v10, %v10586_v46  ;;  %v7128_v54 = vpop.eup %7127  ;;  %v12080_v10 = vld [vmem:[#allocation134_spill] sm:$0xff] }
 0x755   : > { %v10829_v26 = vpop.permute.xlu0 %4466  ;;  %7137 = vpow2.f32 %v3834_v58  ;;  %v3643_v50 = vsub.f32 %v12080_v10, %v10586_v46  ;;  %v4725_v13 = vmul.f32 %v7128_v54, %v10476_v41  ;;  %v12084_v10 = vld [vmem:[#allocation136_spill] sm:$0xff] }
 0x756   : > { %5164 = vperm.xlu0 %6698, %v4679_v29   ;;  %v10842_v8 = vpop.permute.xlu1 %5079  ;;  %v4683_v29 = vmul.f32 %v7122_v35, %v12075_v1  ;;  %v12079_v35 = vld [vmem:[#allocation81_spill] sm:$0xff]  ;;  %v3838_v1 = vmul.f32 1.442695, %v3641_v36  ;;  %7139 = vpow2.f32 %v3908_v3  ;;  %v3645_v41 = vsub.f32 %v12084_v10, %v10586_v46  ;;  %v12086_v3 = vld [vmem:[#allocation90_spill] sm:$0xff] }
 0x757   : > { %5459 = vperm.xlu1 %6699, %v4738_v44   ;;  %v4685_v44 = vmul.f32 %v7126_v42, %v12079_v35  ;;  %v3842_v35 = vmul.f32 1.442695, %v3643_v50  ;;  %v3679_v18 = vsub.f32 %v12086_v3, %v10750_v30 }
 0x758   : > { %v7130_v28 = vpop.eup %7129  ;;  %7141 = vpow2.f32 %v3838_v1  ;;  %v3846_v50 = vmul.f32 1.442695, %v3645_v41 }
 0x759   : > { %v10838_v47 = vpop.permute.xlu0 %4474  ;;  %v7132_v42 = vpop.eup %7131  ;;  %7143 = vpow2.f32 %v3910_v0  ;;  %v3914_v0 = vmul.f32 1.442695, %v3679_v18 }
 0x75a   : > { %5174 = vperm.xlu0 %6698, %v4681_v33   ;;  %v10852_v33 = vpop.permute.xlu1 %5089  ;;  %v7134_v36 = vpop.eup %7133  ;;  %v4726_v54 = vmul.f32 %v7132_v42, %v10736_v7  ;;  %7145 = vpow2.f32 %v3842_v35  ;;  %v12090_v35 = vld [vmem:[#allocation189_spill] sm:$0xff] }
 0x75b   : > { %5389 = vperm.xlu1 %6699, %v4724_v32   ;;  %v12083_v32 = vld [vmem:[#allocation92_spill] sm:$0xff] }
 0x75c   : > { %v4687_v58 = vmul.f32 %v7130_v28, %v12083_v32  ;;  %v7136_v28 = vpop.eup %7135  ;;  %v12088_v32 = vld [vmem:[#allocation138_spill] sm:$0xff] }
 0x75d   : > { %v10848_v38 = vpop.permute.xlu0 %4482  ;;  %v3647_v10 = vsub.f32 %v12088_v32, %v10586_v46  ;;  %v4727_v7 = vmul.f32 %v7136_v28, %v10484_v15 }
 0x75e   : > { %12077 = vst [vmem:[#allocation85_spill] sm:$0xff] %v10848_v38  ;;  %5184 = vperm.xlu0 %6698, %v4683_v29   ;;  %v10862_v29 = vpop.permute.xlu1 %5099 }
 0x75f   : > { %5394 = vperm.xlu1 %6699, %v4725_v13   ;;  %v12087_v13 = vld [vmem:[#allocation84_spill] sm:$0xff] }
 0x760   : > { %v4689_v1 = vmul.f32 %v7134_v36, %v12087_v13  ;;  %v12091_v13 = vld [vmem:[#allocation140_spill] sm:$0xff] }
 0x761   : > { %v10858_v27 = vpop.permute.xlu0 %4490  ;;  %v3649_v15 = vsub.f32 %v12091_v13, %v10586_v46  ;;  %v12094_v13 = vld [vmem:[#allocation142_spill] sm:$0xff] }
 0x762   : > { %12081 = vst [vmem:[#allocation113_spill] sm:$0xff] %v10858_v27  ;;  %5194 = vperm.xlu0 %6698, %v4685_v44   ;;  %v3912_v27 = vmul.f32 1.442695, %v3678_v16  ;;  %v10872_v44 = vpop.permute.xlu1 %5109  ;;  %v12089_v16 = vld [vmem:[#allocation168_spill] sm:$0xff] }
 0x763   : > { %5399 = vperm.xlu1 %6699, %v4726_v54   ;;  %v3680_v3 = vsub.f32 %v12089_v16, %v10750_v30  ;;  %v3850_v54 = vmul.f32 1.442695, %v3647_v10 }
 0x764   : > { %7147 = vpow2.f32 %v3912_v27  ;;  %v12092_v27 = vld [vmem:[#allocation169_spill] sm:$0xff] }
 0x765   : > { %v10868_v56 = vpop.permute.xlu0 %4755  ;;  %7149 = vpow2.f32 %v3846_v50  ;;  %v3681_v32 = vsub.f32 %v12092_v27, %v10750_v30  ;;  %v3916_v16 = vmul.f32 1.442695, %v3680_v3  ;;  %v12093_v50 = vld [vmem:[#allocation190_spill] sm:$0xff] }
 0x766   : > { %12085 = vst [vmem:[#allocation86_spill] sm:$0xff] %v10868_v56  ;;  %5204 = vperm.xlu0 %6698, %v4687_v58   ;;  %v10882_v56 = vpop.permute.xlu1 %5119  ;;  %v7138_v58 = vpop.eup %7137  ;;  %7151 = vpow2.f32 %v3914_v0  ;;  %v12095_v3 = vld [vmem:[#allocation170_spill] sm:$0xff] }
 0x767   : > { %5404 = vperm.xlu1 %6699, %v4727_v7   ;;  %v7140_v36 = vpop.eup %7139  ;;  %v4691_v41 = vmul.f32 %v7138_v58, %v12090_v35  ;;  %7153 = vpow2.f32 %v3850_v54  ;;  %v3854_v35 = vmul.f32 1.442695, %v3649_v15  ;;  %v3918_v38 = vmul.f32 1.442695, %v3681_v32 }
 0x768   : > { %v4728_v28 = vmul.f32 %v7140_v36, %v10746_v45  ;;  %v7142_v7 = vpop.eup %7141  ;;  %v3651_v45 = vsub.f32 %v12094_v13, %v10586_v46  ;;  %7155 = vpow2.f32 %v3916_v16  ;;  %v3682_v27 = vsub.f32 %v12095_v3, %v10750_v30  ;;  %v12096_v46 = vld [vmem:[#allocation144_spill] sm:$0xff]  ;;  %v12097_v16 = vld [vmem:[#allocation171_spill] sm:$0xff] }
 0x769   : > { %v10878_v42 = vpop.permute.xlu0 %4894  ;;  %v7144_v58 = vpop.eup %7143  ;;  %v4693_v10 = vmul.f32 %v7142_v7, %v12093_v50  ;;  %7157 = vpow2.f32 %v3854_v35  ;;  %v3683_v50 = vsub.f32 %v12097_v16, %v10750_v30  ;;  %v4760_v16 = vld [vmem:[%s8305_s28 + $0x8] sm:$0xff] }
 0x76a   : > { %5214 = vperm.xlu0 %6698, %v4689_v1   ;;  %v10892_v1 = vpop.permute.xlu1 %5129  ;;  %v4729_v36 = vmul.f32 %v7144_v58, %v10492_v12  ;;  %v3858_v15 = vmul.f32 1.442695, %v3651_v45  ;;  %v3653_v12 = vsub.f32 %v12096_v46, %v10666_v43  ;;  %7159 = vpow2.f32 %v3918_v38  ;;  %v12100_v46 = vld [vmem:[#allocation191_spill] sm:$0xff] }
 0x76b   : > { %5409 = vperm.xlu1 %6699, %v4728_v28   ;;  %v7146_v28 = vpop.eup %7145  ;;  %v3920_v13 = vmul.f32 1.442695, %v3682_v27  ;;  %v3922_v27 = vmul.f32 1.442695, %v3683_v50  ;;  %v4759_v50 = vld [vmem:[%s8305_s28] sm:$0xff] }
 0x76c   : > { %v4695_v54 = vmul.f32 %v7146_v28, %v10348_v37  ;;  %7161 = vpow2.f32 %v3858_v15  ;;  %v3862_v45 = vmul.f32 1.442695, %v3653_v12  ;;  %v12102_v12 = vld [vmem:[#allocation148_spill] sm:$0xff] }
 0x76d   : > { %v10888_v18 = vpop.permute.xlu0 %4904  ;;  %7163 = vpow2.f32 %v3920_v13 }
 0x76e   : > { %5224 = vperm.xlu0 %6698, %v4691_v41   ;;  %v10902_v41 = vpop.permute.xlu1 %5139  ;;  %v7148_v7 = vpop.eup %7147  ;;  %7165 = vpow2.f32 %v3862_v45  ;;  %v12104_v45 = vld [vmem:[#allocation150_spill] sm:$0xff] }
 0x76f   : > { %5414 = vperm.xlu1 %6699, %v4729_v36   ;;  %v4730_v58 = vmul.f32 %v7148_v7, %v10760_v53  ;;  %v7150_v36 = vpop.eup %7149  ;;  %v12099_v53 = vld [vmem:[#allocation146_spill] sm:$0xff]  ;;  %7167 = vpow2.f32 %v3922_v27 }
 0x770   : > { %v7152_v37 = vpop.eup %7151  ;;  %v4697_v35 = vmul.f32 %v7150_v36, %v10356_v2  ;;  %v3655_v3 = vsub.f32 %v12099_v53, %v10666_v43  ;;  %v3657_v36 = vsub.f32 %v12102_v12, %v10666_v43  ;;  %v5527_v12 = vmul.f32 %v10646_v62, %v4759_v50 }
 0x771   : > { %v10898_v0 = vpop.permute.xlu0 %4914  ;;  %v4731_v38 = vmul.f32 %v7152_v37, %v10509_v52  ;;  %v7154_v7 = vpop.eup %7153 }
 0x772   : > { %5234 = vperm.xlu0 %6698, %v4693_v10   ;;  %v10912_v10 = vpop.permute.xlu1 %5149  ;;  %v3866_v15 = vmul.f32 1.442695, %v3655_v3  ;;  %v3659_v3 = vsub.f32 %v12104_v45, %v10666_v43 }
 0x773   : > { %12098 = vst [vmem:[#allocation115_spill] sm:$0xff] %v10912_v10  ;;  %5419 = vperm.xlu1 %6699, %v4730_v58   ;;  %v4699_v58 = vmul.f32 %v7154_v7, %v12100_v46  ;;  %v3870_v46 = vmul.f32 1.442695, %v3657_v36  ;;  %v4762_v36 = vld [vmem:[%s8305_s28 + $0x18] sm:$0xff] }
 0x774   : > { %7169 = vpow2.f32 %v3866_v15  ;;  %v3874_v15 = vmul.f32 1.442695, %v3659_v3  ;;  %v4776_v3 = vld [vmem:[%s8305_s28 + $0x88] sm:$0xff] }
 0x775   : > { %v10908_v32 = vpop.permute.xlu0 %4924  ;;  %7171 = vpow2.f32 %v3870_v46 }
 0x776   : > { %5244 = vperm.xlu0 %6698, %v4695_v54   ;;  %v7156_v54 = vpop.eup %7155  ;;  %v10922_v2 = vpop.permute.xlu1 %5159  ;;  %7173 = vpow2.f32 %v3874_v15  ;;  %v12113_v15 = vld [vmem:[#allocation192_spill] sm:$0xff] }
 0x777   : > { %5424 = vperm.xlu1 %6699, %v4731_v38   ;;  %12101 = vst [vmem:[#allocation87_spill] sm:$0xff] %v10922_v2  ;;  %v4732_v52 = vmul.f32 %v7156_v54, %v10770_v4  ;;  %v7158_v13 = vpop.eup %7157  ;;  %v12103_v38 = vld [vmem:[#allocation93_spill] sm:$0xff]  ;;  %v12105_v4 = vld [vmem:[#allocation80_spill] sm:$0xff] }
 0x778   : > { %v7160_v53 = vpop.eup %7159  ;;  %v4701_v7 = vmul.f32 %v7158_v13, %v12103_v38  ;;  %v12107_v13 = vld [vmem:[#allocation95_spill] sm:$0xff] }
 0x779   : > { %v10918_v28 = vpop.permute.xlu0 %4934  ;;  %v4733_v54 = vmul.f32 %v7160_v53, %v12105_v4  ;;  %v12108_v53 = vld [vmem:[#allocation61_spill] sm:$0xff] }
 0x77a   : > { %5254 = vperm.xlu0 %6698, %v4697_v35   ;;  %v5528_v35 = vmul.f32 %v10878_v42, %v4760_v16  ;;  %v10939_v2 = vpop.permute.xlu1 %5169  ;;  %v7162_v42 = vpop.eup %7161  ;;  %v3661_v62 = vsub.f32 %v12108_v53, %v10666_v43 }
 0x77b   : > { %5429 = vperm.xlu1 %6699, %v4732_v52   ;;  %12106 = vst [vmem:[#allocation117_spill] sm:$0xff] %v10939_v2  ;;  %v7164_v52 = vpop.eup %7163  ;;  %v4703_v38 = vmul.f32 %v7162_v42, %v12107_v13  ;;  %v12109_v42 = vld [vmem:[#allocation97_spill] sm:$0xff]  ;;  %v4777_v2 = vld [vmem:[%s8305_s28 + $0x90] sm:$0xff] }
 0x77c   : > { %v5655_v16 = vadd.f32 %v5528_v35, %v5527_v12  ;;  %v4734_v45 = vmul.f32 %v7164_v52, %v10784_v19  ;;  %v7166_v35 = vpop.eup %7165  ;;  %v12111_v19 = vld [vmem:[#allocation153_spill] sm:$0xff] }
 0x77d   : > { %v10927_v37 = vpop.permute.xlu0 %4944  ;;  %v7168_v46 = vpop.eup %7167  ;;  %v4705_v13 = vmul.f32 %v7166_v35, %v12109_v42  ;;  %v12112_v52 = vld [vmem:[#allocation105_spill] sm:$0xff] }
 0x77e   : > { %5264 = vperm.xlu0 %6698, %v4699_v58   ;;  %v4761_v58 = vld [vmem:[%s8305_s28 + $0x10] sm:$0xff]  ;;  %v10953_v53 = vpop.permute.xlu1 %5179  ;;  %v4778_v35 = vld [vmem:[%s8305_s28 + $0x98] sm:$0xff] }
 0x77f   : > { %5434 = vperm.xlu1 %6699, %v4733_v54   ;;  %v5529_v50 = vmul.f32 %v10656_v24, %v4761_v58  ;;  %v5530_v54 = vmul.f32 %v10888_v18, %v4762_v36  ;;  %12110 = vst [vmem:[#allocation88_spill] sm:$0xff] %v10953_v53  ;;  %v3878_v24 = vmul.f32 1.442695, %v3661_v62  ;;  %v3663_v58 = vsub.f32 %v12111_v19, %v10666_v43  ;;  %v4763_v18 = vld [vmem:[%s8305_s28 + $0x20] sm:$0xff]  ;;  %v4764_v19 = vld [vmem:[%s8305_s28 + $0x28] sm:$0xff] }
 0x780   : > { %v5545_v62 = vmul.f32 %v10740_v22, %v4777_v2  ;;  %v5532_v2 = vmul.f32 %v10898_v0, %v4764_v19  ;;  %v4782_v19 = vld [vmem:[%s8305_s28 + $0xb8] sm:$0xff] }
 0x781   : > { %v10936_v27 = vpop.permute.xlu0 %4954  ;;  %v5656_v12 = vadd.f32 %v5655_v16, %v5529_v50  ;;  %v7170_v50 = vpop.eup %7169  ;;  %7175 = vpow2.f32 %v3878_v24  ;;  %v4780_v24 = vld [vmem:[%s8305_s28 + $0xa8] sm:$0xff] }
 0x782   : > { %5274 = vperm.xlu0 %6698, %v4701_v7   ;;  %v4775_v7 = vld [vmem:[%s8305_s28 + $0x80] sm:$0xff]  ;;  %v4707_v42 = vmul.f32 %v7170_v50, %v12113_v15  ;;  %v7172_v22 = vpop.eup %7171  ;;  %v4765_v15 = vld [vmem:[%s8305_s28 + $0x30] sm:$0xff] }
 0x783   : > { %5439 = vperm.xlu1 %6699, %v4734_v45   ;;  %v5543_v16 = vmul.f32 %v10730_v14, %v4775_v7  ;;  %v5657_v45 = vadd.f32 %v5656_v12, %v5530_v54  ;;  %v5531_v14 = vmul.f32 %v10670_v48, %v4763_v18  ;;  %v10969_v54 = vpop.permute.xlu1 %5189 }
 0x785   : > { %v10947_v4 = vpop.permute.xlu0 %4964 }
 0x786   : > { %5284 = vperm.xlu0 %6698, %v4703_v38   ;;  %v4735_v38 = vmul.f32 %v7168_v46, %v12112_v52  ;;  %v3882_v46 = vmul.f32 1.442695, %v3663_v58  ;;  %v12114_v52 = vld [vmem:[#allocation155_spill] sm:$0xff]  ;;  %v12115_v58 = vld [vmem:[#allocation193_spill] sm:$0xff] }
 0x787   : > { %v3665_v10 = vsub.f32 %v12114_v52, %v10666_v43  ;;  %v12117_v52 = vld [vmem:[#allocation194_spill] sm:$0xff] }
 0x788   : > { %5444 = vperm.xlu1 %6699, %v4735_v38   ;;  %v4709_v38 = vmul.f32 %v7172_v22, %v12115_v58  ;;  %7177 = vpow2.f32 %v3882_v46  ;;  %v4766_v46 = vld [vmem:[%s8305_s28 + $0x38] sm:$0xff]  ;;  %v4783_v22 = vld [vmem:[%s8305_s28 + $0xc0] sm:$0xff] }
 0x789   : > { %v4975_v21 = vpop.permute.xlu0 %4974  ;;  %v3886_v18 = vmul.f32 1.442695, %v3665_v10  ;;  %v10983_v10 = vpop.permute.xlu1 %5199  ;;  %v5534_v58 = vmul.f32 %v10908_v32, %v4766_v46 }
 0x78a   : > { %v5544_v36 = vmul.f32 %v4975_v21, %v4776_v3  ;;  %5294 = vperm.xlu0 %6698, %v4705_v13   ;;  %v4779_v21 = vld [vmem:[%s8305_s28 + $0xa0] sm:$0xff]  ;;  %v5658_v13 = vadd.f32 %v5657_v45, %v5531_v14  ;;  %v7174_v45 = vpop.eup %7173 }
 0x78b   : > { %v4711_v14 = vmul.f32 %v7174_v45, %v12117_v52  ;;  %7179 = vpow2.f32 %v3886_v18 }
 0x78c   : > { %v5676_v53 = vadd.f32 %v5544_v36, %v5543_v16  ;;  %v5547_v16 = vmul.f32 %v10754_v40, %v4779_v21  ;;  %v12116_v36 = vld [vmem:[#allocation157_spill] sm:$0xff] }
 0x78d   : > { %v4985_v7 = vpop.permute.xlu0 %4984  ;;  %v3667_v50 = vsub.f32 %v12116_v36, %v10666_v43  ;;  %v5551_v36 = vmul.f32 %v10778_v49, %v4783_v22  ;;  %v10997_v45 = vpop.permute.xlu1 %5209  ;;  %v12121_v49 = vld [vmem:[#allocation69_spill] sm:$0xff]  ;;  %v4787_v22 = vld [vmem:[%s8305_s28 + $0xe0] sm:$0xff] }
 0x78e   : > { %v5546_v12 = vmul.f32 %v4985_v7, %v4778_v35  ;;  %v5677_v3 = vadd.f32 %v5676_v53, %v5545_v62  ;;  %5304 = vperm.xlu0 %6698, %v4707_v42   ;;  %v4781_v35 = vld [vmem:[%s8305_s28 + $0xb0] sm:$0xff]  ;;  %v5659_v62 = vadd.f32 %v5658_v13, %v5532_v2  ;;  %v12118_v7 = vld [vmem:[#allocation159_spill] sm:$0xff] }
 0x78f   : > { %v5549_v40 = vmul.f32 %v10764_v51, %v4781_v35  ;;  %v3890_v43 = vmul.f32 1.442695, %v3667_v50  ;;  %v7176_v51 = vpop.eup %7175  ;;  %v12120_v35 = vld [vmem:[#allocation161_spill] sm:$0xff] }
 0x790   : > { %v5678_v48 = vadd.f32 %v5677_v3, %v5546_v12  ;;  %v3669_v12 = vsub.f32 %v12118_v7, %v10750_v30  ;;  %v5533_v3 = vmul.f32 %v10680_v34, %v4765_v15  ;;  %v4785_v15 = vld [vmem:[%s8305_s28 + $0xd0] sm:$0xff]  ;;  %v12122_v7 = vld [vmem:[#allocation133_spill] sm:$0xff] }
 0x791   : > { %v4995_v53 = vpop.permute.xlu0 %4994  ;;  %7181 = vpow2.f32 %v3890_v43  ;;  %v5553_v46 = vmul.f32 %v10786_v20, %v4785_v15 }
 0x792   : > { %v5548_v42 = vmul.f32 %v4995_v53, %v4780_v24  ;;  %v5679_v0 = vadd.f32 %v5678_v48, %v5547_v16  ;;  %5314 = vperm.xlu0 %6698, %v4709_v38   ;;  %v5660_v38 = vadd.f32 %v5659_v62, %v5533_v3  ;;  %v4784_v16 = vld [vmem:[%s8305_s28 + $0xc8] sm:$0xff]  ;;  %v3894_v34 = vmul.f32 1.442695, %v3669_v12 }
 0x793   : > { %v12119_v48 = vld [vmem:[#allocation195_spill] sm:$0xff]  ;;  %v3671_v53 = vsub.f32 %v12120_v35, %v10750_v30  ;;  %v3685_v12 = vsub.f32 %v12122_v7, %v10774_v23 }
 0x794   : > { %v5680_v21 = vadd.f32 %v5679_v0, %v5548_v42  ;;  %v4713_v18 = vmul.f32 %v7176_v51, %v12119_v48  ;;  %v4767_v0 = vld [vmem:[%s8305_s28 + $0x40] sm:$0xff]  ;;  %v5661_v52 = vadd.f32 %v5660_v38, %v5534_v58  ;;  %7183 = vpow2.f32 %v3894_v34  ;;  %v4788_v38 = vld [vmem:[%s8305_s28 + $0xe8] sm:$0xff] }
 0x795   : > { %v5005_v2 = vpop.permute.xlu0 %5004  ;;  %v3898_v30 = vmul.f32 1.442695, %v3671_v53  ;;  %v5535_v3 = vmul.f32 %v10690_v61, %v4767_v0  ;;  %v12124_v34 = vld [vmem:[#allocation135_spill] sm:$0xff]  ;;  %v4789_v53 = vld [vmem:[%s8305_s28 + $0xf0] sm:$0xff] }
 0x796   : > { %v5550_v13 = vmul.f32 %v5005_v2, %v4782_v19  ;;  %v5681_v24 = vadd.f32 %v5680_v21, %v5549_v40  ;;  %5324 = vperm.xlu0 %6698, %v4711_v14   ;;  %v7178_v19 = vpop.eup %7177  ;;  %v4786_v14 = vld [vmem:[%s8305_s28 + $0xd8] sm:$0xff]  ;;  %v4768_v21 = vld [vmem:[%s8305_s28 + $0x48] sm:$0xff]  ;;  %v3687_v35 = vsub.f32 %v12124_v34, %v10774_v23 }
 0x797   : > { %v4715_v40 = vmul.f32 %v7178_v19, %v12121_v49  ;;  %v7180_v51 = vpop.eup %7179  ;;  %v5536_v58 = vmul.f32 %v10918_v28, %v4768_v21  ;;  %v5662_v20 = vadd.f32 %v5661_v52, %v5535_v3  ;;  %7185 = vpow2.f32 %v3898_v30  ;;  %v4790_v19 = vld [vmem:[%s8305_s28 + $0xf8] sm:$0xff] }
 0x798   : > { %v5682_v50 = vadd.f32 %v5681_v24, %v5550_v13  ;;  %v4770_v49 = vld [vmem:[%s8305_s28 + $0x58] sm:$0xff] }
 0x799   : > { %v5015_v42 = vpop.permute.xlu0 %5014 }
 0x79a   : > { %v5552_v32 = vmul.f32 %v5015_v42, %v4784_v16  ;;  %v5683_v62 = vadd.f32 %v5682_v50, %v5551_v36  ;;  %5334 = vperm.xlu0 %6698, %v4713_v18   ;;  %v12123_v16 = vld [vmem:[#allocation71_spill] sm:$0xff]  ;;  %v5555_v18 = vmul.f32 %v10794_v59, %v4787_v22  ;;  %v11011_v36 = vpop.permute.xlu1 %5219  ;;  %v3926_v50 = vmul.f32 1.442695, %v3685_v12  ;;  %v4769_v42 = vld [vmem:[%s8305_s28 + $0x50] sm:$0xff]  ;;  %v12125_v59 = vld [vmem:[#allocation73_spill] sm:$0xff] }
 0x79b   : > { %v4717_v48 = vmul.f32 %v7180_v51, %v12123_v16  ;;  %v5537_v21 = vmul.f32 %v10700_v6, %v4769_v42  ;;  %v4792_v51 = vld [vmem:[%s8305_s28 + $0x108] sm:$0xff]  ;;  %v12129_v42 = vld [vmem:[#allocation78_spill] sm:$0xff] }
 0x79c   : > { %v5684_v43 = vadd.f32 %v5683_v62, %v5552_v32  ;;  %v7182_v32 = vpop.eup %7181  ;;  %v5663_v62 = vadd.f32 %v5662_v20, %v5536_v58  ;;  %7187 = vpow2.f32 %v3926_v50  ;;  %v12127_v58 = vld [vmem:[#allocation75_spill] sm:$0xff]  ;;  %v4771_v50 = vld [vmem:[%s8305_s28 + $0x60] sm:$0xff] }
 0x79d   : > { %v5025_v2 = vpop.permute.xlu0 %5024  ;;  %v4719_v52 = vmul.f32 %v7182_v32, %v12125_v59  ;;  %v4772_v32 = vld [vmem:[%s8305_s28 + $0x68] sm:$0xff] }
 0x79e   : > { %v5554_v13 = vmul.f32 %v5025_v2, %v4786_v14  ;;  %v5685_v24 = vadd.f32 %v5684_v43, %v5553_v46  ;;  %5344 = vperm.xlu0 %6698, %v4715_v40   ;;  %v5557_v14 = vmul.f32 %v10804_v60, %v4789_v53  ;;  %v3930_v46 = vmul.f32 1.442695, %v3687_v35  ;;  %v12126_v43 = vld [vmem:[#allocation173_spill] sm:$0xff]  ;;  %v11024_v12 = vpop.permute.xlu1 %5229  ;;  %v7184_v2 = vpop.eup %7183  ;;  %v4791_v60 = vld [vmem:[%s8305_s28 + $0x100] sm:$0xff] }
 0x79f   : > { %v3688_v30 = vsub.f32 %v12126_v43, %v10774_v23  ;;  %v4721_v6 = vmul.f32 %v7184_v2, %v12127_v58  ;;  %v5559_v34 = vmul.f32 %v10814_v57, %v4791_v60  ;;  %v12130_v57 = vld [vmem:[#allocation174_spill] sm:$0xff]  ;;  %v5540_v43 = vmul.f32 %v10936_v27, %v4772_v32  ;;  %v12132_v60 = vld [vmem:[#allocation137_spill] sm:$0xff] }
 0x7a0   : > { %v5686_v61 = vadd.f32 %v5685_v24, %v5554_v13  ;;  %v5538_v13 = vmul.f32 %v10927_v37, %v4770_v49  ;;  %v5664_v24 = vadd.f32 %v5663_v62, %v5537_v21  ;;  %7189 = vpow2.f32 %v3930_v46 }
 0x7a1   : > { %v5035_v15 = vpop.permute.xlu0 %5034  ;;  %v7186_v35 = vpop.eup %7185  ;;  %v3690_v49 = vsub.f32 %v12130_v57, %v10774_v23 }
 0x7a2   : > { %v5556_v28 = vmul.f32 %v5035_v15, %v4788_v38  ;;  %v5687_v0 = vadd.f32 %v5686_v61, %v5555_v18  ;;  %5354 = vperm.xlu0 %6698, %v4717_v48   ;;  %v12128_v38 = vld [vmem:[#allocation125_spill] sm:$0xff]  ;;  %v4793_v48 = vld [vmem:[%s8305_s28 + $0x110] sm:$0xff]  ;;  %v3932_v18 = vmul.f32 1.442695, %v3688_v30  ;;  %v5665_v53 = vadd.f32 %v5664_v24, %v5538_v13  ;;  %v11041_v62 = vpop.permute.xlu1 %5239 }
 0x7a3   : > { %v3689_v16 = vsub.f32 %v12128_v38, %v10774_v23  ;;  %v4794_v15 = vld [vmem:[%s8305_s28 + $0x118] sm:$0xff]  ;;  %v3691_v13 = vsub.f32 %v12132_v60, %v10774_v23  ;;  %v4797_v24 = vld [vmem:[%s8305_s28 + $0x130] sm:$0xff] }
 0x7a4   : > { %v5688_v40 = vadd.f32 %v5687_v0, %v5556_v28  ;;  %v4723_v28 = vmul.f32 %v7186_v35, %v12129_v42  ;;  %v5561_v0 = vmul.f32 %v10824_v25, %v4793_v48  ;;  %7191 = vpow2.f32 %v3932_v18  ;;  %v12133_v42 = vld [vmem:[#allocation175_spill] sm:$0xff] }
 0x7a5   : > { %v5045_v7 = vpop.permute.xlu0 %5044  ;;  %v3934_v59 = vmul.f32 1.442695, %v3689_v16  ;;  %v3938_v35 = vmul.f32 1.442695, %v3691_v13  ;;  %v12136_v13 = vld [vmem:[#allocation176_spill] sm:$0xff] }
 0x7a6   : > { %v5558_v3 = vmul.f32 %v5045_v7, %v4790_v19  ;;  %v5689_v22 = vadd.f32 %v5688_v40, %v5557_v14  ;;  %5364 = vperm.xlu0 %6698, %v4719_v52   ;;  %v5539_v52 = vmul.f32 %v10710_v55, %v4771_v50  ;;  %v4795_v14 = vld [vmem:[%s8305_s28 + $0x120] sm:$0xff]  ;;  %v7188_v25 = vpop.eup %7187  ;;  %v4796_v7 = vld [vmem:[%s8305_s28 + $0x128] sm:$0xff]  ;;  %v11055_v38 = vpop.permute.xlu1 %5249  ;;  %v5565_v50 = vmul.f32 %v10842_v8, %v4797_v24 }
 0x7a7   : > { %v5563_v55 = vmul.f32 %v10833_v5, %v4795_v14  ;;  %7193 = vpow2.f32 %v3934_v59  ;;  %v4800_v8 = vld [vmem:[%s8305_s28 + $0x148] sm:$0xff]  ;;  %v3694_v24 = vsub.f32 %v12136_v13, %v10774_v23 }
 0x7a8   : > { %v11030_v20 = vadd.f32 %v5689_v22, %v5558_v3  ;;  %v5666_v30 = vadd.f32 %v5665_v53, %v5539_v52  ;;  %v12131_v3 = vld [vmem:[#allocation107_spill] sm:$0xff] }
 0x7a9   : > { %v5055_v61 = vpop.permute.xlu0 %5054  ;;  %v4737_v22 = vmul.f32 %v7188_v25, %v12131_v3  ;;  %v4801_v25 = vld [vmem:[%s8305_s28 + $0x150] sm:$0xff] }
 0x7aa   : > { %v5560_v37 = vmul.f32 %v5055_v61, %v4792_v51  ;;  %5374 = vperm.xlu0 %6698, %v4721_v6   ;;  %v3936_v51 = vmul.f32 1.442695, %v3690_v49  ;;  %v4773_v6 = vld [vmem:[%s8305_s28 + $0x70] sm:$0xff]  ;;  %v7190_v48 = vpop.eup %7189  ;;  %v5667_v18 = vadd.f32 %v5666_v30, %v5540_v43  ;;  %v4798_v61 = vld [vmem:[%s8305_s28 + $0x138] sm:$0xff]  ;;  %v11069_v57 = vpop.permute.xlu1 %5259 }
 0x7ab   : > { %v4739_v5 = vmul.f32 %v7190_v48, %v10548_v39  ;;  %v5541_v53 = vmul.f32 %v10720_v31, %v4773_v6 }
 0x7ac   : > { %v5697_v19 = vadd.f32 %v5560_v37, %v5559_v34  ;;  %v4774_v34 = vld [vmem:[%s8305_s28 + $0x78] sm:$0xff]  ;;  %7195 = vpow2.f32 %v3936_v51  ;;  %v4803_v51 = vld [vmem:[%s8305_s28 + $0x160] sm:$0xff] }
 0x7ad   : > { %v5065_v40 = vpop.permute.xlu0 %5064  ;;  %v5542_v39 = vmul.f32 %v10947_v4, %v4774_v34  ;;  %v5668_v52 = vadd.f32 %v5667_v18, %v5541_v53  ;;  %7197 = vpow2.f32 %v3938_v35  ;;  %v3944_v53 = vmul.f32 1.442695, %v3694_v24 }
 0x7ae   : > { %v5562_v46 = vmul.f32 %v5065_v40, %v4794_v15  ;;  %v5698_v21 = vadd.f32 %v5697_v19, %v5561_v0  ;;  %5384 = vperm.xlu0 %6698, %v4723_v28   ;;  %v4799_v15 = vld [vmem:[%s8305_s28 + $0x140] sm:$0xff]  ;;  %v3692_v28 = vsub.f32 %v12133_v42, %v10774_v23  ;;  %v7192_v59 = vpop.eup %7191  ;;  %v12134_v40 = vld [vmem:[#allocation139_spill] sm:$0xff] }
 0x7af   : > { %v4740_v14 = vmul.f32 %v7192_v59, %v10810_v63  ;;  %v5567_v31 = vmul.f32 %v10852_v33, %v4799_v15  ;;  %v5669_v3 = vadd.f32 %v5668_v52, %v5542_v39  ;;  %v12135_v63 = vld [vmem:[#allocation82_spill] sm:$0xff]  ;;  %v4805_v15 = vld [vmem:[%s8305_s28 + $0x170] sm:$0xff]  ;;  %v4806_v39 = vld [vmem:[%s8305_s28 + $0x178] sm:$0xff] }
 0x7b0   : > { %v5699_v2 = vadd.f32 %v5698_v21, %v5562_v46  ;;  %v3693_v46 = vsub.f32 %v12134_v40, %v10774_v23  ;;  %v3940_v21 = vmul.f32 1.442695, %v3692_v28 }
 0x7b1   : > { %v5075_v58 = vpop.permute.xlu0 %5074 }
 0x7b2   : > { %v5564_v27 = vmul.f32 %v5075_v58, %v4796_v7  ;;  %v5700_v16 = vadd.f32 %v5699_v2, %v5563_v55  ;;  %5454 = vperm.xlu0 %6698, %v4737_v22   ;;  %v7194_v7 = vpop.eup %7193  ;;  %v4802_v22 = vld [vmem:[%s8305_s28 + $0x158] sm:$0xff]  ;;  %v5569_v55 = vmul.f32 %v10862_v29, %v4801_v25  ;;  %v3942_v60 = vmul.f32 1.442695, %v3693_v46  ;;  %v4804_v29 = vld [vmem:[%s8305_s28 + $0x168] sm:$0xff] }
 0x7b3   : > { %v4741_v33 = vmul.f32 %v7194_v7, %v12135_v63  ;;  %7199 = vpow2.f32 %v3940_v21  ;;  %v5691_v58 = vrot.slane %v11030_v20, 4  ;;  %v12139_v7 = vld [vmem:[#allocation178_spill] sm:$0xff]  ;;  %v4809_v63 = vld [vmem:[%s8305_s28 + $0x190] sm:$0xff] }
 0x7b4   : > { %v5701_v37 = vadd.f32 %v5700_v16, %v5564_v27  ;;  %v11081_v27 = vpop.permute.xlu1 %5269  ;;  %7201 = vpow2.f32 %v3942_v60 }
 0x7b5   : > { %v5085_v0 = vpop.permute.xlu0 %5084  ;;  %v5692_v42 = vadd.f32 %v5691_v58, %v11030_v20  ;;  %7203 = vpow2.f32 %v3944_v53  ;;  %v12138_v20 = vld [vmem:[#allocation177_spill] sm:$0xff] }
 0x7b6   : > { %v5566_v32 = vmul.f32 %v5085_v0, %v4798_v61  ;;  %v5702_v19 = vadd.f32 %v5701_v37, %v5565_v50  ;;  %5464 = vperm.xlu0 %6698, %v4739_v5   ;;  %v7196_v18 = vpop.eup %7195  ;;  %v5670_v61 = vrot.slane %v5669_v3, 4  ;;  %v5571_v50 = vmul.f32 %v10872_v44, %v4803_v51  ;;  %v12137_v37 = vld [vmem:[#allocation141_spill] sm:$0xff] }
 0x7b7   : > { %v4742_v5 = vmul.f32 %v7196_v18, %v10820_v11  ;;  %v3695_v35 = vsub.f32 %v12137_v37, %v10774_v23  ;;  %v5573_v44 = vmul.f32 %v10882_v56, %v4805_v15 }
 0x7b8   : > { %v5703_v49 = vadd.f32 %v5702_v19, %v5566_v32  ;;  %v7198_v19 = vpop.eup %7197  ;;  %v5671_v59 = vadd.f32 %v5670_v61, %v5669_v3  ;;  %v11093_v52 = vpop.permute.xlu1 %5279  ;;  %v3697_v3 = vsub.f32 %v12139_v7, %v10774_v23  ;;  %v4815_v7 = vld [vmem:[%s8305_s28 + $0x1c0] sm:$0xff] }
 0x7b9   : > { %v5095_v43 = vpop.permute.xlu0 %5094  ;;  %v4743_v11 = vmul.f32 %v7198_v19, %v10570_v17  ;;  %v4808_v17 = vld [vmem:[%s8305_s28 + $0x188] sm:$0xff] }
 0x7ba   : > { %v5568_v30 = vmul.f32 %v5095_v43, %v4800_v8  ;;  %v5704_v4 = vadd.f32 %v5703_v49, %v5567_v31  ;;  %5469 = vperm.xlu0 %6698, %v4740_v14   ;;  %v3946_v14 = vmul.f32 1.442695, %v3695_v35  ;;  %v3696_v31 = vsub.f32 %v12138_v20, %v10774_v23  ;;  %v4807_v43 = vld [vmem:[%s8305_s28 + $0x180] sm:$0xff] }
 0x7bb   : > { %v5693_v49 = vrot.slane %v5692_v42, 2  ;;  %v3950_v61 = vmul.f32 1.442695, %v3697_v3 }
 0x7bc   : > { %v5705_v2 = vadd.f32 %v5704_v4, %v5568_v30  ;;  %v5672_v30 = vrot.slane %v5671_v59, 2  ;;  %7205 = vpow2.f32 %v3946_v14  ;;  %v11104_v60 = vpop.permute.xlu1 %5289 }
 0x7bd   : > { %v5105_v6 = vpop.permute.xlu0 %5104  ;;  %v7200_v25 = vpop.eup %7199 }
 0x7be   : > { %v5570_v16 = vmul.f32 %v5105_v6, %v4802_v22  ;;  %v5706_v48 = vadd.f32 %v5705_v2, %v5569_v55  ;;  %5474 = vperm.xlu0 %6698, %v4741_v33   ;;  %v4744_v56 = vmul.f32 %v7200_v25, %v10829_v26  ;;  %v3948_v22 = vmul.f32 1.442695, %v3696_v31  ;;  %v7202_v51 = vpop.eup %7201  ;;  %v4810_v26 = vld [vmem:[%s8305_s28 + $0x198] sm:$0xff] }
 0x7bf   : > { %v5694_v33 = vadd.f32 %v5693_v49, %v5692_v42  ;;  %v5575_v2 = vmul.f32 %v10892_v1, %v4807_v43  ;;  %v5673_v58 = vadd.f32 %v5672_v30, %v5671_v59  ;;  %v4745_v6 = vmul.f32 %v7202_v51, %v10590_v9  ;;  %v7204_v15 = vpop.eup %7203  ;;  %v4812_v42 = vld [vmem:[%s8305_s28 + $0x1a8] sm:$0xff]  ;;  %v12143_v25 = vld [vmem:[#allocation109_spill] sm:$0xff] }
 0x7c0   : > { %v5707_v34 = vadd.f32 %v5706_v48, %v5570_v16  ;;  %v5577_v16 = vmul.f32 %v10902_v41, %v4809_v63  ;;  %7207 = vpow2.f32 %v3948_v22  ;;  %v4746_v41 = vmul.f32 %v7204_v15, %v10838_v47  ;;  %v12144_v30 = vld [vmem:[#allocation87_spill] sm:$0xff]  ;;  %v12145_v51 = vld [vmem:[#allocation85_spill] sm:$0xff] }
 0x7c1   : > { %v5115_v28 = vpop.permute.xlu0 %5114  ;;  %v5674_v9 = vrot.slane %v5673_v58, 1  ;;  %7209 = vpow2.f32 %v3950_v61 }
 0x7c2   : > { %v5572_v0 = vmul.f32 %v5115_v28, %v4804_v29  ;;  %v5708_v32 = vadd.f32 %v5707_v34, %v5571_v50  ;;  %5479 = vperm.xlu0 %6698, %v4742_v5   ;;  %v12140_v29 = vld [vmem:[#allocation179_spill] sm:$0xff]  ;;  %v4811_v5 = vld [vmem:[%s8305_s28 + $0x1a0] sm:$0xff]  ;;  %v5695_v50 = vrot.slane %v5694_v33, 1 }
 0x7c3   : > { %v3698_v1 = vsub.f32 %v12140_v29, %v10774_v23  ;;  %v12141_v28 = vld [vmem:[#allocation115_spill] sm:$0xff] }
 0x7c4   : > { %v5709_v8 = vadd.f32 %v5708_v32, %v5572_v0  ;;  %v5579_v0 = vmul.f32 %v12141_v28, %v4811_v5  ;;  %v11115_v32 = vpop.permute.xlu1 %5299  ;;  %v5696_v14 = vadd.f32 %v5695_v50, %v5694_v33  ;;  %v4818_v5 = vld [vmem:[%s8305_s28 + $0x1d8] sm:$0xff]  ;;  %v12147_v50 = vld [vmem:[#allocation83_spill] sm:$0xff] }
 0x7c5   : > { %v5125_v40 = vpop.permute.xlu0 %5124 }
 0x7c6   : > { %v5574_v46 = vmul.f32 %v5125_v40, %v4806_v39  ;;  %v5710_v21 = vadd.f32 %v5709_v8, %v5573_v44  ;;  %5484 = vperm.xlu0 %6698, %v4743_v11   ;;  %v12142_v39 = vld [vmem:[#allocation180_spill] sm:$0xff]  ;;  %v3952_v44 = vmul.f32 1.442695, %v3698_v1  ;;  %v7206_v47 = vpop.eup %7205 }
 0x7c7   : > { %v3699_v11 = vsub.f32 %v12142_v39, %v10774_v23  ;;  %v4813_v8 = vld [vmem:[%s8305_s28 + $0x1b0] sm:$0xff]  ;;  %v4747_v43 = vmul.f32 %v7206_v47, %v12143_v25  ;;  %v4822_v47 = vld [vmem:[%s8305_s28 + $0x1f8] sm:$0xff] }
 0x7c8   : > { %v5711_v4 = vadd.f32 %v5710_v21, %v5574_v46  ;;  %v5675_v46 = vadd.f32 %v5674_v9, %v5673_v58  ;;  %v4814_v21 = vld [vmem:[%s8305_s28 + $0x1b8] sm:$0xff]  ;;  %7211 = vpow2.f32 %v3952_v44  ;;  %v11125_v63 = vpop.permute.xlu1 %5309  ;;  %v4819_v9 = vld [vmem:[%s8305_s28 + $0x1e0] sm:$0xff] }
 0x7c9   : > { %v5135_v55 = vpop.permute.xlu0 %5134  ;;  %v3954_v23 = vmul.f32 1.442695, %v3699_v11  ;;  %v5587_v11 = vmul.f32 %v10969_v54, %v4819_v9 }
 0x7ca   : > { %v5712_v13 = vrot.slane %v5711_v4, 4  ;;  %v5576_v24 = vmul.f32 %v5135_v55, %v4808_v17  ;;  %5489 = vperm.xlu0 %6698, %v4744_v56   ;;  %v5581_v17 = vmul.f32 %v12144_v30, %v4813_v8  ;;  %v5831_v3 = vsel %vm3503_vm1, %v5696_v14, %v5675_v46  ;;  %v4821_v8 = vld [vmem:[%s8305_s28 + $0x1f0] sm:$0xff]  ;;  %v12150_v46 = vld [vmem:[#allocation111_spill] sm:$0xff] }
 0x7cb   : > { %7213 = vpow2.f32 %v3954_v23  ;;  %v5589_v25 = vmul.f32 %v10983_v10, %v4821_v8  ;;  %v4826_v10 = vld [vmem:[%s8305_s28 + $0x218] sm:$0xff] }
 0x7cc   : > { %v5713_v48 = vadd.f32 %v5712_v13, %v5711_v4  ;;  %v5718_v18 = vadd.f32 %v5576_v24, %v5575_v2  ;;  %v7208_v13 = vpop.eup %7207  ;;  %v4816_v24 = vld [vmem:[%s8305_s28 + $0x1c8] sm:$0xff] }
 0x7cd   : > { %v5145_v34 = vpop.permute.xlu0 %5144  ;;  %v4748_v58 = vmul.f32 %v7208_v13, %v12145_v51  ;;  %v7210_v1 = vpop.eup %7209 }
 0x7ce   : > { %v5714_v37 = vrot.slane %v5713_v48, 2  ;;  %v5578_v35 = vmul.f32 %v5145_v34, %v4810_v26  ;;  %v5719_v53 = vadd.f32 %v5718_v18, %v5577_v16  ;;  %5494 = vperm.xlu0 %6698, %v4745_v6   ;;  %v12146_v26 = vld [vmem:[#allocation117_spill] sm:$0xff]  ;;  %v4749_v34 = vmul.f32 %v7210_v1, %v12147_v50  ;;  %v4829_v50 = vld [vmem:[%s8305_s28 + $0x230] sm:$0xff] }
 0x7cf   : > { %v5583_v6 = vmul.f32 %v12146_v26, %v4815_v7  ;;  %v4827_v26 = vld [vmem:[%s8305_s28 + $0x220] sm:$0xff]  ;;  %v5597_v9 = vmul.f32 %v11041_v62, %v4829_v50 }
 0x7d0   : > { %v5715_v19 = vadd.f32 %v5714_v37, %v5713_v48  ;;  %v5720_v59 = vadd.f32 %v5719_v53, %v5578_v35  ;;  %v4817_v48 = vld [vmem:[%s8305_s28 + $0x1d0] sm:$0xff]  ;;  %v11137_v53 = vpop.permute.xlu1 %5319 }
 0x7d1   : > { %v5155_v20 = vpop.permute.xlu0 %5154  ;;  %v12148_v37 = vld [vmem:[#allocation88_spill] sm:$0xff] }
 0x7d2   : > { %v5716_v31 = vrot.slane %v5715_v19, 1  ;;  %v5580_v49 = vmul.f32 %v5155_v20, %v4812_v42  ;;  %v5721_v40 = vadd.f32 %v5720_v59, %v5579_v0  ;;  %5499 = vperm.xlu0 %6698, %v4746_v41   ;;  %v5585_v35 = vmul.f32 %v12148_v37, %v4817_v48  ;;  %v7212_v0 = vpop.eup %7211  ;;  %v12149_v59 = vld [vmem:[#allocation113_spill] sm:$0xff] }
 0x7d3   : > { %v4750_v39 = vmul.f32 %v7212_v0, %v12149_v59  ;;  %v4831_v0 = vld [vmem:[%s8305_s28 + $0x240] sm:$0xff] }
 0x7d4   : > { %v5717_v56 = vadd.f32 %v5716_v31, %v5715_v19  ;;  %v5722_v4 = vadd.f32 %v5721_v40, %v5580_v49  ;;  %v4820_v19 = vld [vmem:[%s8305_s28 + $0x1e8] sm:$0xff]  ;;  %v11144_v20 = vpop.permute.xlu1 %5329 }
 0x7d5   : > { %v5165_v22 = vpop.permute.xlu0 %5164  ;;  %v7214_v40 = vpop.eup %7213 }
 0x7d6   : > { %v11128_v33 = vsel %vm3505_vm2, %v5717_v56, %v5831_v3  ;;  %v5582_v55 = vmul.f32 %v5165_v22, %v4814_v21  ;;  %v5723_v2 = vadd.f32 %v5722_v4, %v5581_v17  ;;  %5504 = vperm.xlu0 %6698, %v4747_v43   ;;  %v4751_v21 = vmul.f32 %v7214_v40, %v12150_v46  ;;  %v4823_v56 = vld [vmem:[%s8305_s28 + $0x200] sm:$0xff]  ;;  %v4824_v4 = vld [vmem:[%s8305_s28 + $0x208] sm:$0xff]  ;;  %v4825_v3 = vld [vmem:[%s8305_s28 + $0x210] sm:$0xff] }
 0x7d8   : > { %v5724_v16 = vadd.f32 %v5723_v2, %v5582_v55  ;;  %v11151_v23 = vpop.permute.xlu1 %5339  ;;  %v5591_v55 = vmul.f32 %v10997_v45, %v4823_v56  ;;  %v5595_v45 = vmul.f32 %v11024_v12, %v4827_v26 }
 0x7d9   : > { %v5175_v18 = vpop.permute.xlu0 %5174 }
 0x7da   : > { %v5584_v61 = vmul.f32 %v5175_v18, %v4816_v24  ;;  %v5725_v29 = vadd.f32 %v5724_v16, %v5583_v6  ;;  %5509 = vperm.xlu0 %6698, %v4748_v58   ;;  %v5593_v24 = vmul.f32 %v11011_v36, %v4825_v3 }
 0x7dc   : > { %v5726_v15 = vadd.f32 %v5725_v29, %v5584_v61  ;;  %v11158_v16 = vpop.permute.xlu1 %5349  ;;  %v4828_v29 = vld [vmem:[%s8305_s28 + $0x228] sm:$0xff] }
 0x7dd   : > { %v5185_v42 = vpop.permute.xlu0 %5184 }
 0x7de   : > { %v5586_v41 = vmul.f32 %v5185_v42, %v4818_v5  ;;  %v5727_v28 = vadd.f32 %v5726_v15, %v5585_v35  ;;  %5514 = vperm.xlu0 %6698, %v4749_v34   ;;  %v4830_v15 = vld [vmem:[%s8305_s28 + $0x238] sm:$0xff] }
 0x7e0   : > { %v5728_v44 = vadd.f32 %v5727_v28, %v5586_v41  ;;  %v11165_v42 = vpop.permute.xlu1 %5359 }
 0x7e1   : > { %v5195_v14 = vpop.permute.xlu0 %5194 }
 0x7e2   : > { %v5588_v31 = vmul.f32 %v5195_v14, %v4820_v19  ;;  %v5729_v49 = vadd.f32 %v5728_v44, %v5587_v11  ;;  %5519 = vperm.xlu0 %6698, %v4750_v39   ;;  %v4832_v11 = vld [vmem:[%s8305_s28 + $0x248] sm:$0xff]  ;;  %v5599_v44 = vmul.f32 %v11055_v38, %v4831_v0  ;;  %v4833_v14 = vld [vmem:[%s8305_s28 + $0x250] sm:$0xff] }
 0x7e3   : > { %v5601_v46 = vmul.f32 %v11069_v57, %v4833_v14 }
 0x7e4   : > { %v5730_v43 = vadd.f32 %v5729_v49, %v5588_v31  ;;  %v11173_v31 = vpop.permute.xlu1 %5369 }
 0x7e5   : > { %v5205_v54 = vpop.permute.xlu0 %5204 }
 0x7e6   : > { %v5590_v30 = vmul.f32 %v5205_v54, %v4822_v47  ;;  %v5731_v17 = vadd.f32 %v5730_v43, %v5589_v25  ;;  %5524 = vperm.xlu0 %6698, %v4751_v21   ;;  %v4834_v47 = vld [vmem:[%s8305_s28 + $0x258] sm:$0xff] }
 0x7e8   : > { %v5732_v7 = vadd.f32 %v5731_v17, %v5590_v30  ;;  %v4836_v30 = vld [vmem:[%s8305_s28 + $0x268] sm:$0xff]  ;;  %v5380_v17 = vpop.permute.xlu1 %5379 }
 0x7e9   : > { %v5215_v22 = vpop.permute.xlu0 %5214 }
 0x7ea   : > { %v5733_v2 = vrot.slane %v5732_v7, 4  ;;  %v5592_v13 = vmul.f32 %v5215_v22, %v4824_v4  ;;  %v4837_v4 = vld [vmem:[%s8305_s28 + $0x270] sm:$0xff] }
 0x7ec   : > { %v5734_v51 = vadd.f32 %v5733_v2, %v5732_v7  ;;  %v5739_v58 = vadd.f32 %v5592_v13, %v5591_v55  ;;  %v4838_v55 = vld [vmem:[%s8305_s28 + $0x278] sm:$0xff]  ;;  %v5605_v2 = vmul.f32 %v11093_v52, %v4837_v4  ;;  %v11183_v57 = vpop.permute.xlu1 %5449 }
 0x7ed   : > { %v5225_v6 = vpop.permute.xlu0 %5224 }
 0x7ee   : > { %v5735_v48 = vrot.slane %v5734_v51, 2  ;;  %v5594_v18 = vmul.f32 %v5225_v6, %v4826_v10  ;;  %v5740_v61 = vadd.f32 %v5739_v58, %v5593_v24 }
 0x7f0   : > { %v5736_v1 = vadd.f32 %v5735_v48, %v5734_v51  ;;  %v5741_v5 = vadd.f32 %v5740_v61, %v5594_v18  ;;  %v11185_v6 = vpop.permute.xlu1 %5459 }
 0x7f1   : > { %v5235_v34 = vpop.permute.xlu0 %5234 }
 0x7f2   : > { %v5737_v36 = vrot.slane %v5736_v1, 1  ;;  %v5596_v37 = vmul.f32 %v5235_v34, %v4828_v29  ;;  %v5742_v35 = vadd.f32 %v5741_v5, %v5595_v45 }
 0x7f4   : > { %v5738_v41 = vadd.f32 %v5737_v36, %v5736_v1  ;;  %v5743_v28 = vadd.f32 %v5742_v35, %v5596_v37  ;;  %v5390_v52 = vpop.permute.xlu1 %5389  ;;  %v4840_v37 = vld [vmem:[%s8305_s28 + $0x288] sm:$0xff] }
 0x7f5   : > { %v5245_v12 = vpop.permute.xlu0 %5244 }
 0x7f6   : > { %v5833_v19 = vsel %vm3507_vm3, %v5738_v41, %v11128_v33  ;;  %v5598_v59 = vmul.f32 %v5245_v12, %v4830_v15  ;;  %v5744_v39 = vadd.f32 %v5743_v28, %v5597_v9  ;;  %v4835_v33 = vld [vmem:[%s8305_s28 + $0x260] sm:$0xff]  ;;  %v4841_v12 = vld [vmem:[%s8305_s28 + $0x290] sm:$0xff] }
 0x7f7   : > { %v5603_v38 = vmul.f32 %v11081_v27, %v4835_v33  ;;  %v4839_v15 = vld [vmem:[%s8305_s28 + $0x280] sm:$0xff] }
 0x7f8   : > { %v5745_v8 = vadd.f32 %v5744_v39, %v5598_v59  ;;  %v5395_v36 = vpop.permute.xlu1 %5394  ;;  %v5607_v28 = vmul.f32 %v11104_v60, %v4839_v15 }
 0x7f9   : > { %v5255_v62 = vpop.permute.xlu0 %5254 }
 0x7fa   : > { %v5600_v49 = vmul.f32 %v5255_v62, %v4832_v11  ;;  %v5746_v40 = vadd.f32 %v5745_v8, %v5599_v44  ;;  %v5609_v11 = vmul.f32 %v11115_v32, %v4841_v12  ;;  %v4863_v12 = vld [vmem:[%s8305_s28 + $0x340] sm:$0xff] }
 0x7fc   : > { %v5747_v21 = vadd.f32 %v5746_v40, %v5600_v49  ;;  %v5400_v0 = vpop.permute.xlu1 %5399  ;;  %v4843_v49 = vld [vmem:[%s8305_s28 + $0x2a0] sm:$0xff] }
 0x7fd   : > { %v5265_v25 = vpop.permute.xlu0 %5264  ;;  %v4855_v40 = vld [vmem:[%s8305_s28 + $0x300] sm:$0xff] }
 0x7fe   : > { %v5602_v43 = vmul.f32 %v5265_v25, %v4834_v47  ;;  %v5748_v54 = vadd.f32 %v5747_v21, %v5601_v46  ;;  %v4856_v47 = vld [vmem:[%s8305_s28 + $0x308] sm:$0xff]  ;;  %v4857_v46 = vld [vmem:[%s8305_s28 + $0x310] sm:$0xff]  ;;  %v5611_v25 = vmul.f32 %v11125_v63, %v4843_v49  ;;  %v5623_v32 = vmul.f32 %v11173_v31, %v4855_v40 }
 0x7ff   : > { %v4844_v21 = vld [vmem:[%s8305_s28 + $0x2a8] sm:$0xff] }
 0x800   : > { %v5749_v56 = vadd.f32 %v5748_v54, %v5602_v43  ;;  %v5405_v44 = vpop.permute.xlu1 %5404 }
 0x801   : > { %v5275_v7 = vpop.permute.xlu0 %5274 }
 0x802   : > { %v5604_v3 = vmul.f32 %v5275_v7, %v4836_v30  ;;  %v5750_v22 = vadd.f32 %v5749_v56, %v5603_v38  ;;  %v4858_v30 = vld [vmem:[%s8305_s28 + $0x318] sm:$0xff]  ;;  %v5625_v38 = vmul.f32 %v5380_v17, %v4857_v46  ;;  %v4865_v46 = vld [vmem:[%s8305_s28 + $0x350] sm:$0xff] }
 0x804   : > { %v5751_v13 = vadd.f32 %v5750_v22, %v5604_v3  ;;  %v5410_v43 = vpop.permute.xlu1 %5409  ;;  %v4859_v3 = vld [vmem:[%s8305_s28 + $0x320] sm:$0xff] }
 0x805   : > { %v5285_v10 = vpop.permute.xlu0 %5284 }
 0x806   : > { %v5606_v24 = vmul.f32 %v5285_v10, %v4838_v55  ;;  %v5752_v51 = vadd.f32 %v5751_v13, %v5605_v2  ;;  %v4845_v13 = vld [vmem:[%s8305_s28 + $0x2b0] sm:$0xff]  ;;  %v4860_v10 = vld [vmem:[%s8305_s28 + $0x328] sm:$0xff] }
 0x807   : > { %v5613_v17 = vmul.f32 %v11137_v53, %v4845_v13  ;;  %v4873_v13 = vld [vmem:[%s8305_s28 + $0x390] sm:$0xff] }
 0x808   : > { %v5753_v58 = vadd.f32 %v5752_v51, %v5606_v24  ;;  %v5627_v24 = vmul.f32 %v5390_v52, %v4859_v3  ;;  %v5415_v63 = vpop.permute.xlu1 %5414 }
 0x809   : > { %v5295_v26 = vpop.permute.xlu0 %5294 }
 0x80a   : > { %v5754_v27 = vrot.slane %v5753_v58, 4  ;;  %v5608_v9 = vmul.f32 %v5295_v26, %v4840_v37  ;;  %v4846_v26 = vld [vmem:[%s8305_s28 + $0x2b8] sm:$0xff] }
 0x80c   : > { %v5755_v48 = vadd.f32 %v5754_v27, %v5753_v58  ;;  %v5760_v59 = vadd.f32 %v5608_v9, %v5607_v28  ;;  %v4861_v58 = vld [vmem:[%s8305_s28 + $0x330] sm:$0xff]  ;;  %v5420_v37 = vpop.permute.xlu1 %5419  ;;  %v4847_v9 = vld [vmem:[%s8305_s28 + $0x2c0] sm:$0xff] }
 0x80d   : > { %v5305_v18 = vpop.permute.xlu0 %5304 }
 0x80e   : > { %v5756_v61 = vrot.slane %v5755_v48, 2  ;;  %v5761_v14 = vadd.f32 %v5760_v59, %v5609_v11  ;;  %v5631_v11 = vmul.f32 %v5410_v43, %v4863_v12  ;;  %v4877_v12 = vld [vmem:[%s8305_s28 + $0x3b0] sm:$0xff] }
 0x810   : > { %v5757_v29 = vadd.f32 %v5756_v61, %v5755_v48  ;;  %v5628_v48 = vmul.f32 %v5395_v36, %v4860_v10  ;;  %v5629_v61 = vmul.f32 %v5400_v0, %v4861_v58  ;;  %v5615_v0 = vmul.f32 %v11144_v20, %v4847_v9 }
 0x811   : > { %v5315_v45 = vpop.permute.xlu0 %5314 }
 0x812   : > { %v5758_v1 = vrot.slane %v5757_v29, 1  ;;  %v5612_v56 = vmul.f32 %v5315_v45, %v4844_v21 }
 0x814   : > { %v5759_v5 = vadd.f32 %v5758_v1, %v5757_v29  ;;  %v4862_v29 = vld [vmem:[%s8305_s28 + $0x338] sm:$0xff] }
 0x815   : > { %v5325_v50 = vpop.permute.xlu0 %5324  ;;  %v5630_v28 = vmul.f32 %v5405_v44, %v4862_v29 }
 0x816   : > { %v11188_v34 = vsel %vm3509_vm4, %v5759_v5, %v5833_v19  ;;  %v4842_v19 = vld [vmem:[%s8305_s28 + $0x298] sm:$0xff]  ;;  %v5614_v45 = vmul.f32 %v5325_v50, %v4846_v26  ;;  %v4864_v50 = vld [vmem:[%s8305_s28 + $0x348] sm:$0xff] }
 0x817   : > { %v5610_v8 = vmul.f32 %v5305_v18, %v4842_v19  ;;  %v4848_v19 = vld [vmem:[%s8305_s28 + $0x2c8] sm:$0xff]  ;;  %v4874_v26 = vld [vmem:[%s8305_s28 + $0x398] sm:$0xff] }
 0x819   : > { %v11191_v35 = vpop.permute.xlu0 %5334  ;;  %v5762_v60 = vadd.f32 %v5761_v14, %v5610_v8  ;;  %v5425_v8 = vpop.permute.xlu1 %5424 }
 0x81a   : > { %v5616_v14 = vmul.f32 %v11191_v35, %v4848_v19  ;;  %v5633_v35 = vmul.f32 %v5420_v37, %v4865_v46  ;;  %v4876_v37 = vld [vmem:[%s8305_s28 + $0x3a8] sm:$0xff] }
 0x81b   : > { %v5763_v4 = vadd.f32 %v5762_v60, %v5611_v25  ;;  %v5632_v60 = vmul.f32 %v5415_v63, %v4864_v50 }
 0x81d   : > { %v11194_v41 = vpop.permute.xlu0 %5344  ;;  %v5764_v51 = vadd.f32 %v5763_v4, %v5612_v56 }
 0x81f   : > { %v5765_v1 = vadd.f32 %v5764_v51, %v5613_v17  ;;  %v5641_v17 = vmul.f32 %v11185_v6, %v4873_v13 }
 0x821   : > { %v11199_v39 = vpop.permute.xlu0 %5354  ;;  %v5766_v59 = vadd.f32 %v5765_v1, %v5614_v45 }
 0x823   : > { %v5767_v49 = vadd.f32 %v5766_v59, %v5615_v0  ;;  %v4869_v59 = vld [vmem:[%s8305_s28 + $0x370] sm:$0xff] }
 0x825   : > { %v11202_v62 = vpop.permute.xlu0 %5364  ;;  %v5768_v21 = vadd.f32 %v5767_v49, %v5616_v14 }
 0x829   : > { %v5375_v33 = vpop.permute.xlu0 %5374 }
 0x82a   : > { %v5624_v54 = vmul.f32 %v5375_v33, %v4856_v47  ;;  %v4849_v47 = vld [vmem:[%s8305_s28 + $0x2d0] sm:$0xff]  ;;  %v4850_v33 = vld [vmem:[%s8305_s28 + $0x2d8] sm:$0xff] }
 0x82b   : > { %v5617_v43 = vmul.f32 %v11151_v23, %v4849_v47  ;;  %v5618_v56 = vmul.f32 %v11194_v41, %v4850_v33  ;;  %v4867_v23 = vld [vmem:[%s8305_s28 + $0x360] sm:$0xff]  ;;  %v4870_v47 = vld [vmem:[%s8305_s28 + $0x378] sm:$0xff] }
 0x82c   : > { %v5781_v7 = vadd.f32 %v5624_v54, %v5623_v32  ;;  %v4872_v32 = vld [vmem:[%s8305_s28 + $0x388] sm:$0xff]  ;;  %v5430_v54 = vpop.permute.xlu1 %5429 }
 0x82d   : > { %v5385_v22 = vpop.permute.xlu0 %5384  ;;  %v5769_v4 = vadd.f32 %v5768_v21, %v5617_v43 }
 0x82e   : > { %v5626_v55 = vmul.f32 %v5385_v22, %v4858_v30  ;;  %v5782_v2 = vadd.f32 %v5781_v7, %v5625_v38  ;;  %v4871_v30 = vld [vmem:[%s8305_s28 + $0x380] sm:$0xff]  ;;  %v4866_v38 = vld [vmem:[%s8305_s28 + $0x358] sm:$0xff] }
 0x82f   : > { %v5634_v10 = vmul.f32 %v5425_v8, %v4866_v38  ;;  %v5770_v63 = vadd.f32 %v5769_v4, %v5618_v56  ;;  %v4882_v4 = vld [vmem:[%s8305_s28 + $0x3d8] sm:$0xff] }
 0x830   : > { %v5783_v31 = vadd.f32 %v5782_v2, %v5626_v55  ;;  %v5639_v55 = vmul.f32 %v11183_v57, %v4871_v30  ;;  %v4851_v2 = vld [vmem:[%s8305_s28 + $0x2e0] sm:$0xff]  ;;  %v5635_v57 = vmul.f32 %v5430_v54, %v4867_v23  ;;  %v4884_v23 = vld [vmem:[%s8305_s28 + $0x3e8] sm:$0xff] }
 0x831   : > { %v5455_v27 = vpop.permute.xlu0 %5454 }
 0x832   : > { %v5784_v18 = vadd.f32 %v5783_v31, %v5627_v24  ;;  %v5640_v7 = vmul.f32 %v5455_v27, %v4872_v32  ;;  %v5435_v24 = vpop.permute.xlu1 %5434  ;;  %v4852_v31 = vld [vmem:[%s8305_s28 + $0x2e8] sm:$0xff]  ;;  %v5619_v27 = vmul.f32 %v11158_v16, %v4851_v2  ;;  %v4853_v16 = vld [vmem:[%s8305_s28 + $0x2f0] sm:$0xff]  ;;  %v4883_v2 = vld [vmem:[%s8305_s28 + $0x3e0] sm:$0xff] }
 0x833   : > { %v5621_v8 = vmul.f32 %v11165_v42, %v4853_v16  ;;  %v4880_v32 = vld [vmem:[%s8305_s28 + $0x3c8] sm:$0xff] }
 0x834   : > { %v5785_v5 = vadd.f32 %v5784_v18, %v5628_v48  ;;  %v5802_v51 = vadd.f32 %v5640_v7, %v5639_v55  ;;  %v4875_v48 = vld [vmem:[%s8305_s28 + $0x3a0] sm:$0xff]  ;;  %v4868_v18 = vld [vmem:[%s8305_s28 + $0x368] sm:$0xff]  ;;  %v5771_v29 = vadd.f32 %v5770_v63, %v5619_v27 }
 0x835   : > { %v5465_v52 = vpop.permute.xlu0 %5464  ;;  %v5636_v6 = vmul.f32 %v5435_v24, %v4868_v18 }
 0x836   : > { %v5786_v15 = vadd.f32 %v5785_v5, %v5629_v61  ;;  %v5620_v61 = vmul.f32 %v11199_v39, %v4852_v31  ;;  %v5642_v45 = vmul.f32 %v5465_v52, %v4874_v26  ;;  %v5803_v1 = vadd.f32 %v5802_v51, %v5641_v17  ;;  %v5440_v9 = vpop.permute.xlu1 %5439  ;;  %v4854_v39 = vld [vmem:[%s8305_s28 + $0x2f8] sm:$0xff] }
 0x837   : > { %v4878_v52 = vld [vmem:[%s8305_s28 + $0x3b8] sm:$0xff]  ;;  %v5622_v46 = vmul.f32 %v11202_v62, %v4854_v39 }
 0x838   : > { %v5787_v53 = vadd.f32 %v5786_v15, %v5630_v28  ;;  %v5772_v19 = vadd.f32 %v5771_v29, %v5620_v61  ;;  %v4886_v61 = vld [vmem:[%s8305_s28 + $0x3f8] sm:$0xff] }
 0x839   : > { %v5470_v36 = vpop.permute.xlu0 %5469 }
 0x83a   : > { %v5788_v40 = vadd.f32 %v5787_v53, %v5631_v11  ;;  %v5643_v28 = vmul.f32 %v5470_v36, %v4875_v48  ;;  %v5804_v53 = vadd.f32 %v5803_v1, %v5642_v45  ;;  %v5637_v36 = vmul.f32 %v5440_v9, %v4869_v59 }
 0x83b   : > { %v5773_v21 = vadd.f32 %v5772_v19, %v5621_v8 }
 0x83c   : > { %v5789_v25 = vadd.f32 %v5788_v40, %v5632_v60  ;;  %v5805_v14 = vadd.f32 %v5804_v53, %v5643_v28  ;;  %v4879_v40 = vld [vmem:[%s8305_s28 + $0x3c0] sm:$0xff]  ;;  %v5445_v60 = vpop.permute.xlu1 %5444 }
 0x83d   : > { %v5475_v44 = vpop.permute.xlu0 %5474  ;;  %v5638_v30 = vmul.f32 %v5445_v60, %v4870_v47 }
 0x83e   : > { %v5790_v3 = vadd.f32 %v5789_v25, %v5633_v35  ;;  %v5644_v0 = vmul.f32 %v5475_v44, %v4876_v37  ;;  %v4881_v35 = vld [vmem:[%s8305_s28 + $0x3d0] sm:$0xff] }
 0x840   : > { %v5791_v58 = vadd.f32 %v5790_v3, %v5634_v10  ;;  %v5806_v33 = vadd.f32 %v5805_v14, %v5644_v0 }
 0x841   : > { %v5480_v20 = vpop.permute.xlu0 %5479 }
 0x842   : > { %v5792_v5 = vadd.f32 %v5791_v58, %v5635_v57  ;;  %v5645_v49 = vmul.f32 %v5480_v20, %v4877_v12  ;;  %v5774_v20 = vadd.f32 %v5773_v21, %v5622_v46  ;;  %v4885_v58 = vld [vmem:[%s8305_s28 + $0x3f0] sm:$0xff]  ;;  %v5851_v46 = vld [vmem:[#allocation3] sm:$0xff] (!%p6313_p9)  ;;  %v7756_v21 = vmov (!%p6313_p9), 0  }
 0x843   : > { %7219 = vset.pattern.permute.xlu0 (!%p6313_p9), %v7756_v21 }
 0x844   : > { %v5793_v11 = vadd.f32 %v5792_v5, %v5636_v6  ;;  %v5807_v54 = vadd.f32 %v5806_v33, %v5645_v49  ;;  %v12151_v49 = vld [vmem:[#allocation86_spill] sm:$0xff]  ;;  %5854 = vperm.xlu0 (!%p6313_p9), %7219, %v5851_v46  }
 0x845   : > { %v5485_v22 = vpop.permute.xlu0 %5484  ;;  %v5850_v33 = vld [vmem:[%s8345_s29 + $0x8] sm:$0xff] (!%p6313_p9) }
 0x846   : > { %v5646_v44 = vmul.f32 %v5485_v22, %v4878_v52  ;;  %v5794_v25 = vadd.f32 %v5793_v11, %v5637_v36  ;;  %v5775_v22 = vrot.slane %v5774_v20, 4  ;;  %v4752_v52 = vld [vmem:[%s8343_s17] sm:$0xff] }
 0x847   : > { %v4758_v36 = vmul.f32 %v12151_v49, %v4752_v52 }
 0x848   : > { %v5808_v38 = vadd.f32 %v5807_v54, %v5646_v44  ;;  %v5795_v3 = vadd.f32 %v5794_v25, %v5638_v30  ;;  %v5776_v26 = vadd.f32 %v5775_v22, %v5774_v20  ;;  %v5848_v30 = vld [vmem:[%s8312_s2 + $0x8] sm:$0xff] (!%p6313_p9) }
 0x849   : > { %v5490_v41 = vpop.permute.xlu0 %5489 }
 0x84a   : > { %v5647_v42 = vmul.f32 %v5490_v41, %v4879_v40  ;;  %v5796_v63 = vrot.slane %v5795_v3, 4  ;;  %v5777_v29 = vrot.slane %v5776_v26, 2 }
 0x84c   : > { %v5809_v62 = vadd.f32 %v5808_v38, %v5647_v42  ;;  %v5797_v57 = vadd.f32 %v5796_v63, %v5795_v3  ;;  %v5778_v9 = vadd.f32 %v5777_v29, %v5776_v26  ;;  %v5847_v42 = vld [vmem:[%s8312_s2] sm:$0xff] (!%p6313_p9) }
 0x84d   : > { %v5495_v15 = vpop.permute.xlu0 %5494 }
 0x84e   : > { %v5648_v56 = vmul.f32 %v5495_v15, %v4880_v32  ;;  %v5798_v5 = vrot.slane %v5797_v57, 2  ;;  %v5779_v12 = vrot.slane %v5778_v9, 1 }
 0x850   : > { %v5810_v13 = vadd.f32 %v5809_v62, %v5648_v56  ;;  %v5799_v16 = vadd.f32 %v5798_v5, %v5797_v57  ;;  %v5780_v0 = vadd.f32 %v5779_v12, %v5778_v9 }
 0x851   : > { %v5500_v50 = vpop.permute.xlu0 %5499 }
 0x852   : > { %v5649_v55 = vmul.f32 %v5500_v50, %v4881_v35  ;;  %v5800_v19 = vrot.slane %v5799_v16, 1  ;;  %v5835_v8 = vsel %vm3511_vm5, %v5780_v0, %v11188_v34  ;;  %v5849_v34 = vld [vmem:[%s8345_s29] sm:$0xff] (!%p6313_p9) }
 0x854   : > { %v5811_v51 = vadd.f32 %v5810_v13, %v5649_v55  ;;  %v5801_v11 = vadd.f32 %v5800_v19, %v5799_v16  ;;  %v5876_v55 = vld [vmem:[%s8319_s14] sm:$0xff] (!%p6313_p9) }
 0x855   : > { %v5505_v43 = vpop.permute.xlu0 %5504 }
 0x856   : > { %v5650_v10 = vmul.f32 %v5505_v43, %v4882_v4  ;;  %v5836_v40 = vsel %vm3513_vm6, %v5801_v11, %v5835_v8 }
 0x858   : > { %v5812_v41 = vadd.f32 %v5811_v51, %v5650_v10 }
 0x859   : > { %v5510_v7 = vpop.permute.xlu0 %5509 }
 0x85a   : > { %v5651_v31 = vmul.f32 %v5510_v7, %v4883_v2  ;;  %v5877_v2 = vld [vmem:[%s8319_s14 + $0x8] sm:$0xff] (!%p6313_p9) }
 0x85c   : > { %v5813_v48 = vadd.f32 %v5812_v41, %v5651_v31 }
 0x85d   : > { %v5515_v24 = vpop.permute.xlu0 %5514 }
 0x85e   : > { %v5652_v27 = vmul.f32 %v5515_v24, %v4884_v23 }
 0x860   : > { %v5814_v45 = vadd.f32 %v5813_v48, %v5652_v27 }
 0x861   : > { %v5520_v17 = vpop.permute.xlu0 %5519 }
 0x862   : > { %v5653_v18 = vmul.f32 %v5520_v17, %v4885_v58 }
 0x864   : > { %v5815_v37 = vadd.f32 %v5814_v45, %v5653_v18 }
 0x865   : > { %v5525_v1 = vpop.permute.xlu0 %5524 }
 0x866   : > { %v5654_v15 = vmul.f32 %v5525_v1, %v4886_v61 }
 0x868   : > { %v5816_v28 = vadd.f32 %v5815_v37, %v5654_v15 }
 0x86a   : > { %v5817_v6 = vrot.slane %v5816_v28, 4 }
 0x86c   : > { %v5818_v59 = vadd.f32 %v5817_v6, %v5816_v28 }
 0x86e   : > { %v5819_v53 = vrot.slane %v5818_v59, 2 }
 0x870   : > { %v5820_v39 = vadd.f32 %v5819_v53, %v5818_v59 }
 0x872   : > { %v5821_v50 = vrot.slane %v5820_v39, 1 }
 0x873   : > { %5846 = sbr.rel (%p6313_p9) target bundleno = 2422 (0x976), region = 124 }
 0x874   : > { %v5822_v14 = vadd.f32 %v5821_v50, %v5820_v39 }
 0x876   : > { %v5837_v47 = vsel %vm3515_vm7, %v5822_v14, %v5836_v40 }
 0x877   : > { %v5839_v60 = vadd.f32 %v5837_v47, %v4758_v36 }
 0x879   : > { %5840 = vst [vmem:[%s8343_s17] sm:$0xff] %v5839_v60 }
 0x880   : > { %v5873_v3 = vld [vmem:[%s8343_s17] sm:$0xff] }
 0x8c3   : > { %v5855_v44 = vpop.permute.xlu0 %5854 }
 0x8c4   : > { %v5857_v25 = vsub.f32 %v5849_v34, %v5855_v44  ;;  %v5858_v32 = vsub.f32 %v5850_v33, %v5855_v44 }
 0x8c6   : > { %v5859_v43 = vmul.f32 1.442695, %v5857_v25  ;;  %v5861_v54 = vmul.f32 1.442695, %v5858_v32 }
 0x8c8   : > { %7220 = vpow2.f32 %v5859_v43 }
 0x8c9   : > { %7222 = vpow2.f32 %v5861_v54 }
 0x8d2   : > { %v7221_v35 = vpop.eup %7220 }
 0x8d3   : > { %v7223_v20 = vpop.eup %7222  ;;  %v5863_v38 = vmul.f32 %v7221_v35, %v5847_v42 }
 0x8d4   : > { %v5864_v56 = vmul.f32 %v7223_v20, %v5848_v30 }
 0x8d6   : > { %v5865_v4 = vadd.f32 %v5864_v56, %v5863_v38 }
 0x8d8   : > { %5866 = vadd.xlane.f32.xlu0 %v5865_v4 }
 0x965   : > { %v5867_v7 = vpop.xlane.xlu0 %5866 }
 0x966   : > { %7224 = vrcp.f32 %v5867_v7 }
 0x970   : > { %v7225_v62 = vpop.eup %7224 }
 0x971   : > { %v5869_v22 = vmul.f32 %v7225_v62, %v5863_v38  ;;  %v5870_v13 = vmul.f32 %v7225_v62, %v5864_v56  ;;  %v5874_v10 = vmul.f32 %v7225_v62, %v5873_v3 }
 0x973   : > { %5871 = vst [vmem:[%s8345_s29] sm:$0xff] %v5869_v22  ;;  %5872 = vst [vmem:[%s8345_s29 + $0x8] sm:$0xff] %v5870_v13  ;;  %v5878_v23 = vadd.f32 %v5876_v55, %v5869_v22  ;;  %v5879_v24 = vadd.f32 %v5877_v2, %v5870_v13 }
 0x974   : > { %5875 = vst [vmem:[%s8343_s17] sm:$0xff] %v5874_v10 }
 0x975   : > { %5880 = vst [vmem:[%s8347_s4] sm:$0xff] %v5878_v23  ;;  %5881 = vst [vmem:[%s8347_s4 + $0x8] sm:$0xff] %v5879_v24 }
 0x976 PF: > { %s12152_s12 = sld [smem:[#allocation50_spill]]  ;;  %s12153_s28 = sld [smem:[#allocation58_spill]] }
 0x977   : > { %s12154_s14 = sld [smem:[#allocation207_spill]]  ;;  %s5920_s9 = sshll.u32 %s8345_s29, 4  ;;  %s5921_s9 = int_to_ptr.vmem [resolvable:$true] %s5920_s9 }
 0x978   : > { %s5888_s7 = scalar_lea.sflag [#allocation26], %s8289_s16  ;;  %s7506_s5 = scalar_lea.vmem %s5921_s9, 256 }
 0x979   : > { %p7507_p1 = scmp.ne.s32.totalorder %s5921_s9, %s7506_s5  ;;  %s7757_s25 = smov [#allocation25]  }
 0x97a   : > { %s7510_s20 = sshll.u32 %s7757_s25, 4  ;;  %s7511_s20 = int_to_ptr.vmem [resolvable:$false] %s7510_s20 }
 0x97b   : > { %s7512_s30 = scalar_lea.vmem %s7511_s20, 512  ;;  %p7513_p3 = scmp.lt.s32.totalorder %s5921_s9, %s7511_s20 }
 0x97c   : > { %s11589_s0 = sshll.u32 %s12152_s12, 8  ;;  %p12155_p6 = scmp.ne.s32.totalorder %s12153_s28, 0 }
 0x97d   : > { %s11287_s24 = scalar_lea.hbm %s12154_s14, %s11589_s0  ;;  %p7514_p13 = scmp.lt.s32.totalorder %s7512_s30, %s7506_s5 }
 0x97e   : > { %p7508_p10 = pnand %p7507_p1, %p12155_p6 }
 0x97f   : > { %p7515_p7 = por %p7514_p13, %p7513_p3 }
 0x980   : > { %p7509_p0 = pneg %p7508_p10 }
 0x982   : > { %p7516_p4 = pnand %p7515_p7, %p7509_p0 }
 0x984   : > { %7519 = shalt.err (!%p7516_p4)
}
 0x985   : > { %s7520_s29 = scalar_lea.hbm %s11287_s24, 256  ;;  %s7524_s19 = scalar_lea.hbm %s12154_s14, 512 }
 0x986   : > { %p7521_p12 = scmp.ne.s32.totalorder %s11287_s24, %s7520_s29  ;;  %p7525_p8 = scmp.lt.u32.totalorder %s11287_s24, %s12154_s14 }
 0x987   : > { %p7526_p2 = scmp.lt.u32.totalorder %s7524_s19, %s7520_s29  ;;  %p7528_p1 = scmp.lt.u32.totalorder %s7520_s29, %s11287_s24 }
 0x988   : > { %p7522_p11 = pnand %p7521_p12, %p12155_p6 }
 0x989   : > { %p7527_p9 = por %p7526_p2, %p7525_p8 }
 0x98a   : > { %p7523_p5 = pneg %p7522_p11 }
 0x98b   : > { %p7529_p10 = por %p7528_p1, %p7527_p9 }
 0x98d   : > { %p7530_p0 = pnand %p7529_p10, %p7523_p5 }
 0x98f   : > { %7533 = shalt.err (!%p7530_p0)
}
 0x990   : > { %6536 = dma.vmem_to_hbm [thread:$0]  (%p12155_p6), %s5921_s9, 256, %s11287_s24, %s5888_s7  }
 0x991   : > { %s6317_s5 = sshll.u32 %s12152_s12, 7  ;;  %s5906_s30 = sshll.u32 %s8343_s17, 4  ;;  %s5907_s30 = int_to_ptr.vmem [resolvable:$true] %s5906_s30 }
 0x992   : > { %s12156_s19 = sld [smem:[#allocation206_spill]]  ;;  %s5883_s29 = scalar_lea.sflag [#allocation6], %s8277_s3 }
 0x993   : > { %s7534_s0 = scalar_lea.vmem %s5907_s30, 128  ;;  %s7758_s1 = smov [#allocation24]  }
 0x994   : > { %p7535_p3 = scmp.ne.s32.totalorder %s5907_s30, %s7534_s0  ;;  %s7538_s6 = sshll.u32 %s7758_s1, 4  ;;  %s7539_s6 = int_to_ptr.vmem [resolvable:$false] %s7538_s6 }
 0x995   : > { %s7540_s8 = scalar_lea.vmem %s7539_s6, 256  ;;  %p7541_p4 = scmp.lt.s32.totalorder %s5907_s30, %s7539_s6 }
 0x996   : > { %p7536_p13 = pnand %p7535_p3, %p12155_p6  ;;  %p7542_p12 = scmp.lt.s32.totalorder %s7540_s8, %s7534_s0 }
 0x998   : > { %s12157_s25 = smov %s12156_s19  ;;  %s11315_s20 = scalar_lea.hbm %s12156_s19, %s6317_s5 }
 0x999   : > { %p7537_p7 = pneg %p7536_p13  ;;  %p7543_p11 = por %p7542_p12, %p7541_p4 }
 0x99b   : > { %p7544_p5 = pnand %p7543_p11, %p7537_p7 }
 0x99d   : > { %7547 = shalt.err (!%p7544_p5)
}
 0x99e   : > { %s7548_s3 = scalar_lea.hbm %s11315_s20, 128  ;;  %s7552_s1 = scalar_lea.hbm %s12157_s25, 256 }
 0x99f   : > { %p7549_p8 = scmp.ne.s32.totalorder %s11315_s20, %s7548_s3  ;;  %p7553_p1 = scmp.lt.u32.totalorder %s11315_s20, %s12157_s25 }
 0x9a0   : > { %p7554_p10 = scmp.lt.u32.totalorder %s7552_s1, %s7548_s3  ;;  %p7556_p3 = scmp.lt.u32.totalorder %s7548_s3, %s11315_s20 }
 0x9a1   : > { %p7550_p2 = pnand %p7549_p8, %p12155_p6 }
 0x9a2   : > { %p7555_p0 = por %p7554_p10, %p7553_p1 }
 0x9a3   : > { %p7551_p9 = pneg %p7550_p2 }
 0x9a4   : > { %p7557_p13 = por %p7556_p3, %p7555_p0 }
 0x9a6   : > { %p7558_p7 = pnand %p7557_p13, %p7551_p9 }
 0x9a8   : > { %7561 = shalt.err (!%p7558_p7)
}
 0x9a9   : > { %6535 = dma.vmem_to_hbm [thread:$0]  (%p12155_p6), %s5907_s30, 128, %s11315_s20, %s5883_s29  }
 0x9aa   : > { %s12158_s8 = sshll.u32 %s12152_s12, 8  ;;  %s12159_s26 = sld [smem:[#allocation208_spill]] }
 0x9ab   : > { %s5934_s19 = sshll.u32 %s8347_s4, 4  ;;  %s7759_s3 = smov [#allocation27]   ;;  %s5935_s19 = int_to_ptr.vmem [resolvable:$true] %s5934_s19 }
 0x9ac   : > { %s7562_s17 = scalar_lea.vmem %s5935_s19, 256  ;;  %s7566_s24 = sshll.u32 %s7759_s3, 4  ;;  %s7567_s24 = int_to_ptr.vmem [resolvable:$false] %s7566_s24 }
 0x9ad   : > { %p7563_p4 = scmp.ne.s32.totalorder %s5935_s19, %s7562_s17  ;;  %s7568_s1 = scalar_lea.vmem %s7567_s24, 512 }
 0x9ae   : > { %p7569_p5 = scmp.lt.s32.totalorder %s5935_s19, %s7567_s24  ;;  %p7570_p8 = scmp.lt.s32.totalorder %s7568_s1, %s7562_s17 }
 0x9af   : > { %p7564_p12 = pnand %p7563_p4, %p12155_p6 }
 0x9b0   : > { %s11340_s2 = scalar_lea.hbm %s12159_s26, %s12158_s8  ;;  %p7571_p2 = por %p7570_p8, %p7569_p5 }
 0x9b1   : > { %p7565_p11 = pneg %p7564_p12 }
 0x9b3   : > { %p7572_p9 = pnand %p7571_p2, %p7565_p11 }
 0x9b5   : > { %7575 = shalt.err (!%p7572_p9)
}
 0x9b6   : > { %s7576_s4 = scalar_lea.hbm %s11340_s2, 256  ;;  %s7580_s20 = scalar_lea.hbm %s12159_s26, 512 }
 0x9b7   : > { %p7577_p1 = scmp.ne.s32.totalorder %s11340_s2, %s7576_s4  ;;  %p7581_p3 = scmp.lt.u32.totalorder %s11340_s2, %s12159_s26 }
 0x9b8   : > { %p7582_p13 = scmp.lt.u32.totalorder %s7580_s20, %s7576_s4  ;;  %p7584_p4 = scmp.lt.u32.totalorder %s7576_s4, %s11340_s2 }
 0x9b9   : > { %p7578_p10 = pnand %p7577_p1, %p12155_p6 }
 0x9ba   : > { %p7583_p7 = por %p7582_p13, %p7581_p3 }
 0x9bb   : > { %p7579_p0 = pneg %p7578_p10 }
 0x9bc   : > { %p7585_p12 = por %p7584_p4, %p7583_p7 }
 0x9be   : > { %p7586_p11 = pnand %p7585_p12, %p7579_p0 }
 0x9c0   : > { %7589 = shalt.err (!%p7586_p11)
}
 0x9c1   : > { %6537 = dma.vmem_to_hbm [thread:$0]  (%p12155_p6), %s5935_s19, 256, %s11340_s2, %s5888_s7  }
 0x9c2 PF: > { %s12160_s6 = sld [smem:[#allocation47_spill]]  ;;  %s12161_s8 = sld [smem:[#allocation59_spill]] }
 0x9c3   : > { %p6582_p5 = scmp.ge.s32.totalorder %s7724_s23, 2 }
 0x9c8   : > { %s5946_s0 = sand.u32 1, %s12160_s6   ;;  %p12162_p8 = scmp.ne.s32.totalorder %s12161_s8, 0 }
 0x9c9   : > { %s5947_s5 = scalar_lea.sflag [#allocation6], %s5946_s0 }
 0x9ca   : > { %p6561_p2 = pnand %p6582_p5, %p12162_p8 }
 0x9cc   : > { %7675 = dma.done.wait (!%p6561_p2), %s5947_s5, 128  }
 0x9cd   : > { %7677 = vsyncadd (!%p6561_p2), %s5947_s5, 4294967168  ;;  %s12163_s17 = sadd.s32 4294967294, %s7724_s23  }
 0x9ce   : > { %s5955_s3 = sand.u32 1, %s12163_s17  }
 0x9cf   : > { %s5956_s24 = scalar_lea.sflag [#allocation26], %s5955_s3 }
 0x9d0   : > { %7679 = dma.done.wait (!%p6561_p2), %s5956_s24, 512  }
 0x9d1   : > { %7681 = vsyncadd (!%p6561_p2), %s5956_s24, 4294966784  ;;  %s46_s23 = sadd.s32 1, %s7724_s23   ;;  %s12164_s29 = sld [smem:[#allocation46_spill]] }
 0x9d2   : > { %p43_p6 = scmp.ge.s32.totalorder %s46_s23, 6   ;;  %s12165_s16 = sld [smem:[#allocation56_spill]] }
 0x9d3   : > { %s12166_s28 = sld [smem:[#allocation48_spill]]  ;;  %s12167_s7 = sld [smem:[#allocation55_spill]] }
 0x9d4   : > { %s12168_s2 = sld [smem:[#allocation52_spill]]  ;;  %s12169_s1 = sld [smem:[#allocation53_spill]] }
 0x9d5   : > { %s12170_s30 = smov %s7692_s15  ;;  %s12173_s17 = smov %s7704_s18 }
 0x9d6   : > { %s12175_s19 = smov %s7716_s21  ;;  %s12176_s20 = smov %s7720_s22 }
 0x9d7   :  { %45 = sbr.rel (!%p43_p6) target bundleno = 34 (0x22), region = 251 }
 0x9d8   : > { %s12171_s15 = smov %s12165_s16 }
 0x9d9   : > { %s12172_s16 = smov %s12166_s28  ;;  %s12174_s18 = smov %s12167_s7 }
 0x9da   : > { %s12177_s21 = smov %s12168_s2  ;;  %s12178_s22 = smov %s12169_s1 }
 0x9de   :  { %5970 = vsyncpa [#allocation5], 1 }
 0x9df   :  { %5972 = vsyncpa [#allocation5 + $0x1], 1 }
 0x9e0   :  { %5973 = vsyncpa [#allocation8], 1 }
 0x9e1   :  { %5975 = vsyncpa [#allocation8 + $0x1], 1 }
 0x9e2   :  { %5976 = vsyncpa [#allocation11], 1 }
 0x9e3   :  { %5978 = vsyncpa [#allocation11 + $0x1], 1 }
 0x9e4   :  { %5979 = vsyncpa [#allocation14], 1 }
 0x9e5   :  { %5981 = vsyncpa [#allocation14 + $0x1], 1 }
 0x9e6   :  { %5982 = vsyncpa [#allocation17], 1 }
 0x9e7   :  { %5983 = vsyncpa [#allocation20], 1 }
 0x9e8   :  { %5984 = vsyncpa [#allocation23], 1 }
 0x9e9   :  { %5985 = vsyncpa [#allocation6], 1 }
 0x9ea   :  { %5987 = vsyncpa [#allocation6 + $0x1], 1 }
 0x9eb   :  { %5988 = vsyncpa [#allocation26], 1 }
 0x9ec   :  { %5990 = vsyncpa [#allocation26 + $0x1], 1 }

</bundles_post_ra>
